<compile_context>
chip_gen: v5e
topology: v5e:2x2
jax: 0.10.0
libtpu: 0.0.40
codegen_flags: <defaults>
</compile_context>

<pallas_src>
import functools
import math

import jax
import jax.numpy as jnp
from jax import lax
from jax.experimental import pallas as pl

MXU_DTYPE = jnp.bfloat16  # matmul operand dtype; accumulation stays float32


# ----------------------------------------------------------------------------
# small in-kernel helpers (trace-time, operate on values)
# ----------------------------------------------------------------------------
def _mm(a, b):
    """a @ b with bf16 operands, f32 accumulation."""
    return jnp.dot(a.astype(MXU_DTYPE), b.astype(MXU_DTYPE),
                   preferred_element_type=jnp.float32)


def _mm_t(a, b):
    """a @ b.T with bf16 operands, f32 accumulation."""
    return lax.dot_general(a.astype(MXU_DTYPE), b.astype(MXU_DTYPE),
                           (((1,), (1,)), ((), ())),
                           preferred_element_type=jnp.float32)


def _leaky(h):
    return jnp.where(h >= 0.0, h, 0.01 * h)  # nn.LeakyReLU default slope


def _bn_channels(y, gamma, beta, nbatch, nchan, eps=1e-5):
    """BatchNorm1d (track_running_stats=False) on rows laid out (nbatch*nchan, F).

    Row r = b*nchan + c belongs to channel c; stats per channel over (batch, F).
    Stats are accumulated over static batch slices (no per-batch concatenation of
    normalized parts); the affine is applied to the full slab in one shot.
    """
    feat = y.shape[-1]
    cnt = nbatch * feat
    s = jnp.zeros((nchan, 1), jnp.float32)
    for b in range(nbatch):
        s = s + jnp.sum(y[b * nchan:(b + 1) * nchan, :], axis=-1, keepdims=True)
    mean = s / cnt
    ss = jnp.zeros((nchan, 1), jnp.float32)
    for b in range(nbatch):
        d = y[b * nchan:(b + 1) * nchan, :] - mean
        ss = ss + jnp.sum(d * d, axis=-1, keepdims=True)
    inv = lax.rsqrt(ss / cnt + eps)            # biased variance, eps=1e-5 (torch default)
    scale = inv * gamma
    shift = beta - mean * scale
    scale_full = jnp.concatenate([scale] * nbatch, axis=0)   # tiny (nchan,1) tiles
    shift_full = jnp.concatenate([shift] * nbatch, axis=0)
    return y * scale_full + shift_full


# ----------------------------------------------------------------------------
# Pallas kernels
# ----------------------------------------------------------------------------
def _embed_kernel(x_ref, w_ref, b_ref, addon_ref, o_ref):
    # x (B*V, T*D); w (T*D, T*E) bf16; b (1, T*E); addon (2, B*V, T*E)
    emb = _mm(x_ref[...], w_ref[...]) + b_ref[...]
    o_ref[0] = (emb + addon_ref[0]).astype(o_ref.dtype)   # temporal input (+pos)
    o_ref[1] = (emb + addon_ref[1]).astype(o_ref.dtype)   # spatial input  (+var)


_MOD_KEYS = ("w_qkv", "b_qkv", "w_o", "b_o", "bias", "mskew", "colmask", "bn1",
             "w_ff1", "b_ff1", "w_ff2", "b_ff2", "bn2", "w_fc", "b_fc", "wtil")


def _encoder_main_kernel(*refs, B, T, V, E, O1):
    """Both encoder modules (last EncoderBlock + module fc_out) + compressor.

    Module m=0 is temporal (L=T heads=V), m=1 is spatial (L=V heads=T).  Multi-head
    structure lives in precomputed data (additive bias, skew tables, column masks),
    so one code path serves both.  The compressor contraction is re-blocked so its
    row-regrouping (reshape in the torch code) becomes precomputed selection matmuls.
    """
    C = T * V
    n_mod = len(_MOD_KEYS)
    assert len(refs) == 6 + 2 * n_mod + 1
    (xmod_ref, masku_ref, gcol_ref, gsel_ref, bcomp_ref, bnc_ref) = refs[:6]
    o_ref = refs[-1]

    masku = masku_ref[...]                      # (B*C, V*O1) f32 per-row block selector
    gcol = gcol_ref[...]                        # (V*O1, O1)  group-sum selector
    acc = jnp.zeros((B * C, O1), jnp.float32)   # per-element compressor contributions

    for m, (L, H) in enumerate(((T, V), (V, T))):
        mr = dict(zip(_MOD_KEYS, refs[6 + m * n_mod: 6 + (m + 1) * n_mod]))
        x_m = xmod_ref[m]                       # (B*C, E) f32

        # fused q/k/v projection; 1/sqrt(E) folded into the q block at pack time
        qkv = _mm(x_m, mr["w_qkv"][...]) + mr["b_qkv"][...]        # (B*C, 3E)
        q, k, v = qkv[:, :E], qkv[:, E:2 * E], qkv[:, 2 * E:]

        bias = mr["bias"][...]                  # (C, C) f32 additive mask
        mskew = mr["mskew"][...]                # (L, C, E) f32 masked rel-pos rows
        colmask = mr["colmask"][...]            # (L, C, C) f32 column scatter masks

        z_parts = []
        for b in range(B):                      # attention must stay per-batch; B is tiny
            sl = slice(b * C, (b + 1) * C)
            qb, kb, vb = q[sl], k[sl], v[sl]

            # all heads at once as a (C, C) Gram matrix; cross-head entries killed by bias
            logits = _mm_t(qb, kb) + bias
            mx = jnp.max(logits, axis=-1, keepdims=True)
            ex = jnp.exp(logits - mx)
            attn = ex * pl.reciprocal(jnp.sum(ex, axis=-1, keepdims=True), approx=True)

            # masked relative-position skew: VPU mul + lane reduce (no O(C^3 E) selector)
            s = jnp.zeros((C, C), jnp.float32)
            for j in range(L):
                t_j = jnp.sum(qb * mskew[j], axis=-1, keepdims=True)   # (C, 1)
                s = s + t_j * colmask[j]                               # scatter to cols j*H+h
            z_parts.append(_mm(attn + s, vb))                          # (C, E)
        z = jnp.concatenate(z_parts, axis=0)                           # (B*C, E), tile-aligned

        y1 = _mm(z, mr["w_o"][...]) + mr["b_o"][...] + x_m             # attn fc_out + residual
        x1 = _bn_channels(y1, mr["bn1"][0], mr["bn1"][1], B, C)        # norm1

        h = _leaky(_mm(x1, mr["w_ff1"][...]) + mr["b_ff1"][...])       # feed-forward
        y2 = _mm(h, mr["w_ff2"][...]) + mr["b_ff2"][...] + x1
        x2 = _bn_channels(y2, mr["bn2"][0], mr["bn2"][1], B, C)        # norm2

        om = _mm(x2, mr["w_fc"][...]) + mr["b_fc"][...]                # module fc_out (B*C, E)

        # compressor contribution of this module, still in element-row layout:
        #   u[p, u_blk*O1+o] = sum_e om[p,e] * Wcomp[u_blk*2E + m*E + e, o]
        u = _mm(om, mr["wtil"][...]) * masku                            # keep block u_blk == p%V
        acc = acc + _mm(u, gcol)                                        # (B*C, O1)

    # compressor: group-sum V elements per output row, Linear bias, LeakyReLU, BN1d(T)
    pre = _leaky(_mm(gsel_ref[...], acc) + bcomp_ref[...])              # (B*T, O1)
    out = _bn_channels(pre, bnc_ref[0], bnc_ref[1], B, T)
    for b in range(B):
        o_ref[b] = out[b * T:(b + 1) * T].astype(o_ref.dtype)


# ----------------------------------------------------------------------------
# one-time (pack-time) table construction -- hoisted out of the forward pass
# ----------------------------------------------------------------------------
def _make_attn_bias(L, H):
    """(C, C) additive logit bias reproducing the reference masking.
       0: same head & strictly-upper (kept) / -1e20: same head filled / -1e30: cross head."""
    C = L * H
    r = jnp.arange(C)
    c = jnp.arange(C)
    i = (r // H)[:, None]
    j = (c // H)[None, :]
    same = (r % H)[:, None] == (c % H)[None, :]
    keep = j > i
    return jnp.where(same & keep, 0.0,
                     jnp.where(same, -1e20, -1e30)).astype(jnp.float32)


def _make_skew_tables(e_rel, L, H):
    """mskew[j, r, :] = E_rel[r%H, L-1-r//H+j, :] if j <= r//H else 0   (L, C, E)
       colmask[j, r, c] = 1 iff c//H == j and c%H == r%H                (L, C, C)"""
    C = L * H
    r = jnp.arange(C)
    i = r // H
    h = r % H
    j = jnp.arange(L)
    idx = jnp.clip((L - 1) - i[None, :] + j[:, None], 0, L - 1)      # (L, C)
    valid = j[:, None] <= i[None, :]                                  # (L, C)
    gathered = e_rel[jnp.broadcast_to(h[None, :], (L, C)), idx, :]    # (L, C, E)
    mskew = jnp.where(valid[:, :, None], gathered, 0.0).astype(jnp.float32)
    c = jnp.arange(C)
    colmask = ((c[None, None, :] // H == j[:, None, None]) &
               (c[None, None, :] % H == h[None, :, None])).astype(jnp.float32)
    return mskew, colmask


def pack_params(params, *, B, T, V, E, Fexp, O1):
    """One-time packing: bf16 weight casts, QKV fusion + scale folding, attention bias,
    skew tables, compressor re-blocking, broadcast tables.  Runs OUTSIDE the jitted
    forward so none of this is recomputed per call."""
    C = T * V
    FE = Fexp * E
    f32, bf16 = jnp.float32, jnp.bfloat16
    out = {}

    # embedding + positional / variable adds
    out["w_elem"] = params["w_elem"].astype(bf16)
    out["b_elem"] = params["b_elem"].reshape(1, T * E).astype(f32)
    pos_add = jnp.tile(params["pos_emb"].reshape(1, T * E), (B * V, 1))    # pos id = p % T
    var_idx = (jnp.arange(V)[:, None] * T + jnp.arange(T)[None, :]) % V    # var id = p % V
    var_add = jnp.tile(params["var_emb"][var_idx].reshape(V, T * E), (B, 1))
    out["addon"] = jnp.stack([pos_add, var_add]).astype(f32)               # (2, B*V, T*E)

    # compressor weight re-blocked per module: wtil[e, u*O1+o] = Wcomp[u*2E + m*E + e, o]
    wc = params["w_comp"].reshape(V, 2, E, O1)
    wtils = [wc[:, mm].transpose(1, 0, 2).reshape(E, V * O1).astype(bf16) for mm in (0, 1)]

    scale = 1.0 / math.sqrt(E)
    mods = []
    for mi, (name, L, H) in enumerate((("temporal", T, V), ("spatial", V, T))):
        mp = params[name]
        bp = mp["layers"][-1]    # reference keeps only the last layer's output
        w_qkv = jnp.concatenate([bp["w_q"] * scale, bp["w_k"], bp["w_v"]], axis=1)
        b_qkv = jnp.concatenate([bp["b_q"] * scale, bp["b_k"], bp["b_v"]]).reshape(1, 3 * E)
        mskew, colmask = _make_skew_tables(bp["e_rel"], L, H)
        mods.append(dict(
            w_qkv=w_qkv.astype(bf16), b_qkv=b_qkv.astype(f32),
            w_o=bp["w_o"].astype(bf16), b_o=bp["b_o"].reshape(1, E).astype(f32),
            bias=_make_attn_bias(L, H),
            # q comes pre-scaled by 1/sqrt(E); the reference skew uses UNscaled q,
            # so fold the compensating sqrt(E) into the table.
            mskew=(mskew * math.sqrt(E)).astype(f32),
            colmask=colmask,
            bn1=jnp.stack([bp["g1"], bp["beta1"]]).reshape(2, C, 1).astype(f32),
            w_ff1=bp["w_ff1"].astype(bf16), b_ff1=bp["b_ff1"].reshape(1, FE).astype(f32),
            w_ff2=bp["w_ff2"].astype(bf16), b_ff2=bp["b_ff2"].reshape(1, E).astype(f32),
            bn2=jnp.stack([bp["g2"], bp["beta2"]]).reshape(2, C, 1).astype(f32),
            w_fc=mp["w_fc"].astype(bf16), b_fc=mp["b_fc"].reshape(1, E).astype(f32),
            wtil=wtils[mi],
        ))
    out["mods"] = mods

    # compressor selection tables (constants)
    row = jnp.arange(B * C)
    col = jnp.arange(V * O1)
    out["mask_u"] = ((row[:, None] % V) == (col[None, :] // O1)).astype(f32)   # (B*C, V*O1)
    out["gcol"] = jnp.tile(jnp.eye(O1, dtype=f32), (V, 1)).astype(jnp.bfloat16)  # (V*O1, O1)
    br = jnp.arange(B * T)
    bc = jnp.arange(B * C)
    out["gsel"] = (((br[:, None] // T) == (bc[None, :] // C)) &
                   (((bc[None, :] % C) // V) == (br[:, None] % T))).astype(jnp.bfloat16)
    out["b_comp"] = params["b_comp"].reshape(1, O1).astype(f32)
    out["bn_c"] = jnp.stack([params["g_comp"], params["beta_comp"]]).reshape(2, T, 1).astype(f32)
    return out


# ----------------------------------------------------------------------------
# forward pass: 2 pallas_calls total (embed, fused modules+compressor)
# ----------------------------------------------------------------------------
def encoder_forward(packed, x, *, B, T, V, E, FE, O1):
    C = T * V

    # element embedding + pos/var adds, stacked output (lane-dense, 256 lanes)
    emb = pl.pallas_call(
        _embed_kernel,
        out_shape=jax.ShapeDtypeStruct((2, B * V, T * E), jnp.float32),
    )(x.reshape(B * V, -1), packed["w_elem"], packed["b_elem"], packed["addon"])
    x_mod = emb.reshape(2, B * C, E)      # pure row-major reshape (free), p = v*T + t

    flat = [x_mod, packed["mask_u"], packed["gcol"], packed["gsel"],
            packed["b_comp"], packed["bn_c"]]
    for mod in packed["mods"]:
        flat.extend(mod[k] for k in _MOD_KEYS)

    per_mod = (2 * B * C * E * 3 * E + 4 * B * C * C * E + 4 * B * C * E * E
               + 4 * B * C * E * FE + 2 * B * C * E * V * O1 + 2 * B * C * V * O1 * O1)
    flops = 2 * per_mod + 2 * (B * T) * (B * C) * O1
    bytes_acc = sum(int(a.size) * a.dtype.itemsize for a in flat) + B * T * O1 * 4

    out = pl.pallas_call(
        functools.partial(_encoder_main_kernel, B=B, T=T, V=V, E=E, O1=O1),
        out_shape=jax.ShapeDtypeStruct((B, T, O1), jnp.float32),
        cost_estimate=pl.CostEstimate(flops=int(flops),
                                      transcendentals=int(2 * B * C * C),
                                      bytes_accessed=int(bytes_acc)),
    )(*flat)
    return out


# ----------------------------------------------------------------------------
# pure-JAX f32 reference of the torch forward (for validation)
# ----------------------------------------------------------------------------
def _bn_ref(y, gamma, beta, eps=1e-5):
    mean = jnp.mean(y, axis=(0, 2), keepdims=True)
    var = jnp.var(y, axis=(0, 2), keepdims=True)
    return ((y - mean) * lax.rsqrt(var + eps) * gamma.reshape(1, -1, 1)
            + beta.reshape(1, -1, 1))


def reference_forward(params, x, *, T, V, E):
    B = x.shape[0]
    C = T * V
    emb = (x @ params["w_elem"] + params["b_elem"]).reshape(B, C, E)
    x_t = emb + params["pos_emb"][jnp.arange(C) % T]
    x_s = emb + params["var_emb"][jnp.arange(C) % V]

    outs = []
    for name, L, H, xin in (("temporal", T, V, x_t), ("spatial", V, T, x_s)):
        mp = params[name]
        bp = mp["layers"][-1]   # only the last layer's output survives in the reference
        q = xin @ bp["w_q"] + bp["b_q"]
        k = xin @ bp["w_k"] + bp["b_k"]
        v = xin @ bp["w_v"] + bp["b_v"]
        q4 = q.reshape(B, L, H, E)
        k4 = k.reshape(B, L, H, E)
        v4 = v.reshape(B, L, H, E)

        QE = jnp.einsum('blhe,hme->bhlm', q4, bp["e_rel"])
        li = jnp.arange(L)[:, None]
        mi = jnp.arange(L)[None, :]
        QE = jnp.where(mi >= (L - 1 - li), QE, 0.0)
        padded = jnp.pad(QE, ((0, 0), (0, 0), (0, 0), (1, 0)))
        S = padded.reshape(B, H, L + 1, L)[:, :, 1:, :]

        qk = jnp.einsum('bqhe,bkhe->bhqk', q4, k4)
        qi = jnp.arange(L)[:, None]
        ki = jnp.arange(L)[None, :]
        qk = jnp.where(ki > qi, qk, -1e20)
        attn = jax.nn.softmax(qk / math.sqrt(E), axis=-1) + S

        z = jnp.einsum('bhql,blhd->bqhd', attn, v4).reshape(B, C, E)
        z = z @ bp["w_o"] + bp["b_o"]
        x1 = _bn_ref(z + xin, bp["g1"], bp["beta1"])
        ff = _leaky(x1 @ bp["w_ff1"] + bp["b_ff1"]) @ bp["w_ff2"] + bp["b_ff2"]
        x2 = _bn_ref(ff + x1, bp["g2"], bp["beta2"])
        outs.append(x2 @ mp["w_fc"] + mp["b_fc"])

    cat = jnp.concatenate(outs, axis=-1).reshape(B, T, 2 * V * E)
    h = _leaky(cat @ params["w_comp"] + params["b_comp"])
    return _bn_ref(h, params["g_comp"], params["beta_comp"])


# ----------------------------------------------------------------------------
# deterministic parameter init (shapes follow the torch module's __init__)
# ----------------------------------------------------------------------------
def _lin_init(key, fan_in, fan_out):
    k1, k2 = jax.random.split(key)
    bound = 1.0 / math.sqrt(fan_in)
    w = jax.random.uniform(k1, (fan_in, fan_out), jnp.float32, -bound, bound)
    b = jax.random.uniform(k2, (fan_out,), jnp.float32, -bound, bound)
    return w, b


def _block_params(key, L, H, E, Fexp):
    ks = jax.random.split(key, 7)
    C = L * H
    w_v, b_v = _lin_init(ks[0], E, E)
    w_k, b_k = _lin_init(ks[1], E, E)
    w_q, b_q = _lin_init(ks[2], E, E)
    w_o, b_o = _lin_init(ks[3], E, E)
    e_rel = jax.random.normal(ks[4], (H, L, E), jnp.float32)   # (heads, head_dim, embed)
    w1, b1 = _lin_init(ks[5], E, Fexp * E)
    w2, b2 = _lin_init(ks[6], Fexp * E, E)
    return dict(w_q=w_q, b_q=b_q, w_k=w_k, b_k=b_k, w_v=w_v, b_v=b_v,
                w_o=w_o, b_o=b_o, e_rel=e_rel,
                w_ff1=w1, b_ff1=b1, w_ff2=w2, b_ff2=b2,
                g1=jnp.ones((C,), jnp.float32), beta1=jnp.zeros((C,), jnp.float32),
                g2=jnp.ones((C,), jnp.float32), beta2=jnp.zeros((C,), jnp.float32))


def _module_params(key, L, H, E, Fexp, num_layers):
    ks = jax.random.split(key, num_layers + 1)
    layers = [_block_params(ks[i], L, H, E, Fexp) for i in range(num_layers)]
    w_fc, b_fc = _lin_init(ks[-1], E, E)
    return dict(layers=layers, w_fc=w_fc, b_fc=b_fc)


def init_params(key, T, V, D, E, Fexp, num_layers, o1):
    ks = jax.random.split(key, 6)
    w_elem, b_elem = _lin_init(ks[0], D * T, E * T)
    pos_emb = jax.random.normal(ks[1], (T, E), jnp.float32)
    var_emb = jax.random.normal(ks[2], (V, E), jnp.float32)
    temporal = _module_params(ks[3], T, V, E, Fexp, num_layers)
    spatial = _module_params(ks[4], V, T, E, Fexp, num_layers)
    w_comp, b_comp = _lin_init(ks[5], 2 * V * E, o1)
    return dict(w_elem=w_elem, b_elem=b_elem, pos_emb=pos_emb, var_emb=var_emb,
                temporal=temporal, spatial=spatial,
                w_comp=w_comp, b_comp=b_comp,
                g_comp=jnp.ones((T,), jnp.float32),
                beta_comp=jnp.zeros((T,), jnp.float32))


# ----------------------------------------------------------------------------
if __name__ == "__main__":
    # Small shapes: batch=2, seq_len=8, num_var=4, data_size=3, embed=32
    B, T, V, D = 2, 8, 4, 3
    E, Fexp, num_layers = 32, 2, 1
    output_size = (T, 16)
    O1 = output_size[1]

    key = jax.random.PRNGKey(0)
    kp, kx = jax.random.split(key)
    params = init_params(kp, T, V, D, E, Fexp, num_layers, O1)

    # layout: x is (batch, num_var, seq_len*data_size)
    x = jax.random.normal(kx, (B, V, T * D), jnp.float32)

    # one-time parameter packing (hoisted out of the per-call forward)
    packed = pack_params(params, B=B, T=T, V=V, E=E, Fexp=Fexp, O1=O1)

    fwd = jax.jit(functools.partial(encoder_forward, B=B, T=T, V=V, E=E,
                                    FE=Fexp * E, O1=O1))
    out = jax.block_until_ready(fwd(packed, x))

    assert out.shape == (B, output_size[0], output_size[1]), out.shape
    assert bool(jnp.all(jnp.isfinite(out)))

    # validate against a pure-JAX f32 reference of the torch forward
    ref = jax.block_until_ready(
        jax.jit(functools.partial(reference_forward, T=T, V=V, E=E))(params, x))
    diff = float(jnp.max(jnp.abs(out - ref)))
    scale = float(jnp.max(jnp.abs(ref)))
    assert diff <= 0.06 * scale + 0.06, f"kernel/reference mismatch: {diff} (scale {scale})"

    print("KERNEL_OK")
</pallas_src>

<mosaic_0001>
module attributes {stable_mosaic.version = 11 : i64} {
  func.func @_embed_kernel(%arg0: memref<8x24xf32, #tpu.memory_space<vmem>>, %arg1: memref<24x256xbf16, #tpu.memory_space<vmem>>, %arg2: memref<1x256xf32, #tpu.memory_space<vmem>>, %arg3: memref<2x8x256xf32, #tpu.memory_space<vmem>>, %arg4: memref<2x8x256xf32, #tpu.memory_space<vmem>>) attributes {dimension_semantics = [], scalar_prefetch = 0 : i64, scratch_operands = 0 : i64, tpu.core_type = #tpu.core_type<tc>} {
    %c0 = arith.constant 0 : index
    %c0_0 = arith.constant 0 : index
    %0 = vector.load %arg0[%c0, %c0_0] : memref<8x24xf32, #tpu.memory_space<vmem>>, vector<8x24xf32>
    %c0_1 = arith.constant 0 : index
    %c0_2 = arith.constant 0 : index
    %1 = vector.load %arg1[%c0_1, %c0_2] : memref<24x256xbf16, #tpu.memory_space<vmem>>, vector<24x256xbf16>
    %2 = arith.truncf %0 : vector<8x24xf32> to vector<8x24xbf16>
    %cst = arith.constant dense<0.000000e+00> : vector<8x256xf32>
    %3 = tpu.matmul %2, %1, %cst {dimension_numbers = #tpu.dot_dimension_numbers<[1], [0], [0], [1], [0, 0, 1, 1], [], []>} : vector<8x24xbf16>, vector<24x256xbf16>, vector<8x256xf32> -> vector<8x256xf32>
    %c0_3 = arith.constant 0 : index
    %c0_4 = arith.constant 0 : index
    %4 = vector.load %arg2[%c0_3, %c0_4] : memref<1x256xf32, #tpu.memory_space<vmem>>, vector<1x256xf32>
    %5 = vector.broadcast %4 : vector<1x256xf32> to vector<8x256xf32>
    %6 = arith.addf %3, %5 : vector<8x256xf32>
    %c0_5 = arith.constant 0 : index
    %c0_6 = arith.constant 0 : index
    %c0_7 = arith.constant 0 : index
    %7 = vector.load %arg3[%c0_5, %c0_6, %c0_7] : memref<2x8x256xf32, #tpu.memory_space<vmem>>, vector<1x8x256xf32>
    %8 = vector.shape_cast %7 : vector<1x8x256xf32> to vector<8x256xf32>
    %9 = arith.addf %6, %8 : vector<8x256xf32>
    %c0_8 = arith.constant 0 : index
    %c0_9 = arith.constant 0 : index
    %c0_10 = arith.constant 0 : index
    %10 = vector.load %arg4[%c0_8, %c0_9, %c0_10] : memref<2x8x256xf32, #tpu.memory_space<vmem>>, vector<1x8x256xf32>
    %11 = vector.shape_cast %10 : vector<1x8x256xf32> to vector<8x256xf32>
    %12 = vector.shape_cast %9 : vector<8x256xf32> to vector<1x8x256xf32>
    tpu.vector_store %arg4[%c0_8, %c0_9, %c0_10], %12 {strides = array<i32>} : memref<2x8x256xf32, #tpu.memory_space<vmem>>, vector<1x8x256xf32>,
    %c1 = arith.constant 1 : index
    %c0_11 = arith.constant 0 : index
    %c0_12 = arith.constant 0 : index
    %13 = vector.load %arg3[%c1, %c0_11, %c0_12] : memref<2x8x256xf32, #tpu.memory_space<vmem>>, vector<1x8x256xf32>
    %14 = vector.shape_cast %13 : vector<1x8x256xf32> to vector<8x256xf32>
    %15 = arith.addf %6, %14 : vector<8x256xf32>
    %c1_13 = arith.constant 1 : index
    %c0_14 = arith.constant 0 : index
    %c0_15 = arith.constant 0 : index
    %16 = vector.load %arg4[%c1_13, %c0_14, %c0_15] : memref<2x8x256xf32, #tpu.memory_space<vmem>>, vector<1x8x256xf32>
    %17 = vector.shape_cast %16 : vector<1x8x256xf32> to vector<8x256xf32>
    %18 = vector.shape_cast %15 : vector<8x256xf32> to vector<1x8x256xf32>
    tpu.vector_store %arg4[%c1_13, %c0_14, %c0_15], %18 {strides = array<i32>} : memref<2x8x256xf32, #tpu.memory_space<vmem>>, vector<1x8x256xf32>,
    return
  }
}

module attributes {stable_mosaic.version = 11 : i64} {
  func.func @_encoder_main_kernel(%arg0: memref<2x64x32xf32, #tpu.memory_space<vmem>>, %arg1: memref<64x64xf32, #tpu.memory_space<vmem>>, %arg2: memref<64x16xbf16, #tpu.memory_space<vmem>>, %arg3: memref<16x64xbf16, #tpu.memory_space<vmem>>, %arg4: memref<1x16xf32, #tpu.memory_space<vmem>>, %arg5: memref<2x8x1xf32, #tpu.memory_space<vmem>>, %arg6: memref<32x96xbf16, #tpu.memory_space<vmem>>, %arg7: memref<1x96xf32, #tpu.memory_space<vmem>>, %arg8: memref<32x32xbf16, #tpu.memory_space<vmem>>, %arg9: memref<1x32xf32, #tpu.memory_space<vmem>>, %arg10: memref<32x32xf32, #tpu.memory_space<vmem>>, %arg11: memref<8x32x32xf32, #tpu.memory_space<vmem>>, %arg12: memref<8x32x32xf32, #tpu.memory_space<vmem>>, %arg13: memref<2x32x1xf32, #tpu.memory_space<vmem>>, %arg14: memref<32x64xbf16, #tpu.memory_space<vmem>>, %arg15: memref<1x64xf32, #tpu.memory_space<vmem>>, %arg16: memref<64x32xbf16, #tpu.memory_space<vmem>>, %arg17: memref<1x32xf32, #tpu.memory_space<vmem>>, %arg18: memref<2x32x1xf32, #tpu.memory_space<vmem>>, %arg19: memref<32x32xbf16, #tpu.memory_space<vmem>>, %arg20: memref<1x32xf32, #tpu.memory_space<vmem>>, %arg21: memref<32x64xbf16, #tpu.memory_space<vmem>>, %arg22: memref<32x96xbf16, #tpu.memory_space<vmem>>, %arg23: memref<1x96xf32, #tpu.memory_space<vmem>>, %arg24: memref<32x32xbf16, #tpu.memory_space<vmem>>, %arg25: memref<1x32xf32, #tpu.memory_space<vmem>>, %arg26: memref<32x32xf32, #tpu.memory_space<vmem>>, %arg27: memref<4x32x32xf32, #tpu.memory_space<vmem>>, %arg28: memref<4x32x32xf32, #tpu.memory_space<vmem>>, %arg29: memref<2x32x1xf32, #tpu.memory_space<vmem>>, %arg30: memref<32x64xbf16, #tpu.memory_space<vmem>>, %arg31: memref<1x64xf32, #tpu.memory_space<vmem>>, %arg32: memref<64x32xbf16, #tpu.memory_space<vmem>>, %arg33: memref<1x32xf32, #tpu.memory_space<vmem>>, %arg34: memref<2x32x1xf32, #tpu.memory_space<vmem>>, %arg35: memref<32x32xbf16, #tpu.memory_space<vmem>>, %arg36: memref<1x32xf32, #tpu.memory_space<vmem>>, %arg37: memref<32x64xbf16, #tpu.memory_space<vmem>>, %arg38: memref<2x8x16xf32, #tpu.memory_space<vmem>>) attributes {dimension_semantics = [], scalar_prefetch = 0 : i64, scratch_operands = 0 : i64, tpu.core_type = #tpu.core_type<tc>} {
    %c0 = arith.constant 0 : index
    %c0_0 = arith.constant 0 : index
    %0 = vector.load %arg1[%c0, %c0_0] : memref<64x64xf32, #tpu.memory_space<vmem>>, vector<64x64xf32>
    %c0_1 = arith.constant 0 : index
    %c0_2 = arith.constant 0 : index
    %1 = vector.load %arg2[%c0_1, %c0_2] : memref<64x16xbf16, #tpu.memory_space<vmem>>, vector<64x16xbf16>
    %cst = arith.constant 0.000000e+00 : f32
    %2 = vector.broadcast %cst : f32 to vector<64x16xf32>
    %c0_3 = arith.constant 0 : index
    %c0_4 = arith.constant 0 : index
    %c0_5 = arith.constant 0 : index
    %3 = vector.load %arg0[%c0_3, %c0_4, %c0_5] : memref<2x64x32xf32, #tpu.memory_space<vmem>>, vector<1x64x32xf32>
    %4 = vector.shape_cast %3 : vector<1x64x32xf32> to vector<64x32xf32>
    %c0_6 = arith.constant 0 : index
    %c0_7 = arith.constant 0 : index
    %5 = vector.load %arg6[%c0_6, %c0_7] : memref<32x96xbf16, #tpu.memory_space<vmem>>, vector<32x96xbf16>
    %6 = arith.truncf %4 : vector<64x32xf32> to vector<64x32xbf16>
    %cst_8 = arith.constant dense<0.000000e+00> : vector<64x96xf32>
    %7 = tpu.matmul %6, %5, %cst_8 {dimension_numbers = #tpu.dot_dimension_numbers<[1], [0], [0], [1], [0, 0, 1, 1], [], []>} : vector<64x32xbf16>, vector<32x96xbf16>, vector<64x96xf32> -> vector<64x96xf32>
    %c0_9 = arith.constant 0 : index
    %c0_10 = arith.constant 0 : index
    %8 = vector.load %arg7[%c0_9, %c0_10] : memref<1x96xf32, #tpu.memory_space<vmem>>, vector<1x96xf32>
    %9 = vector.broadcast %8 : vector<1x96xf32> to vector<64x96xf32>
    %10 = arith.addf %7, %9 : vector<64x96xf32>
    %11 = vector.extract_strided_slice %10 {offsets = [0, 0], sizes = [64, 32], strides = [1, 1]} : vector<64x96xf32> to vector<64x32xf32>
    %12 = vector.extract_strided_slice %10 {offsets = [0, 32], sizes = [64, 32], strides = [1, 1]} : vector<64x96xf32> to vector<64x32xf32>
    %13 = vector.extract_strided_slice %10 {offsets = [0, 64], sizes = [64, 32], strides = [1, 1]} : vector<64x96xf32> to vector<64x32xf32>
    %c0_11 = arith.constant 0 : index
    %c0_12 = arith.constant 0 : index
    %14 = vector.load %arg10[%c0_11, %c0_12] : memref<32x32xf32, #tpu.memory_space<vmem>>, vector<32x32xf32>
    %c0_13 = arith.constant 0 : index
    %c0_14 = arith.constant 0 : index
    %c0_15 = arith.constant 0 : index
    %15 = vector.load %arg11[%c0_13, %c0_14, %c0_15] : memref<8x32x32xf32, #tpu.memory_space<vmem>>, vector<8x32x32xf32>
    %c0_16 = arith.constant 0 : index
    %c0_17 = arith.constant 0 : index
    %c0_18 = arith.constant 0 : index
    %16 = vector.load %arg12[%c0_16, %c0_17, %c0_18] : memref<8x32x32xf32, #tpu.memory_space<vmem>>, vector<8x32x32xf32>
    %17 = vector.extract_strided_slice %11 {offsets = [0, 0], sizes = [32, 32], strides = [1, 1]} : vector<64x32xf32> to vector<32x32xf32>
    %18 = vector.extract_strided_slice %12 {offsets = [0, 0], sizes = [32, 32], strides = [1, 1]} : vector<64x32xf32> to vector<32x32xf32>
    %19 = vector.extract_strided_slice %13 {offsets = [0, 0], sizes = [32, 32], strides = [1, 1]} : vector<64x32xf32> to vector<32x32xf32>
    %20 = arith.truncf %17 : vector<32x32xf32> to vector<32x32xbf16>
    %21 = arith.truncf %18 : vector<32x32xf32> to vector<32x32xbf16>
    %cst_19 = arith.constant dense<0.000000e+00> : vector<32x32xf32>
    %22 = tpu.matmul %20, %21, %cst_19 {dimension_numbers = #tpu.dot_dimension_numbers<[1], [1], [0], [0], [0, 0, 1, 0], [], []>} : vector<32x32xbf16>, vector<32x32xbf16>, vector<32x32xf32> -> vector<32x32xf32>
    %23 = arith.addf %22, %14 : vector<32x32xf32>
    %cst_20 = arith.constant dense<0xFF800000> : vector<32xf32>
    %24 = vector.multi_reduction <maximumf>, %23, %cst_20 [1] : vector<32x32xf32> to vector<32xf32>
    %25 = vector.shape_cast %24 : vector<32xf32> to vector<32x1xf32>
    %26 = vector.broadcast %25 : vector<32x1xf32> to vector<32x32xf32>
    %27 = arith.subf %23, %26 : vector<32x32xf32>
    %28 = math.exp %27 : vector<32x32xf32>
    %cst_21 = arith.constant dense<0.000000e+00> : vector<32xf32>
    %29 = vector.multi_reduction <add>, %28, %cst_21 [1] : vector<32x32xf32> to vector<32xf32>
    %30 = vector.shape_cast %29 : vector<32xf32> to vector<32x1xf32>
    %31 = tpu.reciprocal %30 {approx = true} : vector<32x1xf32> -> vector<32x1xf32>
    %32 = vector.broadcast %31 : vector<32x1xf32> to vector<32x32xf32>
    %33 = arith.mulf %28, %32 : vector<32x32xf32>
    %cst_22 = arith.constant 0.000000e+00 : f32
    %34 = vector.broadcast %cst_22 : f32 to vector<32x32xf32>
    %35 = vector.extract_strided_slice %15 {offsets = [0, 0, 0], sizes = [1, 32, 32], strides = [1, 1, 1]} : vector<8x32x32xf32> to vector<1x32x32xf32>
    %36 = vector.shape_cast %35 : vector<1x32x32xf32> to vector<32x32xf32>
    %37 = arith.mulf %17, %36 : vector<32x32xf32>
    %cst_23 = arith.constant dense<0.000000e+00> : vector<32xf32>
    %38 = vector.multi_reduction <add>, %37, %cst_23 [1] : vector<32x32xf32> to vector<32xf32>
    %39 = vector.shape_cast %38 : vector<32xf32> to vector<32x1xf32>
    %40 = vector.extract_strided_slice %16 {offsets = [0, 0, 0], sizes = [1, 32, 32], strides = [1, 1, 1]} : vector<8x32x32xf32> to vector<1x32x32xf32>
    %41 = vector.shape_cast %40 : vector<1x32x32xf32> to vector<32x32xf32>
    %42 = vector.broadcast %39 : vector<32x1xf32> to vector<32x32xf32>
    %43 = arith.mulf %42, %41 : vector<32x32xf32>
    %44 = arith.addf %34, %43 : vector<32x32xf32>
    %45 = vector.extract_strided_slice %15 {offsets = [1, 0, 0], sizes = [1, 32, 32], strides = [1, 1, 1]} : vector<8x32x32xf32> to vector<1x32x32xf32>
    %46 = vector.shape_cast %45 : vector<1x32x32xf32> to vector<32x32xf32>
    %47 = arith.mulf %17, %46 : vector<32x32xf32>
    %cst_24 = arith.constant dense<0.000000e+00> : vector<32xf32>
    %48 = vector.multi_reduction <add>, %47, %cst_24 [1] : vector<32x32xf32> to vector<32xf32>
    %49 = vector.shape_cast %48 : vector<32xf32> to vector<32x1xf32>
    %50 = vector.extract_strided_slice %16 {offsets = [1, 0, 0], sizes = [1, 32, 32], strides = [1, 1, 1]} : vector<8x32x32xf32> to vector<1x32x32xf32>
    %51 = vector.shape_cast %50 : vector<1x32x32xf32> to vector<32x32xf32>
    %52 = vector.broadcast %49 : vector<32x1xf32> to vector<32x32xf32>
    %53 = arith.mulf %52, %51 : vector<32x32xf32>
    %54 = arith.addf %44, %53 : vector<32x32xf32>
    %55 = vector.extract_strided_slice %15 {offsets = [2, 0, 0], sizes = [1, 32, 32], strides = [1, 1, 1]} : vector<8x32x32xf32> to vector<1x32x32xf32>
    %56 = vector.shape_cast %55 : vector<1x32x32xf32> to vector<32x32xf32>
    %57 = arith.mulf %17, %56 : vector<32x32xf32>
    %cst_25 = arith.constant dense<0.000000e+00> : vector<32xf32>
    %58 = vector.multi_reduction <add>, %57, %cst_25 [1] : vector<32x32xf32> to vector<32xf32>
    %59 = vector.shape_cast %58 : vector<32xf32> to vector<32x1xf32>
    %60 = vector.extract_strided_slice %16 {offsets = [2, 0, 0], sizes = [1, 32, 32], strides = [1, 1, 1]} : vector<8x32x32xf32> to vector<1x32x32xf32>
    %61 = vector.shape_cast %60 : vector<1x32x32xf32> to vector<32x32xf32>
    %62 = vector.broadcast %59 : vector<32x1xf32> to vector<32x32xf32>
    %63 = arith.mulf %62, %61 : vector<32x32xf32>
    %64 = arith.addf %54, %63 : vector<32x32xf32>
    %65 = vector.extract_strided_slice %15 {offsets = [3, 0, 0], sizes = [1, 32, 32], strides = [1, 1, 1]} : vector<8x32x32xf32> to vector<1x32x32xf32>
    %66 = vector.shape_cast %65 : vector<1x32x32xf32> to vector<32x32xf32>
    %67 = arith.mulf %17, %66 : vector<32x32xf32>
    %cst_26 = arith.constant dense<0.000000e+00> : vector<32xf32>
    %68 = vector.multi_reduction <add>, %67, %cst_26 [1] : vector<32x32xf32> to vector<32xf32>
    %69 = vector.shape_cast %68 : vector<32xf32> to vector<32x1xf32>
    %70 = vector.extract_strided_slice %16 {offsets = [3, 0, 0], sizes = [1, 32, 32], strides = [1, 1, 1]} : vector<8x32x32xf32> to vector<1x32x32xf32>
    %71 = vector.shape_cast %70 : vector<1x32x32xf32> to vector<32x32xf32>
    %72 = vector.broadcast %69 : vector<32x1xf32> to vector<32x32xf32>
    %73 = arith.mulf %72, %71 : vector<32x32xf32>
    %74 = arith.addf %64, %73 : vector<32x32xf32>
    %75 = vector.extract_strided_slice %15 {offsets = [4, 0, 0], sizes = [1, 32, 32], strides = [1, 1, 1]} : vector<8x32x32xf32> to vector<1x32x32xf32>
    %76 = vector.shape_cast %75 : vector<1x32x32xf32> to vector<32x32xf32>
    %77 = arith.mulf %17, %76 : vector<32x32xf32>
    %cst_27 = arith.constant dense<0.000000e+00> : vector<32xf32>
    %78 = vector.multi_reduction <add>, %77, %cst_27 [1] : vector<32x32xf32> to vector<32xf32>
    %79 = vector.shape_cast %78 : vector<32xf32> to vector<32x1xf32>
    %80 = vector.extract_strided_slice %16 {offsets = [4, 0, 0], sizes = [1, 32, 32], strides = [1, 1, 1]} : vector<8x32x32xf32> to vector<1x32x32xf32>
    %81 = vector.shape_cast %80 : vector<1x32x32xf32> to vector<32x32xf32>
    %82 = vector.broadcast %79 : vector<32x1xf32> to vector<32x32xf32>
    %83 = arith.mulf %82, %81 : vector<32x32xf32>
    %84 = arith.addf %74, %83 : vector<32x32xf32>
    %85 = vector.extract_strided_slice %15 {offsets = [5, 0, 0], sizes = [1, 32, 32], strides = [1, 1, 1]} : vector<8x32x32xf32> to vector<1x32x32xf32>
    %86 = vector.shape_cast %85 : vector<1x32x32xf32> to vector<32x32xf32>
    %87 = arith.mulf %17, %86 : vector<32x32xf32>
    %cst_28 = arith.constant dense<0.000000e+00> : vector<32xf32>
    %88 = vector.multi_reduction <add>, %87, %cst_28 [1] : vector<32x32xf32> to vector<32xf32>
    %89 = vector.shape_cast %88 : vector<32xf32> to vector<32x1xf32>
    %90 = vector.extract_strided_slice %16 {offsets = [5, 0, 0], sizes = [1, 32, 32], strides = [1, 1, 1]} : vector<8x32x32xf32> to vector<1x32x32xf32>
    %91 = vector.shape_cast %90 : vector<1x32x32xf32> to vector<32x32xf32>
    %92 = vector.broadcast %89 : vector<32x1xf32> to vector<32x32xf32>
    %93 = arith.mulf %92, %91 : vector<32x32xf32>
    %94 = arith.addf %84, %93 : vector<32x32xf32>
    %95 = vector.extract_strided_slice %15 {offsets = [6, 0, 0], sizes = [1, 32, 32], strides = [1, 1, 1]} : vector<8x32x32xf32> to vector<1x32x32xf32>
    %96 = vector.shape_cast %95 : vector<1x32x32xf32> to vector<32x32xf32>
    %97 = arith.mulf %17, %96 : vector<32x32xf32>
    %cst_29 = arith.constant dense<0.000000e+00> : vector<32xf32>
    %98 = vector.multi_reduction <add>, %97, %cst_29 [1] : vector<32x32xf32> to vector<32xf32>
    %99 = vector.shape_cast %98 : vector<32xf32> to vector<32x1xf32>
    %100 = vector.extract_strided_slice %16 {offsets = [6, 0, 0], sizes = [1, 32, 32], strides = [1, 1, 1]} : vector<8x32x32xf32> to vector<1x32x32xf32>
    %101 = vector.shape_cast %100 : vector<1x32x32xf32> to vector<32x32xf32>
    %102 = vector.broadcast %99 : vector<32x1xf32> to vector<32x32xf32>
    %103 = arith.mulf %102, %101 : vector<32x32xf32>
    %104 = arith.addf %94, %103 : vector<32x32xf32>
    %105 = vector.extract_strided_slice %15 {offsets = [7, 0, 0], sizes = [1, 32, 32], strides = [1, 1, 1]} : vector<8x32x32xf32> to vector<1x32x32xf32>
    %106 = vector.shape_cast %105 : vector<1x32x32xf32> to vector<32x32xf32>
    %107 = arith.mulf %17, %106 : vector<32x32xf32>
    %cst_30 = arith.constant dense<0.000000e+00> : vector<32xf32>
    %108 = vector.multi_reduction <add>, %107, %cst_30 [1] : vector<32x32xf32> to vector<32xf32>
    %109 = vector.shape_cast %108 : vector<32xf32> to vector<32x1xf32>
    %110 = vector.extract_strided_slice %16 {offsets = [7, 0, 0], sizes = [1, 32, 32], strides = [1, 1, 1]} : vector<8x32x32xf32> to vector<1x32x32xf32>
    %111 = vector.shape_cast %110 : vector<1x32x32xf32> to vector<32x32xf32>
    %112 = vector.broadcast %109 : vector<32x1xf32> to vector<32x32xf32>
    %113 = arith.mulf %112, %111 : vector<32x32xf32>
    %114 = arith.addf %104, %113 : vector<32x32xf32>
    %115 = arith.addf %33, %114 : vector<32x32xf32>
    %116 = arith.truncf %115 : vector<32x32xf32> to vector<32x32xbf16>
    %117 = arith.truncf %19 : vector<32x32xf32> to vector<32x32xbf16>
    %cst_31 = arith.constant dense<0.000000e+00> : vector<32x32xf32>
    %118 = tpu.matmul %116, %117, %cst_31 {dimension_numbers = #tpu.dot_dimension_numbers<[1], [0], [0], [1], [0, 0, 1, 1], [], []>} : vector<32x32xbf16>, vector<32x32xbf16>, vector<32x32xf32> -> vector<32x32xf32>
    %119 = vector.extract_strided_slice %11 {offsets = [32, 0], sizes = [32, 32], strides = [1, 1]} : vector<64x32xf32> to vector<32x32xf32>
    %120 = vector.extract_strided_slice %12 {offsets = [32, 0], sizes = [32, 32], strides = [1, 1]} : vector<64x32xf32> to vector<32x32xf32>
    %121 = vector.extract_strided_slice %13 {offsets = [32, 0], sizes = [32, 32], strides = [1, 1]} : vector<64x32xf32> to vector<32x32xf32>
    %122 = arith.truncf %119 : vector<32x32xf32> to vector<32x32xbf16>
    %123 = arith.truncf %120 : vector<32x32xf32> to vector<32x32xbf16>
    %cst_32 = arith.constant dense<0.000000e+00> : vector<32x32xf32>
    %124 = tpu.matmul %122, %123, %cst_32 {dimension_numbers = #tpu.dot_dimension_numbers<[1], [1], [0], [0], [0, 0, 1, 0], [], []>} : vector<32x32xbf16>, vector<32x32xbf16>, vector<32x32xf32> -> vector<32x32xf32>
    %125 = arith.addf %124, %14 : vector<32x32xf32>
    %cst_33 = arith.constant dense<0xFF800000> : vector<32xf32>
    %126 = vector.multi_reduction <maximumf>, %125, %cst_33 [1] : vector<32x32xf32> to vector<32xf32>
    %127 = vector.shape_cast %126 : vector<32xf32> to vector<32x1xf32>
    %128 = vector.broadcast %127 : vector<32x1xf32> to vector<32x32xf32>
    %129 = arith.subf %125, %128 : vector<32x32xf32>
    %130 = math.exp %129 : vector<32x32xf32>
    %cst_34 = arith.constant dense<0.000000e+00> : vector<32xf32>
    %131 = vector.multi_reduction <add>, %130, %cst_34 [1] : vector<32x32xf32> to vector<32xf32>
    %132 = vector.shape_cast %131 : vector<32xf32> to vector<32x1xf32>
    %133 = tpu.reciprocal %132 {approx = true} : vector<32x1xf32> -> vector<32x1xf32>
    %134 = vector.broadcast %133 : vector<32x1xf32> to vector<32x32xf32>
    %135 = arith.mulf %130, %134 : vector<32x32xf32>
    %cst_35 = arith.constant 0.000000e+00 : f32
    %136 = vector.broadcast %cst_35 : f32 to vector<32x32xf32>
    %137 = vector.extract_strided_slice %15 {offsets = [0, 0, 0], sizes = [1, 32, 32], strides = [1, 1, 1]} : vector<8x32x32xf32> to vector<1x32x32xf32>
    %138 = vector.shape_cast %137 : vector<1x32x32xf32> to vector<32x32xf32>
    %139 = arith.mulf %119, %138 : vector<32x32xf32>
    %cst_36 = arith.constant dense<0.000000e+00> : vector<32xf32>
    %140 = vector.multi_reduction <add>, %139, %cst_36 [1] : vector<32x32xf32> to vector<32xf32>
    %141 = vector.shape_cast %140 : vector<32xf32> to vector<32x1xf32>
    %142 = vector.extract_strided_slice %16 {offsets = [0, 0, 0], sizes = [1, 32, 32], strides = [1, 1, 1]} : vector<8x32x32xf32> to vector<1x32x32xf32>
    %143 = vector.shape_cast %142 : vector<1x32x32xf32> to vector<32x32xf32>
    %144 = vector.broadcast %141 : vector<32x1xf32> to vector<32x32xf32>
    %145 = arith.mulf %144, %143 : vector<32x32xf32>
    %146 = arith.addf %136, %145 : vector<32x32xf32>
    %147 = vector.extract_strided_slice %15 {offsets = [1, 0, 0], sizes = [1, 32, 32], strides = [1, 1, 1]} : vector<8x32x32xf32> to vector<1x32x32xf32>
    %148 = vector.shape_cast %147 : vector<1x32x32xf32> to vector<32x32xf32>
    %149 = arith.mulf %119, %148 : vector<32x32xf32>
    %cst_37 = arith.constant dense<0.000000e+00> : vector<32xf32>
    %150 = vector.multi_reduction <add>, %149, %cst_37 [1] : vector<32x32xf32> to vector<32xf32>
    %151 = vector.shape_cast %150 : vector<32xf32> to vector<32x1xf32>
    %152 = vector.extract_strided_slice %16 {offsets = [1, 0, 0], sizes = [1, 32, 32], strides = [1, 1, 1]} : vector<8x32x32xf32> to vector<1x32x32xf32>
    %153 = vector.shape_cast %152 : vector<1x32x32xf32> to vector<32x32xf32>
    %154 = vector.broadcast %151 : vector<32x1xf32> to vector<32x32xf32>
    %155 = arith.mulf %154, %153 : vector<32x32xf32>
    %156 = arith.addf %146, %155 : vector<32x32xf32>
    %157 = vector.extract_strided_slice %15 {offsets = [2, 0, 0], sizes = [1, 32, 32], strides = [1, 1, 1]} : vector<8x32x32xf32> to vector<1x32x32xf32>
    %158 = vector.shape_cast %157 : vector<1x32x32xf32> to vector<32x32xf32>
    %159 = arith.mulf %119, %158 : vector<32x32xf32>
    %cst_38 = arith.constant dense<0.000000e+00> : vector<32xf32>
    %160 = vector.multi_reduction <add>, %159, %cst_38 [1] : vector<32x32xf32> to vector<32xf32>
    %161 = vector.shape_cast %160 : vector<32xf32> to vector<32x1xf32>
    %162 = vector.extract_strided_slice %16 {offsets = [2, 0, 0], sizes = [1, 32, 32], strides = [1, 1, 1]} : vector<8x32x32xf32> to vector<1x32x32xf32>
    %163 = vector.shape_cast %162 : vector<1x32x32xf32> to vector<32x32xf32>
    %164 = vector.broadcast %161 : vector<32x1xf32> to vector<32x32xf32>
    %165 = arith.mulf %164, %163 : vector<32x32xf32>
    %166 = arith.addf %156, %165 : vector<32x32xf32>
    %167 = vector.extract_strided_slice %15 {offsets = [3, 0, 0], sizes = [1, 32, 32], strides = [1, 1, 1]} : vector<8x32x32xf32> to vector<1x32x32xf32>
    %168 = vector.shape_cast %167 : vector<1x32x32xf32> to vector<32x32xf32>
    %169 = arith.mulf %119, %168 : vector<32x32xf32>
    %cst_39 = arith.constant dense<0.000000e+00> : vector<32xf32>
    %170 = vector.multi_reduction <add>, %169, %cst_39 [1] : vector<32x32xf32> to vector<32xf32>
    %171 = vector.shape_cast %170 : vector<32xf32> to vector<32x1xf32>
    %172 = vector.extract_strided_slice %16 {offsets = [3, 0, 0], sizes = [1, 32, 32], strides = [1, 1, 1]} : vector<8x32x32xf32> to vector<1x32x32xf32>
    %173 = vector.shape_cast %172 : vector<1x32x32xf32> to vector<32x32xf32>
    %174 = vector.broadcast %171 : vector<32x1xf32> to vector<32x32xf32>
    %175 = arith.mulf %174, %173 : vector<32x32xf32>
    %176 = arith.addf %166, %175 : vector<32x32xf32>
    %177 = vector.extract_strided_slice %15 {offsets = [4, 0, 0], sizes = [1, 32, 32], strides = [1, 1, 1]} : vector<8x32x32xf32> to vector<1x32x32xf32>
    %178 = vector.shape_cast %177 : vector<1x32x32xf32> to vector<32x32xf32>
    %179 = arith.mulf %119, %178 : vector<32x32xf32>
    %cst_40 = arith.constant dense<0.000000e+00> : vector<32xf32>
    %180 = vector.multi_reduction <add>, %179, %cst_40 [1] : vector<32x32xf32> to vector<32xf32>
    %181 = vector.shape_cast %180 : vector<32xf32> to vector<32x1xf32>
    %182 = vector.extract_strided_slice %16 {offsets = [4, 0, 0], sizes = [1, 32, 32], strides = [1, 1, 1]} : vector<8x32x32xf32> to vector<1x32x32xf32>
    %183 = vector.shape_cast %182 : vector<1x32x32xf32> to vector<32x32xf32>
    %184 = vector.broadcast %181 : vector<32x1xf32> to vector<32x32xf32>
    %185 = arith.mulf %184, %183 : vector<32x32xf32>
    %186 = arith.addf %176, %185 : vector<32x32xf32>
    %187 = vector.extract_strided_slice %15 {offsets = [5, 0, 0], sizes = [1, 32, 32], strides = [1, 1, 1]} : vector<8x32x32xf32> to vector<1x32x32xf32>
    %188 = vector.shape_cast %187 : vector<1x32x32xf32> to vector<32x32xf32>
    %189 = arith.mulf %119, %188 : vector<32x32xf32>
    %cst_41 = arith.constant dense<0.000000e+00> : vector<32xf32>
    %190 = vector.multi_reduction <add>, %189, %cst_41 [1] : vector<32x32xf32> to vector<32xf32>
    %191 = vector.shape_cast %190 : vector<32xf32> to vector<32x1xf32>
    %192 = vector.extract_strided_slice %16 {offsets = [5, 0, 0], sizes = [1, 32, 32], strides = [1, 1, 1]} : vector<8x32x32xf32> to vector<1x32x32xf32>
    %193 = vector.shape_cast %192 : vector<1x32x32xf32> to vector<32x32xf32>
    %194 = vector.broadcast %191 : vector<32x1xf32> to vector<32x32xf32>
    %195 = arith.mulf %194, %193 : vector<32x32xf32>
    %196 = arith.addf %186, %195 : vector<32x32xf32>
    %197 = vector.extract_strided_slice %15 {offsets = [6, 0, 0], sizes = [1, 32, 32], strides = [1, 1, 1]} : vector<8x32x32xf32> to vector<1x32x32xf32>
    %198 = vector.shape_cast %197 : vector<1x32x32xf32> to vector<32x32xf32>
    %199 = arith.mulf %119, %198 : vector<32x32xf32>
    %cst_42 = arith.constant dense<0.000000e+00> : vector<32xf32>
    %200 = vector.multi_reduction <add>, %199, %cst_42 [1] : vector<32x32xf32> to vector<32xf32>
    %201 = vector.shape_cast %200 : vector<32xf32> to vector<32x1xf32>
    %202 = vector.extract_strided_slice %16 {offsets = [6, 0, 0], sizes = [1, 32, 32], strides = [1, 1, 1]} : vector<8x32x32xf32> to vector<1x32x32xf32>
    %203 = vector.shape_cast %202 : vector<1x32x32xf32> to vector<32x32xf32>
    %204 = vector.broadcast %201 : vector<32x1xf32> to vector<32x32xf32>
    %205 = arith.mulf %204, %203 : vector<32x32xf32>
    %206 = arith.addf %196, %205 : vector<32x32xf32>
    %207 = vector.extract_strided_slice %15 {offsets = [7, 0, 0], sizes = [1, 32, 32], strides = [1, 1, 1]} : vector<8x32x32xf32> to vector<1x32x32xf32>
    %208 = vector.shape_cast %207 : vector<1x32x32xf32> to vector<32x32xf32>
    %209 = arith.mulf %119, %208 : vector<32x32xf32>
    %cst_43 = arith.constant dense<0.000000e+00> : vector<32xf32>
    %210 = vector.multi_reduction <add>, %209, %cst_43 [1] : vector<32x32xf32> to vector<32xf32>
    %211 = vector.shape_cast %210 : vector<32xf32> to vector<32x1xf32>
    %212 = vector.extract_strided_slice %16 {offsets = [7, 0, 0], sizes = [1, 32, 32], strides = [1, 1, 1]} : vector<8x32x32xf32> to vector<1x32x32xf32>
    %213 = vector.shape_cast %212 : vector<1x32x32xf32> to vector<32x32xf32>
    %214 = vector.broadcast %211 : vector<32x1xf32> to vector<32x32xf32>
    %215 = arith.mulf %214, %213 : vector<32x32xf32>
    %216 = arith.addf %206, %215 : vector<32x32xf32>
    %217 = arith.addf %135, %216 : vector<32x32xf32>
    %218 = arith.truncf %217 : vector<32x32xf32> to vector<32x32xbf16>
    %219 = arith.truncf %121 : vector<32x32xf32> to vector<32x32xbf16>
    %cst_44 = arith.constant dense<0.000000e+00> : vector<32x32xf32>
    %220 = tpu.matmul %218, %219, %cst_44 {dimension_numbers = #tpu.dot_dimension_numbers<[1], [0], [0], [1], [0, 0, 1, 1], [], []>} : vector<32x32xbf16>, vector<32x32xbf16>, vector<32x32xf32> -> vector<32x32xf32>
    %221 = tpu.concatenate %118, %220 in 0 : vector<32x32xf32>, vector<32x32xf32> -> vector<64x32xf32>
    %c0_45 = arith.constant 0 : index
    %c0_46 = arith.constant 0 : index
    %222 = vector.load %arg8[%c0_45, %c0_46] : memref<32x32xbf16, #tpu.memory_space<vmem>>, vector<32x32xbf16>
    %223 = arith.truncf %221 : vector<64x32xf32> to vector<64x32xbf16>
    %cst_47 = arith.constant dense<0.000000e+00> : vector<64x32xf32>
    %224 = tpu.matmul %223, %222, %cst_47 {dimension_numbers = #tpu.dot_dimension_numbers<[1], [0], [0], [1], [0, 0, 1, 1], [], []>} : vector<64x32xbf16>, vector<32x32xbf16>, vector<64x32xf32> -> vector<64x32xf32>
    %c0_48 = arith.constant 0 : index
    %c0_49 = arith.constant 0 : index
    %225 = vector.load %arg9[%c0_48, %c0_49] : memref<1x32xf32, #tpu.memory_space<vmem>>, vector<1x32xf32>
    %226 = vector.broadcast %225 : vector<1x32xf32> to vector<64x32xf32>
    %227 = arith.addf %224, %226 : vector<64x32xf32>
    %228 = arith.addf %227, %4 : vector<64x32xf32>
    %c0_50 = arith.constant 0 : index
    %c0_51 = arith.constant 0 : index
    %c0_52 = arith.constant 0 : index
    %229 = vector.load %arg13[%c0_50, %c0_51, %c0_52] : memref<2x32x1xf32, #tpu.memory_space<vmem>>, vector<1x32x1xf32>
    %230 = vector.shape_cast %229 : vector<1x32x1xf32> to vector<32x1xf32>
    %c1 = arith.constant 1 : index
    %c0_53 = arith.constant 0 : index
    %c0_54 = arith.constant 0 : index
    %231 = vector.load %arg13[%c1, %c0_53, %c0_54] : memref<2x32x1xf32, #tpu.memory_space<vmem>>, vector<1x32x1xf32>
    %232 = vector.shape_cast %231 : vector<1x32x1xf32> to vector<32x1xf32>
    %cst_55 = arith.constant 0.000000e+00 : f32
    %233 = vector.broadcast %cst_55 : f32 to vector<32x1xf32>
    %234 = vector.extract_strided_slice %228 {offsets = [0, 0], sizes = [32, 32], strides = [1, 1]} : vector<64x32xf32> to vector<32x32xf32>
    %cst_56 = arith.constant dense<0.000000e+00> : vector<32xf32>
    %235 = vector.multi_reduction <add>, %234, %cst_56 [1] : vector<32x32xf32> to vector<32xf32>
    %236 = vector.shape_cast %235 : vector<32xf32> to vector<32x1xf32>
    %237 = arith.addf %233, %236 : vector<32x1xf32>
    %238 = vector.extract_strided_slice %228 {offsets = [32, 0], sizes = [32, 32], strides = [1, 1]} : vector<64x32xf32> to vector<32x32xf32>
    %cst_57 = arith.constant dense<0.000000e+00> : vector<32xf32>
    %239 = vector.multi_reduction <add>, %238, %cst_57 [1] : vector<32x32xf32> to vector<32xf32>
    %240 = vector.shape_cast %239 : vector<32xf32> to vector<32x1xf32>
    %241 = arith.addf %237, %240 : vector<32x1xf32>
    %cst_58 = arith.constant 6.400000e+01 : f32
    %242 = vector.broadcast %cst_58 : f32 to vector<32x1xf32>
    %243 = arith.divf %241, %242 : vector<32x1xf32>
    %cst_59 = arith.constant 0.000000e+00 : f32
    %244 = vector.broadcast %cst_59 : f32 to vector<32x1xf32>
    %245 = vector.extract_strided_slice %228 {offsets = [0, 0], sizes = [32, 32], strides = [1, 1]} : vector<64x32xf32> to vector<32x32xf32>
    %246 = vector.broadcast %243 : vector<32x1xf32> to vector<32x32xf32>
    %247 = arith.subf %245, %246 : vector<32x32xf32>
    %248 = arith.mulf %247, %247 : vector<32x32xf32>
    %cst_60 = arith.constant dense<0.000000e+00> : vector<32xf32>
    %249 = vector.multi_reduction <add>, %248, %cst_60 [1] : vector<32x32xf32> to vector<32xf32>
    %250 = vector.shape_cast %249 : vector<32xf32> to vector<32x1xf32>
    %251 = arith.addf %244, %250 : vector<32x1xf32>
    %252 = vector.extract_strided_slice %228 {offsets = [32, 0], sizes = [32, 32], strides = [1, 1]} : vector<64x32xf32> to vector<32x32xf32>
    %253 = vector.broadcast %243 : vector<32x1xf32> to vector<32x32xf32>
    %254 = arith.subf %252, %253 : vector<32x32xf32>
    %255 = arith.mulf %254, %254 : vector<32x32xf32>
    %cst_61 = arith.constant dense<0.000000e+00> : vector<32xf32>
    %256 = vector.multi_reduction <add>, %255, %cst_61 [1] : vector<32x32xf32> to vector<32xf32>
    %257 = vector.shape_cast %256 : vector<32xf32> to vector<32x1xf32>
    %258 = arith.addf %251, %257 : vector<32x1xf32>
    %cst_62 = arith.constant 6.400000e+01 : f32
    %259 = vector.broadcast %cst_62 : f32 to vector<32x1xf32>
    %260 = arith.divf %258, %259 : vector<32x1xf32>
    %cst_63 = arith.constant 9.99999974E-6 : f32
    %261 = vector.broadcast %cst_63 : f32 to vector<32x1xf32>
    %262 = arith.addf %260, %261 : vector<32x1xf32>
    %263 = math.rsqrt %262 : vector<32x1xf32>
    %264 = arith.mulf %263, %230 : vector<32x1xf32>
    %265 = arith.mulf %243, %264 : vector<32x1xf32>
    %266 = arith.subf %232, %265 : vector<32x1xf32>
    %267 = tpu.concatenate %264, %264 in 0 : vector<32x1xf32>, vector<32x1xf32> -> vector<64x1xf32>
    %268 = tpu.concatenate %266, %266 in 0 : vector<32x1xf32>, vector<32x1xf32> -> vector<64x1xf32>
    %269 = vector.broadcast %267 : vector<64x1xf32> to vector<64x32xf32>
    %270 = arith.mulf %228, %269 : vector<64x32xf32>
    %271 = vector.broadcast %268 : vector<64x1xf32> to vector<64x32xf32>
    %272 = arith.addf %270, %271 : vector<64x32xf32>
    %c0_64 = arith.constant 0 : index
    %c0_65 = arith.constant 0 : index
    %273 = vector.load %arg14[%c0_64, %c0_65] : memref<32x64xbf16, #tpu.memory_space<vmem>>, vector<32x64xbf16>
    %274 = arith.truncf %272 : vector<64x32xf32> to vector<64x32xbf16>
    %cst_66 = arith.constant dense<0.000000e+00> : vector<64x64xf32>
    %275 = tpu.matmul %274, %273, %cst_66 {dimension_numbers = #tpu.dot_dimension_numbers<[1], [0], [0], [1], [0, 0, 1, 1], [], []>} : vector<64x32xbf16>, vector<32x64xbf16>, vector<64x64xf32> -> vector<64x64xf32>
    %c0_67 = arith.constant 0 : index
    %c0_68 = arith.constant 0 : index
    %276 = vector.load %arg15[%c0_67, %c0_68] : memref<1x64xf32, #tpu.memory_space<vmem>>, vector<1x64xf32>
    %277 = vector.broadcast %276 : vector<1x64xf32> to vector<64x64xf32>
    %278 = arith.addf %275, %277 : vector<64x64xf32>
    %cst_69 = arith.constant 0.000000e+00 : f32
    %279 = vector.broadcast %cst_69 : f32 to vector<64x64xf32>
    %280 = arith.cmpf oge, %278, %279 : vector<64x64xf32>
    %cst_70 = arith.constant 0.00999999977 : f32
    %281 = vector.broadcast %cst_70 : f32 to vector<64x64xf32>
    %282 = arith.mulf %281, %278 : vector<64x64xf32>
    %283 = arith.select %280, %278, %282 : vector<64x64xi1>, vector<64x64xf32>
    %c0_71 = arith.constant 0 : index
    %c0_72 = arith.constant 0 : index
    %284 = vector.load %arg16[%c0_71, %c0_72] : memref<64x32xbf16, #tpu.memory_space<vmem>>, vector<64x32xbf16>
    %285 = arith.truncf %283 : vector<64x64xf32> to vector<64x64xbf16>
    %cst_73 = arith.constant dense<0.000000e+00> : vector<64x32xf32>
    %286 = tpu.matmul %285, %284, %cst_73 {dimension_numbers = #tpu.dot_dimension_numbers<[1], [0], [0], [1], [0, 0, 1, 1], [], []>} : vector<64x64xbf16>, vector<64x32xbf16>, vector<64x32xf32> -> vector<64x32xf32>
    %c0_74 = arith.constant 0 : index
    %c0_75 = arith.constant 0 : index
    %287 = vector.load %arg17[%c0_74, %c0_75] : memref<1x32xf32, #tpu.memory_space<vmem>>, vector<1x32xf32>
    %288 = vector.broadcast %287 : vector<1x32xf32> to vector<64x32xf32>
    %289 = arith.addf %286, %288 : vector<64x32xf32>
    %290 = arith.addf %289, %272 : vector<64x32xf32>
    %c0_76 = arith.constant 0 : index
    %c0_77 = arith.constant 0 : index
    %c0_78 = arith.constant 0 : index
    %291 = vector.load %arg18[%c0_76, %c0_77, %c0_78] : memref<2x32x1xf32, #tpu.memory_space<vmem>>, vector<1x32x1xf32>
    %292 = vector.shape_cast %291 : vector<1x32x1xf32> to vector<32x1xf32>
    %c1_79 = arith.constant 1 : index
    %c0_80 = arith.constant 0 : index
    %c0_81 = arith.constant 0 : index
    %293 = vector.load %arg18[%c1_79, %c0_80, %c0_81] : memref<2x32x1xf32, #tpu.memory_space<vmem>>, vector<1x32x1xf32>
    %294 = vector.shape_cast %293 : vector<1x32x1xf32> to vector<32x1xf32>
    %cst_82 = arith.constant 0.000000e+00 : f32
    %295 = vector.broadcast %cst_82 : f32 to vector<32x1xf32>
    %296 = vector.extract_strided_slice %290 {offsets = [0, 0], sizes = [32, 32], strides = [1, 1]} : vector<64x32xf32> to vector<32x32xf32>
    %cst_83 = arith.constant dense<0.000000e+00> : vector<32xf32>
    %297 = vector.multi_reduction <add>, %296, %cst_83 [1] : vector<32x32xf32> to vector<32xf32>
    %298 = vector.shape_cast %297 : vector<32xf32> to vector<32x1xf32>
    %299 = arith.addf %295, %298 : vector<32x1xf32>
    %300 = vector.extract_strided_slice %290 {offsets = [32, 0], sizes = [32, 32], strides = [1, 1]} : vector<64x32xf32> to vector<32x32xf32>
    %cst_84 = arith.constant dense<0.000000e+00> : vector<32xf32>
    %301 = vector.multi_reduction <add>, %300, %cst_84 [1] : vector<32x32xf32> to vector<32xf32>
    %302 = vector.shape_cast %301 : vector<32xf32> to vector<32x1xf32>
    %303 = arith.addf %299, %302 : vector<32x1xf32>
    %cst_85 = arith.constant 6.400000e+01 : f32
    %304 = vector.broadcast %cst_85 : f32 to vector<32x1xf32>
    %305 = arith.divf %303, %304 : vector<32x1xf32>
    %cst_86 = arith.constant 0.000000e+00 : f32
    %306 = vector.broadcast %cst_86 : f32 to vector<32x1xf32>
    %307 = vector.extract_strided_slice %290 {offsets = [0, 0], sizes = [32, 32], strides = [1, 1]} : vector<64x32xf32> to vector<32x32xf32>
    %308 = vector.broadcast %305 : vector<32x1xf32> to vector<32x32xf32>
    %309 = arith.subf %307, %308 : vector<32x32xf32>
    %310 = arith.mulf %309, %309 : vector<32x32xf32>
    %cst_87 = arith.constant dense<0.000000e+00> : vector<32xf32>
    %311 = vector.multi_reduction <add>, %310, %cst_87 [1] : vector<32x32xf32> to vector<32xf32>
    %312 = vector.shape_cast %311 : vector<32xf32> to vector<32x1xf32>
    %313 = arith.addf %306, %312 : vector<32x1xf32>
    %314 = vector.extract_strided_slice %290 {offsets = [32, 0], sizes = [32, 32], strides = [1, 1]} : vector<64x32xf32> to vector<32x32xf32>
    %315 = vector.broadcast %305 : vector<32x1xf32> to vector<32x32xf32>
    %316 = arith.subf %314, %315 : vector<32x32xf32>
    %317 = arith.mulf %316, %316 : vector<32x32xf32>
    %cst_88 = arith.constant dense<0.000000e+00> : vector<32xf32>
    %318 = vector.multi_reduction <add>, %317, %cst_88 [1] : vector<32x32xf32> to vector<32xf32>
    %319 = vector.shape_cast %318 : vector<32xf32> to vector<32x1xf32>
    %320 = arith.addf %313, %319 : vector<32x1xf32>
    %cst_89 = arith.constant 6.400000e+01 : f32
    %321 = vector.broadcast %cst_89 : f32 to vector<32x1xf32>
    %322 = arith.divf %320, %321 : vector<32x1xf32>
    %cst_90 = arith.constant 9.99999974E-6 : f32
    %323 = vector.broadcast %cst_90 : f32 to vector<32x1xf32>
    %324 = arith.addf %322, %323 : vector<32x1xf32>
    %325 = math.rsqrt %324 : vector<32x1xf32>
    %326 = arith.mulf %325, %292 : vector<32x1xf32>
    %327 = arith.mulf %305, %326 : vector<32x1xf32>
    %328 = arith.subf %294, %327 : vector<32x1xf32>
    %329 = tpu.concatenate %326, %326 in 0 : vector<32x1xf32>, vector<32x1xf32> -> vector<64x1xf32>
    %330 = tpu.concatenate %328, %328 in 0 : vector<32x1xf32>, vector<32x1xf32> -> vector<64x1xf32>
    %331 = vector.broadcast %329 : vector<64x1xf32> to vector<64x32xf32>
    %332 = arith.mulf %290, %331 : vector<64x32xf32>
    %333 = vector.broadcast %330 : vector<64x1xf32> to vector<64x32xf32>
    %334 = arith.addf %332, %333 : vector<64x32xf32>
    %c0_91 = arith.constant 0 : index
    %c0_92 = arith.constant 0 : index
    %335 = vector.load %arg19[%c0_91, %c0_92] : memref<32x32xbf16, #tpu.memory_space<vmem>>, vector<32x32xbf16>
    %336 = arith.truncf %334 : vector<64x32xf32> to vector<64x32xbf16>
    %cst_93 = arith.constant dense<0.000000e+00> : vector<64x32xf32>
    %337 = tpu.matmul %336, %335, %cst_93 {dimension_numbers = #tpu.dot_dimension_numbers<[1], [0], [0], [1], [0, 0, 1, 1], [], []>} : vector<64x32xbf16>, vector<32x32xbf16>, vector<64x32xf32> -> vector<64x32xf32>
    %c0_94 = arith.constant 0 : index
    %c0_95 = arith.constant 0 : index
    %338 = vector.load %arg20[%c0_94, %c0_95] : memref<1x32xf32, #tpu.memory_space<vmem>>, vector<1x32xf32>
    %339 = vector.broadcast %338 : vector<1x32xf32> to vector<64x32xf32>
    %340 = arith.addf %337, %339 : vector<64x32xf32>
    %c0_96 = arith.constant 0 : index
    %c0_97 = arith.constant 0 : index
    %341 = vector.load %arg21[%c0_96, %c0_97] : memref<32x64xbf16, #tpu.memory_space<vmem>>, vector<32x64xbf16>
    %342 = arith.truncf %340 : vector<64x32xf32> to vector<64x32xbf16>
    %cst_98 = arith.constant dense<0.000000e+00> : vector<64x64xf32>
    %343 = tpu.matmul %342, %341, %cst_98 {dimension_numbers = #tpu.dot_dimension_numbers<[1], [0], [0], [1], [0, 0, 1, 1], [], []>} : vector<64x32xbf16>, vector<32x64xbf16>, vector<64x64xf32> -> vector<64x64xf32>
    %344 = arith.mulf %343, %0 : vector<64x64xf32>
    %345 = arith.truncf %344 : vector<64x64xf32> to vector<64x64xbf16>
    %cst_99 = arith.constant dense<0.000000e+00> : vector<64x16xf32>
    %346 = tpu.matmul %345, %1, %cst_99 {dimension_numbers = #tpu.dot_dimension_numbers<[1], [0], [0], [1], [0, 0, 1, 1], [], []>} : vector<64x64xbf16>, vector<64x16xbf16>, vector<64x16xf32> -> vector<64x16xf32>
    %347 = arith.addf %2, %346 : vector<64x16xf32>
    %c1_100 = arith.constant 1 : index
    %c0_101 = arith.constant 0 : index
    %c0_102 = arith.constant 0 : index
    %348 = vector.load %arg0[%c1_100, %c0_101, %c0_102] : memref<2x64x32xf32, #tpu.memory_space<vmem>>, vector<1x64x32xf32>
    %349 = vector.shape_cast %348 : vector<1x64x32xf32> to vector<64x32xf32>
    %c0_103 = arith.constant 0 : index
    %c0_104 = arith.constant 0 : index
    %350 = vector.load %arg22[%c0_103, %c0_104] : memref<32x96xbf16, #tpu.memory_space<vmem>>, vector<32x96xbf16>
    %351 = arith.truncf %349 : vector<64x32xf32> to vector<64x32xbf16>
    %cst_105 = arith.constant dense<0.000000e+00> : vector<64x96xf32>
    %352 = tpu.matmul %351, %350, %cst_105 {dimension_numbers = #tpu.dot_dimension_numbers<[1], [0], [0], [1], [0, 0, 1, 1], [], []>} : vector<64x32xbf16>, vector<32x96xbf16>, vector<64x96xf32> -> vector<64x96xf32>
    %c0_106 = arith.constant 0 : index
    %c0_107 = arith.constant 0 : index
    %353 = vector.load %arg23[%c0_106, %c0_107] : memref<1x96xf32, #tpu.memory_space<vmem>>, vector<1x96xf32>
    %354 = vector.broadcast %353 : vector<1x96xf32> to vector<64x96xf32>
    %355 = arith.addf %352, %354 : vector<64x96xf32>
    %356 = vector.extract_strided_slice %355 {offsets = [0, 0], sizes = [64, 32], strides = [1, 1]} : vector<64x96xf32> to vector<64x32xf32>
    %357 = vector.extract_strided_slice %355 {offsets = [0, 32], sizes = [64, 32], strides = [1, 1]} : vector<64x96xf32> to vector<64x32xf32>
    %358 = vector.extract_strided_slice %355 {offsets = [0, 64], sizes = [64, 32], strides = [1, 1]} : vector<64x96xf32> to vector<64x32xf32>
    %c0_108 = arith.constant 0 : index
    %c0_109 = arith.constant 0 : index
    %359 = vector.load %arg26[%c0_108, %c0_109] : memref<32x32xf32, #tpu.memory_space<vmem>>, vector<32x32xf32>
    %c0_110 = arith.constant 0 : index
    %c0_111 = arith.constant 0 : index
    %c0_112 = arith.constant 0 : index
    %360 = vector.load %arg27[%c0_110, %c0_111, %c0_112] : memref<4x32x32xf32, #tpu.memory_space<vmem>>, vector<4x32x32xf32>
    %c0_113 = arith.constant 0 : index
    %c0_114 = arith.constant 0 : index
    %c0_115 = arith.constant 0 : index
    %361 = vector.load %arg28[%c0_113, %c0_114, %c0_115] : memref<4x32x32xf32, #tpu.memory_space<vmem>>, vector<4x32x32xf32>
    %362 = vector.extract_strided_slice %356 {offsets = [0, 0], sizes = [32, 32], strides = [1, 1]} : vector<64x32xf32> to vector<32x32xf32>
    %363 = vector.extract_strided_slice %357 {offsets = [0, 0], sizes = [32, 32], strides = [1, 1]} : vector<64x32xf32> to vector<32x32xf32>
    %364 = vector.extract_strided_slice %358 {offsets = [0, 0], sizes = [32, 32], strides = [1, 1]} : vector<64x32xf32> to vector<32x32xf32>
    %365 = arith.truncf %362 : vector<32x32xf32> to vector<32x32xbf16>
    %366 = arith.truncf %363 : vector<32x32xf32> to vector<32x32xbf16>
    %cst_116 = arith.constant dense<0.000000e+00> : vector<32x32xf32>
    %367 = tpu.matmul %365, %366, %cst_116 {dimension_numbers = #tpu.dot_dimension_numbers<[1], [1], [0], [0], [0, 0, 1, 0], [], []>} : vector<32x32xbf16>, vector<32x32xbf16>, vector<32x32xf32> -> vector<32x32xf32>
    %368 = arith.addf %367, %359 : vector<32x32xf32>
    %cst_117 = arith.constant dense<0xFF800000> : vector<32xf32>
    %369 = vector.multi_reduction <maximumf>, %368, %cst_117 [1] : vector<32x32xf32> to vector<32xf32>
    %370 = vector.shape_cast %369 : vector<32xf32> to vector<32x1xf32>
    %371 = vector.broadcast %370 : vector<32x1xf32> to vector<32x32xf32>
    %372 = arith.subf %368, %371 : vector<32x32xf32>
    %373 = math.exp %372 : vector<32x32xf32>
    %cst_118 = arith.constant dense<0.000000e+00> : vector<32xf32>
    %374 = vector.multi_reduction <add>, %373, %cst_118 [1] : vector<32x32xf32> to vector<32xf32>
    %375 = vector.shape_cast %374 : vector<32xf32> to vector<32x1xf32>
    %376 = tpu.reciprocal %375 {approx = true} : vector<32x1xf32> -> vector<32x1xf32>
    %377 = vector.broadcast %376 : vector<32x1xf32> to vector<32x32xf32>
    %378 = arith.mulf %373, %377 : vector<32x32xf32>
    %cst_119 = arith.constant 0.000000e+00 : f32
    %379 = vector.broadcast %cst_119 : f32 to vector<32x32xf32>
    %380 = vector.extract_strided_slice %360 {offsets = [0, 0, 0], sizes = [1, 32, 32], strides = [1, 1, 1]} : vector<4x32x32xf32> to vector<1x32x32xf32>
    %381 = vector.shape_cast %380 : vector<1x32x32xf32> to vector<32x32xf32>
    %382 = arith.mulf %362, %381 : vector<32x32xf32>
    %cst_120 = arith.constant dense<0.000000e+00> : vector<32xf32>
    %383 = vector.multi_reduction <add>, %382, %cst_120 [1] : vector<32x32xf32> to vector<32xf32>
    %384 = vector.shape_cast %383 : vector<32xf32> to vector<32x1xf32>
    %385 = vector.extract_strided_slice %361 {offsets = [0, 0, 0], sizes = [1, 32, 32], strides = [1, 1, 1]} : vector<4x32x32xf32> to vector<1x32x32xf32>
    %386 = vector.shape_cast %385 : vector<1x32x32xf32> to vector<32x32xf32>
    %387 = vector.broadcast %384 : vector<32x1xf32> to vector<32x32xf32>
    %388 = arith.mulf %387, %386 : vector<32x32xf32>
    %389 = arith.addf %379, %388 : vector<32x32xf32>
    %390 = vector.extract_strided_slice %360 {offsets = [1, 0, 0], sizes = [1, 32, 32], strides = [1, 1, 1]} : vector<4x32x32xf32> to vector<1x32x32xf32>
    %391 = vector.shape_cast %390 : vector<1x32x32xf32> to vector<32x32xf32>
    %392 = arith.mulf %362, %391 : vector<32x32xf32>
    %cst_121 = arith.constant dense<0.000000e+00> : vector<32xf32>
    %393 = vector.multi_reduction <add>, %392, %cst_121 [1] : vector<32x32xf32> to vector<32xf32>
    %394 = vector.shape_cast %393 : vector<32xf32> to vector<32x1xf32>
    %395 = vector.extract_strided_slice %361 {offsets = [1, 0, 0], sizes = [1, 32, 32], strides = [1, 1, 1]} : vector<4x32x32xf32> to vector<1x32x32xf32>
    %396 = vector.shape_cast %395 : vector<1x32x32xf32> to vector<32x32xf32>
    %397 = vector.broadcast %394 : vector<32x1xf32> to vector<32x32xf32>
    %398 = arith.mulf %397, %396 : vector<32x32xf32>
    %399 = arith.addf %389, %398 : vector<32x32xf32>
    %400 = vector.extract_strided_slice %360 {offsets = [2, 0, 0], sizes = [1, 32, 32], strides = [1, 1, 1]} : vector<4x32x32xf32> to vector<1x32x32xf32>
    %401 = vector.shape_cast %400 : vector<1x32x32xf32> to vector<32x32xf32>
    %402 = arith.mulf %362, %401 : vector<32x32xf32>
    %cst_122 = arith.constant dense<0.000000e+00> : vector<32xf32>
    %403 = vector.multi_reduction <add>, %402, %cst_122 [1] : vector<32x32xf32> to vector<32xf32>
    %404 = vector.shape_cast %403 : vector<32xf32> to vector<32x1xf32>
    %405 = vector.extract_strided_slice %361 {offsets = [2, 0, 0], sizes = [1, 32, 32], strides = [1, 1, 1]} : vector<4x32x32xf32> to vector<1x32x32xf32>
    %406 = vector.shape_cast %405 : vector<1x32x32xf32> to vector<32x32xf32>
    %407 = vector.broadcast %404 : vector<32x1xf32> to vector<32x32xf32>
    %408 = arith.mulf %407, %406 : vector<32x32xf32>
    %409 = arith.addf %399, %408 : vector<32x32xf32>
    %410 = vector.extract_strided_slice %360 {offsets = [3, 0, 0], sizes = [1, 32, 32], strides = [1, 1, 1]} : vector<4x32x32xf32> to vector<1x32x32xf32>
    %411 = vector.shape_cast %410 : vector<1x32x32xf32> to vector<32x32xf32>
    %412 = arith.mulf %362, %411 : vector<32x32xf32>
    %cst_123 = arith.constant dense<0.000000e+00> : vector<32xf32>
    %413 = vector.multi_reduction <add>, %412, %cst_123 [1] : vector<32x32xf32> to vector<32xf32>
    %414 = vector.shape_cast %413 : vector<32xf32> to vector<32x1xf32>
    %415 = vector.extract_strided_slice %361 {offsets = [3, 0, 0], sizes = [1, 32, 32], strides = [1, 1, 1]} : vector<4x32x32xf32> to vector<1x32x32xf32>
    %416 = vector.shape_cast %415 : vector<1x32x32xf32> to vector<32x32xf32>
    %417 = vector.broadcast %414 : vector<32x1xf32> to vector<32x32xf32>
    %418 = arith.mulf %417, %416 : vector<32x32xf32>
    %419 = arith.addf %409, %418 : vector<32x32xf32>
    %420 = arith.addf %378, %419 : vector<32x32xf32>
    %421 = arith.truncf %420 : vector<32x32xf32> to vector<32x32xbf16>
    %422 = arith.truncf %364 : vector<32x32xf32> to vector<32x32xbf16>
    %cst_124 = arith.constant dense<0.000000e+00> : vector<32x32xf32>
    %423 = tpu.matmul %421, %422, %cst_124 {dimension_numbers = #tpu.dot_dimension_numbers<[1], [0], [0], [1], [0, 0, 1, 1], [], []>} : vector<32x32xbf16>, vector<32x32xbf16>, vector<32x32xf32> -> vector<32x32xf32>
    %424 = vector.extract_strided_slice %356 {offsets = [32, 0], sizes = [32, 32], strides = [1, 1]} : vector<64x32xf32> to vector<32x32xf32>
    %425 = vector.extract_strided_slice %357 {offsets = [32, 0], sizes = [32, 32], strides = [1, 1]} : vector<64x32xf32> to vector<32x32xf32>
    %426 = vector.extract_strided_slice %358 {offsets = [32, 0], sizes = [32, 32], strides = [1, 1]} : vector<64x32xf32> to vector<32x32xf32>
    %427 = arith.truncf %424 : vector<32x32xf32> to vector<32x32xbf16>
    %428 = arith.truncf %425 : vector<32x32xf32> to vector<32x32xbf16>
    %cst_125 = arith.constant dense<0.000000e+00> : vector<32x32xf32>
    %429 = tpu.matmul %427, %428, %cst_125 {dimension_numbers = #tpu.dot_dimension_numbers<[1], [1], [0], [0], [0, 0, 1, 0], [], []>} : vector<32x32xbf16>, vector<32x32xbf16>, vector<32x32xf32> -> vector<32x32xf32>
    %430 = arith.addf %429, %359 : vector<32x32xf32>
    %cst_126 = arith.constant dense<0xFF800000> : vector<32xf32>
    %431 = vector.multi_reduction <maximumf>, %430, %cst_126 [1] : vector<32x32xf32> to vector<32xf32>
    %432 = vector.shape_cast %431 : vector<32xf32> to vector<32x1xf32>
    %433 = vector.broadcast %432 : vector<32x1xf32> to vector<32x32xf32>
    %434 = arith.subf %430, %433 : vector<32x32xf32>
    %435 = math.exp %434 : vector<32x32xf32>
    %cst_127 = arith.constant dense<0.000000e+00> : vector<32xf32>
    %436 = vector.multi_reduction <add>, %435, %cst_127 [1] : vector<32x32xf32> to vector<32xf32>
    %437 = vector.shape_cast %436 : vector<32xf32> to vector<32x1xf32>
    %438 = tpu.reciprocal %437 {approx = true} : vector<32x1xf32> -> vector<32x1xf32>
    %439 = vector.broadcast %438 : vector<32x1xf32> to vector<32x32xf32>
    %440 = arith.mulf %435, %439 : vector<32x32xf32>
    %cst_128 = arith.constant 0.000000e+00 : f32
    %441 = vector.broadcast %cst_128 : f32 to vector<32x32xf32>
    %442 = vector.extract_strided_slice %360 {offsets = [0, 0, 0], sizes = [1, 32, 32], strides = [1, 1, 1]} : vector<4x32x32xf32> to vector<1x32x32xf32>
    %443 = vector.shape_cast %442 : vector<1x32x32xf32> to vector<32x32xf32>
    %444 = arith.mulf %424, %443 : vector<32x32xf32>
    %cst_129 = arith.constant dense<0.000000e+00> : vector<32xf32>
    %445 = vector.multi_reduction <add>, %444, %cst_129 [1] : vector<32x32xf32> to vector<32xf32>
    %446 = vector.shape_cast %445 : vector<32xf32> to vector<32x1xf32>
    %447 = vector.extract_strided_slice %361 {offsets = [0, 0, 0], sizes = [1, 32, 32], strides = [1, 1, 1]} : vector<4x32x32xf32> to vector<1x32x32xf32>
    %448 = vector.shape_cast %447 : vector<1x32x32xf32> to vector<32x32xf32>
    %449 = vector.broadcast %446 : vector<32x1xf32> to vector<32x32xf32>
    %450 = arith.mulf %449, %448 : vector<32x32xf32>
    %451 = arith.addf %441, %450 : vector<32x32xf32>
    %452 = vector.extract_strided_slice %360 {offsets = [1, 0, 0], sizes = [1, 32, 32], strides = [1, 1, 1]} : vector<4x32x32xf32> to vector<1x32x32xf32>
    %453 = vector.shape_cast %452 : vector<1x32x32xf32> to vector<32x32xf32>
    %454 = arith.mulf %424, %453 : vector<32x32xf32>
    %cst_130 = arith.constant dense<0.000000e+00> : vector<32xf32>
    %455 = vector.multi_reduction <add>, %454, %cst_130 [1] : vector<32x32xf32> to vector<32xf32>
    %456 = vector.shape_cast %455 : vector<32xf32> to vector<32x1xf32>
    %457 = vector.extract_strided_slice %361 {offsets = [1, 0, 0], sizes = [1, 32, 32], strides = [1, 1, 1]} : vector<4x32x32xf32> to vector<1x32x32xf32>
    %458 = vector.shape_cast %457 : vector<1x32x32xf32> to vector<32x32xf32>
    %459 = vector.broadcast %456 : vector<32x1xf32> to vector<32x32xf32>
    %460 = arith.mulf %459, %458 : vector<32x32xf32>
    %461 = arith.addf %451, %460 : vector<32x32xf32>
    %462 = vector.extract_strided_slice %360 {offsets = [2, 0, 0], sizes = [1, 32, 32], strides = [1, 1, 1]} : vector<4x32x32xf32> to vector<1x32x32xf32>
    %463 = vector.shape_cast %462 : vector<1x32x32xf32> to vector<32x32xf32>
    %464 = arith.mulf %424, %463 : vector<32x32xf32>
    %cst_131 = arith.constant dense<0.000000e+00> : vector<32xf32>
    %465 = vector.multi_reduction <add>, %464, %cst_131 [1] : vector<32x32xf32> to vector<32xf32>
    %466 = vector.shape_cast %465 : vector<32xf32> to vector<32x1xf32>
    %467 = vector.extract_strided_slice %361 {offsets = [2, 0, 0], sizes = [1, 32, 32], strides = [1, 1, 1]} : vector<4x32x32xf32> to vector<1x32x32xf32>
    %468 = vector.shape_cast %467 : vector<1x32x32xf32> to vector<32x32xf32>
    %469 = vector.broadcast %466 : vector<32x1xf32> to vector<32x32xf32>
    %470 = arith.mulf %469, %468 : vector<32x32xf32>
    %471 = arith.addf %461, %470 : vector<32x32xf32>
    %472 = vector.extract_strided_slice %360 {offsets = [3, 0, 0], sizes = [1, 32, 32], strides = [1, 1, 1]} : vector<4x32x32xf32> to vector<1x32x32xf32>
    %473 = vector.shape_cast %472 : vector<1x32x32xf32> to vector<32x32xf32>
    %474 = arith.mulf %424, %473 : vector<32x32xf32>
    %cst_132 = arith.constant dense<0.000000e+00> : vector<32xf32>
    %475 = vector.multi_reduction <add>, %474, %cst_132 [1] : vector<32x32xf32> to vector<32xf32>
    %476 = vector.shape_cast %475 : vector<32xf32> to vector<32x1xf32>
    %477 = vector.extract_strided_slice %361 {offsets = [3, 0, 0], sizes = [1, 32, 32], strides = [1, 1, 1]} : vector<4x32x32xf32> to vector<1x32x32xf32>
    %478 = vector.shape_cast %477 : vector<1x32x32xf32> to vector<32x32xf32>
    %479 = vector.broadcast %476 : vector<32x1xf32> to vector<32x32xf32>
    %480 = arith.mulf %479, %478 : vector<32x32xf32>
    %481 = arith.addf %471, %480 : vector<32x32xf32>
    %482 = arith.addf %440, %481 : vector<32x32xf32>
    %483 = arith.truncf %482 : vector<32x32xf32> to vector<32x32xbf16>
    %484 = arith.truncf %426 : vector<32x32xf32> to vector<32x32xbf16>
    %cst_133 = arith.constant dense<0.000000e+00> : vector<32x32xf32>
    %485 = tpu.matmul %483, %484, %cst_133 {dimension_numbers = #tpu.dot_dimension_numbers<[1], [0], [0], [1], [0, 0, 1, 1], [], []>} : vector<32x32xbf16>, vector<32x32xbf16>, vector<32x32xf32> -> vector<32x32xf32>
    %486 = tpu.concatenate %423, %485 in 0 : vector<32x32xf32>, vector<32x32xf32> -> vector<64x32xf32>
    %c0_134 = arith.constant 0 : index
    %c0_135 = arith.constant 0 : index
    %487 = vector.load %arg24[%c0_134, %c0_135] : memref<32x32xbf16, #tpu.memory_space<vmem>>, vector<32x32xbf16>
    %488 = arith.truncf %486 : vector<64x32xf32> to vector<64x32xbf16>
    %cst_136 = arith.constant dense<0.000000e+00> : vector<64x32xf32>
    %489 = tpu.matmul %488, %487, %cst_136 {dimension_numbers = #tpu.dot_dimension_numbers<[1], [0], [0], [1], [0, 0, 1, 1], [], []>} : vector<64x32xbf16>, vector<32x32xbf16>, vector<64x32xf32> -> vector<64x32xf32>
    %c0_137 = arith.constant 0 : index
    %c0_138 = arith.constant 0 : index
    %490 = vector.load %arg25[%c0_137, %c0_138] : memref<1x32xf32, #tpu.memory_space<vmem>>, vector<1x32xf32>
    %491 = vector.broadcast %490 : vector<1x32xf32> to vector<64x32xf32>
    %492 = arith.addf %489, %491 : vector<64x32xf32>
    %493 = arith.addf %492, %349 : vector<64x32xf32>
    %c0_139 = arith.constant 0 : index
    %c0_140 = arith.constant 0 : index
    %c0_141 = arith.constant 0 : index
    %494 = vector.load %arg29[%c0_139, %c0_140, %c0_141] : memref<2x32x1xf32, #tpu.memory_space<vmem>>, vector<1x32x1xf32>
    %495 = vector.shape_cast %494 : vector<1x32x1xf32> to vector<32x1xf32>
    %c1_142 = arith.constant 1 : index
    %c0_143 = arith.constant 0 : index
    %c0_144 = arith.constant 0 : index
    %496 = vector.load %arg29[%c1_142, %c0_143, %c0_144] : memref<2x32x1xf32, #tpu.memory_space<vmem>>, vector<1x32x1xf32>
    %497 = vector.shape_cast %496 : vector<1x32x1xf32> to vector<32x1xf32>
    %cst_145 = arith.constant 0.000000e+00 : f32
    %498 = vector.broadcast %cst_145 : f32 to vector<32x1xf32>
    %499 = vector.extract_strided_slice %493 {offsets = [0, 0], sizes = [32, 32], strides = [1, 1]} : vector<64x32xf32> to vector<32x32xf32>
    %cst_146 = arith.constant dense<0.000000e+00> : vector<32xf32>
    %500 = vector.multi_reduction <add>, %499, %cst_146 [1] : vector<32x32xf32> to vector<32xf32>
    %501 = vector.shape_cast %500 : vector<32xf32> to vector<32x1xf32>
    %502 = arith.addf %498, %501 : vector<32x1xf32>
    %503 = vector.extract_strided_slice %493 {offsets = [32, 0], sizes = [32, 32], strides = [1, 1]} : vector<64x32xf32> to vector<32x32xf32>
    %cst_147 = arith.constant dense<0.000000e+00> : vector<32xf32>
    %504 = vector.multi_reduction <add>, %503, %cst_147 [1] : vector<32x32xf32> to vector<32xf32>
    %505 = vector.shape_cast %504 : vector<32xf32> to vector<32x1xf32>
    %506 = arith.addf %502, %505 : vector<32x1xf32>
    %cst_148 = arith.constant 6.400000e+01 : f32
    %507 = vector.broadcast %cst_148 : f32 to vector<32x1xf32>
    %508 = arith.divf %506, %507 : vector<32x1xf32>
    %cst_149 = arith.constant 0.000000e+00 : f32
    %509 = vector.broadcast %cst_149 : f32 to vector<32x1xf32>
    %510 = vector.extract_strided_slice %493 {offsets = [0, 0], sizes = [32, 32], strides = [1, 1]} : vector<64x32xf32> to vector<32x32xf32>
    %511 = vector.broadcast %508 : vector<32x1xf32> to vector<32x32xf32>
    %512 = arith.subf %510, %511 : vector<32x32xf32>
    %513 = arith.mulf %512, %512 : vector<32x32xf32>
    %cst_150 = arith.constant dense<0.000000e+00> : vector<32xf32>
    %514 = vector.multi_reduction <add>, %513, %cst_150 [1] : vector<32x32xf32> to vector<32xf32>
    %515 = vector.shape_cast %514 : vector<32xf32> to vector<32x1xf32>
    %516 = arith.addf %509, %515 : vector<32x1xf32>
    %517 = vector.extract_strided_slice %493 {offsets = [32, 0], sizes = [32, 32], strides = [1, 1]} : vector<64x32xf32> to vector<32x32xf32>
    %518 = vector.broadcast %508 : vector<32x1xf32> to vector<32x32xf32>
    %519 = arith.subf %517, %518 : vector<32x32xf32>
    %520 = arith.mulf %519, %519 : vector<32x32xf32>
    %cst_151 = arith.constant dense<0.000000e+00> : vector<32xf32>
    %521 = vector.multi_reduction <add>, %520, %cst_151 [1] : vector<32x32xf32> to vector<32xf32>
    %522 = vector.shape_cast %521 : vector<32xf32> to vector<32x1xf32>
    %523 = arith.addf %516, %522 : vector<32x1xf32>
    %cst_152 = arith.constant 6.400000e+01 : f32
    %524 = vector.broadcast %cst_152 : f32 to vector<32x1xf32>
    %525 = arith.divf %523, %524 : vector<32x1xf32>
    %cst_153 = arith.constant 9.99999974E-6 : f32
    %526 = vector.broadcast %cst_153 : f32 to vector<32x1xf32>
    %527 = arith.addf %525, %526 : vector<32x1xf32>
    %528 = math.rsqrt %527 : vector<32x1xf32>
    %529 = arith.mulf %528, %495 : vector<32x1xf32>
    %530 = arith.mulf %508, %529 : vector<32x1xf32>
    %531 = arith.subf %497, %530 : vector<32x1xf32>
    %532 = tpu.concatenate %529, %529 in 0 : vector<32x1xf32>, vector<32x1xf32> -> vector<64x1xf32>
    %533 = tpu.concatenate %531, %531 in 0 : vector<32x1xf32>, vector<32x1xf32> -> vector<64x1xf32>
    %534 = vector.broadcast %532 : vector<64x1xf32> to vector<64x32xf32>
    %535 = arith.mulf %493, %534 : vector<64x32xf32>
    %536 = vector.broadcast %533 : vector<64x1xf32> to vector<64x32xf32>
    %537 = arith.addf %535, %536 : vector<64x32xf32>
    %c0_154 = arith.constant 0 : index
    %c0_155 = arith.constant 0 : index
    %538 = vector.load %arg30[%c0_154, %c0_155] : memref<32x64xbf16, #tpu.memory_space<vmem>>, vector<32x64xbf16>
    %539 = arith.truncf %537 : vector<64x32xf32> to vector<64x32xbf16>
    %cst_156 = arith.constant dense<0.000000e+00> : vector<64x64xf32>
    %540 = tpu.matmul %539, %538, %cst_156 {dimension_numbers = #tpu.dot_dimension_numbers<[1], [0], [0], [1], [0, 0, 1, 1], [], []>} : vector<64x32xbf16>, vector<32x64xbf16>, vector<64x64xf32> -> vector<64x64xf32>
    %c0_157 = arith.constant 0 : index
    %c0_158 = arith.constant 0 : index
    %541 = vector.load %arg31[%c0_157, %c0_158] : memref<1x64xf32, #tpu.memory_space<vmem>>, vector<1x64xf32>
    %542 = vector.broadcast %541 : vector<1x64xf32> to vector<64x64xf32>
    %543 = arith.addf %540, %542 : vector<64x64xf32>
    %cst_159 = arith.constant 0.000000e+00 : f32
    %544 = vector.broadcast %cst_159 : f32 to vector<64x64xf32>
    %545 = arith.cmpf oge, %543, %544 : vector<64x64xf32>
    %cst_160 = arith.constant 0.00999999977 : f32
    %546 = vector.broadcast %cst_160 : f32 to vector<64x64xf32>
    %547 = arith.mulf %546, %543 : vector<64x64xf32>
    %548 = arith.select %545, %543, %547 : vector<64x64xi1>, vector<64x64xf32>
    %c0_161 = arith.constant 0 : index
    %c0_162 = arith.constant 0 : index
    %549 = vector.load %arg32[%c0_161, %c0_162] : memref<64x32xbf16, #tpu.memory_space<vmem>>, vector<64x32xbf16>
    %550 = arith.truncf %548 : vector<64x64xf32> to vector<64x64xbf16>
    %cst_163 = arith.constant dense<0.000000e+00> : vector<64x32xf32>
    %551 = tpu.matmul %550, %549, %cst_163 {dimension_numbers = #tpu.dot_dimension_numbers<[1], [0], [0], [1], [0, 0, 1, 1], [], []>} : vector<64x64xbf16>, vector<64x32xbf16>, vector<64x32xf32> -> vector<64x32xf32>
    %c0_164 = arith.constant 0 : index
    %c0_165 = arith.constant 0 : index
    %552 = vector.load %arg33[%c0_164, %c0_165] : memref<1x32xf32, #tpu.memory_space<vmem>>, vector<1x32xf32>
    %553 = vector.broadcast %552 : vector<1x32xf32> to vector<64x32xf32>
    %554 = arith.addf %551, %553 : vector<64x32xf32>
    %555 = arith.addf %554, %537 : vector<64x32xf32>
    %c0_166 = arith.constant 0 : index
    %c0_167 = arith.constant 0 : index
    %c0_168 = arith.constant 0 : index
    %556 = vector.load %arg34[%c0_166, %c0_167, %c0_168] : memref<2x32x1xf32, #tpu.memory_space<vmem>>, vector<1x32x1xf32>
    %557 = vector.shape_cast %556 : vector<1x32x1xf32> to vector<32x1xf32>
    %c1_169 = arith.constant 1 : index
    %c0_170 = arith.constant 0 : index
    %c0_171 = arith.constant 0 : index
    %558 = vector.load %arg34[%c1_169, %c0_170, %c0_171] : memref<2x32x1xf32, #tpu.memory_space<vmem>>, vector<1x32x1xf32>
    %559 = vector.shape_cast %558 : vector<1x32x1xf32> to vector<32x1xf32>
    %cst_172 = arith.constant 0.000000e+00 : f32
    %560 = vector.broadcast %cst_172 : f32 to vector<32x1xf32>
    %561 = vector.extract_strided_slice %555 {offsets = [0, 0], sizes = [32, 32], strides = [1, 1]} : vector<64x32xf32> to vector<32x32xf32>
    %cst_173 = arith.constant dense<0.000000e+00> : vector<32xf32>
    %562 = vector.multi_reduction <add>, %561, %cst_173 [1] : vector<32x32xf32> to vector<32xf32>
    %563 = vector.shape_cast %562 : vector<32xf32> to vector<32x1xf32>
    %564 = arith.addf %560, %563 : vector<32x1xf32>
    %565 = vector.extract_strided_slice %555 {offsets = [32, 0], sizes = [32, 32], strides = [1, 1]} : vector<64x32xf32> to vector<32x32xf32>
    %cst_174 = arith.constant dense<0.000000e+00> : vector<32xf32>
    %566 = vector.multi_reduction <add>, %565, %cst_174 [1] : vector<32x32xf32> to vector<32xf32>
    %567 = vector.shape_cast %566 : vector<32xf32> to vector<32x1xf32>
    %568 = arith.addf %564, %567 : vector<32x1xf32>
    %cst_175 = arith.constant 6.400000e+01 : f32
    %569 = vector.broadcast %cst_175 : f32 to vector<32x1xf32>
    %570 = arith.divf %568, %569 : vector<32x1xf32>
    %cst_176 = arith.constant 0.000000e+00 : f32
    %571 = vector.broadcast %cst_176 : f32 to vector<32x1xf32>
    %572 = vector.extract_strided_slice %555 {offsets = [0, 0], sizes = [32, 32], strides = [1, 1]} : vector<64x32xf32> to vector<32x32xf32>
    %573 = vector.broadcast %570 : vector<32x1xf32> to vector<32x32xf32>
    %574 = arith.subf %572, %573 : vector<32x32xf32>
    %575 = arith.mulf %574, %574 : vector<32x32xf32>
    %cst_177 = arith.constant dense<0.000000e+00> : vector<32xf32>
    %576 = vector.multi_reduction <add>, %575, %cst_177 [1] : vector<32x32xf32> to vector<32xf32>
    %577 = vector.shape_cast %576 : vector<32xf32> to vector<32x1xf32>
    %578 = arith.addf %571, %577 : vector<32x1xf32>
    %579 = vector.extract_strided_slice %555 {offsets = [32, 0], sizes = [32, 32], strides = [1, 1]} : vector<64x32xf32> to vector<32x32xf32>
    %580 = vector.broadcast %570 : vector<32x1xf32> to vector<32x32xf32>
    %581 = arith.subf %579, %580 : vector<32x32xf32>
    %582 = arith.mulf %581, %581 : vector<32x32xf32>
    %cst_178 = arith.constant dense<0.000000e+00> : vector<32xf32>
    %583 = vector.multi_reduction <add>, %582, %cst_178 [1] : vector<32x32xf32> to vector<32xf32>
    %584 = vector.shape_cast %583 : vector<32xf32> to vector<32x1xf32>
    %585 = arith.addf %578, %584 : vector<32x1xf32>
    %cst_179 = arith.constant 6.400000e+01 : f32
    %586 = vector.broadcast %cst_179 : f32 to vector<32x1xf32>
    %587 = arith.divf %585, %586 : vector<32x1xf32>
    %cst_180 = arith.constant 9.99999974E-6 : f32
    %588 = vector.broadcast %cst_180 : f32 to vector<32x1xf32>
    %589 = arith.addf %587, %588 : vector<32x1xf32>
    %590 = math.rsqrt %589 : vector<32x1xf32>
    %591 = arith.mulf %590, %557 : vector<32x1xf32>
    %592 = arith.mulf %570, %591 : vector<32x1xf32>
    %593 = arith.subf %559, %592 : vector<32x1xf32>
    %594 = tpu.concatenate %591, %591 in 0 : vector<32x1xf32>, vector<32x1xf32> -> vector<64x1xf32>
    %595 = tpu.concatenate %593, %593 in 0 : vector<32x1xf32>, vector<32x1xf32> -> vector<64x1xf32>
    %596 = vector.broadcast %594 : vector<64x1xf32> to vector<64x32xf32>
    %597 = arith.mulf %555, %596 : vector<64x32xf32>
    %598 = vector.broadcast %595 : vector<64x1xf32> to vector<64x32xf32>
    %599 = arith.addf %597, %598 : vector<64x32xf32>
    %c0_181 = arith.constant 0 : index
    %c0_182 = arith.constant 0 : index
    %600 = vector.load %arg35[%c0_181, %c0_182] : memref<32x32xbf16, #tpu.memory_space<vmem>>, vector<32x32xbf16>
    %601 = arith.truncf %599 : vector<64x32xf32> to vector<64x32xbf16>
    %cst_183 = arith.constant dense<0.000000e+00> : vector<64x32xf32>
    %602 = tpu.matmul %601, %600, %cst_183 {dimension_numbers = #tpu.dot_dimension_numbers<[1], [0], [0], [1], [0, 0, 1, 1], [], []>} : vector<64x32xbf16>, vector<32x32xbf16>, vector<64x32xf32> -> vector<64x32xf32>
    %c0_184 = arith.constant 0 : index
    %c0_185 = arith.constant 0 : index
    %603 = vector.load %arg36[%c0_184, %c0_185] : memref<1x32xf32, #tpu.memory_space<vmem>>, vector<1x32xf32>
    %604 = vector.broadcast %603 : vector<1x32xf32> to vector<64x32xf32>
    %605 = arith.addf %602, %604 : vector<64x32xf32>
    %c0_186 = arith.constant 0 : index
    %c0_187 = arith.constant 0 : index
    %606 = vector.load %arg37[%c0_186, %c0_187] : memref<32x64xbf16, #tpu.memory_space<vmem>>, vector<32x64xbf16>
    %607 = arith.truncf %605 : vector<64x32xf32> to vector<64x32xbf16>
    %cst_188 = arith.constant dense<0.000000e+00> : vector<64x64xf32>
    %608 = tpu.matmul %607, %606, %cst_188 {dimension_numbers = #tpu.dot_dimension_numbers<[1], [0], [0], [1], [0, 0, 1, 1], [], []>} : vector<64x32xbf16>, vector<32x64xbf16>, vector<64x64xf32> -> vector<64x64xf32>
    %609 = arith.mulf %608, %0 : vector<64x64xf32>
    %610 = arith.truncf %609 : vector<64x64xf32> to vector<64x64xbf16>
    %cst_189 = arith.constant dense<0.000000e+00> : vector<64x16xf32>
    %611 = tpu.matmul %610, %1, %cst_189 {dimension_numbers = #tpu.dot_dimension_numbers<[1], [0], [0], [1], [0, 0, 1, 1], [], []>} : vector<64x64xbf16>, vector<64x16xbf16>, vector<64x16xf32> -> vector<64x16xf32>
    %612 = arith.addf %347, %611 : vector<64x16xf32>
    %c0_190 = arith.constant 0 : index
    %c0_191 = arith.constant 0 : index
    %613 = vector.load %arg3[%c0_190, %c0_191] : memref<16x64xbf16, #tpu.memory_space<vmem>>, vector<16x64xbf16>
    %614 = arith.truncf %612 : vector<64x16xf32> to vector<64x16xbf16>
    %cst_192 = arith.constant dense<0.000000e+00> : vector<16x16xf32>
    %615 = tpu.matmul %613, %614, %cst_192 {dimension_numbers = #tpu.dot_dimension_numbers<[1], [0], [0], [1], [0, 0, 1, 1], [], []>} : vector<16x64xbf16>, vector<64x16xbf16>, vector<16x16xf32> -> vector<16x16xf32>
    %c0_193 = arith.constant 0 : index
    %c0_194 = arith.constant 0 : index
    %616 = vector.load %arg4[%c0_193, %c0_194] : memref<1x16xf32, #tpu.memory_space<vmem>>, vector<1x16xf32>
    %617 = vector.broadcast %616 : vector<1x16xf32> to vector<16x16xf32>
    %618 = arith.addf %615, %617 : vector<16x16xf32>
    %cst_195 = arith.constant 0.000000e+00 : f32
    %619 = vector.broadcast %cst_195 : f32 to vector<16x16xf32>
    %620 = arith.cmpf oge, %618, %619 : vector<16x16xf32>
    %cst_196 = arith.constant 0.00999999977 : f32
    %621 = vector.broadcast %cst_196 : f32 to vector<16x16xf32>
    %622 = arith.mulf %621, %618 : vector<16x16xf32>
    %623 = arith.select %620, %618, %622 : vector<16x16xi1>, vector<16x16xf32>
    %c0_197 = arith.constant 0 : index
    %c0_198 = arith.constant 0 : index
    %c0_199 = arith.constant 0 : index
    %624 = vector.load %arg5[%c0_197, %c0_198, %c0_199] : memref<2x8x1xf32, #tpu.memory_space<vmem>>, vector<1x8x1xf32>
    %625 = vector.shape_cast %624 : vector<1x8x1xf32> to vector<8x1xf32>
    %c1_200 = arith.constant 1 : index
    %c0_201 = arith.constant 0 : index
    %c0_202 = arith.constant 0 : index
    %626 = vector.load %arg5[%c1_200, %c0_201, %c0_202] : memref<2x8x1xf32, #tpu.memory_space<vmem>>, vector<1x8x1xf32>
    %627 = vector.shape_cast %626 : vector<1x8x1xf32> to vector<8x1xf32>
    %cst_203 = arith.constant 0.000000e+00 : f32
    %628 = vector.broadcast %cst_203 : f32 to vector<8x1xf32>
    %629 = vector.extract_strided_slice %623 {offsets = [0, 0], sizes = [8, 16], strides = [1, 1]} : vector<16x16xf32> to vector<8x16xf32>
    %cst_204 = arith.constant dense<0.000000e+00> : vector<8xf32>
    %630 = vector.multi_reduction <add>, %629, %cst_204 [1] : vector<8x16xf32> to vector<8xf32>
    %631 = vector.shape_cast %630 : vector<8xf32> to vector<8x1xf32>
    %632 = arith.addf %628, %631 : vector<8x1xf32>
    %633 = vector.extract_strided_slice %623 {offsets = [8, 0], sizes = [8, 16], strides = [1, 1]} : vector<16x16xf32> to vector<8x16xf32>
    %cst_205 = arith.constant dense<0.000000e+00> : vector<8xf32>
    %634 = vector.multi_reduction <add>, %633, %cst_205 [1] : vector<8x16xf32> to vector<8xf32>
    %635 = vector.shape_cast %634 : vector<8xf32> to vector<8x1xf32>
    %636 = arith.addf %632, %635 : vector<8x1xf32>
    %cst_206 = arith.constant 3.200000e+01 : f32
    %637 = vector.broadcast %cst_206 : f32 to vector<8x1xf32>
    %638 = arith.divf %636, %637 : vector<8x1xf32>
    %cst_207 = arith.constant 0.000000e+00 : f32
    %639 = vector.broadcast %cst_207 : f32 to vector<8x1xf32>
    %640 = vector.extract_strided_slice %623 {offsets = [0, 0], sizes = [8, 16], strides = [1, 1]} : vector<16x16xf32> to vector<8x16xf32>
    %641 = vector.broadcast %638 : vector<8x1xf32> to vector<8x16xf32>
    %642 = arith.subf %640, %641 : vector<8x16xf32>
    %643 = arith.mulf %642, %642 : vector<8x16xf32>
    %cst_208 = arith.constant dense<0.000000e+00> : vector<8xf32>
    %644 = vector.multi_reduction <add>, %643, %cst_208 [1] : vector<8x16xf32> to vector<8xf32>
    %645 = vector.shape_cast %644 : vector<8xf32> to vector<8x1xf32>
    %646 = arith.addf %639, %645 : vector<8x1xf32>
    %647 = vector.extract_strided_slice %623 {offsets = [8, 0], sizes = [8, 16], strides = [1, 1]} : vector<16x16xf32> to vector<8x16xf32>
    %648 = vector.broadcast %638 : vector<8x1xf32> to vector<8x16xf32>
    %649 = arith.subf %647, %648 : vector<8x16xf32>
    %650 = arith.mulf %649, %649 : vector<8x16xf32>
    %cst_209 = arith.constant dense<0.000000e+00> : vector<8xf32>
    %651 = vector.multi_reduction <add>, %650, %cst_209 [1] : vector<8x16xf32> to vector<8xf32>
    %652 = vector.shape_cast %651 : vector<8xf32> to vector<8x1xf32>
    %653 = arith.addf %646, %652 : vector<8x1xf32>
    %cst_210 = arith.constant 3.200000e+01 : f32
    %654 = vector.broadcast %cst_210 : f32 to vector<8x1xf32>
    %655 = arith.divf %653, %654 : vector<8x1xf32>
    %cst_211 = arith.constant 9.99999974E-6 : f32
    %656 = vector.broadcast %cst_211 : f32 to vector<8x1xf32>
    %657 = arith.addf %655, %656 : vector<8x1xf32>
    %658 = math.rsqrt %657 : vector<8x1xf32>
    %659 = arith.mulf %658, %625 : vector<8x1xf32>
    %660 = arith.mulf %638, %659 : vector<8x1xf32>
    %661 = arith.subf %627, %660 : vector<8x1xf32>
    %662 = tpu.concatenate %659, %659 in 0 : vector<8x1xf32>, vector<8x1xf32> -> vector<16x1xf32>
    %663 = tpu.concatenate %661, %661 in 0 : vector<8x1xf32>, vector<8x1xf32> -> vector<16x1xf32>
    %664 = vector.broadcast %662 : vector<16x1xf32> to vector<16x16xf32>
    %665 = arith.mulf %623, %664 : vector<16x16xf32>
    %666 = vector.broadcast %663 : vector<16x1xf32> to vector<16x16xf32>
    %667 = arith.addf %665, %666 : vector<16x16xf32>
    %668 = vector.extract_strided_slice %667 {offsets = [0, 0], sizes = [8, 16], strides = [1, 1]} : vector<16x16xf32> to vector<8x16xf32>
    %c0_212 = arith.constant 0 : index
    %c0_213 = arith.constant 0 : index
    %c0_214 = arith.constant 0 : index
    %669 = vector.load %arg38[%c0_212, %c0_213, %c0_214] : memref<2x8x16xf32, #tpu.memory_space<vmem>>, vector<1x8x16xf32>
    %670 = vector.shape_cast %669 : vector<1x8x16xf32> to vector<8x16xf32>
    %671 = vector.shape_cast %668 : vector<8x16xf32> to vector<1x8x16xf32>
    tpu.vector_store %arg38[%c0_212, %c0_213, %c0_214], %671 {strides = array<i32>} : memref<2x8x16xf32, #tpu.memory_space<vmem>>, vector<1x8x16xf32>,
    %672 = vector.extract_strided_slice %667 {offsets = [8, 0], sizes = [8, 16], strides = [1, 1]} : vector<16x16xf32> to vector<8x16xf32>
    %c1_215 = arith.constant 1 : index
    %c0_216 = arith.constant 0 : index
    %c0_217 = arith.constant 0 : index
    %673 = vector.load %arg38[%c1_215, %c0_216, %c0_217] : memref<2x8x16xf32, #tpu.memory_space<vmem>>, vector<1x8x16xf32>
    %674 = vector.shape_cast %673 : vector<1x8x16xf32> to vector<8x16xf32>
    %675 = vector.shape_cast %672 : vector<8x16xf32> to vector<1x8x16xf32>
    tpu.vector_store %arg38[%c1_215, %c0_216, %c0_217], %675 {strides = array<i32>} : memref<2x8x16xf32, #tpu.memory_space<vmem>>, vector<1x8x16xf32>,
    return
  }
}

</mosaic_0001>

<bundles_post_ra>
// kernel: encoder_forward.2
= control target key start
LH: loop header
LB: loop body
LE: loop exit
PB: predicated region body
PF: predicated region fallthrough
CT: control target
= control target key end

     0   :  { %9 = vsyncpa [#allocation3], 0  ;;  %s299_s0 = inlined_call_operand.vmem [shape: f32[8,24], index: 0, kind: input, shape index: {}]   ;;  %s300_s1 = inlined_call_operand.hbm [shape: bf16[24,256], index: 1, kind: input, shape index: {}]   ;;  %s301_s2 = inlined_call_operand.hbm [shape: f32[1,256], index: 2, kind: input, shape index: {}]   ;;  %s302_s3 = inlined_call_operand.hbm [shape: f32[2,8,256], index: 3, kind: input, shape index: {}]   ;;  %s303_s4 = inlined_call_operand.vmem [shape: f32[2,8,256], index: 4, kind: output, shape index: {}]  }
   0x1   :  { %10 = vsyncpa [#allocation5], 0  ;;  %s31_s17 = sshll.u32 %s301_s2, 4  ;;  %s243_s18 = smov [#allocation4]   ;;  %s32_s17 = int_to_ptr.hbm [resolvable:$true] %s31_s17 }
   0x2   :  { %s33_s19 = sshll.u32 %s243_s18, 4  ;;  %s17_s22 = sshll.u32 %s300_s1, 4  ;;  %s34_s19 = int_to_ptr.vmem [resolvable:$true] %s33_s19  ;;  %s18_s22 = int_to_ptr.hbm [resolvable:$true] %s17_s22 }
   0x3   :  { %36 = dma.hbm_to_vmem [thread:$0]  %s32_s17, 32, %s34_s19, [#allocation5]  }
   0x4   :  { %s244_s23 = smov [#allocation2]   ;;  %s245_s25 = smov 128  }
   0x5   :  { %s19_s24 = sshll.u32 %s244_s23, 4  ;;  %s246_s26 = smov 8   ;;  %s20_s24 = int_to_ptr.vmem [resolvable:$true] %s19_s24 }
   0x6   :  { %25 = dma.hbm_to_vmem [thread:$0]  %s18_s22, 384, %s20_s24, [#allocation3], %s245_s25, %s245_s25, %s246_s26  }
   0x7   :  { %s41_s2 = sshll.u32 %s302_s3, 4  ;;  %s247_s29 = smov [#allocation6]   ;;  %s42_s2 = int_to_ptr.hbm [resolvable:$true] %s41_s2 }
   0x8   :  { %s43_s30 = sshll.u32 %s247_s29, 4  ;;  %s248_s5 = smov 256   ;;  %s44_s30 = int_to_ptr.vmem [resolvable:$true] %s43_s30 }
   0x9   :  { %s249_s6 = smov 16  }
   0xa   :  { %49 = dma.hbm_to_vmem [thread:$0]  %s42_s2, 512, %s44_s30, [#allocation5], %s248_s5, %s248_s5, %s249_s6  }
   0xb   :  { %239 = dma.done.wait [#allocation3], 384  }
   0xc   :  { %240 = vsyncadd [#allocation3], 4294966912 }
   0xd   :  { %241 = dma.done.wait [#allocation5], 544  }
   0xe   :  { %242 = vsyncadd [#allocation5], 4294966752  ;;  %v66_v0 = vld [vmem:[#allocation2 + $0x10] sm:$0xff]  ;;  %vm93_vm0 = vcmask 1043456   ;;  %v148_v3 = vld [vmem:[#allocation2] sm:$0xf] }
   0xf   :  { %v81_v1 = vunpack.c.l.b16 %v66_v0  ;;  %v82_v2 = vunpack.c.h.b16 %v66_v0  ;;  %v159_v6 = vld [vmem:[#allocation2 + $0x4] sm:$0xf0]  ;;  %v158_v7 = vld [vmem:[#allocation2 + $0x4] sm:$0xf]  ;;  %v150_v8 = vld [vmem:[#allocation2 + $0x8] sm:$0xf0] }
  0x10   :  { %v149_v11 = vor.u32 %v159_v6, %v148_v3  ;;  %v153_v12 = vor.u32 %v158_v7, %v150_v8  ;;  %v63_v13 = vld [vmem:[%s299_s0] sm:$0xff]  ;;  %vm89_vm1 = vcmask 195584   ;;  %v68_v15 = vld [vmem:[#allocation4] sm:$0x3]  ;;  %v133_v20 = vld [vmem:[#allocation6 + $0x10] sm:$0xff] }
  0x11   :  { %v85_v4 = vpack.c.b16 %v81_v1, %v81_v1  ;;  %v86_v5 = vpack.c.b16 %v82_v2, %v82_v2  ;;  %v67_v14 = vpack.c.bf16 %v63_v13, %v63_v13  ;;  %v70_v16 = vperm.slane %v68_v15, 0  ;;  %v126_v19 = vld [vmem:[#allocation6] sm:$0xff]  ;;  %v127_v22 = vld [vmem:[#allocation6 + $0x8] sm:$0xff]  ;;  %v134_v25 = vld [vmem:[#allocation6 + $0x18] sm:$0xff] }
  0x12   :  { %v71_v17 = vperm.slane %v68_v15, 1 }
  0x13   :  { %v95_v9 = vsel %vm93_vm0, %v85_v4, 0  ;;  %v98_v10 = vsel %vm93_vm0, %v86_v5, 0 }
  0x14   :  { %106 = vmatpush.bf16.msra.mxu0 %v95_v9  ;;  %119 = vmatpush.bf16.msra.mxu1 %v98_v10 }
  0x18   :  { %107 = vmatpush.bf16.msra.mxu0 %v149_v11  ;;  %120 = vmatpush.bf16.msra.mxu1 %v153_v12 }
  0x1b   :  { %154 = vmatmul.msk.bf16.vlgmr.msra.gmra.mxu0 %vm89_vm1, %v67_v14  ;;  %155 = vmatmul.msk.bf16.vlgmr.msra.gmra.mxu1 %vm89_vm1, %v67_v14 }
  0x98   :  { %v109_v18 = vpop.f32.mrf.mxu0  ;;  %v122_v21 = vpop.f32.mrf.mxu1 }
  0x99   :  { %v110_v23 = vadd.f32 %v109_v18, %v70_v16  ;;  %v123_v24 = vadd.f32 %v122_v21, %v71_v17 }
  0x9b   :  { %v128_v26 = vadd.f32 %v126_v19, %v110_v23  ;;  %v135_v27 = vadd.f32 %v133_v20, %v110_v23  ;;  %v129_v28 = vadd.f32 %v127_v22, %v123_v24  ;;  %v136_v29 = vadd.f32 %v134_v25, %v123_v24 }
  0x9d   :  { %130 = vst [vmem:[%s303_s4] sm:$0xff] %v128_v26 }
  0x9e   :  { %156 = vst [vmem:[%s303_s4 + $0x10] sm:$0xff] %v135_v27 }
  0x9f   :  { %131 = vst [vmem:[%s303_s4 + $0x8] sm:$0xff] %v129_v28 }
  0xa0   :  { %157 = vst [vmem:[%s303_s4 + $0x18] sm:$0xff] %v136_v29  ;;  %v111_v30 = vpop.f32.mrf.mxu0  ;;  %v124_v31 = vpop.f32.mrf.mxu1 }
  0xa1   :  { %144 = vsyncpa [#allocation3], 1 }
  0xa2   :  { %145 = vsyncpa [#allocation5], 1 }

// kernel: encoder_forward.3
= control target key start
LH: loop header
LB: loop body
LE: loop exit
PB: predicated region body
PF: predicated region fallthrough
CT: control target
= control target key end

     0   :  { %s4878_s6 = smov 1   ;;  %s4879_s10 = smov 2   ;;  %s6967_s0 = inlined_call_operand.smem [shape: u32[39], index: -1, kind: input, shape index: {}] }
   0x1   :  { %s4958_s5 = sld [smem:[%s6967_s0]]   ;;  %s4880_s14 = smov 3  }
   0x2   :  { %s4963_s9 = sld [smem:[%s6967_s0 + %s4878_s6]]   ;;  %s4881_s18 = smov 4  }
   0x3   :  { %s4968_s13 = sld [smem:[%s6967_s0 + %s4879_s10]]   ;;  %s4882_s22 = smov 5  }
   0x4   :  { %s4973_s17 = sld [smem:[%s6967_s0 + %s4880_s14]]   ;;  %s4883_s26 = smov 6  }
   0x5   :  { %s4978_s21 = sld [smem:[%s6967_s0 + %s4881_s18]]   ;;  %s4884_s30 = smov 7  }
   0x6   :  { %s4983_s25 = sld [smem:[%s6967_s0 + %s4882_s22]]   ;;  %s4885_s4 = smov 8  }
   0x7   :  { %6997 = sst [smem:[#allocation56_spill]] %s4958_s5  ;;  %s4886_s10 = smov 9  }
   0x8   :  { %6998 = sst [smem:[#allocation57_spill]] %s4963_s9  ;;  %s4887_s15 = smov 10  }
   0x9   :  { %6999 = sst [smem:[#allocation58_spill]] %s4968_s13  ;;  %s4888_s20 = smov 11  }
   0xa   :  { %7000 = sst [smem:[#allocation59_spill]] %s4973_s17  ;;  %s4890_s1 = smov 13  }
   0xb   :  { %s4988_s29 = sld [smem:[%s6967_s0 + %s4883_s26]]   ;;  %s4889_s26 = smov 12  }
   0xc   :  { %7001 = sst [smem:[#allocation60_spill]] %s4983_s25  ;;  %s4891_s7 = smov 14  }
   0xd   :  { %s4993_s3 = sld [smem:[%s6967_s0 + %s4884_s30]]   ;;  %s4893_s22 = smov 16  }
   0xe   :  { %s4998_s8 = sld [smem:[%s6967_s0 + %s4885_s4]]   ;;  %s4894_s28 = smov 17  }
   0xf   :  { %s5003_s14 = sld [smem:[%s6967_s0 + %s4886_s10]]  }
  0x10   :  { %s5008_s19 = sld [smem:[%s6967_s0 + %s4887_s15]]   ;;  %s4892_s15 = smov 15  }
  0x11   :  { %s5013_s24 = sld [smem:[%s6967_s0 + %s4888_s20]]  }
  0x12   :  { %s5018_s30 = sld [smem:[%s6967_s0 + %s4889_s26]]  }
  0x13   :  { %s5023_s6 = sld [smem:[%s6967_s0 + %s4890_s1]]  }
  0x14   :  { %s5028_s12 = sld [smem:[%s6967_s0 + %s4891_s7]]   ;;  %s4895_s7 = smov 18  }
  0x15   :  { %s5033_s20 = sld [smem:[%s6967_s0 + %s4892_s15]]   ;;  %s4896_s15 = smov 19  }
  0x16   :  { %s5038_s27 = sld [smem:[%s6967_s0 + %s4893_s22]]   ;;  %s4897_s22 = smov 20  }
  0x17   :  { %7002 = sst [smem:[#allocation61_spill]] %s5013_s24 }
  0x18   :  { %7003 = sst [smem:[#allocation62_spill]] %s5018_s30 }
  0x19   :  { %7004 = sst [smem:[#allocation63_spill]] %s5023_s6 }
  0x1a   :  { %7005 = sst [smem:[#allocation64_spill]] %s5028_s12 }
  0x1b   :  { %s5043_s4 = sld [smem:[%s6967_s0 + %s4894_s28]]   ;;  %s4898_s28 = smov 21  }
  0x1c   :  { %7006 = sst [smem:[#allocation65_spill]] %s5038_s27 }
  0x1d   :  { %s5048_s25 = sld [smem:[%s6967_s0 + %s4895_s7]]   ;;  %s4899_s7 = smov 22  }
  0x1e   :  { %s5053_s17 = sld [smem:[%s6967_s0 + %s4896_s15]]   ;;  %s4900_s15 = smov 23  }
  0x1f   :  { %s5058_s13 = sld [smem:[%s6967_s0 + %s4897_s22]]   ;;  %s4901_s22 = smov 24  }
  0x20   :  { %s5063_s9 = sld [smem:[%s6967_s0 + %s4898_s28]]   ;;  %s4902_s28 = smov 25  }
  0x21   :  { %7007 = sst [smem:[#allocation66_spill]] %s5043_s4 }
  0x22   :  { %s5073_s27 = sld [smem:[%s6967_s0 + %s4900_s15]]   ;;  %s4904_s15 = smov 27  }
  0x23   :  { %7008 = sst [smem:[#allocation67_spill]] %s5048_s25 }
  0x24   :  { %s5068_s25 = sld [smem:[%s6967_s0 + %s4899_s7]]   ;;  %s4903_s7 = smov 26  }
  0x25   :  { %7009 = sst [smem:[#allocation68_spill]] %s5058_s13 }
  0x26   :  { %s5078_s6 = sld [smem:[%s6967_s0 + %s4901_s22]]   ;;  %s4905_s22 = smov 28  }
  0x27   :  { %s5083_s30 = sld [smem:[%s6967_s0 + %s4902_s28]]   ;;  %s4906_s28 = smov 29  }
  0x28   :  { %s5088_s24 = sld [smem:[%s6967_s0 + %s4903_s7]]   ;;  %s4907_s7 = smov 30  }
  0x29   :  { %s5093_s5 = sld [smem:[%s6967_s0 + %s4904_s15]]   ;;  %s4908_s15 = smov 31  }
  0x2a   :  { %7010 = sst [smem:[#allocation69_spill]] %s5068_s25 }
  0x2b   :  { %s5103_s25 = sld [smem:[%s6967_s0 + %s4906_s28]]   ;;  %s4910_s28 = smov 33  }
  0x2c   :  { %7011 = sst [smem:[#allocation70_spill]] %s5078_s6 }
  0x2d   :  { %s5098_s6 = sld [smem:[%s6967_s0 + %s4905_s22]]   ;;  %s4909_s22 = smov 32  }
  0x2e   :  { %7012 = sst [smem:[#allocation71_spill]] %s5088_s24 }
  0x2f   :  { %s5108_s24 = sld [smem:[%s6967_s0 + %s4907_s7]]   ;;  %s4911_s7 = smov 34  }
  0x30   :  { %s5113_s13 = sld [smem:[%s6967_s0 + %s4908_s15]]   ;;  %s4912_s15 = smov 35  }
  0x31   :  { %7014 = sst [smem:[#allocation73_spill]] %s5103_s25 }
  0x32   :  { %s5123_s25 = sld [smem:[%s6967_s0 + %s4910_s28]]   ;;  %s4914_s28 = smov 37  }
  0x33   :  { %7013 = sst [smem:[#allocation72_spill]] %s5098_s6 }
  0x34   :  { %s5118_s6 = sld [smem:[%s6967_s0 + %s4909_s22]]   ;;  %s4913_s22 = smov 36  }
  0x35   :  { %s5128_s4 = sld [smem:[%s6967_s0 + %s4911_s7]]   ;;  %s4915_s7 = smov 38  }
  0x36   :  { %7015 = sst [smem:[#allocation74_spill]] %s5113_s13 }
  0x37   :  { %s5133_s13 = sld [smem:[%s6967_s0 + %s4912_s15]]  }
  0x38   :  { %s5143_s12 = sld [smem:[%s6967_s0 + %s4914_s28]]  }
  0x3a   :  { %7016 = sst [smem:[#allocation75_spill]] %s5118_s6 }
  0x3b   :  { %7017 = sst [smem:[#allocation76_spill]] %s5128_s4 }
  0x3c   :  { %s5138_s6 = sld [smem:[%s6967_s0 + %s4913_s22]]  }
  0x3d   :  { %s5148_s4 = sld [smem:[%s6967_s0 + %s4915_s7]]  }
  0x3e   :  { %82 = vsyncpa [#allocation3], 0 }
  0x3f   :  { %83 = vsyncpa [#allocation6], 0 }
  0x40   :  { %84 = vsyncpa [#allocation9], 0 }
  0x41   :  { %85 = vsyncpa [#allocation12], 0 }
  0x42   :  { %86 = vsyncpa [#allocation15], 0 }
  0x43   :  { %87 = vsyncpa [#allocation18], 0 }
  0x44   :  { %88 = vsyncpa [#allocation21], 0 }
  0x45   :  { %89 = vsyncpa [#allocation24], 0 }
  0x46   :  { %90 = vsyncpa [#allocation27], 0 }
  0x47   :  { %91 = vsyncpa [#allocation30], 0 }
  0x48   :  { %92 = vsyncpa [#allocation33], 0 }
  0x49   :  { %93 = vsyncpa [#allocation36], 0 }
  0x4a   :  { %94 = vsyncpa [#allocation39], 0  ;;  %s121_s15 = sshll.u32 %s4988_s29, 4  ;;  %s122_s15 = int_to_ptr.hbm [resolvable:$true] %s121_s15 }
  0x4b   :  { %95 = vsyncpa [#allocation4], 0  ;;  %s4916_s0 = smov [#allocation5]   ;;  %s145_s18 = sshll.u32 %s4998_s8, 4  ;;  %s146_s18 = int_to_ptr.hbm [resolvable:$true] %s145_s18 }
  0x4c   :  { %s123_s16 = sshll.u32 %s4916_s0, 4  ;;  %s4226_s22 = sshra.s32 %s122_s15, 4  ;;  %s124_s16 = int_to_ptr.vmem [resolvable:$true] %s123_s16  ;;  %s4227_s22 = int_to_ptr.hbm [resolvable:$true] %s4226_s22 }
  0x4d   :  { %s4228_s23 = scalar_lea.hbm %s4227_s22, 16  ;;  %s4230_s26 = scalar_lea.hbm %s4988_s29, 16 }
  0x4e   :  { %p4229_p0 = scmp.ne.s32.totalorder %s4227_s22, %s4228_s23  ;;  %p4231_p1 = scmp.lt.s32.totalorder %s4227_s22, %s4988_s29 }
  0x4f   :  { %p4232_p2 = scmp.lt.s32.totalorder %s4230_s26, %s4228_s23 }
  0x51   :  { %p4233_p3 = por %p4232_p2, %p4231_p1 }
  0x53   :  { %p4234_p4 = pnand %p4233_p3, %p4229_p0 }
  0x55   :  { %4237 = shalt.err (!%p4234_p4)
}
  0x56   :  { %s4917_s28 = smov 64   ;;  %s4918_s1 = smov 4  }
  0x57   :  { %129 = dma.hbm_to_vmem [thread:$0]  %s122_s15, 256, %s124_s16, [#allocation6], %s4917_s28, %s4917_s28, %s4918_s1  }
  0x58   :  { %s4919_s2 = smov [#allocation8]   ;;  %s169_s10 = sshll.u32 %s5008_s19, 4  ;;  %s5158_s10 = int_to_ptr.hbm [resolvable:$true] %s169_s10 }
  0x59   :  { %s147_s7 = sshll.u32 %s4919_s2, 4  ;;  %s4250_s29 = sshra.s32 %s146_s18, 4  ;;  %s148_s7 = int_to_ptr.vmem [resolvable:$true] %s147_s7  ;;  %s4251_s29 = int_to_ptr.hbm [resolvable:$true] %s4250_s29 }
  0x5a   :  { %s4252_s11 = scalar_lea.hbm %s4251_s29, 16  ;;  %s4254_s0 = scalar_lea.hbm %s4998_s8, 16 }
  0x5b   :  { %p4253_p5 = scmp.ne.s32.totalorder %s4251_s29, %s4252_s11  ;;  %p4255_p6 = scmp.lt.s32.totalorder %s4251_s29, %s4998_s8 }
  0x5c   :  { %p4256_p7 = scmp.lt.s32.totalorder %s4254_s0, %s4252_s11 }
  0x5e   :  { %p4257_p8 = por %p4256_p7, %p4255_p6 }
  0x60   :  { %p4258_p9 = pnand %p4257_p8, %p4253_p5 }
  0x62   :  { %4261 = shalt.err (!%p4258_p9)
}
  0x63   :  { %153 = dma.hbm_to_vmem [thread:$0]  %s146_s18, 256, %s148_s7, [#allocation9], %s4917_s28, %s4917_s28, %s4918_s1  }
  0x64   :  { %s4920_s15 = smov [#allocation11]   ;;  %s202_s22 = sshll.u32 %s5033_s20, 4  ;;  %s203_s22 = int_to_ptr.hbm [resolvable:$true] %s202_s22 }
  0x65   :  { %s171_s16 = sshll.u32 %s4920_s15, 4  ;;  %s4274_s23 = sshra.s32 %s5158_s10, 4  ;;  %s172_s16 = int_to_ptr.vmem [resolvable:$true] %s171_s16  ;;  %s4275_s23 = int_to_ptr.hbm [resolvable:$true] %s4274_s23 }
  0x66   :  { %s4276_s26 = scalar_lea.hbm %s4275_s23, 32  ;;  %s4278_s8 = scalar_lea.hbm %s5008_s19, 32 }
  0x67   :  { %p4277_p10 = scmp.ne.s32.totalorder %s4275_s23, %s4276_s26  ;;  %p4279_p11 = scmp.lt.s32.totalorder %s4275_s23, %s5008_s19 }
  0x68   :  { %p4280_p12 = scmp.lt.s32.totalorder %s4278_s8, %s4276_s26 }
  0x6a   :  { %p4281_p13 = por %p4280_p12, %p4279_p11 }
  0x6c   :  { %p4282_p0 = pnand %p4281_p13, %p4277_p10 }
  0x6e   :  { %4285 = shalt.err (!%p4282_p0)
}
  0x6f   :  { %s4921_s2 = smov 128   ;;  %s4922_s18 = smov 8  }
  0x70   :  { %177 = dma.hbm_to_vmem [thread:$0]  %s5158_s10, 512, %s172_s16, [#allocation12], %s4921_s2, %s4921_s2, %s4922_s18  }
  0x71   :  { %s4923_s7 = smov [#allocation14]   ;;  %s227_s11 = sshll.u32 %s5053_s17, 4  ;;  %s5174_s11 = int_to_ptr.hbm [resolvable:$true] %s227_s11 }
  0x72   :  { %s204_s29 = sshll.u32 %s4923_s7, 4  ;;  %s4298_s19 = sshra.s32 %s203_s22, 4  ;;  %s205_s29 = int_to_ptr.vmem [resolvable:$true] %s204_s29  ;;  %s4299_s19 = int_to_ptr.hbm [resolvable:$true] %s4298_s19 }
  0x73   :  { %s4300_s0 = scalar_lea.hbm %s4299_s19, 1  ;;  %s4302_s15 = scalar_lea.hbm %s5033_s20, 1 }
  0x74   :  { %p4301_p1 = scmp.ne.s32.totalorder %s4299_s19, %s4300_s0  ;;  %p4303_p2 = scmp.lt.s32.totalorder %s4299_s19, %s5033_s20 }
  0x75   :  { %p4304_p3 = scmp.lt.s32.totalorder %s4302_s15, %s4300_s0 }
  0x77   :  { %p4305_p4 = por %p4304_p3, %p4303_p2 }
  0x79   :  { %p4306_p5 = pnand %p4305_p4, %p4301_p1 }
  0x7b   :  { %4309 = shalt.err (!%p4306_p5)
}
  0x7c   :  { %207 = dma.hbm_to_vmem [thread:$0]  %s203_s22, 16, %s205_s29, [#allocation15]  }
  0x7d   :  { %s251_s10 = sshll.u32 %s5063_s9, 4  ;;  %s4924_s16 = smov [#allocation17]   ;;  %s5179_s10 = int_to_ptr.hbm [resolvable:$true] %s251_s10 }
  0x7e   :  { %s229_s23 = sshll.u32 %s4924_s16, 4  ;;  %s4322_s26 = sshra.s32 %s5174_s11, 4  ;;  %s230_s23 = int_to_ptr.vmem [resolvable:$true] %s229_s23  ;;  %s4323_s26 = int_to_ptr.hbm [resolvable:$true] %s4322_s26 }
  0x7f   :  { %s4324_s8 = scalar_lea.hbm %s4323_s26, 16  ;;  %s4326_s20 = scalar_lea.hbm %s5053_s17, 16 }
  0x80   :  { %p4325_p6 = scmp.ne.s32.totalorder %s4323_s26, %s4324_s8  ;;  %p4327_p7 = scmp.lt.s32.totalorder %s4323_s26, %s5053_s17 }
  0x81   :  { %p4328_p8 = scmp.lt.s32.totalorder %s4326_s20, %s4324_s8 }
  0x83   :  { %p4329_p9 = por %p4328_p8, %p4327_p7 }
  0x85   :  { %p4330_p10 = pnand %p4329_p9, %p4325_p6 }
  0x87   :  { %4333 = shalt.err (!%p4330_p10)
}
  0x88   :  { %235 = dma.hbm_to_vmem [thread:$0]  %s5174_s11, 256, %s230_s23, [#allocation18], %s4917_s28, %s4917_s28, %s4918_s1  }
  0x89   :  { %s4925_s22 = smov [#allocation20]   ;;  %s278_s29 = sshll.u32 %s5073_s27, 4  ;;  %s279_s29 = int_to_ptr.hbm [resolvable:$true] %s278_s29 }
  0x8a   :  { %s253_s7 = sshll.u32 %s4925_s22, 4  ;;  %s4346_s19 = sshra.s32 %s5179_s10, 4  ;;  %s254_s7 = int_to_ptr.vmem [resolvable:$true] %s253_s7  ;;  %s4347_s19 = int_to_ptr.hbm [resolvable:$true] %s4346_s19 }
  0x8b   :  { %s4348_s17 = scalar_lea.hbm %s4347_s19, 16  ;;  %s4350_s0 = scalar_lea.hbm %s5063_s9, 16 }
  0x8c   :  { %p4349_p11 = scmp.ne.s32.totalorder %s4347_s19, %s4348_s17  ;;  %p4351_p12 = scmp.lt.s32.totalorder %s4347_s19, %s5063_s9 }
  0x8d   :  { %p4352_p13 = scmp.lt.s32.totalorder %s4350_s0, %s4348_s17 }
  0x8f   :  { %p4353_p0 = por %p4352_p13, %p4351_p12 }
  0x91   :  { %p4354_p1 = pnand %p4353_p0, %p4349_p11 }
  0x93   :  { %4357 = shalt.err (!%p4354_p1)
}
  0x94   :  { %259 = dma.hbm_to_vmem [thread:$0]  %s5179_s10, 256, %s254_s7, [#allocation21], %s4917_s28, %s4917_s28, %s4918_s1  }
  0x95   :  { %s302_s11 = sshll.u32 %s5083_s30, 4  ;;  %s4926_s15 = smov [#allocation23]   ;;  %s303_s11 = int_to_ptr.hbm [resolvable:$true] %s302_s11 }
  0x96   :  { %s280_s16 = sshll.u32 %s4926_s15, 4  ;;  %s4370_s23 = sshra.s32 %s279_s29, 4  ;;  %s281_s16 = int_to_ptr.vmem [resolvable:$true] %s280_s16  ;;  %s4371_s23 = int_to_ptr.hbm [resolvable:$true] %s4370_s23 }
  0x97   :  { %s4372_s9 = scalar_lea.hbm %s4371_s23, 1  ;;  %s4374_s26 = scalar_lea.hbm %s5073_s27, 1 }
  0x98   :  { %p4373_p2 = scmp.ne.s32.totalorder %s4371_s23, %s4372_s9  ;;  %p4375_p3 = scmp.lt.s32.totalorder %s4371_s23, %s5073_s27 }
  0x99   :  { %p4376_p4 = scmp.lt.s32.totalorder %s4374_s26, %s4372_s9 }
  0x9b   :  { %p4377_p5 = por %p4376_p4, %p4375_p3 }
  0x9d   :  { %p4378_p6 = pnand %p4377_p5, %p4373_p2 }
  0x9f   :  { %4381 = shalt.err (!%p4378_p6)
}
  0xa0   :  { %283 = dma.hbm_to_vmem [thread:$0]  %s279_s29, 16, %s281_s16, [#allocation24]  }
  0xa1   :  { %s4927_s10 = smov [#allocation26]   ;;  %s325_s20 = sshll.u32 %s5093_s5, 4  ;;  %s5200_s20 = int_to_ptr.hbm [resolvable:$true] %s325_s20 }
  0xa2   :  { %s304_s8 = sshll.u32 %s4927_s10, 4  ;;  %s4394_s22 = sshra.s32 %s303_s11, 4  ;;  %s305_s8 = int_to_ptr.vmem [resolvable:$true] %s304_s8  ;;  %s4395_s22 = int_to_ptr.hbm [resolvable:$true] %s4394_s22 }
  0xa3   :  { %s4396_s7 = scalar_lea.hbm %s4395_s22, 1  ;;  %s4398_s19 = scalar_lea.hbm %s5083_s30, 1 }
  0xa4   :  { %p4397_p7 = scmp.ne.s32.totalorder %s4395_s22, %s4396_s7  ;;  %p4399_p8 = scmp.lt.s32.totalorder %s4395_s22, %s5083_s30 }
  0xa5   :  { %p4400_p9 = scmp.lt.s32.totalorder %s4398_s19, %s4396_s7 }
  0xa7   :  { %p4401_p10 = por %p4400_p9, %p4399_p8 }
  0xa9   :  { %p4402_p11 = pnand %p4401_p10, %p4397_p7 }
  0xab   :  { %4405 = shalt.err (!%p4402_p11)
}
  0xac   :  { %307 = dma.hbm_to_vmem [thread:$0]  %s303_s11, 16, %s305_s8, [#allocation27]  }
  0xad   :  { %s353_s27 = sshll.u32 %s5108_s24, 4  ;;  %s4928_s29 = smov [#allocation29]   ;;  %s5205_s27 = int_to_ptr.hbm [resolvable:$true] %s353_s27 }
  0xae   :  { %s327_s17 = sshll.u32 %s4928_s29, 4  ;;  %s4418_s0 = sshra.s32 %s5200_s20, 4  ;;  %s328_s17 = int_to_ptr.vmem [resolvable:$true] %s327_s17  ;;  %s4419_s0 = int_to_ptr.hbm [resolvable:$true] %s4418_s0 }
  0xaf   :  { %s4420_s15 = scalar_lea.hbm %s4419_s0, 128  ;;  %s4422_s30 = scalar_lea.hbm %s5093_s5, 128 }
  0xb0   :  { %p4421_p12 = scmp.ne.s32.totalorder %s4419_s0, %s4420_s15  ;;  %p4423_p13 = scmp.lt.s32.totalorder %s4419_s0, %s5093_s5 }
  0xb1   :  { %p4424_p0 = scmp.lt.s32.totalorder %s4422_s30, %s4420_s15 }
  0xb3   :  { %p4425_p1 = por %p4424_p0, %p4423_p13 }
  0xb5   :  { %p4426_p2 = pnand %p4425_p1, %p4421_p12 }
  0xb7   :  { %4429 = shalt.err (!%p4426_p2)
}
  0xb8   :  { %333 = dma.hbm_to_vmem [thread:$0]  %s5200_s20, 2048, %s328_s17, [#allocation30], %s4921_s2, %s4921_s2, %s4922_s18  }
  0xb9   :  { %s4929_s11 = smov [#allocation32]   ;;  %s380_s23 = sshll.u32 %s5123_s25, 4  ;;  %s381_s23 = int_to_ptr.hbm [resolvable:$true] %s380_s23 }
  0xba   :  { %s355_s16 = sshll.u32 %s4929_s11, 4  ;;  %s4442_s9 = sshra.s32 %s5205_s27, 4  ;;  %s356_s16 = int_to_ptr.vmem [resolvable:$true] %s355_s16  ;;  %s4443_s9 = int_to_ptr.hbm [resolvable:$true] %s4442_s9 }
  0xbb   :  { %s4444_s5 = scalar_lea.hbm %s4443_s9, 16  ;;  %s4446_s26 = scalar_lea.hbm %s5108_s24, 16 }
  0xbc   :  { %p4445_p3 = scmp.ne.s32.totalorder %s4443_s9, %s4444_s5  ;;  %p4447_p4 = scmp.lt.s32.totalorder %s4443_s9, %s5108_s24 }
  0xbd   :  { %p4448_p5 = scmp.lt.s32.totalorder %s4446_s26, %s4444_s5 }
  0xbf   :  { %p4449_p6 = por %p4448_p5, %p4447_p4 }
  0xc1   :  { %p4450_p7 = pnand %p4449_p6, %p4445_p3 }
  0xc3   :  { %4453 = shalt.err (!%p4450_p7)
}
  0xc4   :  { %361 = dma.hbm_to_vmem [thread:$0]  %s5205_s27, 256, %s356_s16, [#allocation33], %s4917_s28, %s4917_s28, %s4918_s1  }
  0xc5   :  { %s406_s10 = sshll.u32 %s5138_s6, 4  ;;  %s4930_s8 = smov [#allocation35]   ;;  %s407_s10 = int_to_ptr.hbm [resolvable:$true] %s406_s10 }
  0xc6   :  { %s382_s20 = sshll.u32 %s4930_s8, 4  ;;  %s4466_s22 = sshra.s32 %s381_s23, 4  ;;  %s383_s20 = int_to_ptr.vmem [resolvable:$true] %s382_s20  ;;  %s4467_s22 = int_to_ptr.hbm [resolvable:$true] %s4466_s22 }
  0xc7   :  { %s4468_s24 = scalar_lea.hbm %s4467_s22, 1  ;;  %s4470_s7 = scalar_lea.hbm %s5123_s25, 1 }
  0xc8   :  { %p4469_p8 = scmp.ne.s32.totalorder %s4467_s22, %s4468_s24  ;;  %p4471_p9 = scmp.lt.s32.totalorder %s4467_s22, %s5123_s25 }
  0xc9   :  { %p4472_p10 = scmp.lt.s32.totalorder %s4470_s7, %s4468_s24 }
  0xcb   :  { %p4473_p11 = por %p4472_p10, %p4471_p9 }
  0xcd   :  { %p4474_p12 = pnand %p4473_p11, %p4469_p8 }
  0xcf   :  { %4477 = shalt.err (!%p4474_p12)
}
  0xd0   :  { %385 = dma.hbm_to_vmem [thread:$0]  %s381_s23, 16, %s383_s20, [#allocation36]  }
  0xd1   :  { %s4931_s19 = smov [#allocation38]   ;;  %s109_s29 = sshll.u32 %s4978_s21, 4  ;;  %s110_s29 = int_to_ptr.hbm [resolvable:$true] %s109_s29 }
  0xd2   :  { %s408_s27 = sshll.u32 %s4931_s19, 4  ;;  %s4490_s17 = sshra.s32 %s407_s10, 4  ;;  %s409_s27 = int_to_ptr.vmem [resolvable:$true] %s408_s27  ;;  %s4491_s17 = int_to_ptr.hbm [resolvable:$true] %s4490_s17 }
  0xd3   :  { %s4492_s0 = scalar_lea.hbm %s4491_s17, 1  ;;  %s4494_s15 = scalar_lea.hbm %s5138_s6, 1 }
  0xd4   :  { %p4493_p13 = scmp.ne.s32.totalorder %s4491_s17, %s4492_s0  ;;  %p4495_p0 = scmp.lt.s32.totalorder %s4491_s17, %s5138_s6 }
  0xd5   :  { %p4496_p1 = scmp.lt.s32.totalorder %s4494_s15, %s4492_s0 }
  0xd7   :  { %p4497_p2 = por %p4496_p1, %p4495_p0 }
  0xd9   :  { %p4498_p3 = pnand %p4497_p2, %p4493_p13 }
  0xdb   :  { %4501 = shalt.err (!%p4498_p3)
}
  0xdc   :  { %411 = dma.hbm_to_vmem [thread:$0]  %s407_s10, 16, %s409_s27, [#allocation39]  }
  0xdd   :  { %s135_s25 = sshll.u32 %s4993_s3, 4  ;;  %s4932_s30 = smov [#allocation2]   ;;  %s136_s25 = int_to_ptr.hbm [resolvable:$true] %s135_s25 }
  0xde   :  { %s111_s11 = sshll.u32 %s4932_s30, 4  ;;  %s4514_s16 = sshra.s32 %s110_s29, 4  ;;  %s112_s11 = int_to_ptr.vmem [resolvable:$true] %s111_s11  ;;  %s4515_s16 = int_to_ptr.hbm [resolvable:$true] %s4514_s16 }
  0xdf   :  { %s4516_s23 = scalar_lea.hbm %s4515_s16, 1  ;;  %s4518_s9 = scalar_lea.hbm %s4978_s21, 1 }
  0xe0   :  { %p4517_p4 = scmp.ne.s32.totalorder %s4515_s16, %s4516_s23  ;;  %p4519_p5 = scmp.lt.s32.totalorder %s4515_s16, %s4978_s21 }
  0xe1   :  { %p4520_p6 = scmp.lt.s32.totalorder %s4518_s9, %s4516_s23 }
  0xe3   :  { %p4521_p7 = por %p4520_p6, %p4519_p5 }
  0xe5   :  { %p4522_p8 = pnand %p4521_p7, %p4517_p4 }
  0xe7   :  { %4525 = shalt.err (!%p4522_p8)
}
  0xe8   :  { %114 = dma.hbm_to_vmem [thread:$0]  %s110_s29, 16, %s112_s11, [#allocation3]  }
  0xe9   :  { %s4933_s6 = smov [#allocation7]   ;;  %s159_s26 = sshll.u32 %s5003_s14, 4  ;;  %s160_s26 = int_to_ptr.hbm [resolvable:$true] %s159_s26 }
  0xea   :  { %s137_s5 = sshll.u32 %s4933_s6, 4  ;;  %s4538_s10 = sshra.s32 %s136_s25, 4  ;;  %s138_s5 = int_to_ptr.vmem [resolvable:$true] %s137_s5  ;;  %s4539_s10 = int_to_ptr.hbm [resolvable:$true] %s4538_s10 }
  0xeb   :  { %s4540_s8 = scalar_lea.hbm %s4539_s10, 1  ;;  %s4542_s20 = scalar_lea.hbm %s4993_s3, 1 }
  0xec   :  { %p4541_p9 = scmp.ne.s32.totalorder %s4539_s10, %s4540_s8  ;;  %p4543_p10 = scmp.lt.s32.totalorder %s4539_s10, %s4993_s3 }
  0xed   :  { %p4544_p11 = scmp.lt.s32.totalorder %s4542_s20, %s4540_s8 }
  0xef   :  { %p4545_p12 = por %p4544_p11, %p4543_p10 }
  0xf1   :  { %p4546_p13 = pnand %p4545_p12, %p4541_p9 }
  0xf3   :  { %4549 = shalt.err (!%p4546_p13)
}
  0xf4   :  { %140 = dma.hbm_to_vmem [thread:$0]  %s136_s25, 16, %s138_s5, [#allocation6]  }
  0xf5   :  { %s7018_s21 = sld [smem:[#allocation64_spill]]  ;;  %s4934_s24 = smov [#allocation10]  }
  0xf6   :  { %s161_s7 = sshll.u32 %s4934_s24, 4  ;;  %s4562_s19 = sshra.s32 %s160_s26, 4  ;;  %s162_s7 = int_to_ptr.vmem [resolvable:$true] %s161_s7  ;;  %s4563_s19 = int_to_ptr.hbm [resolvable:$true] %s4562_s19 }
  0xf7   :  { %s4564_s27 = scalar_lea.hbm %s4563_s19, 1  ;;  %s4566_s29 = scalar_lea.hbm %s5003_s14, 1 }
  0xf8   :  { %p4565_p0 = scmp.ne.s32.totalorder %s4563_s19, %s4564_s27  ;;  %p4567_p1 = scmp.lt.s32.totalorder %s4563_s19, %s5003_s14 }
  0xf9   :  { %p4568_p2 = scmp.lt.s32.totalorder %s4566_s29, %s4564_s27 }
  0xfb   :  { %s188_s22 = sshll.u32 %s7018_s21, 4  ;;  %p4569_p3 = por %p4568_p2, %p4567_p1  ;;  %s5235_s22 = int_to_ptr.hbm [resolvable:$true] %s188_s22 }
  0xfd   :  { %p4570_p4 = pnand %p4569_p3, %p4565_p0 }
  0xff   :  { %4573 = shalt.err (!%p4570_p4)
}
 0x100   :  { %164 = dma.hbm_to_vmem [thread:$0]  %s160_s26, 16, %s162_s7, [#allocation9]  }
 0x101   :  { %s7019_s3 = sld [smem:[#allocation66_spill]]  ;;  %s4935_s17 = smov [#allocation13]  }
 0x102   :  { %s190_s0 = sshll.u32 %s4935_s17, 4  ;;  %s4586_s25 = sshra.s32 %s5235_s22, 4  ;;  %s191_s0 = int_to_ptr.vmem [resolvable:$true] %s190_s0  ;;  %s4587_s25 = int_to_ptr.hbm [resolvable:$true] %s4586_s25 }
 0x103   :  { %s4588_s30 = scalar_lea.hbm %s4587_s25, 16  ;;  %s4590_s11 = scalar_lea.hbm %s7018_s21, 16 }
 0x104   :  { %p4589_p5 = scmp.ne.s32.totalorder %s4587_s25, %s4588_s30  ;;  %p4591_p6 = scmp.lt.s32.totalorder %s4587_s25, %s7018_s21 }
 0x105   :  { %p4592_p7 = scmp.lt.s32.totalorder %s4590_s11, %s4588_s30 }
 0x107   :  { %s215_s15 = sshll.u32 %s7019_s3, 4  ;;  %p4593_p8 = por %p4592_p7, %p4591_p6  ;;  %s216_s15 = int_to_ptr.hbm [resolvable:$true] %s215_s15 }
 0x109   :  { %p4594_p9 = pnand %p4593_p8, %p4589_p5 }
 0x10b   :  { %4597 = shalt.err (!%p4594_p9)
}
 0x10c   :  { %s7020_s14 = sld [smem:[#allocation68_spill]]  ;;  %s4936_s23 = smov [#allocation16]  }
 0x10d   :  { %196 = dma.hbm_to_vmem [thread:$0]  %s5235_s22, 256, %s191_s0, [#allocation12], %s4917_s28, %s4917_s28, %s4918_s1  }
 0x10e   :  { %s217_s9 = sshll.u32 %s4936_s23, 4  ;;  %s4610_s6 = sshra.s32 %s216_s15, 4  ;;  %s218_s9 = int_to_ptr.vmem [resolvable:$true] %s217_s9  ;;  %s4611_s6 = int_to_ptr.hbm [resolvable:$true] %s4610_s6 }
 0x10f   :  { %s4612_s5 = scalar_lea.hbm %s4611_s6, 1  ;;  %s4614_s26 = scalar_lea.hbm %s7019_s3, 1 }
 0x110   :  { %p4613_p10 = scmp.ne.s32.totalorder %s4611_s6, %s4612_s5  ;;  %p4615_p11 = scmp.lt.s32.totalorder %s4611_s6, %s7019_s3 }
 0x111   :  { %p4616_p12 = scmp.lt.s32.totalorder %s4614_s26, %s4612_s5 }
 0x112   :  { %s241_s16 = sshll.u32 %s7020_s14, 4  ;;  %s242_s16 = int_to_ptr.hbm [resolvable:$true] %s241_s16 }
 0x113   :  { %p4617_p13 = por %p4616_p12, %p4615_p11 }
 0x115   :  { %p4618_p0 = pnand %p4617_p13, %p4613_p10 }
 0x117   :  { %4621 = shalt.err (!%p4618_p0)
}
 0x118   :  { %220 = dma.hbm_to_vmem [thread:$0]  %s216_s15, 16, %s218_s9, [#allocation15]  }
 0x119   :  { %s7021_s10 = sld [smem:[#allocation69_spill]]  ;;  %s4937_s8 = smov [#allocation19]  }
 0x11a   :  { %s243_s20 = sshll.u32 %s4937_s8, 4  ;;  %s4634_s22 = sshra.s32 %s242_s16, 4  ;;  %s244_s20 = int_to_ptr.vmem [resolvable:$true] %s243_s20  ;;  %s4635_s22 = int_to_ptr.hbm [resolvable:$true] %s4634_s22 }
 0x11b   :  { %s4636_s24 = scalar_lea.hbm %s4635_s22, 1  ;;  %s4638_s7 = scalar_lea.hbm %s7020_s14, 1 }
 0x11c   :  { %p4637_p1 = scmp.ne.s32.totalorder %s4635_s22, %s4636_s24  ;;  %p4639_p2 = scmp.lt.s32.totalorder %s4635_s22, %s7020_s14 }
 0x11d   :  { %p4640_p3 = scmp.lt.s32.totalorder %s4638_s7, %s4636_s24 }
 0x11f   :  { %s264_s21 = sshll.u32 %s7021_s10, 4  ;;  %p4641_p4 = por %p4640_p3, %p4639_p2  ;;  %s5251_s21 = int_to_ptr.hbm [resolvable:$true] %s264_s21 }
 0x121   :  { %p4642_p5 = pnand %p4641_p4, %p4637_p1 }
 0x123   :  { %4645 = shalt.err (!%p4642_p5)
}
 0x124   :  { %246 = dma.hbm_to_vmem [thread:$0]  %s242_s16, 16, %s244_s20, [#allocation18]  }
 0x125   :  { %s7022_s19 = sld [smem:[#allocation70_spill]]  ;;  %s4938_s29 = smov [#allocation22]  }
 0x126   :  { %s266_s3 = sshll.u32 %s4938_s29, 4  ;;  %s4658_s17 = sshra.s32 %s5251_s21, 4  ;;  %s267_s3 = int_to_ptr.vmem [resolvable:$true] %s266_s3  ;;  %s4659_s17 = int_to_ptr.hbm [resolvable:$true] %s4658_s17 }
 0x127   :  { %s4660_s0 = scalar_lea.hbm %s4659_s17, 16  ;;  %s4662_s15 = scalar_lea.hbm %s7021_s10, 16 }
 0x128   :  { %p4661_p6 = scmp.ne.s32.totalorder %s4659_s17, %s4660_s0  ;;  %p4663_p7 = scmp.lt.s32.totalorder %s4659_s17, %s7021_s10 }
 0x129   :  { %p4664_p8 = scmp.lt.s32.totalorder %s4662_s15, %s4660_s0 }
 0x12b   :  { %s288_s27 = sshll.u32 %s7022_s19, 4  ;;  %p4665_p9 = por %p4664_p8, %p4663_p7  ;;  %s5256_s27 = int_to_ptr.hbm [resolvable:$true] %s288_s27 }
 0x12d   :  { %p4666_p10 = pnand %p4665_p9, %p4661_p6 }
 0x12f   :  { %4669 = shalt.err (!%p4666_p10)
}
 0x130   :  { %s7023_s25 = sld [smem:[#allocation71_spill]]  ;;  %s4939_s30 = smov [#allocation25]  }
 0x131   :  { %272 = dma.hbm_to_vmem [thread:$0]  %s5251_s21, 256, %s267_s3, [#allocation21], %s4917_s28, %s4917_s28, %s4918_s1  }
 0x132   :  { %s290_s11 = sshll.u32 %s4939_s30, 4  ;;  %s4682_s16 = sshra.s32 %s5256_s27, 4  ;;  %s291_s11 = int_to_ptr.vmem [resolvable:$true] %s290_s11  ;;  %s4683_s16 = int_to_ptr.hbm [resolvable:$true] %s4682_s16 }
 0x133   :  { %s4684_s23 = scalar_lea.hbm %s4683_s16, 16  ;;  %s4686_s9 = scalar_lea.hbm %s7022_s19, 16 }
 0x134   :  { %p4685_p11 = scmp.ne.s32.totalorder %s4683_s16, %s4684_s23  ;;  %p4687_p12 = scmp.lt.s32.totalorder %s4683_s16, %s7022_s19 }
 0x135   :  { %p4688_p13 = scmp.lt.s32.totalorder %s4686_s9, %s4684_s23 }
 0x136   :  { %s312_s14 = sshll.u32 %s7023_s25, 4  ;;  %s5266_s14 = int_to_ptr.hbm [resolvable:$true] %s312_s14 }
 0x137   :  { %p4689_p0 = por %p4688_p13, %p4687_p12 }
 0x139   :  { %p4690_p1 = pnand %p4689_p0, %p4685_p11 }
 0x13b   :  { %4693 = shalt.err (!%p4690_p1)
}
 0x13c   :  { %s7024_s6 = sld [smem:[#allocation72_spill]]  ;;  %s4940_s26 = smov [#allocation28]  }
 0x13d   :  { %296 = dma.hbm_to_vmem [thread:$0]  %s5256_s27, 256, %s291_s11, [#allocation24], %s4917_s28, %s4917_s28, %s4918_s1  }
 0x13e   :  { %s314_s10 = sshll.u32 %s4940_s26, 4  ;;  %s4706_s8 = sshra.s32 %s5266_s14, 4  ;;  %s315_s10 = int_to_ptr.vmem [resolvable:$true] %s314_s10  ;;  %s4707_s8 = int_to_ptr.hbm [resolvable:$true] %s4706_s8 }
 0x13f   :  { %s4708_s20 = scalar_lea.hbm %s4707_s8, 32  ;;  %s4710_s21 = scalar_lea.hbm %s7023_s25, 32 }
 0x140   :  { %p4709_p2 = scmp.ne.s32.totalorder %s4707_s8, %s4708_s20  ;;  %p4711_p3 = scmp.lt.s32.totalorder %s4707_s8, %s7023_s25 }
 0x141   :  { %p4712_p4 = scmp.lt.s32.totalorder %s4710_s21, %s4708_s20 }
 0x142   :  { %s338_s5 = sshll.u32 %s7024_s6, 4  ;;  %s5276_s5 = int_to_ptr.hbm [resolvable:$true] %s338_s5 }
 0x143   :  { %p4713_p5 = por %p4712_p4, %p4711_p3 }
 0x145   :  { %p4714_p6 = pnand %p4713_p5, %p4709_p2 }
 0x147   :  { %4717 = shalt.err (!%p4714_p6)
}
 0x148   :  { %s7025_s22 = sld [smem:[#allocation74_spill]]  ;;  %s4941_s24 = smov [#allocation31]  }
 0x149   :  { %320 = dma.hbm_to_vmem [thread:$0]  %s5266_s14, 512, %s315_s10, [#allocation27], %s4921_s2, %s4921_s2, %s4922_s18  }
 0x14a   :  { %s340_s7 = sshll.u32 %s4941_s24, 4  ;;  %s4730_s27 = sshra.s32 %s5276_s5, 4  ;;  %s341_s7 = int_to_ptr.vmem [resolvable:$true] %s340_s7  ;;  %s4731_s27 = int_to_ptr.hbm [resolvable:$true] %s4730_s27 }
 0x14b   :  { %s4732_s29 = scalar_lea.hbm %s4731_s27, 128  ;;  %s4734_s3 = scalar_lea.hbm %s7024_s6, 128 }
 0x14c   :  { %p4733_p7 = scmp.ne.s32.totalorder %s4731_s27, %s4732_s29  ;;  %p4735_p8 = scmp.lt.s32.totalorder %s4731_s27, %s7024_s6 }
 0x14d   :  { %p4736_p9 = scmp.lt.s32.totalorder %s4734_s3, %s4732_s29 }
 0x14e   :  { %s367_s19 = sshll.u32 %s7025_s22, 4  ;;  %s368_s19 = int_to_ptr.hbm [resolvable:$true] %s367_s19 }
 0x14f   :  { %p4737_p10 = por %p4736_p9, %p4735_p8 }
 0x151   :  { %p4738_p11 = pnand %p4737_p10, %p4733_p7 }
 0x153   :  { %4741 = shalt.err (!%p4738_p11)
}
 0x154   :  { %346 = dma.hbm_to_vmem [thread:$0]  %s5276_s5, 2048, %s341_s7, [#allocation30], %s4921_s2, %s4921_s2, %s4922_s18  }
 0x155   :  { %s392_s17 = sshll.u32 %s5133_s13, 4  ;;  %s4942_s0 = smov [#allocation34]   ;;  %s5294_s17 = int_to_ptr.hbm [resolvable:$true] %s392_s17 }
 0x156   :  { %s369_s15 = sshll.u32 %s4942_s0, 4  ;;  %s4754_s25 = sshra.s32 %s368_s19, 4  ;;  %s370_s15 = int_to_ptr.vmem [resolvable:$true] %s369_s15  ;;  %s4755_s25 = int_to_ptr.hbm [resolvable:$true] %s4754_s25 }
 0x157   :  { %s4756_s30 = scalar_lea.hbm %s4755_s25, 1  ;;  %s4758_s11 = scalar_lea.hbm %s7025_s22, 1 }
 0x158   :  { %p4757_p12 = scmp.ne.s32.totalorder %s4755_s25, %s4756_s30  ;;  %p4759_p13 = scmp.lt.s32.totalorder %s4755_s25, %s7025_s22 }
 0x159   :  { %p4760_p0 = scmp.lt.s32.totalorder %s4758_s11, %s4756_s30 }
 0x15b   :  { %p4761_p1 = por %p4760_p0, %p4759_p13 }
 0x15d   :  { %p4762_p2 = pnand %p4761_p1, %p4757_p12 }
 0x15f   :  { %4765 = shalt.err (!%p4762_p2)
}
 0x160   :  { %372 = dma.hbm_to_vmem [thread:$0]  %s368_s19, 16, %s370_s15, [#allocation33]  }
 0x161   :  { %s4943_s14 = smov [#allocation37]   ;;  %s416_s23 = sshll.u32 %s5143_s12, 4  ;;  %s417_s23 = int_to_ptr.hbm [resolvable:$true] %s416_s23 }
 0x162   :  { %s394_s16 = sshll.u32 %s4943_s14, 4  ;;  %s4778_s9 = sshra.s32 %s5294_s17, 4  ;;  %s395_s16 = int_to_ptr.vmem [resolvable:$true] %s394_s16  ;;  %s4779_s9 = int_to_ptr.hbm [resolvable:$true] %s4778_s9 }
 0x163   :  { %s4780_s6 = scalar_lea.hbm %s4779_s9, 16  ;;  %s4782_s5 = scalar_lea.hbm %s5133_s13, 16 }
 0x164   :  { %p4781_p3 = scmp.ne.s32.totalorder %s4779_s9, %s4780_s6  ;;  %p4783_p4 = scmp.lt.s32.totalorder %s4779_s9, %s5133_s13 }
 0x165   :  { %p4784_p5 = scmp.lt.s32.totalorder %s4782_s5, %s4780_s6 }
 0x167   :  { %p4785_p6 = por %p4784_p5, %p4783_p4 }
 0x169   :  { %p4786_p7 = pnand %p4785_p6, %p4781_p3 }
 0x16b   :  { %4789 = shalt.err (!%p4786_p7)
}
 0x16c   :  { %400 = dma.hbm_to_vmem [thread:$0]  %s5294_s17, 256, %s395_s16, [#allocation36], %s4917_s28, %s4917_s28, %s4918_s1  }
 0x16d   :  { %s4944_s26 = smov [#allocation40]   ;;  %s4802_s8 = sshra.s32 %s417_s23, 4  ;;  %s4803_s8 = int_to_ptr.hbm [resolvable:$true] %s4802_s8 }
 0x16e   :  { %s418_s10 = sshll.u32 %s4944_s26, 4  ;;  %s4804_s20 = scalar_lea.hbm %s4803_s8, 16  ;;  %s419_s10 = int_to_ptr.vmem [resolvable:$true] %s418_s10 }
 0x16f   :  { %p4805_p8 = scmp.ne.s32.totalorder %s4803_s8, %s4804_s20  ;;  %s4806_s13 = scalar_lea.hbm %s5143_s12, 16 }
 0x170   :  { %p4807_p9 = scmp.lt.s32.totalorder %s4803_s8, %s5143_s12  ;;  %p4808_p10 = scmp.lt.s32.totalorder %s4806_s13, %s4804_s20 }
 0x172   :  { %p4809_p11 = por %p4808_p10, %p4807_p9 }
 0x174   :  { %p4810_p12 = pnand %p4809_p11, %p4805_p8 }
 0x176   :  { %4813 = shalt.err (!%p4810_p12)
}
 0x177   :  { %424 = dma.hbm_to_vmem [thread:$0]  %s417_s23, 256, %s419_s10, [#allocation39], %s4917_s28, %s4917_s28, %s4918_s1  }
 0x178   :  { %4850 = dma.done.wait [#allocation3], 16  }
 0x179   :  { %4851 = vsyncadd [#allocation3], 4294967280 }
 0x17a   :  { %4852 = dma.done.wait [#allocation6], 272  }
 0x17b   :  { %4853 = vsyncadd [#allocation6], 4294967024 }
 0x17c   :  { %4854 = dma.done.wait [#allocation9], 272  }
 0x17d   :  { %4855 = vsyncadd [#allocation9], 4294967024 }
 0x17e   :  { %4856 = dma.done.wait [#allocation12], 768  }
 0x17f   :  { %4857 = vsyncadd [#allocation12], 4294966528 }
 0x180   :  { %4858 = dma.done.wait [#allocation15], 32  }
 0x181   :  { %4859 = vsyncadd [#allocation15], 4294967264 }
 0x182   :  { %4860 = dma.done.wait [#allocation18], 272  }
 0x183   :  { %4861 = vsyncadd [#allocation18], 4294967024 }
 0x184   :  { %4862 = dma.done.wait [#allocation21], 512  }
 0x185   :  { %4863 = vsyncadd [#allocation21], 4294966784 }
 0x186   :  { %4864 = dma.done.wait [#allocation24], 272  }
 0x187   :  { %4865 = vsyncadd [#allocation24], 4294967024 }
 0x188   :  { %4866 = dma.done.wait [#allocation27], 528  }
 0x189   :  { %4867 = vsyncadd [#allocation27], 4294966768 }
 0x18a   :  { %4868 = dma.done.wait [#allocation30], 4096  }
 0x18b   :  { %4869 = vsyncadd [#allocation30], 4294963200 }
 0x18c   :  { %4870 = dma.done.wait [#allocation33], 272  }
 0x18d   :  { %4871 = vsyncadd [#allocation33], 4294967024 }
 0x18e   :  { %4872 = dma.done.wait [#allocation36], 272  }
 0x18f   :  { %4873 = vsyncadd [#allocation36], 4294967024 }
 0x190   :  { %4874 = dma.done.wait [#allocation39], 272  }
 0x191   :  { %4875 = vsyncadd [#allocation39], 4294967024  ;;  %s7026_s12 = sld [smem:[#allocation56_spill]]  ;;  %v3984_v0 = vld [vmem:[#allocation5 + $0x8] sm:$0xff]  ;;  %v3983_v1 = vld [vmem:[#allocation5] sm:$0xff]  ;;  %vm574_vm0 = vcmask 261120  }
 0x192   :  { %593 = vmatpush.bf16.msra.mxu0 %v3984_v0  ;;  %4012 = vmatpush.bf16.msra.mxu2 %v3984_v0  ;;  %s7027_s1 = sld [smem:[#allocation61_spill]]  ;;  %v5323_v14 = vld [vmem:[#allocation7] ss:$0 sm:$0xff]  ;;  %s4945_s21 = smov 96  }
 0x193   :  { %s7046_s22 = sld [smem:[#allocation62_spill]]  ;;  %s4949_s25 = smov [#allocation41]  }
 0x194   :  { %s7083_s24 = sld [smem:[#allocation63_spill]]  ;;  %s3684_s30 = sshll.u32 %s4949_s25, 4  ;;  %s3685_s30 = int_to_ptr.vmem [resolvable:$true] %s3684_s30 }
 0x195   :  { %s7084_s7 = sld [smem:[#allocation65_spill]]  ;;  %s3686_s11 = sshll.u32 %s5148_s4, 4  ;;  %s3687_s11 = int_to_ptr.hbm [resolvable:$true] %s3686_s11 }
 0x196   :  { %594 = vmatpush.bf16.msra.mxu0 %v3983_v1  ;;  %4013 = vmatpush.bf16.msra.mxu2 %v3983_v1  ;;  %s7092_s19 = sld [smem:[#allocation67_spill]]  ;;  %s4838_s14 = sshra.s32 %s3687_s11, 4  ;;  %s4839_s14 = int_to_ptr.hbm [resolvable:$true] %s4838_s14 }
 0x197   :  { %v542_v2 = vld [vmem:[%s7026_s12] sm:$0xff]  ;;  %v543_v3 = vld [vmem:[%s7026_s12 + $0x8] sm:$0xff]  ;;  %v548_v4 = vld [vmem:[%s7026_s12 + $0x30] sm:$0xff]  ;;  %s7101_s27 = sld [smem:[#allocation73_spill]]  ;;  %s4840_s16 = scalar_lea.hbm %s4839_s14, 16 }
 0x198   :  { %v549_v5 = vld [vmem:[%s7026_s12 + $0x38] sm:$0xff]  ;;  %v554_v6 = vpack.c.bf16 %v543_v3, %v542_v2  ;;  %v544_v8 = vld [vmem:[%s7026_s12 + $0x10] sm:$0xff]  ;;  %v546_v11 = vld [vmem:[%s7026_s12 + $0x20] sm:$0xff]  ;;  %s7102_s29 = sld [smem:[#allocation75_spill]]  ;;  %p4841_p13 = scmp.ne.s32.totalorder %s4839_s14, %s4840_s16 }
 0x199   :  { %v557_v7 = vpack.c.bf16 %v549_v5, %v548_v4  ;;  %v545_v9 = vld [vmem:[%s7026_s12 + $0x18] sm:$0xff]  ;;  %v547_v12 = vld [vmem:[%s7026_s12 + $0x28] sm:$0xff]  ;;  %v5326_v16 = vld [vmem:[%s7027_s1] sm:$0xff]  ;;  %s7103_s3 = sld [smem:[#allocation58_spill]]  ;;  %s4842_s23 = scalar_lea.hbm %s5148_s4, 16 }
 0x19a   :  { %3757 = vmatmul.msk.bf16.vlgmr.msra.gmra.mxu0 %vm574_vm0, %v554_v6  ;;  %v555_v10 = vpack.c.bf16 %v545_v9, %v544_v8  ;;  %v556_v13 = vpack.c.bf16 %v547_v12, %v546_v11  ;;  %v5335_v21 = vld [vmem:[%s7027_s1 + $0x10] sm:$0xff]  ;;  %v5351_v28 = vld [vmem:[%s7027_s1 + $0x8] sm:$0xff]  ;;  %v624_v36 = vld [vmem:[%s7027_s1 + $0x20] sm:$0xff]  ;;  %s7104_s17 = sld [smem:[#allocation76_spill]]  ;;  %p4843_p0 = scmp.lt.s32.totalorder %s4839_s14, %s5148_s4 }
 0x19b   :  { %3760 = vmatmul.msk.bf16.vlgmr.msra.gmra.mxu2 %vm574_vm0, %v557_v7  ;;  %v5338_v22 = vld [vmem:[%s7027_s1 + $0x30] sm:$0xff]  ;;  %v5378_v41 = vld [vmem:[%s7027_s1 + $0x18] sm:$0xff]  ;;  %v625_v57 = vld [vmem:[%s7027_s1 + $0x28] sm:$0xff]  ;;  %s7105_s0 = sld [smem:[#allocation59_spill]]  ;;  %p4844_p1 = scmp.lt.s32.totalorder %s4842_s23, %s4840_s16 }
 0x19c   :  { %v5341_v23 = vld [vmem:[%s7027_s1 + $0x50] sm:$0xff]  ;;  %v5381_v42 = vld [vmem:[%s7027_s1 + $0x38] sm:$0xff]  ;;  %v633_v9 = vld [vmem:[%s7027_s1 + $0x68] sm:$0xff]  ;;  %s7106_s15 = sld [smem:[#allocation60_spill]] }
 0x19d   :  { %v5345_v25 = vld [vmem:[%s7027_s1 + $0x70] sm:$0xff]  ;;  %v5384_v44 = vld [vmem:[%s7027_s1 + $0x58] sm:$0xff]  ;;  %p4845_p2 = por %p4844_p1, %p4843_p0 }
 0x19e   :  { %v5348_v26 = vld [vmem:[%s7027_s1 + $0xb0] sm:$0xff]  ;;  %v5392_v47 = vld [vmem:[%s7027_s1 + $0x78] sm:$0xff] }
 0x19f   :  { %v5389_v46 = vld [vmem:[%s7027_s1 + $0xd0] sm:$0xff]  ;;  %v5410_v53 = vld [vmem:[%s7027_s1 + $0x98] sm:$0xff]  ;;  %p4846_p3 = pnand %p4845_p2, %p4841_p13 }
 0x1a0   :  { %v5395_v48 = vld [vmem:[%s7027_s1 + $0xf0] sm:$0xff]  ;;  %v5413_v54 = vld [vmem:[%s7027_s1 + $0xb8] sm:$0xff] }
 0x1a1   :  { %v5398_v49 = vld [vmem:[%s7027_s1 + $0x90] sm:$0xff]  ;;  %v5416_v55 = vld [vmem:[%s7027_s1 + $0xd8] sm:$0xff] }
 0x1a2   :  { %v5423_v58 = vld [vmem:[%s7027_s1 + $0xf8] sm:$0xff] }
 0x1aa   :  { %3758 = vmatmul.msk.bf16.gmra.mxu0 %vm574_vm0, %v555_v10 }
 0x1ba   :  { %3759 = vmatmul.msk.bf16.gmra.mxu0 %vm574_vm0, %v556_v13 }
 0x217   :  { %v596_v15 = vpop.f32.mrf.mxu0 }
 0x218   :  { %v5329_v17 = vadd.f32 %v5323_v14, %v596_v15  ;;  %v641_v15 = vld [vmem:[%s7027_s1 + $0xa8] sm:$0xff] }
 0x21a   :  { %v767_v18 = vmul.f32 %v5326_v16, %v5329_v17  ;;  %v791_v40 = vmul.f32 %v624_v36, %v5329_v17 }
 0x21c   :  { %v771_v19 = vsel %vm574_vm0, %v767_v18, 0.0  ;;  %v795_v52 = vsel %vm574_vm0, %v791_v40, 0.0 }
 0x21d   :  { %772 = vadd.xlane.f32.xlu2 %v771_v19 }
 0x21e   :  { %v611_v20 = vpop.f32.mrf.mxu2 }
 0x21f   :  { %v612_v24 = vadd.f32 %v5323_v14, %v611_v20  ;;  %v598_v27 = vpop.f32.mrf.mxu0 }
 0x220   :  { %v5354_v29 = vadd.f32 %v5323_v14, %v598_v27 }
 0x221   :  { %v5357_v30 = vmul.f32 %v5335_v21, %v612_v24  ;;  %v5360_v31 = vmul.f32 %v5338_v22, %v612_v24  ;;  %v5363_v32 = vmul.f32 %v5341_v23, %v612_v24  ;;  %v5366_v33 = vmul.f32 %v5348_v26, %v612_v24 }
 0x222   :  { %v5369_v34 = vmul.f32 %v5345_v25, %v612_v24  ;;  %v768_v35 = vmul.f32 %v5351_v28, %v5354_v29  ;;  %v5426_v59 = vmul.f32 %v5389_v46, %v612_v24  ;;  %v5432_v61 = vmul.f32 %v5395_v48, %v612_v24 }
 0x223   :  { %v5435_v62 = vmul.f32 %v5398_v49, %v612_v24  ;;  %v792_v3 = vmul.f32 %v625_v57, %v5354_v29  ;;  %v840_v10 = vmul.f32 %v633_v9, %v5354_v29  ;;  %v5467_v12 = vpack.c.bf16 %v5354_v29, %v5329_v17 }
 0x224   :  { %v774_v37 = vsel %vm574_vm0, %v768_v35, 0.0  ;;  %v888_v18 = vmul.f32 %v641_v15, %v5354_v29  ;;  %v629_v35 = vld [vmem:[%s7027_s1 + $0x48] sm:$0xff] }
 0x225   :  { %775 = vadd.xlane.f32.xlu2 %v774_v37  ;;  %v798_v8 = vsel %vm574_vm0, %v792_v3, 0.0  ;;  %v846_v13 = vsel %vm574_vm0, %v840_v10, 0.0 }
 0x226   :  { %v613_v38 = vpop.f32.mrf.mxu2  ;;  %v894_v27 = vsel %vm574_vm0, %v888_v18, 0.0 }
 0x227   :  { %v614_v39 = vadd.f32 %v5323_v14, %v613_v38  ;;  %v601_v43 = vpop.f32.mrf.mxu0  ;;  %v648_v38 = vld [vmem:[%s7027_s1 + $0xe0] sm:$0xff] }
 0x228   :  { %v5447_v2 = vadd.f32 %v5323_v14, %v601_v43  ;;  %v935_v43 = vmul.f32 %v648_v38, %v5329_v17 }
 0x229   :  { %v5386_v45 = vpack.c.bf16 %v614_v39, %v612_v24  ;;  %v5401_v50 = vmul.f32 %v5378_v41, %v614_v39  ;;  %v5404_v51 = vmul.f32 %v5381_v42, %v614_v39  ;;  %v5419_v56 = vmul.f32 %v5384_v44, %v614_v39 }
 0x22a   :  { %v5429_v60 = vmul.f32 %v5392_v47, %v614_v39  ;;  %v5438_v63 = vmul.f32 %v5413_v54, %v614_v39  ;;  %v5441_v0 = vmul.f32 %v5416_v55, %v614_v39  ;;  %v5444_v1 = vmul.f32 %v5410_v53, %v614_v39 }
 0x22b   :  { %1002 = vrot.lane.b32.xlu1 %v5386_v45, %s4945_s21  ;;  %v5451_v4 = vmul.f32 %v5423_v58, %v614_v39  ;;  %v939_v10 = vsel %vm574_vm0, %v935_v43, 0.0  ;;  %v817_v18 = vmul.f32 %v5341_v23, %v5447_v2 }
 0x22c   :  { %7028 = vst [vmem:[#allocation77_spill] sm:$0xff] %v5444_v1  ;;  %v5795_v1 = vld [vmem:[%s7046_s22 + $0xa8] sm:$0xff] }
 0x22d   :  { %796 = vadd.xlane.f32.xlu2 %v795_v52  ;;  %7029 = vst [vmem:[#allocation78_spill] sm:$0xff] %v5451_v4  ;;  %v628_v52 = vld [vmem:[%s7027_s1 + $0x40] sm:$0xff]  ;;  %v5791_v4 = vld [vmem:[%s7046_s22 + $0x88] sm:$0xff] }
 0x22e   :  { %7055 = vst [vmem:[#allocation103_spill] sm:$0xff] %v5795_v1 }
 0x22f   :  { %v603_v5 = vpop.f32.mrf.mxu0 }
 0x230   :  { %v5454_v6 = vadd.f32 %v5323_v14, %v603_v5 }
 0x232   :  { %v5458_v7 = vpack.c.bf16 %v5454_v6, %v5447_v2 }
 0x234   :  { %690 = vrot.lane.b32.xlu0 %v5458_v7, %s4945_s21 }
 0x235   :  { %799 = vadd.xlane.f32.xlu2 %v798_v8 }
 0x237   :  { %v606_v11 = vpop.f32.mrf.mxu0 }
 0x238   :  { %v5475_v19 = vadd.f32 %v5323_v14, %v606_v11  ;;  %v816_v11 = vmul.f32 %v629_v35, %v5354_v29 }
 0x23a   :  { %v5483_v37 = vmul.f32 %v624_v36, %v5475_v19  ;;  %v5491_v40 = vmul.f32 %v5326_v16, %v5475_v19  ;;  %v5499_v3 = vmul.f32 %v628_v52, %v5475_v19  ;;  %v5502_v36 = vmul.f32 %v648_v38, %v5475_v19 }
 0x23c   :  { %688 = vrot.lane.b32.xlu0 %v5467_v12, %s4945_s21 }
 0x23d   :  { %847 = vadd.xlane.f32.xlu2 %v846_v13 }
 0x23f   :  { %v608_v20 = vpop.f32.mrf.mxu0 }
 0x240   :  { %v5478_v24 = vadd.f32 %v5323_v14, %v608_v20  ;;  %v825_v20 = vsel %vm574_vm0, %v817_v18, 0.0 }
 0x242   :  { %v5487_v39 = vmul.f32 %v629_v35, %v5478_v24  ;;  %v5496_v14 = vmul.f32 %v625_v57, %v5478_v24  ;;  %v5506_v5 = vmul.f32 %v5351_v28, %v5478_v24  ;;  %v5509_v16 = vmul.f32 %v633_v9, %v5478_v24  ;;  %v636_v35 = vld [vmem:[%s7027_s1 + $0x80] sm:$0xff] }
 0x243   :  { %v5512_v8 = vmul.f32 %v641_v15, %v5478_v24  ;;  %v769_v57 = vmul.f32 %v5335_v21, %v5447_v2  ;;  %v822_v28 = vsel %vm574_vm0, %v816_v11, 0.0  ;;  %v793_v9 = vmul.f32 %v5338_v22, %v5447_v2 }
 0x244   :  { %v815_v21 = vmul.f32 %v628_v52, %v5329_v17  ;;  %v841_v22 = vmul.f32 %v5345_v25, %v5447_v2  ;;  %v863_v38 = vmul.f32 %v636_v35, %v5329_v17  ;;  %v5534_v43 = vpack.c.bf16 %v5478_v24, %v5475_v19 }
 0x245   :  { %895 = vadd.xlane.f32.xlu2 %v894_v27  ;;  %v777_v13 = vsel %vm574_vm0, %v769_v57, 0.0  ;;  %v801_v15 = vsel %vm574_vm0, %v793_v9, 0.0  ;;  %v866_v57 = vmul.f32 %v5410_v53, %v5454_v6  ;;  %v890_v9 = vmul.f32 %v5413_v54, %v5454_v6 }
 0x246   :  { %v819_v27 = vsel %vm574_vm0, %v815_v21, 0.0  ;;  %v849_v23 = vsel %vm574_vm0, %v841_v22, 0.0  ;;  %v867_v52 = vsel %vm574_vm0, %v863_v38, 0.0  ;;  %v914_v21 = vmul.f32 %v5416_v55, %v5454_v6 }
 0x247   :  { %v876_v11 = vsel %vm574_vm0, %v866_v57, 0.0  ;;  %v900_v18 = vsel %vm574_vm0, %v890_v9, 0.0  ;;  %v938_v22 = vmul.f32 %v5423_v58, %v5454_v6  ;;  %v794_v38 = vmul.f32 %v5381_v42, %v5454_v6 }
 0x248   :  { %v842_v9 = vmul.f32 %v5392_v47, %v5454_v6  ;;  %v889_v47 = vmul.f32 %v5348_v26, %v5447_v2 }
 0x249   :  { %v804_v55 = vsel %vm574_vm0, %v794_v38, 0.0 }
 0x24d   :  { %940 = vadd.xlane.f32.xlu2 %v939_v10  ;;  %v644_v10 = vld [vmem:[%s7027_s1 + $0xc0] sm:$0xff] }
 0x24e   :  { %v911_v25 = vmul.f32 %v644_v10, %v5329_v17 }
 0x255   :  { %823 = vadd.xlane.f32.xlu1 %v822_v28  ;;  %778 = vadd.xlane.f32.xlu2 %v777_v13  ;;  %v915_v13 = vsel %vm574_vm0, %v911_v25, 0.0  ;;  %v5547_v28 = vld [vmem:[%s7027_s1 + $0xe8] sm:$0xff]  ;;  %v1107_v25 = vsel %vm574_vm0, %v5483_v37, 0.0 }
 0x25d   :  { %802 = vadd.xlane.f32.xlu2 %v801_v15  ;;  %v936_v15 = vmul.f32 %v5547_v28, %v5354_v29 }
 0x25f   :  { %v942_v53 = vsel %vm574_vm0, %v936_v15, 0.0 }
 0x265   :  { %826 = vadd.xlane.f32.xlu2 %v825_v20  ;;  %v770_v20 = vmul.f32 %v5378_v41, %v5454_v6  ;;  %v632_v41 = vld [vmem:[%s7027_s1 + $0x60] sm:$0xff] }
 0x266   :  { %820 = vadd.xlane.f32.xlu0 %v819_v27  ;;  %v924_v27 = vsel %vm574_vm0, %v914_v21, 0.0  ;;  %v839_v57 = vmul.f32 %v632_v41, %v5329_v17 }
 0x267   :  { %v780_v54 = vsel %vm574_vm0, %v770_v20, 0.0  ;;  %v1223_v20 = vmul.f32 %v644_v10, %v5475_v19  ;;  %v913_v10 = vmul.f32 %v5389_v46, %v5447_v2 }
 0x268   :  { %v843_v42 = vsel %vm574_vm0, %v839_v57, 0.0 }
 0x26d   :  { %850 = vadd.xlane.f32.xlu2 %v849_v23  ;;  %v948_v23 = vsel %vm574_vm0, %v938_v22, 0.0 }
 0x26e   :  { %1000 = vrot.lane.b32.xlu1 %v5534_v43, %s4945_s21  ;;  %868 = vadd.xlane.f32.xlu0 %v867_v52  ;;  %v818_v52 = vmul.f32 %v5384_v44, %v5454_v6 }
 0x270   :  { %v828_v58 = vsel %vm574_vm0, %v818_v52, 0.0  ;;  %v921_v52 = vsel %vm574_vm0, %v913_v10, 0.0  ;;  %v1158_v10 = vsel %vm574_vm0, %v5509_v16, 0.0 }
 0x275   :  { %877 = vadd.xlane.f32.xlu2 %v876_v11  ;;  %v637_v11 = vld [vmem:[%s7027_s1 + $0x88] sm:$0xff] }
 0x276   :  { %916 = vadd.xlane.f32.xlu0 %v915_v13  ;;  %v1175_v13 = vmul.f32 %v636_v35, %v5475_v19  ;;  %v864_v44 = vmul.f32 %v637_v11, %v5354_v29  ;;  %v640_v35 = vld [vmem:[%s7027_s1 + $0xa0] sm:$0xff] }
 0x277   :  { %v887_v6 = vmul.f32 %v640_v35, %v5329_v17  ;;  %v1134_v17 = vsel %vm574_vm0, %v5487_v39, 0.0 }
 0x278   :  { %v870_v21 = vsel %vm574_vm0, %v864_v44, 0.0 }
 0x279   :  { %v891_v38 = vsel %vm574_vm0, %v887_v6, 0.0 }
 0x27d   :  { %901 = vadd.xlane.f32.xlu2 %v900_v18  ;;  %v1179_v18 = vsel %vm574_vm0, %v1175_v13, 0.0  ;;  %v1083_v13 = vsel %vm574_vm0, %v5491_v40, 0.0 }
 0x27e   :  { %943 = vadd.xlane.f32.xlu0 %v942_v53  ;;  %v852_v53 = vsel %vm574_vm0, %v842_v9, 0.0  ;;  %v1151_v9 = vmul.f32 %v632_v41, %v5475_v19  ;;  %v1110_v41 = vsel %vm574_vm0, %v5496_v14, 0.0 }
 0x285   :  { %925 = vadd.xlane.f32.xlu2 %v924_v27  ;;  %v1227_v27 = vsel %vm574_vm0, %v1223_v20, 0.0  ;;  %v865_v20 = vmul.f32 %v5398_v49, %v5447_v2  ;;  %v1251_v49 = vsel %vm574_vm0, %v5502_v36, 0.0 }
 0x286   :  { %781 = vadd.xlane.f32.xlu0 %v780_v54  ;;  %v897_v54 = vsel %vm574_vm0, %v889_v47, 0.0 }
 0x28d   :  { %949 = vadd.xlane.f32.xlu2 %v948_v23 }
 0x28e   :  { %805 = vadd.xlane.f32.xlu0 %v804_v55  ;;  %v645_v55 = vld [vmem:[%s7027_s1 + $0xc8] sm:$0xff] }
 0x28f   :  { %v912_v26 = vmul.f32 %v645_v55, %v5354_v29  ;;  %v937_v29 = vmul.f32 %v5395_v48, %v5447_v2  ;;  %v1199_v48 = vmul.f32 %v640_v35, %v5475_v19 }
 0x290   :  { %v5622_v40 = vpop.xlane.xlu2 %772 }
 0x291   :  { %v945_v39 = vsel %vm574_vm0, %v937_v29, 0.0  ;;  %v1203_v44 = vsel %vm574_vm0, %v1199_v48, 0.0 }
 0x295   :  { %1108 = vadd.xlane.f32.xlu2 %v1107_v25  ;;  %v918_v25 = vsel %vm574_vm0, %v912_v26, 0.0 }
 0x296   :  { %829 = vadd.xlane.f32.xlu0 %v828_v58 }
 0x298   :  { %844 = vadd.xlane.f32.xlu1 %v843_v42  ;;  %v1248_v42 = vmul.f32 %v5547_v28, %v5478_v24  ;;  %v1155_v28 = vsel %vm574_vm0, %v1151_v9, 0.0  ;;  %v617_v9 = vld [vmem:[#allocation11 + $0x8] sm:$0xff] }
 0x29a   :  { %v1254_v46 = vsel %vm574_vm0, %v1248_v42, 0.0  ;;  %v616_v42 = vld [vmem:[#allocation11] sm:$0xff] }
 0x29d   :  { %v1003_v15 = vpop.permute.xlu1 %1002  ;;  %1180 = vadd.xlane.f32.xlu2 %v1179_v18  ;;  %v1176_v18 = vmul.f32 %v637_v11, %v5478_v24 }
 0x29e   :  { %v1014_v37 = vsel %vm574_vm0, %v1003_v15, 0  ;;  %853 = vadd.xlane.f32.xlu0 %v852_v53 }
 0x29f   :  { %1022 = vmatpush.bf16.xpose.msra.mxu3 %v1014_v37  ;;  %v5629_v37 = vpop.xlane.xlu2 %775 }
 0x2a0   :  { %871 = vadd.xlane.f32.xlu1 %v870_v21 }
 0x2a5   :  { %1228 = vadd.xlane.f32.xlu2 %v1227_v27  ;;  %v1131_v27 = vsel %vm574_vm0, %v5499_v3, 0.0 }
 0x2a6   :  { %v691_v22 = vpop.permute.xlu0 %690  ;;  %898 = vadd.xlane.f32.xlu0 %v897_v54 }
 0x2a7   :  { %v702_v23 = vsel %vm574_vm0, %v691_v22, 0  ;;  %v5634_v21 = vpop.xlane.xlu2 %796 }
 0x2a8   :  { %892 = vadd.xlane.f32.xlu1 %v891_v38  ;;  %710 = vmatpush.bf16.xpose.msra.mxu1 %v702_v23  ;;  %v1086_v38 = vsel %vm574_vm0, %v5506_v5, 0.0  ;;  %v1206_v5 = vsel %vm574_vm0, %v5512_v8, 0.0 }
 0x2ad   :  { %1135 = vadd.xlane.f32.xlu2 %v1134_v17 }
 0x2ae   :  { %922 = vadd.xlane.f32.xlu0 %v921_v52  ;;  %v689_v57 = vpop.permute.xlu0 %688 }
 0x2af   :  { %v699_v58 = vsel %vm574_vm0, %v689_v57, 0  ;;  %v5639_v11 = vpop.xlane.xlu2 %799 }
 0x2b0   :  { %919 = vadd.xlane.f32.xlu1 %v918_v25  ;;  %711 = vmatpush.bf16.xpose.msra.mxu1 %v699_v58 }
 0x2b5   :  { %1255 = vadd.xlane.f32.xlu2 %v1254_v46 }
 0x2b6   :  { %946 = vadd.xlane.f32.xlu0 %v945_v39 }
 0x2b7   :  { %3761 = vmatmul.msk.bf16.vlgmr.msra.gmra.mxu1 %vm574_vm0, %v5467_v12  ;;  %v5647_v47 = vpop.xlane.xlu2 %847 }
 0x2be   :  { %1084 = vadd.xlane.f32.xlu0 %v1083_v13 }
 0x2bf   :  { %v5654_v54 = vpop.xlane.xlu2 %895 }
 0x2c0   :  { %7030 = vst [vmem:[#allocation79_spill] sm:$0xff] %v5654_v54 }
 0x2c6   :  { %1156 = vadd.xlane.f32.xlu0 %v1155_v28 }
 0x2c7   :  { %3762 = vmatmul.msk.bf16.gmra.mxu1 %vm574_vm0, %v5458_v7  ;;  %v5660_v2 = vpop.xlane.xlu2 %940 }
 0x2c8   :  { %v5626_v15 = vpop.xlane.xlu1 %823  ;;  %7032 = vst [vmem:[#allocation81_spill] sm:$0xff] %v5660_v2 }
 0x2c9   :  { %967 = vrot.lane.b32.xlu1 %v5458_v7, %s4917_s28  ;;  %v1182_v7 = vsel %vm574_vm0, %v1176_v18, 0.0 }
 0x2ce   :  { %1204 = vadd.xlane.f32.xlu0 %v1203_v44 }
 0x2cf   :  { %v5668_v3 = vpop.xlane.xlu2 %778 }
 0x2d0   :  { %7034 = vst [vmem:[#allocation83_spill] sm:$0xff] %v5668_v3  ;;  %v5751_v3 = vld [vmem:[%s7046_s22 + $0x80] sm:$0xff] }
 0x2d1   :  { %965 = vrot.lane.b32.xlu1 %v5467_v12, %s4917_s28  ;;  %v1224_v12 = vmul.f32 %v645_v55, %v5478_v24  ;;  %v873_v24 = vsel %vm574_vm0, %v865_v20, 0.0 }
 0x2d3   :  { %v1230_v14 = vsel %vm574_vm0, %v1224_v12, 0.0 }
 0x2d6   :  { %1111 = vadd.xlane.f32.xlu0 %v1110_v41 }
 0x2d7   :  { %v5676_v17 = vpop.xlane.xlu2 %802 }
 0x2d8   :  { %7036 = vst [vmem:[#allocation85_spill] sm:$0xff] %v5676_v17 }
 0x2d9   :  { %v5641_v35 = vpop.xlane.xlu0 %820 }
 0x2de   :  { %1183 = vadd.xlane.f32.xlu0 %v1182_v7 }
 0x2df   :  { %v5684_v25 = vpop.xlane.xlu2 %826 }
 0x2e0   :  { %v1001_v19 = vpop.permute.xlu1 %1000  ;;  %7038 = vst [vmem:[#allocation87_spill] sm:$0xff] %v5684_v25 }
 0x2e1   :  { %v1011_v53 = vsel %vm574_vm0, %v1001_v19, 0  ;;  %v5650_v6 = vpop.xlane.xlu0 %868  ;;  %v618_v19 = vld [vmem:[#allocation11 + $0x10] sm:$0xff] }
 0x2e2   :  { %1023 = vmatpush.bf16.xpose.msra.mxu3 %v1011_v53 }
 0x2e6   :  { %1231 = vadd.xlane.f32.xlu0 %v1230_v14 }
 0x2e7   :  { %v5690_v46 = vpop.xlane.xlu2 %850 }
 0x2e8   :  { %7041 = vst [vmem:[#allocation90_spill] sm:$0xff] %v5690_v46 }
 0x2e9   :  { %3765 = vmatmul.msk.bf16.vlgmr.msra.gmra.mxu3 %vm574_vm0, %v5534_v43  ;;  %v5656_v22 = vpop.xlane.xlu0 %916 }
 0x2ea   :  { %7031 = vst [vmem:[#allocation80_spill] sm:$0xff] %v5656_v22  ;;  %v5799_v22 = vld [vmem:[%s7046_s22 + $0xc8] sm:$0xff] }
 0x2ef   :  { %v5700_v41 = vpop.xlane.xlu2 %877 }
 0x2f0   :  { %7043 = vst [vmem:[#allocation92_spill] sm:$0xff] %v5700_v41 }
 0x2f1   :  { %v5664_v23 = vpop.xlane.xlu0 %943 }
 0x2f2   :  { %7033 = vst [vmem:[#allocation82_spill] sm:$0xff] %v5664_v23 }
 0x2f9   :  { %3766 = vmatmul.msk.bf16.gmra.mxu3 %vm574_vm0, %v5386_v45  ;;  %v5672_v26 = vpop.xlane.xlu0 %781 }
 0x2fa   :  { %7035 = vst [vmem:[#allocation84_spill] sm:$0xff] %v5672_v26 }
 0x2fb   :  { %874 = vadd.xlane.f32.xlu1 %v873_v24  ;;  %v5710_v24 = vpop.xlane.xlu2 %901 }
 0x2fc   :  { %7045 = vst [vmem:[#allocation94_spill] sm:$0xff] %v5710_v24  ;;  %v5741_v24 = vld [vmem:[%s7046_s22 + $0x40] sm:$0xff] }
 0x301   :  { %v5680_v52 = vpop.xlane.xlu0 %805 }
 0x302   :  { %7037 = vst [vmem:[#allocation86_spill] sm:$0xff] %v5680_v52 }
 0x303   :  { %1132 = vadd.xlane.f32.xlu1 %v1131_v27  ;;  %v619_v27 = vld [vmem:[#allocation11 + $0x18] sm:$0xff] }
 0x309   :  { %v5686_v58 = vpop.xlane.xlu0 %829 }
 0x30a   :  { %7039 = vst [vmem:[#allocation88_spill] sm:$0xff] %v5686_v58 }
 0x30b   :  { %1252 = vadd.xlane.f32.xlu1 %v1251_v49  ;;  %v5666_v55 = vpop.xlane.xlu1 %844 }
 0x311   :  { %v5696_v28 = vpop.xlane.xlu0 %853 }
 0x312   :  { %7042 = vst [vmem:[#allocation91_spill] sm:$0xff] %v5696_v28  ;;  %v5747_v28 = vld [vmem:[%s7046_s22 + $0x60] sm:$0xff] }
 0x313   :  { %1087 = vadd.xlane.f32.xlu1 %v1086_v38  ;;  %v5674_v36 = vpop.xlane.xlu1 %871 }
 0x319   :  { %v5704_v12 = vpop.xlane.xlu0 %898 }
 0x31a   :  { %7044 = vst [vmem:[#allocation93_spill] sm:$0xff] %v5704_v12 }
 0x31b   :  { %1159 = vadd.xlane.f32.xlu1 %v1158_v10  ;;  %v5682_v57 = vpop.xlane.xlu1 %892 }
 0x321   :  { %v5714_v10 = vpop.xlane.xlu0 %922 }
 0x322   :  { %7047 = vst [vmem:[#allocation95_spill] sm:$0xff] %v5714_v10 }
 0x323   :  { %1207 = vadd.xlane.f32.xlu1 %v1206_v5  ;;  %v5688_v16 = vpop.xlane.xlu1 %919 }
 0x324   :  { %7040 = vst [vmem:[#allocation89_spill] sm:$0xff] %v5688_v16 }
 0x334   :  { %v713_v29 = vpop.f32.mrf.mxu1 }
 0x335   :  { %v5692_v39 = vadd.f32 %v713_v29, %v616_v42  ;;  %v5718_v29 = vpop.xlane.xlu2 %925 }
 0x336   :  { %7048 = vst [vmem:[#allocation96_spill] sm:$0xff] %v5718_v29 }
 0x337   :  { %v723_v8 = vsel %vm574_vm0, %v5692_v39, -inf }
 0x338   :  { %724 = vmax.xlane.f32.xlu2 %v723_v8  ;;  %v5720_v8 = vpop.xlane.xlu0 %946 }
 0x339   :  { %7049 = vst [vmem:[#allocation97_spill] sm:$0xff] %v5720_v8 }
 0x33b   :  { %v968_v13 = vpop.permute.xlu1 %967 }
 0x33c   :  { %983 = vmatpush.bf16.msrb.mxu2 %v968_v13  ;;  %v715_v48 = vpop.f32.mrf.mxu1 }
 0x33d   :  { %v5698_v44 = vadd.f32 %v715_v48, %v617_v9  ;;  %v5722_v13 = vpop.xlane.xlu2 %949 }
 0x33e   :  { %7050 = vst [vmem:[#allocation98_spill] sm:$0xff] %v5722_v13  ;;  %v5735_v13 = vld [vmem:[%s7046_s22 + $0x20] sm:$0xff] }
 0x33f   :  { %v726_v18 = vsel %vm574_vm0, %v5698_v44, -inf }
 0x340   :  { %727 = vmax.xlane.f32.xlu2 %v726_v18  ;;  %v1085_v48 = vpop.xlane.xlu0 %1084 }
 0x343   :  { %v966_v7 = vpop.permute.xlu1 %965 }
 0x344   :  { %984 = vmatpush.bf16.msrb.mxu2 %v966_v7  ;;  %v718_v53 = vpop.f32.mrf.mxu1 }
 0x345   :  { %v5706_v14 = vadd.f32 %v718_v53, %v618_v19  ;;  %v1109_v18 = vpop.xlane.xlu2 %1108 }
 0x347   :  { %v729_v20 = vsel %vm574_vm0, %v5706_v14, -inf }
 0x348   :  { %730 = vmax.xlane.f32.xlu0 %v729_v20  ;;  %v1157_v20 = vpop.xlane.xlu0 %1156 }
 0x349   :  { %v1167_v25 = vmul.f32 %v1157_v20, %v5747_v28 }
 0x34c   :  { %v720_v49 = vpop.f32.mrf.mxu1 }
 0x34d   :  { %v5712_v38 = vadd.f32 %v720_v49, %v619_v27  ;;  %v1181_v29 = vpop.xlane.xlu2 %1180 }
 0x34f   :  { %v732_v5 = vsel %vm574_vm0, %v5712_v38, -inf }
 0x350   :  { %733 = vmax.xlane.f32.xlu1 %v732_v5  ;;  %v5731_v5 = vld [vmem:[%s7046_s22] sm:$0xff] }
 0x351   :  { %v1095_v8 = vmul.f32 %v1085_v48, %v5731_v5  ;;  %v1205_v48 = vpop.xlane.xlu0 %1204 }
 0x355   :  { %v1229_v58 = vpop.xlane.xlu2 %1228 }
 0x36c   :  { %v1025_v7 = vpop.f32.mrf.mxu3 }
 0x36d   :  { %v5724_v53 = vadd.f32 %v1025_v7, %v616_v42  ;;  %v1119_v42 = vmul.f32 %v1109_v18, %v5735_v13 }
 0x36e   :  { %v5726_v49 = vpop.xlane.xlu1 %874 }
 0x36f   :  { %7051 = vst [vmem:[#allocation99_spill] sm:$0xff] %v5726_v49  ;;  %v1035_v10 = vsel %vm574_vm0, %v5724_v53, -inf  ;;  %v1123_v49 = vadd.f32 %v1119_v42, %v1095_v8  ;;  %v5755_v8 = vld [vmem:[%s7046_s22 + $0xa0] sm:$0xff] }
 0x370   :  { %1036 = vmax.xlane.f32.xlu2 %v1035_v10  ;;  %v1215_v42 = vmul.f32 %v1205_v48, %v5755_v8  ;;  %v1112_v48 = vpop.xlane.xlu0 %1111 }
 0x374   :  { %v1027_v12 = vpop.f32.mrf.mxu3 }
 0x375   :  { %v5738_v7 = vadd.f32 %v1027_v12, %v617_v9  ;;  %v1191_v9 = vmul.f32 %v1181_v29, %v5751_v3 }
 0x376   :  { %v1133_v41 = vpop.xlane.xlu1 %1132 }
 0x377   :  { %v1143_v10 = vmul.f32 %v1133_v41, %v5741_v24  ;;  %v1038_v46 = vsel %vm574_vm0, %v5738_v7, -inf }
 0x378   :  { %1039 = vmax.xlane.f32.xlu2 %v1038_v46  ;;  %v5761_v46 = vld [vmem:[%s7046_s22 + $0xc0] sm:$0xff] }
 0x379   :  { %v1147_v18 = vadd.f32 %v1143_v10, %v1123_v49  ;;  %7052 = vst [vmem:[#allocation100_spill] sm:$0xff] %v5761_v46  ;;  %v1239_v49 = vmul.f32 %v1229_v58, %v5761_v46  ;;  %v5779_v58 = vld [vmem:[%s7046_s22 + $0x28] sm:$0xff] }
 0x37b   :  { %v1171_v12 = vadd.f32 %v1167_v25, %v1147_v18 }
 0x37c   :  { %v1030_v41 = vpop.f32.mrf.mxu3 }
 0x37d   :  { %v1195_v26 = vadd.f32 %v1191_v9, %v1171_v12  ;;  %v5758_v17 = vadd.f32 %v1030_v41, %v618_v19  ;;  %v5775_v41 = vld [vmem:[%s7046_s22 + $0x8] sm:$0xff] }
 0x37e   :  { %v5763_v20 = vpop.xlane.xlu1 %1252 }
 0x37f   :  { %7053 = vst [vmem:[#allocation101_spill] sm:$0xff] %v5763_v20  ;;  %v1219_v10 = vadd.f32 %v1215_v42, %v1195_v26  ;;  %v1041_v25 = vsel %vm574_vm0, %v5758_v17, -inf  ;;  %v1120_v42 = vmul.f32 %v1112_v48, %v5779_v58 }
 0x380   :  { %1042 = vmax.xlane.f32.xlu2 %v1041_v25  ;;  %v5783_v25 = vld [vmem:[%s7046_s22 + $0x68] sm:$0xff] }
 0x381   :  { %v5768_v29 = vadd.f32 %v1239_v49, %v1219_v10  ;;  %v1136_v49 = vpop.xlane.xlu2 %1135  ;;  %v1184_v10 = vpop.xlane.xlu0 %1183 }
 0x382   :  { %v1192_v48 = vmul.f32 %v1184_v10, %v5791_v4 }
 0x383   :  { %7054 = vst [vmem:[#allocation102_spill] sm:$0xff] %v5768_v29 }
 0x384   :  { %v1032_v18 = vpop.f32.mrf.mxu3 }
 0x385   :  { %v5770_v19 = vadd.f32 %v1032_v18, %v619_v27  ;;  %v5786_v18 = vld [vmem:[%s7046_s22 + $0x48] sm:$0xff] }
 0x386   :  { %v1088_v9 = vpop.xlane.xlu1 %1087  ;;  %v1144_v20 = vmul.f32 %v1136_v49, %v5786_v18 }
 0x387   :  { %v1044_v12 = vsel %vm574_vm0, %v5770_v19, -inf  ;;  %v1096_v26 = vmul.f32 %v1088_v9, %v5775_v41 }
 0x388   :  { %1045 = vmax.xlane.f32.xlu0 %v1044_v12 }
 0x389   :  { %v1124_v27 = vadd.f32 %v1120_v42, %v1096_v26  ;;  %v1232_v23 = vpop.xlane.xlu0 %1231  ;;  %v1256_v46 = vpop.xlane.xlu2 %1255 }
 0x38a   :  { %v1240_v49 = vmul.f32 %v1232_v23, %v5799_v22 }
 0x38b   :  { %v1148_v52 = vadd.f32 %v1144_v20, %v1124_v27 }
 0x38e   :  { %v1160_v29 = vpop.xlane.xlu1 %1159 }
 0x38f   :  { %v1168_v12 = vmul.f32 %v1160_v29, %v5783_v25  ;;  %v5803_v29 = vld [vmem:[%s7046_s22 + $0xe8] sm:$0xff] }
 0x391   :  { %v1172_v9 = vadd.f32 %v1168_v12, %v1148_v52  ;;  %v1264_v52 = vmul.f32 %v1256_v46, %v5803_v29 }
 0x393   :  { %v1196_v42 = vadd.f32 %v1192_v48, %v1172_v9 }
 0x396   :  { %v1208_v26 = vpop.xlane.xlu1 %1207 }
 0x397   :  { %v1216_v2 = vmul.f32 %v1208_v26, %v5795_v1 }
 0x399   :  { %v1220_v16 = vadd.f32 %v1216_v2, %v1196_v42 }
 0x39b   :  { %v1244_v20 = vadd.f32 %v1240_v49, %v1220_v16 }
 0x39d   :  { %v5806_v27 = vadd.f32 %v1264_v52, %v1244_v20 }
 0x3ab   :  { %v725_v10 = vpop.xlane.xlu2 %724 }
 0x3ac   :  { %v735_v12 = vsub.f32 %v5692_v39, %v725_v10 }
 0x3ae   :  { %v739_v54 = vmul.f32 1.442695, %v735_v12 }
 0x3b0   :  { %4100 = vpow2.f32 %v739_v54  ;;  %v1092_v54 = vsel %vm574_vm0, %v5401_v50, 0.0 }
 0x3b3   :  { %v728_v9 = vpop.xlane.xlu2 %727 }
 0x3b4   :  { %v736_v48 = vsub.f32 %v5698_v44, %v728_v9 }
 0x3b6   :  { %v5810_v26 = vpop.eup %4100  ;;  %v741_v1 = vmul.f32 1.442695, %v736_v48 }
 0x3b7   :  { %v747_v2 = vsel %vm574_vm0, %v5810_v26, 0.0 }
 0x3b8   :  { %4102 = vpow2.f32 %v741_v1  ;;  %748 = vadd.xlane.f32.xlu2 %v747_v2  ;;  %v1116_v1 = vsel %vm574_vm0, %v5404_v51, 0.0 }
 0x3bb   :  { %v731_v23 = vpop.xlane.xlu0 %730 }
 0x3bc   :  { %v737_v16 = vsub.f32 %v5706_v14, %v731_v23 }
 0x3be   :  { %v5815_v46 = vpop.eup %4102  ;;  %v743_v42 = vmul.f32 1.442695, %v737_v16 }
 0x3bf   :  { %v750_v39 = vsel %vm574_vm0, %v5815_v46, 0.0 }
 0x3c0   :  { %4104 = vpow2.f32 %v743_v42  ;;  %1093 = vadd.xlane.f32.xlu2 %v1092_v54  ;;  %751 = vadd.xlane.f32.xlu0 %v750_v39  ;;  %v1140_v54 = vsel %vm574_vm0, %v5419_v56, 0.0  ;;  %v1209_v39 = vsel %vm574_vm0, %v5366_v33, 0.0  ;;  %v1164_v56 = vsel %vm574_vm0, %v5429_v60, 0.0 }
 0x3c1   :  { %v1185_v33 = vsel %vm574_vm0, %v5435_v62, 0.0  ;;  %v807_v60 = vmul.f32 %v5634_v21, %v5735_v13  ;;  %v832_v62 = vmul.f32 %v5626_v15, %v5786_v18  ;;  %v855_v21 = vmul.f32 %v5666_v55, %v5747_v28 }
 0x3c2   :  { %v880_v15 = vmul.f32 %v5674_v36, %v5791_v4  ;;  %v1236_v18 = vsel %vm574_vm0, %v5441_v0, 0.0  ;;  %v879_v55 = vmul.f32 %v5650_v6, %v5751_v3  ;;  %v7058_v0 = vld [vmem:[#allocation89_spill] sm:$0xff]  ;;  %v7059_v3 = vld [vmem:[#allocation100_spill] sm:$0xff] }
 0x3c3   :  { %v734_v20 = vpop.xlane.xlu1 %733 }
 0x3c4   :  { %v738_v51 = vsub.f32 %v5712_v38, %v734_v20  ;;  %v1113_v38 = vsel %vm574_vm0, %v5360_v31, 0.0  ;;  %v1161_v31 = vsel %vm574_vm0, %v5369_v34, 0.0 }
 0x3c6   :  { %v5821_v44 = vpop.eup %4104 }
 0x3c7   :  { %v753_v14 = vsel %vm574_vm0, %v5821_v44, 0.0 }
 0x3c8   :  { %1117 = vadd.xlane.f32.xlu2 %v1116_v1  ;;  %754 = vadd.xlane.f32.xlu0 %v753_v14  ;;  %v1233_v1 = vsel %vm574_vm0, %v5426_v59, 0.0  ;;  %v783_v59 = vmul.f32 %v5622_v40, %v5731_v5  ;;  %v784_v14 = vmul.f32 %v5629_v37, %v5775_v41  ;;  %v831_v40 = vmul.f32 %v5641_v35, %v5741_v24 }
 0x3ca   :  { %v811_v5 = vadd.f32 %v807_v60, %v783_v59  ;;  %v7064_v60 = vld [vmem:[#allocation78_spill] sm:$0xff] }
 0x3dc   :  { %1279 = vrot.lane.b32.xlu0 %v5386_v45, %s4917_s28  ;;  %v745_v45 = vmul.f32 1.442695, %v738_v51  ;;  %v7060_v51 = vld [vmem:[#allocation80_spill] sm:$0xff] }
 0x3e3   :  { %v1037_v50 = vpop.xlane.xlu2 %1036 }
 0x3e4   :  { %v1047_v49 = vsub.f32 %v5724_v53, %v1037_v50  ;;  %v1089_v53 = vsel %vm574_vm0, %v5357_v30, 0.0  ;;  %v1137_v30 = vsel %vm574_vm0, %v5363_v32, 0.0  ;;  %v1257_v32 = vsel %vm574_vm0, %v5432_v61, 0.0 }
 0x3e5   :  { %v1212_v50 = vsel %vm574_vm0, %v5438_v63, 0.0 }
 0x3e6   :  { %v1051_v52 = vmul.f32 1.442695, %v1047_v49  ;;  %v903_v49 = vmul.f32 %v5682_v57, %v5755_v8  ;;  %v927_v57 = vmul.f32 %v7060_v51, %v7059_v3 }
 0x3e8   :  { %4106 = vpow2.f32 %v1051_v52  ;;  %v7057_v52 = vld [vmem:[#allocation79_spill] sm:$0xff] }
 0x3eb   :  { %v1040_v10 = vpop.xlane.xlu2 %1039 }
 0x3ec   :  { %v1048_v12 = vsub.f32 %v5738_v7, %v1040_v10 }
 0x3ee   :  { %v5831_v9 = vpop.eup %4106  ;;  %v1053_v48 = vmul.f32 1.442695, %v1048_v12  ;;  %v928_v12 = vmul.f32 %v7058_v0, %v5799_v22  ;;  %v7062_v22 = vld [vmem:[#allocation82_spill] sm:$0xff] }
 0x3ef   :  { %v1059_v2 = vsel %vm574_vm0, %v5831_v9, 0.0  ;;  %v5965_v0 = vld [vmem:[%s7046_s22 + $0x90] sm:$0xff] }
 0x3f0   :  { %4108 = vpow2.f32 %v1053_v48  ;;  %1060 = vadd.xlane.f32.xlu1 %v1059_v2  ;;  %v5903_v2 = vld [vmem:[%s7046_s22 + $0xe0] sm:$0xff] }
 0x3f1   :  { %4110 = vpow2.f32 %v745_v45 }
 0x3f3   :  { %v1043_v34 = vpop.xlane.xlu2 %1042 }
 0x3f4   :  { %v1049_v61 = vsub.f32 %v5758_v17, %v1043_v34  ;;  %v856_v17 = vmul.f32 %v5647_v47, %v5783_v25 }
 0x3f6   :  { %v5836_v23 = vpop.eup %4108  ;;  %v1055_v13 = vmul.f32 1.442695, %v1049_v61 }
 0x3f7   :  { %v1062_v7 = vsel %vm574_vm0, %v5836_v23, 0.0  ;;  %v5842_v16 = vpop.eup %4110 }
 0x3f8   :  { %1090 = vadd.xlane.f32.xlu1 %v1089_v53  ;;  %1063 = vadd.xlane.f32.xlu2 %v1062_v7  ;;  %v756_v42 = vsel %vm574_vm0, %v5842_v16, 0.0  ;;  %4112 = vpow2.f32 %v1055_v13 }
 0x3fb   :  { %v1046_v41 = vpop.xlane.xlu0 %1045 }
 0x3fc   :  { %v1050_v35 = vsub.f32 %v5770_v19, %v1046_v41  ;;  %v7056_v19 = vld [vmem:[#allocation103_spill] sm:$0xff] }
 0x3fd   :  { %v904_v20 = vmul.f32 %v7057_v52, %v7056_v19 }
 0x3fe   :  { %v1057_v4 = vmul.f32 1.442695, %v1050_v35  ;;  %v5894_v36 = vpop.eup %4112 }
 0x3ff   :  { %v1065_v45 = vsel %vm574_vm0, %v5894_v36, 0.0 }
 0x400   :  { %1114 = vadd.xlane.f32.xlu1 %v1113_v38  ;;  %757 = vadd.xlane.f32.xlu2 %v756_v42  ;;  %v7061_v38 = vld [vmem:[#allocation81_spill] sm:$0xff] }
 0x401   :  { %v951_v42 = vmul.f32 %v7061_v38, %v5903_v2 }
 0x406   :  { %1141 = vadd.xlane.f32.xlu0 %v1140_v54  ;;  %v952_v54 = vmul.f32 %v7062_v22, %v5803_v29  ;;  %v7063_v29 = vld [vmem:[#allocation77_spill] sm:$0xff]  ;;  %v7074_v22 = vld [vmem:[#allocation92_spill] sm:$0xff] }
 0x408   :  { %1138 = vadd.xlane.f32.xlu1 %v1137_v30 }
 0x40e   :  { %1210 = vadd.xlane.f32.xlu0 %v1209_v39 }
 0x410   :  { %1162 = vadd.xlane.f32.xlu1 %v1161_v31 }
 0x416   :  { %1234 = vadd.xlane.f32.xlu0 %v1233_v1 }
 0x418   :  { %1165 = vadd.xlane.f32.xlu1 %v1164_v56  ;;  %1277 = vrot.lane.b32.xlu2 %v5534_v43, %s4917_s28  ;;  %v808_v43 = vmul.f32 %v5639_v11, %v5779_v58  ;;  %v835_v58 = vadd.f32 %v831_v40, %v811_v5  ;;  %v5928_v40 = vld [vmem:[%s7046_s22 + $0x30] sm:$0xff]  ;;  %v5931_v5 = vld [vmem:[%s7046_s22 + $0x18] sm:$0xff] }
 0x41a   :  { %v812_v37 = vadd.f32 %v808_v43, %v784_v14  ;;  %v859_v63 = vadd.f32 %v855_v21, %v835_v58  ;;  %v1260_v43 = vsel %vm574_vm0, %v7064_v60, 0.0  ;;  %v7065_v21 = vld [vmem:[#allocation86_spill] sm:$0xff] }
 0x41b   :  { %v5941_v58 = vld [vmem:[%s7046_s22 + $0x10] sm:$0xff] }
 0x41c   :  { %v836_v11 = vadd.f32 %v832_v62, %v812_v37  ;;  %v883_v25 = vadd.f32 %v879_v55, %v859_v63  ;;  %v5925_v62 = vld [vmem:[%s7046_s22 + $0x38] sm:$0xff] }
 0x41d   :  { %v5934_v37 = vld [vmem:[%s7046_s22 + $0x58] sm:$0xff]  ;;  %v810_v13 = vmul.f32 %v7065_v21, %v5925_v62  ;;  %v5993_v21 = vld [vmem:[%s7046_s22 + $0xd0] sm:$0xff] }
 0x41e   :  { %1258 = vadd.xlane.f32.xlu0 %v1257_v32  ;;  %v860_v28 = vadd.f32 %v856_v17, %v836_v11  ;;  %v907_v10 = vadd.f32 %v903_v49, %v883_v25  ;;  %v5944_v17 = vld [vmem:[%s7046_s22 + $0x50] sm:$0xff]  ;;  %v5947_v63 = vld [vmem:[%s7046_s22 + $0x78] sm:$0xff] }
 0x41f   :  { %v7068_v55 = vld [vmem:[#allocation88_spill] sm:$0xff]  ;;  %v5956_v49 = vld [vmem:[%s7046_s22 + $0x70] sm:$0xff] }
 0x420   :  { %1186 = vadd.xlane.f32.xlu1 %v1185_v33  ;;  %v884_v47 = vadd.f32 %v880_v15, %v860_v28  ;;  %v931_v53 = vadd.f32 %v927_v57, %v907_v10  ;;  %v7066_v15 = vld [vmem:[#allocation85_spill] sm:$0xff]  ;;  %v834_v28 = vmul.f32 %v7068_v55, %v5934_v37  ;;  %v5970_v57 = vld [vmem:[%s7046_s22 + $0x98] sm:$0xff] }
 0x421   :  { %v809_v35 = vmul.f32 %v7066_v15, %v5928_v40 }
 0x422   :  { %v908_v8 = vadd.f32 %v904_v20, %v884_v47  ;;  %v955_v1 = vadd.f32 %v951_v42, %v931_v53  ;;  %v7069_v47 = vld [vmem:[#allocation83_spill] sm:$0xff] }
 0x423   :  { %v785_v25 = vmul.f32 %v7069_v47, %v5941_v58  ;;  %v7071_v20 = vld [vmem:[#allocation91_spill] sm:$0xff] }
 0x424   :  { %v932_v7 = vadd.f32 %v928_v12, %v908_v8  ;;  %v858_v10 = vmul.f32 %v7071_v20, %v5947_v63 }
 0x425   :  { %v813_v12 = vadd.f32 %v809_v35, %v785_v25 }
 0x426   :  { %v956_v56 = vadd.f32 %v952_v54, %v932_v7  ;;  %v882_v54 = vmul.f32 %v7074_v22, %v5970_v57 }
 0x428   :  { %1213 = vadd.xlane.f32.xlu1 %v1212_v50 }
 0x42b   :  { %v749_v24 = vpop.xlane.xlu2 %748 }
 0x42c   :  { %4114 = vrcp.f32 %v749_v24  ;;  %v7067_v24 = vld [vmem:[#allocation84_spill] sm:$0xff] }
 0x430   :  { %1237 = vadd.xlane.f32.xlu1 %v1236_v18  ;;  %v786_v18 = vmul.f32 %v7067_v24, %v5931_v5 }
 0x432   :  { %v4115_v48 = vpop.eup %4114  ;;  %v814_v52 = vadd.f32 %v810_v13, %v786_v18 }
 0x433   :  { %v752_v6 = vpop.xlane.xlu0 %751  ;;  %v763_v30 = vmul.f32 %v4115_v48, %v5810_v26  ;;  %v1188_v26 = vsel %vm574_vm0, %v7063_v29, 0.0  ;;  %v5922_v50 = vpop.xlane.xlu2 %1093 }
 0x434   :  { %4116 = vrcp.f32 %v752_v6  ;;  %v7072_v6 = vld [vmem:[#allocation90_spill] sm:$0xff]  ;;  %v838_v51 = vadd.f32 %v834_v28, %v814_v52 }
 0x435   :  { %4118 = vpow2.f32 %v1057_v4  ;;  %v959_v33 = vadd.f32 %v955_v1, %v763_v30  ;;  %v7070_v4 = vld [vmem:[#allocation87_spill] sm:$0xff]  ;;  %v857_v3 = vmul.f32 %v7072_v6, %v5956_v49 }
 0x436   :  { %v833_v19 = vmul.f32 %v7070_v4, %v5944_v17  ;;  %v862_v48 = vadd.f32 %v858_v10, %v838_v51  ;;  %v5980_v1 = vld [vmem:[%s7046_s22 + $0xb0] sm:$0xff] }
 0x437   :  { %v6006_v52 = vld [vmem:[%s7046_s22 + $0xf0] sm:$0xff] }
 0x438   :  { %1066 = vadd.xlane.f32.xlu1 %v1065_v45  ;;  %v837_v8 = vadd.f32 %v833_v19, %v813_v12  ;;  %v7073_v45 = vld [vmem:[#allocation99_spill] sm:$0xff]  ;;  %v7081_v12 = vld [vmem:[#allocation98_spill] sm:$0xff] }
 0x439   :  { %v881_v53 = vmul.f32 %v7073_v45, %v5965_v0  ;;  %v6003_v19 = vld [vmem:[%s7046_s22 + $0xf8] sm:$0xff] }
 0x43a   :  { %v4117_v39 = vpop.eup %4116  ;;  %v861_v42 = vadd.f32 %v857_v3, %v837_v8  ;;  %v954_v6 = vmul.f32 %v7081_v12, %v6003_v19  ;;  %v7082_v3 = vld [vmem:[#allocation97_spill] sm:$0xff] }
 0x43b   :  { %v5912_v31 = vpop.eup %4118  ;;  %v764_v32 = vmul.f32 %v4117_v39, %v5815_v46  ;;  %v755_v46 = vpop.xlane.xlu0 %754  ;;  %v5977_v39 = vld [vmem:[%s7046_s22 + $0xb8] sm:$0xff]  ;;  %v953_v51 = vmul.f32 %v7082_v3, %v6006_v52 }
 0x43c   :  { %v1068_v59 = vsel %vm574_vm0, %v5912_v31, 0.0  ;;  %v5938_v41 = vpop.xlane.xlu2 %1117 }
 0x43d   :  { %v960_v34 = vadd.f32 %v956_v56, %v764_v32  ;;  %v886_v56 = vadd.f32 %v882_v54, %v862_v48  ;;  %v885_v32 = vadd.f32 %v881_v53, %v861_v42 }
 0x43f   :  { %v963_v14 = vpack.c.bf16 %v960_v34, %v959_v33  ;;  %v7075_v33 = vld [vmem:[#allocation94_spill] sm:$0xff] }
 0x440   :  { %1069 = vadd.xlane.f32.xlu1 %v1068_v59  ;;  %v906_v34 = vmul.f32 %v7075_v33, %v5977_v39  ;;  %v7076_v59 = vld [vmem:[#allocation93_spill] sm:$0xff] }
 0x441   :  { %1189 = vadd.xlane.f32.xlu2 %v1188_v26  ;;  %3763 = vmatmul.msk.bf16.vlgmr.msrb.gmra.mxu2 %vm574_vm0, %v963_v14  ;;  %v905_v29 = vmul.f32 %v7076_v59, %v5980_v1  ;;  %v7077_v26 = vld [vmem:[#allocation101_spill] sm:$0xff] }
 0x442   :  { %v1263_v14 = vmul.f32 %v7077_v26, %v5903_v2  ;;  %v910_v13 = vadd.f32 %v906_v34, %v886_v56  ;;  %v7079_v2 = vld [vmem:[#allocation96_spill] sm:$0xff] }
 0x443   :  { %v3986_v26 = vld [vmem:[#allocation8 + $0x8] sm:$0xff] }
 0x444   :  { %1350 = vmatpush.bf16.msrb.mxu1 %v3986_v26 }
 0x448   :  { %1261 = vadd.xlane.f32.xlu1 %v1260_v43 }
 0x44e   :  { %v1280_v61 = vpop.permute.xlu0 %1279 }
 0x44f   :  { %1295 = vmatpush.bf16.msra.mxu2 %v1280_v61  ;;  %v5990_v61 = vld [vmem:[%s7046_s22 + $0xd8] sm:$0xff] }
 0x450   :  { %v930_v55 = vmul.f32 %v7079_v2, %v5990_v61  ;;  %v1098_v2 = vmul.f32 %v5922_v50, %v5931_v5 }
 0x452   :  { %v934_v20 = vadd.f32 %v930_v55, %v910_v13 }
 0x454   :  { %v958_v42 = vadd.f32 %v954_v6, %v934_v20 }
 0x463   :  { %v1061_v11 = vpop.xlane.xlu1 %1060 }
 0x464   :  { %4120 = vrcp.f32 %v1061_v11  ;;  %v7078_v11 = vld [vmem:[#allocation102_spill] sm:$0xff] }
 0x465   :  { %v1267_v15 = vadd.f32 %v1263_v14, %v7078_v11  ;;  %v1122_v11 = vmul.f32 %v5938_v41, %v5925_v62 }
 0x46a   :  { %v4121_v30 = vpop.eup %4120 }
 0x46b   :  { %v1091_v7 = vpop.xlane.xlu1 %1090  ;;  %v1064_v38 = vpop.xlane.xlu2 %1063  ;;  %v1075_v60 = vmul.f32 %v4121_v30, %v5831_v9  ;;  %v7080_v9 = vld [vmem:[#allocation95_spill] sm:$0xff] }
 0x46c   :  { %4122 = vrcp.f32 %v1064_v38  ;;  %v929_v28 = vmul.f32 %v7080_v9, %v5993_v21  ;;  %v1097_v14 = vmul.f32 %v1091_v7, %v5941_v58 }
 0x46d   :  { %4124 = vrcp.f32 %v755_v46  ;;  %v909_v46 = vadd.f32 %v905_v29, %v885_v32  ;;  %v1271_v47 = vadd.f32 %v1267_v15, %v1075_v60 }
 0x46f   :  { %v933_v10 = vadd.f32 %v929_v28, %v909_v46 }
 0x471   :  { %v957_v38 = vadd.f32 %v953_v51, %v933_v10 }
 0x472   :  { %v4123_v43 = vpop.eup %4122 }
 0x473   :  { %v1076_v35 = vmul.f32 %v4123_v43, %v5836_v23  ;;  %v1115_v24 = vpop.xlane.xlu1 %1114  ;;  %v758_v18 = vpop.xlane.xlu2 %757 }
 0x474   :  { %4126 = vrcp.f32 %v758_v18  ;;  %v4125_v4 = vpop.eup %4124  ;;  %v3985_v18 = vld [vmem:[#allocation8] sm:$0xff] }
 0x475   :  { %v1272_v25 = vadd.f32 %v5806_v27, %v1076_v35  ;;  %v765_v8 = vmul.f32 %v4125_v4, %v5821_v44  ;;  %1351 = vmatpush.bf16.msrb.mxu1 %v3985_v18 }
 0x477   :  { %v1275_v23 = vpack.c.bf16 %v1272_v25, %v1271_v47  ;;  %v961_v22 = vadd.f32 %v957_v38, %v765_v8 }
 0x479   :  { %v1142_v34 = vpop.xlane.xlu0 %1141 }
 0x47a   :  { %v4127_v48 = vpop.eup %4126 }
 0x47b   :  { %v1139_v45 = vpop.xlane.xlu1 %1138  ;;  %v1278_v53 = vpop.permute.xlu2 %1277  ;;  %v766_v27 = vmul.f32 %v4127_v48, %v5842_v16  ;;  %v1121_v16 = vmul.f32 %v1115_v24, %v5928_v40  ;;  %v1146_v40 = vmul.f32 %v1142_v34, %v5934_v37 }
 0x47c   :  { %1296 = vmatpush.bf16.msra.mxu2 %v1278_v53  ;;  %v1145_v60 = vmul.f32 %v1139_v45, %v5944_v17  ;;  %v1126_v17 = vadd.f32 %v1122_v11, %v1098_v2 }
 0x47d   :  { %v962_v54 = vadd.f32 %v958_v42, %v766_v27  ;;  %v1125_v13 = vadd.f32 %v1121_v16, %v1097_v14  ;;  %v4203_v16 = vld [vmem:[%s7026_s12 + $0x8] sm:$0xff] }
 0x47f   :  { %v964_v30 = vpack.c.bf16 %v962_v54, %v961_v22  ;;  %v1149_v15 = vadd.f32 %v1145_v60, %v1125_v13  ;;  %v4090_v54 = vld [vmem:[#allocation10] ss:$0 sm:$0xff] }
 0x481   :  { %3764 = vmatmul.msk.bf16.gmra.mxu2 %vm574_vm0, %v964_v30  ;;  %v1211_v29 = vpop.xlane.xlu0 %1210 }
 0x482   :  { %v1217_v62 = vmul.f32 %v1211_v29, %v5980_v1 }
 0x483   :  { %v1163_v56 = vpop.xlane.xlu1 %1162 }
 0x484   :  { %v1169_v46 = vmul.f32 %v1163_v56, %v5956_v49  ;;  %v1150_v49 = vadd.f32 %v1146_v40, %v1126_v17  ;;  %v4205_v40 = vld [vmem:[%s7026_s12 + $0x20] sm:$0xff] }
 0x486   :  { %v1173_v58 = vadd.f32 %v1169_v46, %v1149_v15  ;;  %v4204_v46 = vld [vmem:[%s7026_s12 + $0x10] sm:$0xff] }
 0x489   :  { %v1235_v24 = vpop.xlane.xlu0 %1234 }
 0x48a   :  { %v1241_v47 = vmul.f32 %v1235_v24, %v5993_v21 }
 0x48b   :  { %v1166_v32 = vpop.xlane.xlu1 %1165 }
 0x48c   :  { %v1170_v7 = vmul.f32 %v1166_v32, %v5947_v63 }
 0x491   :  { %3767 = vmatmul.msk.bf16.vlgmr.msra.gmra.mxu2 %vm574_vm0, %v1275_v23  ;;  %v1259_v4 = vpop.xlane.xlu0 %1258 }
 0x492   :  { %v1265_v6 = vmul.f32 %v1259_v4, %v6006_v52 }
 0x493   :  { %v1187_v33 = vpop.xlane.xlu1 %1186 }
 0x494   :  { %v1193_v35 = vmul.f32 %v1187_v33, %v5965_v0  ;;  %v1174_v0 = vadd.f32 %v1170_v7, %v1150_v49  ;;  %v4202_v33 = vld [vmem:[%s7026_s12] sm:$0xff] }
 0x496   :  { %v1197_v55 = vadd.f32 %v1193_v35, %v1173_v58 }
 0x498   :  { %v1221_v50 = vadd.f32 %v1217_v62, %v1197_v55  ;;  %v4206_v55 = vld [vmem:[%s7026_s12 + $0x18] sm:$0xff]  ;;  %v4207_v62 = vld [vmem:[%s7026_s12 + $0x28] sm:$0xff] }
 0x49a   :  { %v1245_v10 = vadd.f32 %v1241_v47, %v1221_v50 }
 0x49b   :  { %v1214_v44 = vpop.xlane.xlu1 %1213 }
 0x49c   :  { %v1218_v5 = vmul.f32 %v1214_v44, %v5977_v39  ;;  %v1269_v8 = vadd.f32 %v1265_v6, %v1245_v10 }
 0x4a3   :  { %v1238_v59 = vpop.xlane.xlu1 %1237 }
 0x4a4   :  { %v1242_v63 = vmul.f32 %v1238_v59, %v5990_v61 }
 0x4ab   :  { %v1067_v43 = vpop.xlane.xlu1 %1066 }
 0x4ac   :  { %4128 = vrcp.f32 %v1067_v43 }
 0x4b2   :  { %v4129_v25 = vpop.eup %4128 }
 0x4b3   :  { %v1070_v9 = vpop.xlane.xlu1 %1069 }
 0x4b4   :  { %v1190_v41 = vpop.xlane.xlu2 %1189  ;;  %4130 = vrcp.f32 %v1070_v9 }
 0x4b5   :  { %v1194_v28 = vmul.f32 %v1190_v41, %v5970_v57  ;;  %v1077_v57 = vmul.f32 %v4129_v25, %v5894_v36 }
 0x4b7   :  { %v1198_v37 = vadd.f32 %v1194_v28, %v1174_v0  ;;  %v1273_v48 = vadd.f32 %v1269_v8, %v1077_v57 }
 0x4b9   :  { %v1222_v20 = vadd.f32 %v1218_v5, %v1198_v37  ;;  %v4208_v37 = vld [vmem:[%s7026_s12 + $0x30] sm:$0xff] }
 0x4ba   :  { %v4131_v23 = vpop.eup %4130 }
 0x4bb   :  { %v1262_v12 = vpop.xlane.xlu1 %1261  ;;  %v1246_v1 = vadd.f32 %v1242_v63, %v1222_v20  ;;  %v1078_v39 = vmul.f32 %v4131_v23, %v5912_v31  ;;  %v4209_v20 = vld [vmem:[%s7026_s12 + $0x38] sm:$0xff] }
 0x4bc   :  { %v1266_v3 = vmul.f32 %v1262_v12, %v6003_v19  ;;  %v4946_v12 = vmov 64.0  }
 0x4bd   :  { %4132 = vrcp.f32 %v4946_v12 }
 0x4be   :  { %v1270_v51 = vadd.f32 %v1266_v3, %v1246_v1 }
 0x4c0   :  { %v1274_v21 = vadd.f32 %v1270_v51, %v1078_v39 }
 0x4c2   :  { %v1276_v45 = vpack.c.bf16 %v1274_v21, %v1273_v48 }
 0x4c3   :  { %v4133_v1 = vpop.eup %4132 }
 0x4c4   :  { %3768 = vmatmul.msk.bf16.gmra.mxu2 %vm574_vm0, %v1276_v45  ;;  %v986_v61 = vpop.f32.mrf.mxu2  ;;  %v1423_v6 = vmul.f32 64.0, %v4133_v1  ;;  %vm1427_vm1 = vweird.f32 %v4133_v1 }
 0x4c6   :  { %v1424_v3 = vsub.f32 1.0, %v1423_v6 }
 0x4c8   :  { %v1425_v57 = vmul.f32 %v4133_v1, %v1424_v3 }
 0x4ca   :  { %v1426_v39 = vadd.f32 %v4133_v1, %v1425_v57 }
 0x4cc   :  { %v988_v53 = vpop.f32.mrf.mxu2  ;;  %v6081_v8 = vsel %vm1427_vm1, %v4133_v1, %v1426_v39  ;;  %vm1726_vm1 = vcmask 523264  }
 0x4cd   :  { %v1312_v27 = vpack.c.bf16 %v988_v53, %v986_v61 }
 0x4cf   :  { %3777 = vmatmul.msk.bf16.vlgmr.msrb.gmra.mxu1 %vm574_vm0, %v1312_v27 }
 0x504   :  { %v991_v52 = vpop.f32.mrf.mxu2 }
 0x50c   :  { %v993_v38 = vpop.f32.mrf.mxu2 }
 0x50d   :  { %v1313_v19 = vpack.c.bf16 %v993_v38, %v991_v52 }
 0x50f   :  { %3778 = vmatmul.msk.bf16.gmra.mxu1 %vm574_vm0, %v1313_v19 }
 0x514   :  { %v1298_v36 = vpop.f32.mrf.mxu2 }
 0x51c   :  { %v1300_v31 = vpop.f32.mrf.mxu2 }
 0x51d   :  { %v1314_v42 = vpack.c.bf16 %v1300_v31, %v1298_v36 }
 0x51f   :  { %3779 = vmatmul.msk.bf16.gmra.mxu1 %vm574_vm0, %v1314_v42 }
 0x547   :  { %v1303_v22 = vpop.f32.mrf.mxu2 }
 0x54c   :  { %v1353_v30 = vpop.f32.mrf.mxu1 }
 0x54d   :  { %v1354_v56 = vadd.f32 %v4090_v54, %v1353_v30 }
 0x54f   :  { %v1305_v32 = vpop.f32.mrf.mxu2  ;;  %v6041_v34 = vadd.f32 %v4202_v33, %v1354_v56 }
 0x550   :  { %v1315_v44 = vpack.c.bf16 %v1305_v32, %v1303_v22 }
 0x551   :  { %v1390_v59 = vsel %vm574_vm0, %v6041_v34, 0.0 }
 0x552   :  { %3780 = vmatmul.msk.bf16.gmra.mxu1 %vm574_vm0, %v1315_v44  ;;  %1391 = vadd.xlane.f32.xlu0 %v1390_v59 }
 0x554   :  { %v1355_v29 = vpop.f32.mrf.mxu1 }
 0x555   :  { %v1356_v26 = vadd.f32 %v4090_v54, %v1355_v29 }
 0x557   :  { %v6047_v14 = vadd.f32 %v4203_v16, %v1356_v26 }
 0x559   :  { %v1393_v60 = vsel %vm574_vm0, %v6047_v14, 0.0 }
 0x55a   :  { %1394 = vadd.xlane.f32.xlu2 %v1393_v60 }
 0x58c   :  { %v1358_v43 = vpop.f32.mrf.mxu1 }
 0x58d   :  { %v1359_v13 = vadd.f32 %v4090_v54, %v1358_v43 }
 0x58f   :  { %v6052_v11 = vadd.f32 %v4204_v46, %v1359_v13 }
 0x591   :  { %v1396_v15 = vsel %vm574_vm0, %v6052_v11, 0.0 }
 0x592   :  { %1397 = vadd.xlane.f32.xlu2 %v1396_v15 }
 0x594   :  { %v1360_v35 = vpop.f32.mrf.mxu1 }
 0x595   :  { %v1361_v58 = vadd.f32 %v4090_v54, %v1360_v35 }
 0x597   :  { %v6062_v49 = vadd.f32 %v4206_v55, %v1361_v58 }
 0x599   :  { %v1399_v28 = vsel %vm574_vm0, %v6062_v49, 0.0 }
 0x59c   :  { %v1363_v18 = vpop.f32.mrf.mxu1 }
 0x59d   :  { %v1364_v2 = vadd.f32 %v4090_v54, %v1363_v18 }
 0x59f   :  { %v6057_v24 = vadd.f32 %v4205_v40, %v1364_v2 }
 0x5a1   :  { %v1406_v17 = vsel %vm574_vm0, %v6057_v24, 0.0 }
 0x5a2   :  { %1407 = vadd.xlane.f32.xlu1 %v1406_v17 }
 0x5a4   :  { %v1365_v7 = vpop.f32.mrf.mxu1 }
 0x5a5   :  { %v1366_v9 = vadd.f32 %v4090_v54, %v1365_v7 }
 0x5a7   :  { %v6065_v41 = vadd.f32 %v4207_v62, %v1366_v9 }
 0x5a9   :  { %v1409_v0 = vsel %vm574_vm0, %v6065_v41, 0.0 }
 0x5aa   :  { %1410 = vadd.xlane.f32.xlu0 %v1409_v0  ;;  %1400 = vadd.xlane.f32.xlu1 %v1399_v28  ;;  %v4947_v28 = vmov 0  }
 0x5ab   :  { %4086 = vset.pattern.permute.xlu2 %v4947_v28  ;;  %4088 = vset.pattern.permute.xlu0 %v4947_v28 }
 0x5ac   :  { %4087 = vset.pattern.permute.xlu1 %v4947_v28 }
 0x5c5   :  { %v1392_v51 = vpop.xlane.xlu0 %1391 }
 0x5cd   :  { %v1395_v38 = vpop.xlane.xlu2 %1394 }
 0x5cf   :  { %v1368_v50 = vpop.f32.mrf.mxu1 }
 0x5d0   :  { %v1369_v5 = vadd.f32 %v4090_v54, %v1368_v50 }
 0x5d2   :  { %v6072_v47 = vadd.f32 %v4208_v37, %v1369_v5 }
 0x5d4   :  { %v1412_v25 = vsel %vm574_vm0, %v6072_v47, 0.0 }
 0x5d5   :  { %1413 = vadd.xlane.f32.xlu0 %v1412_v25 }
 0x5d7   :  { %v1370_v4 = vpop.f32.mrf.mxu1 }
 0x5d8   :  { %v1371_v63 = vadd.f32 %v4090_v54, %v1370_v4 }
 0x5da   :  { %v6077_v10 = vadd.f32 %v4209_v20, %v1371_v63 }
 0x5dc   :  { %v1415_v23 = vsel %vm574_vm0, %v6077_v10, 0.0 }
 0x5dd   :  { %1416 = vadd.xlane.f32.xlu2 %v1415_v23 }
 0x605   :  { %v1398_v59 = vpop.xlane.xlu2 %1397 }
 0x615   :  { %v1408_v21 = vpop.xlane.xlu1 %1407 }
 0x616   :  { %v1418_v48 = vadd.f32 %v1408_v21, %v1392_v51 }
 0x618   :  { %v6084_v45 = vmul.f32 %v6081_v8, %v1418_v48 }
 0x61a   :  { %v1457_v61 = vsub.f32 %v6057_v24, %v6084_v45  ;;  %v1433_v53 = vsub.f32 %v6041_v34, %v6084_v45 }
 0x61c   :  { %v1461_v27 = vmul.f32 %v1457_v61, %v1457_v61  ;;  %v1437_v52 = vmul.f32 %v1433_v53, %v1433_v53  ;;  %v1381_v61 = vld [vmem:[%s7083_s24] sm:$0xff] }
 0x61d   :  { %v1411_v19 = vpop.xlane.xlu0 %1410  ;;  %v1401_v15 = vpop.xlane.xlu1 %1400 }
 0x61e   :  { %v1419_v36 = vadd.f32 %v1411_v19, %v1395_v38  ;;  %v1465_v31 = vsel %vm574_vm0, %v1461_v27, 0.0  ;;  %v1441_v42 = vsel %vm574_vm0, %v1437_v52, 0.0 }
 0x61f   :  { %1466 = vadd.xlane.f32.xlu2 %v1465_v31  ;;  %1442 = vadd.xlane.f32.xlu1 %v1441_v42 }
 0x620   :  { %v6093_v22 = vmul.f32 %v6081_v8, %v1419_v36  ;;  %v3781_v36 = vld [vmem:[%s7083_s24 + $0x20] sm:$0xff] }
 0x622   :  { %v1458_v54 = vsub.f32 %v6065_v41, %v6093_v22  ;;  %v1434_v30 = vsub.f32 %v6047_v14, %v6093_v22 }
 0x624   :  { %v1462_v56 = vmul.f32 %v1458_v54, %v1458_v54  ;;  %v1438_v32 = vmul.f32 %v1434_v30, %v1434_v30  ;;  %v1382_v30 = vld [vmem:[%s7083_s24 + $0x8] sm:$0xff] }
 0x626   :  { %v1468_v33 = vsel %vm574_vm0, %v1462_v56, 0.0  ;;  %v1444_v44 = vsel %vm574_vm0, %v1438_v32, 0.0 }
 0x627   :  { %1469 = vadd.xlane.f32.xlu1 %v1468_v33  ;;  %1445 = vadd.xlane.f32.xlu0 %v1444_v44  ;;  %v3782_v44 = vld [vmem:[%s7083_s24 + $0x28] sm:$0xff] }
 0x648   :  { %v1414_v29 = vpop.xlane.xlu0 %1413 }
 0x649   :  { %v1420_v26 = vadd.f32 %v1414_v29, %v1398_v59 }
 0x64b   :  { %v6102_v16 = vmul.f32 %v6081_v8, %v1420_v26 }
 0x64d   :  { %v1459_v60 = vsub.f32 %v6072_v47, %v6102_v16  ;;  %v1435_v43 = vsub.f32 %v6052_v11, %v6102_v16 }
 0x64f   :  { %v1463_v13 = vmul.f32 %v1459_v60, %v1459_v60  ;;  %v1439_v46 = vmul.f32 %v1435_v43, %v1435_v43 }
 0x650   :  { %v1417_v35 = vpop.xlane.xlu2 %1416 }
 0x651   :  { %v1421_v18 = vadd.f32 %v1417_v35, %v1401_v15  ;;  %v1471_v2 = vsel %vm574_vm0, %v1463_v13, 0.0  ;;  %v1447_v40 = vsel %vm574_vm0, %v1439_v46, 0.0 }
 0x652   :  { %1472 = vadd.xlane.f32.xlu1 %v1471_v2  ;;  %1448 = vadd.xlane.f32.xlu0 %v1447_v40 }
 0x653   :  { %v6111_v58 = vmul.f32 %v6081_v8, %v1421_v18 }
 0x655   :  { %v1436_v17 = vsub.f32 %v6062_v49, %v6111_v58  ;;  %v1460_v7 = vsub.f32 %v6077_v10, %v6111_v58 }
 0x657   :  { %v1440_v55 = vmul.f32 %v1436_v17, %v1436_v17  ;;  %v1464_v9 = vmul.f32 %v1460_v7, %v1460_v7 }
 0x659   :  { %v1450_v62 = vsel %vm574_vm0, %v1440_v55, 0.0  ;;  %v1474_v0 = vsel %vm574_vm0, %v1464_v9, 0.0 }
 0x65a   :  { %1451 = vadd.xlane.f32.xlu2 %v1450_v62  ;;  %1475 = vadd.xlane.f32.xlu0 %v1474_v0  ;;  %v1383_v0 = vld [vmem:[%s7083_s24 + $0x10] sm:$0xff] }
 0x692   :  { %v1467_v50 = vpop.xlane.xlu2 %1466  ;;  %v1443_v5 = vpop.xlane.xlu1 %1442 }
 0x693   :  { %v1477_v37 = vadd.f32 %v1467_v50, %v1443_v5 }
 0x695   :  { %v1481_v25 = vmul.f32 %v1477_v37, %v6081_v8 }
 0x697   :  { %v1485_v4 = vadd.f32 1e-05, %v1481_v25 }
 0x699   :  { %4134 = vrsqrt.f32 %v1485_v4  ;;  %vm1495_vm3 = vweird.f32 %v1485_v4 }
 0x69a   :  { %v1470_v63 = vpop.xlane.xlu1 %1469  ;;  %v1446_v20 = vpop.xlane.xlu0 %1445 }
 0x69b   :  { %v1478_v23 = vadd.f32 %v1470_v63, %v1446_v20  ;;  %v3783_v20 = vld [vmem:[%s7083_s24 + $0x30] sm:$0xff] }
 0x69d   :  { %v1482_v12 = vmul.f32 %v1478_v23, %v6081_v8  ;;  %v1384_v23 = vld [vmem:[%s7083_s24 + $0x18] sm:$0xff] }
 0x69f   :  { %v4135_v1 = vpop.eup %4134  ;;  %v1486_v6 = vadd.f32 1e-05, %v1482_v12 }
 0x6a0   :  { %v1490_v3 = vmul.f32 %v4135_v1, %v1485_v4  ;;  %vm1496_vm2 = vweird.f32 %v4135_v1 }
 0x6a1   :  { %4136 = vrsqrt.f32 %v1486_v6  ;;  %vm1497_vm4 = vmor %vm1495_vm3, %vm1496_vm2  ;;  %vm1505_vm6 = vweird.f32 %v1486_v6 }
 0x6a2   :  { %v1491_v57 = vmul.f32 %v4135_v1, %v1490_v3 }
 0x6a4   :  { %v1492_v39 = vmul.f32 0.5, %v1491_v57 }
 0x6a6   :  { %v1493_v51 = vsub.f32 1.5, %v1492_v39  ;;  %v3784_v39 = vld [vmem:[%s7083_s24 + $0x38] sm:$0xff] }
 0x6a7   :  { %v4137_v21 = vpop.eup %4136 }
 0x6a8   :  { %v1500_v48 = vmul.f32 %v4137_v21, %v1486_v6  ;;  %v1494_v53 = vmul.f32 %v4135_v1, %v1493_v51  ;;  %vm1506_vm5 = vweird.f32 %v4137_v21 }
 0x6a9   :  { %vm1507_vm7 = vmor %vm1505_vm6, %vm1506_vm5 }
 0x6aa   :  { %v1501_v27 = vmul.f32 %v4137_v21, %v1500_v48  ;;  %v1498_v52 = vsel %vm1497_vm4, %v4135_v1, %v1494_v53  ;;  %v3987_v48 = vld [vmem:[#allocation13] sm:$0xff] }
 0x6ab   :  { %v1529_v38 = vmul.f32 %v1498_v52, %v1381_v61 }
 0x6ac   :  { %v1502_v19 = vmul.f32 0.5, %v1501_v27 }
 0x6ad   :  { %1543 = vperm.xlu2 %4086, %v1529_v38   ;;  %v1533_v31 = vmul.f32 %v1529_v38, %v6084_v45 }
 0x6ae   :  { %v1503_v42 = vsub.f32 1.5, %v1502_v19 }
 0x6af   :  { %v1537_v54 = vsub.f32 %v3781_v36, %v1533_v31 }
 0x6b0   :  { %v1504_v56 = vmul.f32 %v4137_v21, %v1503_v42 }
 0x6b1   :  { %1571 = vperm.xlu0 %4088, %v1537_v54  }
 0x6b2   :  { %v1508_v32 = vsel %vm1507_vm7, %v4137_v21, %v1504_v56  ;;  %v3988_v21 = vld [vmem:[#allocation13 + $0x8] sm:$0xff] }
 0x6b3   :  { %v1530_v33 = vmul.f32 %v1508_v32, %v1382_v30  ;;  %1639 = vmatpush.bf16.msrb.mxu3 %v3988_v21 }
 0x6b5   :  { %1548 = vperm.xlu1 %4087, %v1530_v33   ;;  %v1534_v59 = vmul.f32 %v1530_v33, %v6093_v22 }
 0x6b7   :  { %v1538_v29 = vsub.f32 %v3782_v44, %v1534_v59  ;;  %1640 = vmatpush.bf16.msrb.mxu3 %v3987_v48  ;;  %v3998_v44 = vld [vmem:[#allocation22 + $0x8] sm:$0xff]  ;;  %v3997_v59 = vld [vmem:[#allocation22] sm:$0xff] }
 0x6b9   :  { %1576 = vperm.xlu2 %4086, %v1538_v29  }
 0x6bb   :  { %2174 = vmatpush.bf16.msra.mxu3 %v3998_v44 }
 0x6bf   :  { %2175 = vmatpush.bf16.msra.mxu3 %v3997_v59 }
 0x6c5   :  { %v1473_v26 = vpop.xlane.xlu1 %1472  ;;  %v1449_v60 = vpop.xlane.xlu0 %1448 }
 0x6c6   :  { %v1479_v43 = vadd.f32 %v1473_v26, %v1449_v60 }
 0x6c8   :  { %v1483_v45 = vmul.f32 %v1479_v43, %v6081_v8 }
 0x6ca   :  { %v1487_v13 = vadd.f32 1e-05, %v1483_v45 }
 0x6cc   :  { %4138 = vrsqrt.f32 %v1487_v13  ;;  %vm1515_vm9 = vweird.f32 %v1487_v13 }
 0x6cd   :  { %v1452_v46 = vpop.xlane.xlu2 %1451  ;;  %v1476_v15 = vpop.xlane.xlu0 %1475 }
 0x6ce   :  { %v1480_v35 = vadd.f32 %v1476_v15, %v1452_v46  ;;  %v3845_v46 = vld [vmem:[%s7026_s12 + $0x40] sm:$0xff]  ;;  %v3846_v15 = vld [vmem:[%s7026_s12 + $0x48] sm:$0xff] }
 0x6d0   :  { %v1484_v18 = vmul.f32 %v1480_v35, %v6081_v8  ;;  %v2136_v35 = vpack.c.bf16 %v3846_v15, %v3845_v46  ;;  %v2213_v46 = vld [vmem:[#allocation29 + $0x60] sm:$0xff] }
 0x6d1   :  { %v2209_v15 = vld [vmem:[#allocation29 + $0x40] sm:$0xff] }
 0x6d2   :  { %v4139_v2 = vpop.eup %4138  ;;  %v1488_v40 = vadd.f32 1e-05, %v1484_v18  ;;  %v3848_v18 = vld [vmem:[%s7026_s12 + $0x58] sm:$0xff] }
 0x6d3   :  { %v1510_v17 = vmul.f32 %v4139_v2, %v1487_v13  ;;  %vm1516_vm8 = vweird.f32 %v4139_v2 }
 0x6d4   :  { %4140 = vrsqrt.f32 %v1488_v40  ;;  %vm1517_vm10 = vmor %vm1515_vm9, %vm1516_vm8  ;;  %vm1525_vm12 = vweird.f32 %v1488_v40 }
 0x6d5   :  { %v1511_v22 = vmul.f32 %v4139_v2, %v1510_v17  ;;  %v3990_v17 = vld [vmem:[%s7084_s7 + $0x8] sm:$0xff] }
 0x6d7   :  { %v1512_v7 = vmul.f32 0.5, %v1511_v22  ;;  %v3989_v22 = vld [vmem:[%s7084_s7] sm:$0xff] }
 0x6d9   :  { %v1513_v55 = vsub.f32 1.5, %v1512_v7  ;;  %v3849_v7 = vld [vmem:[%s7026_s12 + $0x60] sm:$0xff] }
 0x6da   :  { %v4141_v9 = vpop.eup %4140 }
 0x6db   :  { %v1520_v62 = vmul.f32 %v4141_v9, %v1488_v40  ;;  %v1514_v28 = vmul.f32 %v4139_v2, %v1513_v55  ;;  %vm1526_vm11 = vweird.f32 %v4141_v9  ;;  %v3850_v55 = vld [vmem:[%s7026_s12 + $0x68] sm:$0xff] }
 0x6dc   :  { %vm1527_vm13 = vmor %vm1525_vm12, %vm1526_vm11 }
 0x6dd   :  { %v1521_v50 = vmul.f32 %v4141_v9, %v1520_v62  ;;  %v1518_v5 = vsel %vm1517_vm10, %v4139_v2, %v1514_v28  ;;  %v3991_v2 = vld [vmem:[%s7084_s7 + $0x10] sm:$0xff] }
 0x6de   :  { %v1531_v37 = vmul.f32 %v1518_v5, %v1383_v0  ;;  %v4091_v0 = vld [vmem:[#allocation14] ss:$0 sm:$0xff]  ;;  %v3852_v5 = vld [vmem:[%s7026_s12 + $0x78] sm:$0xff] }
 0x6df   :  { %v1522_v25 = vmul.f32 0.5, %v1521_v50  ;;  %v3851_v50 = vld [vmem:[%s7026_s12 + $0x70] sm:$0xff] }
 0x6e0   :  { %1553 = vperm.xlu1 %4087, %v1531_v37   ;;  %v1535_v63 = vmul.f32 %v1531_v37, %v6102_v16 }
 0x6e1   :  { %v1523_v4 = vsub.f32 1.5, %v1522_v25 }
 0x6e2   :  { %v1539_v6 = vsub.f32 %v3783_v20, %v1535_v63  ;;  %v2139_v63 = vpack.c.bf16 %v3852_v5, %v3851_v50 }
 0x6e3   :  { %v1524_v12 = vmul.f32 %v4141_v9, %v1523_v4 }
 0x6e5   :  { %v1528_v1 = vsel %vm1527_vm13, %v4141_v9, %v1524_v12  ;;  %v2138_v9 = vpack.c.bf16 %v3850_v55, %v3849_v7  ;;  %v2205_v7 = vld [vmem:[#allocation29 + $0x20] sm:$0xff] }
 0x6e6   :  { %v1532_v3 = vmul.f32 %v1528_v1, %v1384_v23 }
 0x6e8   :  { %1581 = vperm.xlu1 %4087, %v1539_v6   ;;  %1558 = vperm.xlu2 %4086, %v1532_v3   ;;  %v1536_v57 = vmul.f32 %v1532_v3, %v6111_v58 }
 0x6ea   :  { %v1540_v51 = vsub.f32 %v3784_v39, %v1536_v57 }
 0x6f0   :  { %1586 = vperm.xlu2 %4086, %v1540_v51  }
 0x707   :  { %v1544_v16 = vpop.permute.xlu2 %1543 }
 0x708   :  { %v1561_v27 = vmul.f32 %v1544_v16, %v6041_v34 }
 0x713   :  { %v1577_v38 = vpop.permute.xlu2 %1576 }
 0x723   :  { %v1572_v61 = vpop.permute.xlu0 %1571 }
 0x724   :  { %v6137_v19 = vadd.f32 %v1572_v61, %v1561_v27 }
 0x727   :  { %v1549_v53 = vpop.permute.xlu1 %1548 }
 0x728   :  { %v1562_v52 = vmul.f32 %v1549_v53, %v6047_v14  ;;  %v1566_v29 = vmul.f32 %v1549_v53, %v6065_v41 }
 0x72a   :  { %v6139_v36 = vadd.f32 %v1577_v38, %v1562_v52 }
 0x72c   :  { %v1601_v58 = vpack.c.bf16 %v6139_v36, %v6137_v19 }
 0x72e   :  { %3793 = vmatmul.msk.bf16.vlgmr.msrb.gmra.mxu3 %vm574_vm0, %v1601_v58 }
 0x742   :  { %v1559_v31 = vpop.permute.xlu2 %1558 }
 0x743   :  { %v1564_v30 = vmul.f32 %v1559_v31, %v6062_v49  ;;  %v6155_v49 = vadd.f32 %v1577_v38, %v1566_v29  ;;  %v1568_v41 = vmul.f32 %v1559_v31, %v6077_v10  ;;  %v3847_v10 = vld [vmem:[%s7026_s12 + $0x50] sm:$0xff] }
 0x744   :  { %v2137_v40 = vpack.c.bf16 %v3848_v18, %v3847_v10 }
 0x74a   :  { %v1587_v54 = vpop.permute.xlu2 %1586 }
 0x74b   :  { %v6146_v32 = vadd.f32 %v1587_v54, %v1564_v30 }
 0x752   :  { %v1554_v42 = vpop.permute.xlu1 %1553 }
 0x753   :  { %v1563_v56 = vmul.f32 %v1554_v42, %v6052_v11  ;;  %v1565_v11 = vmul.f32 %v1544_v16, %v6057_v24  ;;  %v1567_v43 = vmul.f32 %v1554_v42, %v6072_v47  ;;  %v6166_v24 = vadd.f32 %v1587_v54, %v1568_v41  ;;  %v3992_v47 = vld [vmem:[%s7084_s7 + $0x18] sm:$0xff] }
 0x754   :  { %1743 = vmatpush.bf16.msrb.mxu0 %v3992_v47 }
 0x755   :  { %v6157_v26 = vadd.f32 %v1572_v61, %v1565_v11 }
 0x757   :  { %v1603_v60 = vpack.c.bf16 %v6155_v49, %v6157_v26 }
 0x758   :  { %1744 = vmatpush.bf16.msrb.mxu0 %v3991_v2 }
 0x75a   :  { %v1582_v34 = vpop.permute.xlu1 %1581 }
 0x75b   :  { %v6148_v14 = vadd.f32 %v1582_v34, %v1563_v56  ;;  %v6164_v45 = vadd.f32 %v1582_v34, %v1567_v43  ;;  %v6190_v43 = vld [vmem:[#allocation23] ss:$0 sm:$0xff] }
 0x75c   :  { %1745 = vmatpush.bf16.msrb.mxu0 %v3990_v17 }
 0x75d   :  { %v1602_v33 = vpack.c.bf16 %v6146_v32, %v6148_v14  ;;  %v1604_v13 = vpack.c.bf16 %v6166_v24, %v6164_v45 }
 0x75f   :  { %3794 = vmatmul.msk.bf16.gmra.mxu3 %vm574_vm0, %v1602_v33 }
 0x760   :  { %1746 = vmatpush.bf16.msrb.mxu0 %v3989_v22 }
 0x76f   :  { %3795 = vmatmul.msk.bf16.gmra.mxu3 %vm574_vm0, %v1603_v60 }
 0x77f   :  { %3796 = vmatmul.msk.bf16.gmra.mxu3 %vm574_vm0, %v1604_v13 }
 0x78f   :  { %3861 = vmatmul.msk.bf16.vlgmr.msra.gmra.mxu3 %vm574_vm0, %v2136_v35  ;;  %v2201_v35 = vld [vmem:[#allocation29] sm:$0xff] }
 0x79f   :  { %3862 = vmatmul.msk.bf16.gmra.mxu3 %vm574_vm0, %v2137_v40 }
 0x7af   :  { %3863 = vmatmul.msk.bf16.gmra.mxu3 %vm574_vm0, %v2138_v9  ;;  %v2206_v9 = vld [vmem:[#allocation29 + $0x28] sm:$0xff] }
 0x7b1   :  { %v1642_v62 = vpop.f32.mrf.mxu3 }
 0x7b2   :  { %v1643_v28 = vadd.f32 %v4091_v0, %v1642_v62 }
 0x7b4   :  { %v1670_v25 = vmul.f32 0.01, %v1643_v28  ;;  %vm1662_vm14 = vcmp.ge.f32.partialorder %v1643_v28, 0.0 }
 0x7b6   :  { %v1678_v23 = vsel %vm1662_vm14, %v1643_v28, %v1670_v25 }
 0x7b9   :  { %v1644_v37 = vpop.f32.mrf.mxu3 }
 0x7ba   :  { %v1645_v4 = vadd.f32 %v4091_v0, %v1644_v37  ;;  %v2210_v37 = vld [vmem:[#allocation29 + $0x48] sm:$0xff] }
 0x7bc   :  { %vm1663_vm15 = vcmp.ge.f32.partialorder %v1645_v4, 0.0  ;;  %v1671_v20 = vmul.f32 0.01, %v1645_v4 }
 0x7be   :  { %v1679_v12 = vsel %vm1663_vm15, %v1645_v4, %v1671_v20 }
 0x7bf   :  { %v1694_v1 = vpack.c.bf16 %v1679_v12, %v1678_v23  ;;  %3864 = vmatmul.msk.bf16.gmra.mxu3 %vm574_vm0, %v2139_v63 }
 0x7c1   :  { %3813 = vmatmul.msk.bf16.vlgmr.msrb.gmra.mxu0 %vm1726_vm1, %v1694_v1 }
 0x7e2   :  { %v1647_v6 = vpop.f32.mrf.mxu3 }
 0x7e3   :  { %v1648_v3 = vadd.f32 %v4091_v0, %v1647_v6 }
 0x7e5   :  { %v1672_v39 = vmul.f32 0.01, %v1648_v3  ;;  %vm1664_vm2 = vcmp.ge.f32.partialorder %v1648_v3, 0.0 }
 0x7e7   :  { %v1680_v48 = vsel %vm1664_vm2, %v1648_v3, %v1672_v39 }
 0x7ea   :  { %v1649_v57 = vpop.f32.mrf.mxu3 }
 0x7eb   :  { %v1650_v51 = vadd.f32 %v4091_v0, %v1649_v57 }
 0x7ed   :  { %vm1665_vm3 = vcmp.ge.f32.partialorder %v1650_v51, 0.0  ;;  %v1673_v21 = vmul.f32 0.01, %v1650_v51 }
 0x7ef   :  { %v1681_v16 = vsel %vm1665_vm3, %v1650_v51, %v1673_v21 }
 0x7f0   :  { %v1695_v61 = vpack.c.bf16 %v1681_v16, %v1680_v48  ;;  %v2202_v16 = vld [vmem:[#allocation29 + $0x8] sm:$0xff] }
 0x7f2   :  { %v1652_v53 = vpop.f32.mrf.mxu3  ;;  %3814 = vmatmul.msk.bf16.gmra.mxu0 %vm1726_vm1, %v1695_v61  ;;  %v2214_v61 = vld [vmem:[#allocation29 + $0x68] sm:$0xff] }
 0x7f3   :  { %v1653_v27 = vadd.f32 %v4091_v0, %v1652_v53 }
 0x7f5   :  { %v1674_v38 = vmul.f32 0.01, %v1653_v27  ;;  %vm1666_vm4 = vcmp.ge.f32.partialorder %v1653_v27, 0.0 }
 0x7f7   :  { %v1682_v42 = vsel %vm1666_vm4, %v1653_v27, %v1674_v38 }
 0x7fa   :  { %v1654_v52 = vpop.f32.mrf.mxu3 }
 0x7fb   :  { %v1655_v58 = vadd.f32 %v4091_v0, %v1654_v52 }
 0x7fd   :  { %vm1667_vm5 = vcmp.ge.f32.partialorder %v1655_v58, 0.0  ;;  %v1675_v31 = vmul.f32 0.01, %v1655_v58 }
 0x7ff   :  { %v1683_v54 = vsel %vm1667_vm5, %v1655_v58, %v1675_v31 }
 0x800   :  { %v1696_v30 = vpack.c.bf16 %v1683_v54, %v1682_v42 }
 0x802   :  { %v1657_v56 = vpop.f32.mrf.mxu3  ;;  %3815 = vmatmul.msk.bf16.gmra.mxu0 %vm1726_vm1, %v1696_v30  ;;  %v2203_v30 = vld [vmem:[#allocation29 + $0x10] sm:$0xff] }
 0x803   :  { %v1658_v34 = vadd.f32 %v4091_v0, %v1657_v56  ;;  %v2211_v56 = vld [vmem:[#allocation29 + $0x50] sm:$0xff] }
 0x805   :  { %v1676_v44 = vmul.f32 0.01, %v1658_v34  ;;  %vm1668_vm6 = vcmp.ge.f32.partialorder %v1658_v34, 0.0 }
 0x807   :  { %v1684_v11 = vsel %vm1668_vm6, %v1658_v34, %v1676_v44  ;;  %v6236_v34 = vld [vmem:[#allocation29 + $0x70] sm:$0xff] }
 0x80a   :  { %v1659_v33 = vpop.f32.mrf.mxu3 }
 0x80b   :  { %v1660_v59 = vadd.f32 %v4091_v0, %v1659_v33  ;;  %v6238_v33 = vld [vmem:[#allocation29 + $0x30] sm:$0xff] }
 0x80d   :  { %vm1669_vm7 = vcmp.ge.f32.partialorder %v1660_v59, 0.0  ;;  %v1677_v29 = vmul.f32 0.01, %v1660_v59 }
 0x80f   :  { %v1685_v60 = vsel %vm1669_vm7, %v1660_v59, %v1677_v29 }
 0x810   :  { %v1697_v41 = vpack.c.bf16 %v1685_v60, %v1684_v11 }
 0x812   :  { %3816 = vmatmul.msk.bf16.gmra.mxu0 %vm1726_vm1, %v1697_v41  ;;  %v2177_v13 = vpop.f32.mrf.mxu3 }
 0x813   :  { %v2178_v47 = vadd.f32 %v6190_v43, %v2177_v13 }
 0x815   :  { %v2388_v10 = vmul.f32 %v2213_v46, %v2178_v47  ;;  %v2364_v18 = vmul.f32 %v2209_v15, %v2178_v47  ;;  %v2316_v2 = vmul.f32 %v2201_v35, %v2178_v47  ;;  %v2340_v0 = vmul.f32 %v2205_v7, %v2178_v47 }
 0x817   :  { %v2392_v40 = vsel %vm574_vm0, %v2388_v10, 0.0  ;;  %v2368_v17 = vsel %vm574_vm0, %v2364_v18, 0.0  ;;  %v2320_v22 = vsel %vm574_vm0, %v2316_v2, 0.0  ;;  %v2344_v5 = vsel %vm574_vm0, %v2340_v0, 0.0  ;;  %v2216_v10 = vld [vmem:[#allocation29 + $0x78] sm:$0xff] }
 0x818   :  { %2393 = vadd.xlane.f32.xlu2 %v2392_v40  ;;  %2369 = vadd.xlane.f32.xlu0 %v2368_v17 }
 0x819   :  { %2321 = vadd.xlane.f32.xlu1 %v2320_v22 }
 0x81a   :  { %v2179_v55 = vpop.f32.mrf.mxu3 }
 0x81b   :  { %v2180_v62 = vadd.f32 %v6190_v43, %v2179_v55 }
 0x81d   :  { %v2341_v28 = vmul.f32 %v2206_v9, %v2180_v62  ;;  %v2365_v4 = vmul.f32 %v2210_v37, %v2180_v62  ;;  %v6201_v23 = vpack.c.bf16 %v2180_v62, %v2178_v47  ;;  %v2389_v55 = vmul.f32 %v2214_v61, %v2180_v62 }
 0x81f   :  { %v2347_v50 = vsel %vm574_vm0, %v2341_v28, 0.0  ;;  %v2371_v63 = vsel %vm574_vm0, %v2365_v4, 0.0  ;;  %v2395_v28 = vsel %vm574_vm0, %v2389_v55, 0.0 }
 0x820   :  { %2348 = vadd.xlane.f32.xlu2 %v2347_v50 }
 0x821   :  { %2345 = vadd.xlane.f32.xlu1 %v2344_v5 }
 0x822   :  { %v2182_v25 = vpop.f32.mrf.mxu3 }
 0x823   :  { %v6225_v38 = vadd.f32 %v6190_v43, %v2182_v25 }
 0x825   :  { %v2318_v25 = vmul.f32 %v2203_v30, %v6225_v38 }
 0x827   :  { %v2326_v4 = vsel %vm574_vm0, %v2318_v25, 0.0 }
 0x829   :  { %2372 = vadd.xlane.f32.xlu1 %v2371_v63 }
 0x82a   :  { %v2184_v20 = vpop.f32.mrf.mxu3 }
 0x82b   :  { %v6216_v48 = vadd.f32 %v6190_v43, %v2184_v20 }
 0x82c   :  { %2237 = vrot.lane.b32.xlu0 %v6201_v23, %s4945_s21 }
 0x82d   :  { %v6231_v31 = vpack.c.bf16 %v6216_v48, %v6225_v38 }
 0x832   :  { %v2187_v12 = vpop.f32.mrf.mxu3 }
 0x833   :  { %v2188_v1 = vadd.f32 %v6190_v43, %v2187_v12 }
 0x835   :  { %v6206_v6 = vmul.f32 %v2201_v35, %v2188_v1  ;;  %v6208_v3 = vmul.f32 %v2205_v7, %v2188_v1  ;;  %v6210_v57 = vmul.f32 %v2209_v15, %v2188_v1  ;;  %v6212_v39 = vmul.f32 %v2213_v46, %v2188_v1  ;;  %v2208_v46 = vld [vmem:[#allocation29 + $0x38] sm:$0xff] }
 0x836   :  { %v2212_v15 = vld [vmem:[#allocation29 + $0x58] sm:$0xff]  ;;  %v2343_v20 = vmul.f32 %v2208_v46, %v6216_v48 }
 0x837   :  { %v6255_v35 = vld [vmem:[#allocation29 + $0x18] sm:$0xff] }
 0x838   :  { %v6271_v7 = vld [vmem:[#allocation16] ss:$0 sm:$0xff] }
 0x83a   :  { %v2189_v51 = vpop.f32.mrf.mxu3 }
 0x83b   :  { %v2190_v21 = vadd.f32 %v6190_v43, %v2189_v51 }
 0x83d   :  { %v6218_v53 = vmul.f32 %v2206_v9, %v2190_v21  ;;  %v6220_v27 = vmul.f32 %v2202_v16, %v2190_v21  ;;  %v6222_v52 = vmul.f32 %v2210_v37, %v2190_v21  ;;  %v6227_v58 = vmul.f32 %v2214_v61, %v2190_v21 }
 0x83e   :  { %v6250_v60 = vpack.c.bf16 %v2190_v21, %v2188_v1  ;;  %v1748_v9 = vpop.f32.mrf.mxu0  ;;  %v2366_v61 = vmul.f32 %v2211_v56, %v6225_v38 }
 0x83f   :  { %v1749_v0 = vadd.f32 %v6271_v7, %v1748_v9 }
 0x841   :  { %v6276_v50 = vadd.f32 %v1749_v0, %v6137_v19  ;;  %v2353_v19 = vsel %vm574_vm0, %v2343_v20, 0.0  ;;  %v2391_v0 = vmul.f32 %v2216_v10, %v6216_v48  ;;  %v6326_v20 = vld [vmem:[#allocation31 + $0x60] sm:$0xff] }
 0x842   :  { %2239 = vrot.lane.b32.xlu1 %v6231_v31, %s4945_s21  ;;  %v2192_v42 = vpop.f32.mrf.mxu3 }
 0x843   :  { %v2193_v54 = vadd.f32 %v6190_v43, %v2192_v42  ;;  %v1785_v5 = vsel %vm574_vm0, %v6276_v50, 0.0 }
 0x845   :  { %v6240_v44 = vmul.f32 %v2203_v30, %v2193_v54  ;;  %v6242_v59 = vmul.f32 %v2211_v56, %v2193_v54  ;;  %v6245_v29 = vmul.f32 %v6238_v33, %v2193_v54  ;;  %v6248_v11 = vmul.f32 %v6236_v34, %v2193_v54 }
 0x846   :  { %v1750_v37 = vpop.f32.mrf.mxu0  ;;  %v2374_v30 = vsel %vm574_vm0, %v2366_v61, 0.0 }
 0x84a   :  { %2453 = vrot.lane.b32.xlu1 %v6250_v60, %s4945_s21  ;;  %v2194_v41 = vpop.f32.mrf.mxu3 }
 0x84b   :  { %v2195_v13 = vadd.f32 %v6190_v43, %v2194_v41  ;;  %v2317_v43 = vmul.f32 %v2202_v16, %v2180_v62  ;;  %v1751_v62 = vadd.f32 %v6271_v7, %v1750_v37 }
 0x84d   :  { %v6257_v47 = vpack.c.bf16 %v2195_v13, %v2193_v54  ;;  %v6260_v18 = vmul.f32 %v6255_v35, %v2195_v13  ;;  %v6262_v2 = vmul.f32 %v2208_v46, %v2195_v13  ;;  %v6264_v40 = vmul.f32 %v2212_v15, %v2195_v13 }
 0x84e   :  { %v6266_v17 = vmul.f32 %v2216_v10, %v2195_v13  ;;  %v2323_v22 = vsel %vm574_vm0, %v2317_v43, 0.0  ;;  %v6285_v12 = vadd.f32 %v1751_v62, %v6139_v36 }
 0x84f   :  { %2455 = vrot.lane.b32.xlu2 %v6257_v47, %s4945_s21 }
 0x850   :  { %v1788_v21 = vsel %vm574_vm0, %v6285_v12, 0.0 }
 0x856   :  { %2324 = vadd.xlane.f32.xlu0 %v2323_v22  ;;  %v2390_v22 = vmul.f32 %v6236_v34, %v6225_v38 }
 0x858   :  { %v2398_v9 = vsel %vm574_vm0, %v2390_v22, 0.0 }
 0x85e   :  { %2396 = vadd.xlane.f32.xlu0 %v2395_v28  ;;  %v6316_v28 = vld [vmem:[#allocation31] sm:$0xff] }
 0x866   :  { %1786 = vadd.xlane.f32.xlu0 %v1785_v5  ;;  %v6320_v5 = vld [vmem:[#allocation31 + $0x40] sm:$0xff] }
 0x86e   :  { %2327 = vadd.xlane.f32.xlu0 %v2326_v4 }
 0x86f   :  { %v1753_v63 = vpop.f32.mrf.mxu0 }
 0x870   :  { %v1754_v1 = vadd.f32 %v6271_v7, %v1753_v63  ;;  %v2401_v63 = vsel %vm574_vm0, %v2391_v0, 0.0 }
 0x872   :  { %v6297_v36 = vadd.f32 %v1754_v1, %v6148_v14 }
 0x874   :  { %v1791_v13 = vsel %vm574_vm0, %v6297_v36, 0.0 }
 0x876   :  { %2354 = vadd.xlane.f32.xlu0 %v2353_v19 }
 0x877   :  { %v1755_v51 = vpop.f32.mrf.mxu0 }
 0x878   :  { %v1756_v16 = vadd.f32 %v6271_v7, %v1755_v51  ;;  %1789 = vadd.xlane.f32.xlu2 %v1788_v21 }
 0x87a   :  { %v6294_v42 = vadd.f32 %v1756_v16, %v6146_v32  ;;  %v2367_v32 = vmul.f32 %v2212_v15, %v6216_v48 }
 0x87c   :  { %v1794_v54 = vsel %vm574_vm0, %v6294_v42, 0.0  ;;  %v2377_v43 = vsel %vm574_vm0, %v2367_v32, 0.0 }
 0x87d   :  { %1795 = vadd.xlane.f32.xlu1 %v1794_v54 }
 0x87e   :  { %2375 = vadd.xlane.f32.xlu0 %v2374_v30 }
 0x87f   :  { %v1758_v41 = vpop.f32.mrf.mxu0 }
 0x880   :  { %v1759_v46 = vadd.f32 %v6271_v7, %v1758_v41  ;;  %1792 = vadd.xlane.f32.xlu2 %v1791_v13  ;;  %v2536_v13 = vsel %vm574_vm0, %v6206_v6, 0.0 }
 0x882   :  { %v6307_v56 = vadd.f32 %v1759_v46, %v6157_v26  ;;  %v6318_v26 = vld [vmem:[#allocation31 + $0x20] sm:$0xff] }
 0x884   :  { %v1801_v14 = vsel %vm574_vm0, %v6307_v56, 0.0 }
 0x885   :  { %1802 = vadd.xlane.f32.xlu1 %v1801_v14 }
 0x886   :  { %2378 = vadd.xlane.f32.xlu0 %v2377_v43 }
 0x887   :  { %v1760_v15 = vpop.f32.mrf.mxu0 }
 0x888   :  { %v1761_v4 = vadd.f32 %v6271_v7, %v1760_v15 }
 0x88a   :  { %v6332_v51 = vadd.f32 %v1761_v4, %v6155_v49 }
 0x88b   :  { %v2370_v37 = vpop.xlane.xlu0 %2369  ;;  %v2394_v10 = vpop.xlane.xlu2 %2393 }
 0x88c   :  { %v2322_v55 = vpop.xlane.xlu1 %2321  ;;  %v2380_v19 = vmul.f32 %v2370_v37, %v6320_v5  ;;  %v2404_v21 = vmul.f32 %v2394_v10, %v6326_v20  ;;  %v1804_v54 = vsel %vm574_vm0, %v6332_v51, 0.0 }
 0x88d   :  { %v2332_v62 = vmul.f32 %v2322_v55, %v6316_v28  ;;  %v2563_v55 = vsel %vm574_vm0, %v6218_v53, 0.0 }
 0x88e   :  { %2399 = vadd.xlane.f32.xlu0 %v2398_v9 }
 0x88f   :  { %v1763_v30 = vpop.f32.mrf.mxu0 }
 0x890   :  { %v1764_v41 = vadd.f32 %v6271_v7, %v1763_v30  ;;  %v2539_v30 = vsel %vm574_vm0, %v6220_v27, 0.0 }
 0x892   :  { %v6345_v49 = vadd.f32 %v1764_v41, %v6164_v45  ;;  %v2319_v45 = vmul.f32 %v6255_v35, %v6216_v48  ;;  %v6366_v35 = vld [vmem:[#allocation31 + $0x28] sm:$0xff] }
 0x893   :  { %v2349_v14 = vpop.xlane.xlu2 %2348 }
 0x894   :  { %v2346_v25 = vpop.xlane.xlu1 %2345  ;;  %v1807_v32 = vsel %vm574_vm0, %v6345_v49, 0.0  ;;  %v2329_v4 = vsel %vm574_vm0, %v2319_v45, 0.0 }
 0x895   :  { %v2356_v34 = vmul.f32 %v2346_v25, %v6318_v26 }
 0x896   :  { %2402 = vadd.xlane.f32.xlu0 %v2401_v63  ;;  %v6369_v63 = vld [vmem:[#allocation31 + $0x8] sm:$0xff] }
 0x897   :  { %v2360_v1 = vadd.f32 %v2356_v34, %v2332_v62  ;;  %v1765_v0 = vpop.f32.mrf.mxu0  ;;  %v2342_v62 = vmul.f32 %v6238_v33, %v6225_v38  ;;  %v6373_v38 = vld [vmem:[#allocation31 + $0x48] sm:$0xff]  ;;  %v2357_v33 = vmul.f32 %v2349_v14, %v6366_v35 }
 0x898   :  { %2418 = vrot.lane.b32.xlu2 %v6201_v23, %s4917_s28  ;;  %v1766_v25 = vadd.f32 %v6271_v7, %v1765_v0 }
 0x899   :  { %v2384_v16 = vadd.f32 %v2380_v19, %v2360_v1  ;;  %v2350_v7 = vsel %vm574_vm0, %v2342_v62, 0.0 }
 0x89a   :  { %v6361_v34 = vadd.f32 %v1766_v25, %v6166_v24 }
 0x89b   :  { %v6335_v61 = vadd.f32 %v2404_v21, %v2384_v16  ;;  %v2560_v16 = vsel %vm574_vm0, %v6208_v3, 0.0 }
 0x89c   :  { %v2373_v46 = vpop.xlane.xlu1 %2372  ;;  %v1810_v10 = vsel %vm574_vm0, %v6361_v34, 0.0 }
 0x89d   :  { %v2381_v19 = vmul.f32 %v2373_v46, %v6373_v38  ;;  %v2584_v46 = vsel %vm574_vm0, %v6210_v57, 0.0 }
 0x89e   :  { %2420 = vrot.lane.b32.xlu1 %v6231_v31, %s4917_s28  ;;  %1805 = vadd.xlane.f32.xlu0 %v1804_v54  ;;  %v2238_v9 = vpop.permute.xlu0 %2237  ;;  %v6380_v54 = vld [vmem:[#allocation31 + $0x68] sm:$0xff] }
 0x89f   :  { %v2248_v15 = vsel %vm574_vm0, %v2238_v9, 0 }
 0x8a6   :  { %2537 = vadd.xlane.f32.xlu0 %v2536_v13 }
 0x8a9   :  { %v2456_v6 = vpop.permute.xlu2 %2455 }
 0x8aa   :  { %v2467_v37 = vsel %vm574_vm0, %v2456_v6, 0 }
 0x8ae   :  { %1808 = vadd.xlane.f32.xlu0 %v1807_v32 }
 0x8b4   :  { %v2240_v43 = vpop.permute.xlu1 %2239 }
 0x8b5   :  { %v2251_v22 = vsel %vm574_vm0, %v2240_v43, 0  ;;  %v3994_v43 = vld [vmem:[#allocation17 + $0x8] sm:$0xff] }
 0x8b6   :  { %2259 = vmatpush.bf16.xpose.msra.mxu0 %v2251_v22  ;;  %2564 = vadd.xlane.f32.xlu0 %v2563_v55  ;;  %v3993_v22 = vld [vmem:[#allocation17] sm:$0xff] }
 0x8b7   :  { %2027 = vmatpush.bf16.msrb.mxu2 %v3994_v43 }
 0x8bb   :  { %2028 = vmatpush.bf16.msrb.mxu2 %v3993_v22 }
 0x8bc   :  { %v2454_v53 = vpop.permute.xlu1 %2453 }
 0x8bd   :  { %v2464_v48 = vsel %vm574_vm0, %v2454_v53, 0 }
 0x8be   :  { %2260 = vmatpush.bf16.xpose.msra.mxu0 %v2248_v15 }
 0x8c1   :  { %2330 = vadd.xlane.f32.xlu2 %v2329_v4 }
 0x8c5   :  { %3865 = vmatmul.msk.bf16.vlgmr.msra.gmra.mxu0 %vm574_vm0, %v6201_v23 }
 0x8c6   :  { %2475 = vmatpush.bf16.xpose.msrb.mxu0 %v2467_v37 }
 0x8c8   :  { %2351 = vadd.xlane.f32.xlu1 %v2350_v7 }
 0x8c9   :  { %v2325_v24 = vpop.xlane.xlu0 %2324  ;;  %1811 = vadd.xlane.f32.xlu2 %v1810_v10 }
 0x8ca   :  { %v2333_v23 = vmul.f32 %v2325_v24, %v6369_v63 }
 0x8cc   :  { %v2361_v1 = vadd.f32 %v2357_v33, %v2333_v23 }
 0x8ce   :  { %2476 = vmatpush.bf16.xpose.msrb.mxu0 %v2464_v48  ;;  %v2385_v21 = vadd.f32 %v2381_v19, %v2361_v1 }
 0x8d0   :  { %2561 = vadd.xlane.f32.xlu1 %v2560_v16 }
 0x8d1   :  { %v2397_v41 = vpop.xlane.xlu0 %2396  ;;  %2540 = vadd.xlane.f32.xlu2 %v2539_v30 }
 0x8d2   :  { %v2405_v13 = vmul.f32 %v2397_v41, %v6380_v54 }
 0x8d4   :  { %v6385_v32 = vadd.f32 %v2405_v13, %v2385_v21 }
 0x8d5   :  { %3866 = vmatmul.msk.bf16.gmra.mxu0 %vm574_vm0, %v6231_v31 }
 0x8d9   :  { %2585 = vadd.xlane.f32.xlu2 %v2584_v46  ;;  %v1787_v3 = vpop.xlane.xlu0 %1786 }
 0x8e1   :  { %v6391_v14 = vpop.xlane.xlu0 %2327 }
 0x8e5   :  { %3869 = vmatmul.msk.bf16.vlgmr.msrb.gmra.mxu0 %vm574_vm0, %v6250_v60 }
 0x8e9   :  { %v2355_v27 = vpop.xlane.xlu0 %2354 }
 0x8eb   :  { %v1790_v4 = vpop.xlane.xlu2 %1789 }
 0x8f0   :  { %v6395_v55 = vpop.xlane.xlu1 %1795 }
 0x8f1   :  { %v6397_v9 = vpop.xlane.xlu0 %2375 }
 0x8f3   :  { %v1793_v10 = vpop.xlane.xlu2 %1792 }
 0x8f5   :  { %3870 = vmatmul.msk.bf16.gmra.mxu0 %vm574_vm0, %v6257_v47 }
 0x8f8   :  { %v1803_v57 = vpop.xlane.xlu1 %1802 }
 0x8f9   :  { %v1813_v31 = vadd.f32 %v1803_v57, %v1787_v3  ;;  %v2379_v6 = vpop.xlane.xlu0 %2378 }
 0x8fb   :  { %v6402_v45 = vmul.f32 %v1813_v31, %v6081_v8  ;;  %v2419_v19 = vpop.permute.xlu2 %2418 }
 0x8fd   :  { %v1845_v0 = vsub.f32 %v6307_v56, %v6402_v45  ;;  %v1821_v15 = vsub.f32 %v6276_v50, %v6402_v45 }
 0x8ff   :  { %v1849_v37 = vmul.f32 %v1845_v0, %v1845_v0  ;;  %v1825_v25 = vmul.f32 %v1821_v15, %v1821_v15 }
 0x901   :  { %v2400_v53 = vpop.xlane.xlu0 %2399  ;;  %v1853_v62 = vsel %vm574_vm0, %v1849_v37, 0.0  ;;  %v1829_v48 = vsel %vm574_vm0, %v1825_v25, 0.0 }
 0x902   :  { %1854 = vadd.xlane.f32.xlu2 %v1853_v62  ;;  %1830 = vadd.xlane.f32.xlu1 %v1829_v48  ;;  %v6428_v62 = vld [vmem:[#allocation31 + $0x38] sm:$0xff] }
 0x903   :  { %7085 = vst [vmem:[#allocation103_spill] sm:$0xff] %v6428_v62  ;;  %v6430_v48 = vld [vmem:[#allocation31 + $0x18] sm:$0xff] }
 0x904   :  { %7086 = vst [vmem:[#allocation79_spill] sm:$0xff] %v6430_v48 }
 0x909   :  { %v2403_v7 = vpop.xlane.xlu0 %2402 }
 0x910   :  { %v2421_v24 = vpop.permute.xlu1 %2420 }
 0x911   :  { %2436 = vmatpush.bf16.msra.mxu2 %v2421_v24  ;;  %v1806_v33 = vpop.xlane.xlu0 %1805 }
 0x912   :  { %v1814_v23 = vadd.f32 %v1806_v33, %v1790_v4  ;;  %v2359_v33 = vmul.f32 %v2355_v27, %v6428_v62 }
 0x914   :  { %v6411_v1 = vmul.f32 %v1814_v23, %v6081_v8 }
 0x915   :  { %2437 = vmatpush.bf16.msra.mxu2 %v2419_v19  ;;  %v6436_v19 = vld [vmem:[#allocation31 + $0x78] sm:$0xff] }
 0x916   :  { %v1846_v21 = vsub.f32 %v6332_v51, %v6411_v1  ;;  %v1822_v16 = vsub.f32 %v6285_v12, %v6411_v1  ;;  %7088 = vst [vmem:[#allocation100_spill] sm:$0xff] %v6436_v19 }
 0x918   :  { %v1850_v30 = vmul.f32 %v1846_v21, %v1846_v21  ;;  %v1826_v41 = vmul.f32 %v1822_v16, %v1822_v16 }
 0x919   :  { %v2538_v13 = vpop.xlane.xlu0 %2537 }
 0x91a   :  { %v1856_v46 = vsel %vm574_vm0, %v1850_v30, 0.0  ;;  %v1832_v3 = vsel %vm574_vm0, %v1826_v41, 0.0  ;;  %v6439_v30 = vld [vmem:[#allocation31 + $0x10] sm:$0xff]  ;;  %v2407_v41 = vmul.f32 %v2403_v7, %v6436_v19 }
 0x91b   :  { %1857 = vadd.xlane.f32.xlu1 %v1856_v46  ;;  %1833 = vadd.xlane.f32.xlu0 %v1832_v3  ;;  %7089 = vst [vmem:[#allocation80_spill] sm:$0xff] %v6439_v30  ;;  %v6442_v3 = vld [vmem:[#allocation31 + $0x30] sm:$0xff]  ;;  %v2334_v27 = vmul.f32 %v6391_v14, %v6439_v30 }
 0x921   :  { %v1809_v43 = vpop.xlane.xlu0 %1808 }
 0x922   :  { %v1815_v22 = vadd.f32 %v1809_v43, %v1793_v10  ;;  %v6432_v10 = vld [vmem:[#allocation31 + $0x58] sm:$0xff]  ;;  %v6444_v43 = vld [vmem:[#allocation31 + $0x50] sm:$0xff] }
 0x923   :  { %7087 = vst [vmem:[#allocation89_spill] sm:$0xff] %v6432_v10  ;;  %v2383_v21 = vmul.f32 %v2379_v6, %v6432_v10  ;;  %v6451_v6 = vld [vmem:[#allocation31 + $0x70] sm:$0xff]  ;;  %v2382_v7 = vmul.f32 %v6397_v9, %v6444_v43  ;;  %v2548_v9 = vmul.f32 %v2538_v13, %v6316_v28 }
 0x924   :  { %v6420_v57 = vmul.f32 %v1815_v22, %v6081_v8  ;;  %7090 = vst [vmem:[#allocation81_spill] sm:$0xff] %v6444_v43 }
 0x925   :  { %7091 = vst [vmem:[#allocation82_spill] sm:$0xff] %v6451_v6 }
 0x926   :  { %v1847_v31 = vsub.f32 %v6345_v49, %v6420_v57  ;;  %v1823_v0 = vsub.f32 %v6297_v36, %v6420_v57 }
 0x928   :  { %v1851_v15 = vmul.f32 %v1847_v31, %v1847_v31  ;;  %v1827_v37 = vmul.f32 %v1823_v0, %v1823_v0 }
 0x92a   :  { %v1859_v25 = vsel %vm574_vm0, %v1851_v15, 0.0  ;;  %v1835_v4 = vsel %vm574_vm0, %v1827_v37, 0.0 }
 0x92b   :  { %1860 = vadd.xlane.f32.xlu1 %v1859_v25  ;;  %1836 = vadd.xlane.f32.xlu0 %v1835_v4 }
 0x934   :  { %v2331_v24 = vpop.xlane.xlu2 %2330 }
 0x935   :  { %v2335_v23 = vmul.f32 %v2331_v24, %v6430_v48  ;;  %v2406_v24 = vmul.f32 %v2400_v53, %v6451_v6  ;;  %v6508_v6 = vpop.xlane.xlu0 %2564  ;;  %v3817_v48 = vld [vmem:[%s7092_s19 + $0x20] sm:$0xff] }
 0x937   :  { %v2363_v16 = vadd.f32 %v2359_v33, %v2335_v23 }
 0x939   :  { %v2387_v46 = vadd.f32 %v2383_v21, %v2363_v16 }
 0x93b   :  { %v6446_v22 = vadd.f32 %v2407_v41, %v2387_v46  ;;  %v2352_v31 = vpop.xlane.xlu1 %2351 }
 0x93c   :  { %v2358_v0 = vmul.f32 %v2352_v31, %v6442_v3  ;;  %v1812_v15 = vpop.xlane.xlu2 %1811 }
 0x93d   :  { %v1816_v37 = vadd.f32 %v1812_v15, %v6395_v55  ;;  %v2197_v15 = vld [vmem:[#allocation28] sm:$0xff] }
 0x93e   :  { %v2362_v25 = vadd.f32 %v2358_v0, %v2334_v27 }
 0x93f   :  { %v6457_v4 = vmul.f32 %v1816_v37, %v6081_v8 }
 0x940   :  { %v2386_v33 = vadd.f32 %v2382_v7, %v2362_v25  ;;  %v2198_v7 = vld [vmem:[#allocation28 + $0x8] sm:$0xff] }
 0x941   :  { %v1824_v14 = vsub.f32 %v6294_v42, %v6457_v4  ;;  %v1848_v23 = vsub.f32 %v6361_v34, %v6457_v4 }
 0x942   :  { %v6464_v21 = vadd.f32 %v2406_v24, %v2386_v33  ;;  %v2262_v16 = vpop.f32.mrf.mxu0 }
 0x943   :  { %v2562_v55 = vpop.xlane.xlu1 %2561  ;;  %v1828_v41 = vmul.f32 %v1824_v14, %v1824_v14  ;;  %v1852_v46 = vmul.f32 %v1848_v23, %v1848_v23  ;;  %v6472_v25 = vadd.f32 %v2262_v16, %v2197_v15 }
 0x944   :  { %v2572_v31 = vmul.f32 %v2562_v55, %v6318_v26  ;;  %v6468_v27 = vpop.xlane.xlu2 %2540  ;;  %v2199_v55 = vld [vmem:[#allocation28 + $0x10] sm:$0xff] }
 0x945   :  { %v1838_v53 = vsel %vm574_vm0, %v1828_v41, 0.0  ;;  %v1862_v0 = vsel %vm574_vm0, %v1852_v46, 0.0  ;;  %v2272_v13 = vsel %vm574_vm0, %v6472_v25, -inf }
 0x946   :  { %v2576_v37 = vadd.f32 %v2572_v31, %v2548_v9  ;;  %1839 = vadd.xlane.f32.xlu2 %v1838_v53  ;;  %1863 = vadd.xlane.f32.xlu0 %v1862_v0  ;;  %v2200_v9 = vld [vmem:[#allocation28 + $0x18] sm:$0xff] }
 0x94a   :  { %v2264_v24 = vpop.f32.mrf.mxu0 }
 0x94b   :  { %v6474_v33 = vadd.f32 %v2264_v24, %v2198_v7 }
 0x94c   :  { %v2586_v14 = vpop.xlane.xlu2 %2585 }
 0x94d   :  { %v2596_v28 = vmul.f32 %v2586_v14, %v6320_v5  ;;  %v2275_v26 = vsel %vm574_vm0, %v6474_v33, -inf }
 0x94e   :  { %2276 = vmax.xlane.f32.xlu1 %v2275_v26  ;;  %2273 = vmax.xlane.f32.xlu0 %v2272_v13 }
 0x94f   :  { %v6481_v23 = vadd.f32 %v2596_v28, %v2576_v37 }
 0x952   :  { %v2267_v41 = vpop.f32.mrf.mxu0 }
 0x953   :  { %v6483_v16 = vadd.f32 %v2267_v41, %v2199_v55 }
 0x955   :  { %v2278_v46 = vsel %vm574_vm0, %v6483_v16, -inf }
 0x956   :  { %2279 = vmax.xlane.f32.xlu2 %v2278_v46 }
 0x95a   :  { %v2269_v5 = vpop.f32.mrf.mxu0 }
 0x95b   :  { %v6487_v31 = vadd.f32 %v2269_v5, %v2200_v9 }
 0x95d   :  { %v2281_v53 = vsel %vm574_vm0, %v6487_v31, -inf }
 0x95e   :  { %2282 = vmax.xlane.f32.xlu0 %v2281_v53 }
 0x962   :  { %v2478_v0 = vpop.f32.mrf.mxu0 }
 0x963   :  { %v6491_v24 = vadd.f32 %v2478_v0, %v2197_v15 }
 0x965   :  { %v2488_v37 = vsel %vm574_vm0, %v6491_v24, -inf }
 0x966   :  { %2489 = vmax.xlane.f32.xlu1 %v2488_v37 }
 0x96a   :  { %v2480_v14 = vpop.f32.mrf.mxu0 }
 0x96b   :  { %v6495_v28 = vadd.f32 %v2480_v14, %v2198_v7 }
 0x96d   :  { %v2491_v26 = vsel %vm574_vm0, %v6495_v28, -inf }
 0x96e   :  { %2492 = vmax.xlane.f32.xlu0 %v2491_v26 }
 0x972   :  { %v2483_v13 = vpop.f32.mrf.mxu0 }
 0x973   :  { %v6499_v41 = vadd.f32 %v2483_v13, %v2199_v55 }
 0x975   :  { %v1855_v46 = vpop.xlane.xlu2 %1854  ;;  %v1831_v5 = vpop.xlane.xlu1 %1830  ;;  %v2494_v15 = vsel %vm574_vm0, %v6499_v41, -inf }
 0x976   :  { %v1865_v53 = vadd.f32 %v1855_v46, %v1831_v5  ;;  %2495 = vmax.xlane.f32.xlu1 %v2494_v15 }
 0x978   :  { %v1869_v0 = vmul.f32 %v1865_v53, %v6081_v8  ;;  %v1776_v53 = vld [vmem:[%s7092_s19] sm:$0xff] }
 0x97a   :  { %v1873_v37 = vadd.f32 1e-05, %v1869_v0  ;;  %v2485_v7 = vpop.f32.mrf.mxu0 }
 0x97b   :  { %v6504_v14 = vadd.f32 %v2485_v7, %v2200_v9 }
 0x97c   :  { %4142 = vrsqrt.f32 %v1873_v37  ;;  %vm1883_vm9 = vweird.f32 %v1873_v37 }
 0x97d   :  { %v2497_v26 = vsel %vm574_vm0, %v6504_v14, -inf }
 0x97e   :  { %2498 = vmax.xlane.f32.xlu0 %v2497_v26 }
 0x982   :  { %v4143_v55 = vpop.eup %4142 }
 0x983   :  { %v1878_v13 = vmul.f32 %v4143_v55, %v1873_v37  ;;  %vm1884_vm8 = vweird.f32 %v4143_v55 }
 0x984   :  { %vm1885_vm10 = vmor %vm1883_vm9, %vm1884_vm8 }
 0x985   :  { %v1879_v19 = vmul.f32 %v4143_v55, %v1878_v13 }
 0x987   :  { %v1880_v46 = vmul.f32 0.5, %v1879_v19 }
 0x989   :  { %v1881_v5 = vsub.f32 1.5, %v1880_v46 }
 0x98b   :  { %v1882_v15 = vmul.f32 %v4143_v55, %v1881_v5 }
 0x98d   :  { %v1886_v9 = vsel %vm1885_vm10, %v4143_v55, %v1882_v15 }
 0x98e   :  { %v1858_v0 = vpop.xlane.xlu1 %1857  ;;  %v1834_v7 = vpop.xlane.xlu0 %1833  ;;  %v1917_v10 = vmul.f32 %v1886_v9, %v1776_v53 }
 0x98f   :  { %v1866_v43 = vadd.f32 %v1858_v0, %v1834_v7  ;;  %v3818_v7 = vld [vmem:[%s7092_s19 + $0x28] sm:$0xff] }
 0x990   :  { %1931 = vperm.xlu2 %4086, %v1917_v10   ;;  %v1921_v26 = vmul.f32 %v1917_v10, %v6402_v45 }
 0x991   :  { %v1870_v13 = vmul.f32 %v1866_v43, %v6081_v8 }
 0x992   :  { %v1925_v62 = vsub.f32 %v3817_v48, %v1921_v26  ;;  %v1777_v48 = vld [vmem:[%s7092_s19 + $0x8] sm:$0xff] }
 0x993   :  { %v1874_v30 = vadd.f32 1e-05, %v1870_v13 }
 0x994   :  { %1959 = vperm.xlu0 %4088, %v1925_v62  }
 0x995   :  { %4144 = vrsqrt.f32 %v1874_v30  ;;  %vm1893_vm12 = vweird.f32 %v1874_v30 }
 0x99b   :  { %v4145_v19 = vpop.eup %4144 }
 0x99c   :  { %v1888_v37 = vmul.f32 %v4145_v19, %v1874_v30  ;;  %vm1894_vm11 = vweird.f32 %v4145_v19 }
 0x99d   :  { %vm1895_vm13 = vmor %vm1893_vm12, %vm1894_vm11 }
 0x99e   :  { %v1889_v46 = vmul.f32 %v4145_v19, %v1888_v37  ;;  %v1861_v55 = vpop.xlane.xlu1 %1860  ;;  %v1837_v5 = vpop.xlane.xlu0 %1836 }
 0x99f   :  { %v1867_v15 = vadd.f32 %v1861_v55, %v1837_v5 }
 0x9a0   :  { %v1890_v53 = vmul.f32 0.5, %v1889_v46 }
 0x9a1   :  { %v1871_v9 = vmul.f32 %v1867_v15, %v6081_v8 }
 0x9a2   :  { %v1891_v0 = vsub.f32 1.5, %v1890_v53  ;;  %v1778_v53 = vld [vmem:[%s7092_s19 + $0x10] sm:$0xff] }
 0x9a3   :  { %v1875_v45 = vadd.f32 1e-05, %v1871_v9 }
 0x9a4   :  { %v1892_v10 = vmul.f32 %v4145_v19, %v1891_v0 }
 0x9a5   :  { %4146 = vrsqrt.f32 %v1875_v45  ;;  %vm1903_vm15 = vweird.f32 %v1875_v45 }
 0x9a6   :  { %v1896_v62 = vsel %vm1895_vm13, %v4145_v19, %v1892_v10 }
 0x9a7   :  { %v1918_v43 = vmul.f32 %v1896_v62, %v1777_v48 }
 0x9a9   :  { %1936 = vperm.xlu1 %4087, %v1918_v43   ;;  %v1922_v26 = vmul.f32 %v1918_v43, %v6411_v1  ;;  %v3819_v43 = vld [vmem:[%s7092_s19 + $0x30] sm:$0xff] }
 0x9ab   :  { %v4147_v13 = vpop.eup %4146  ;;  %v1926_v37 = vsub.f32 %v3818_v7, %v1922_v26  ;;  %v2608_v7 = vsel %vm574_vm0, %v6212_v39, 0.0 }
 0x9ac   :  { %v1898_v46 = vmul.f32 %v4147_v13, %v1875_v45  ;;  %vm1904_vm14 = vweird.f32 %v4147_v13 }
 0x9ad   :  { %1964 = vperm.xlu2 %4086, %v1926_v37   ;;  %vm1905_vm2 = vmor %vm1903_vm15, %vm1904_vm14 }
 0x9ae   :  { %v1899_v55 = vmul.f32 %v4147_v13, %v1898_v46 }
 0x9b0   :  { %v1900_v5 = vmul.f32 0.5, %v1899_v55 }
 0x9b2   :  { %v1901_v15 = vsub.f32 1.5, %v1900_v5 }
 0x9b4   :  { %v1902_v30 = vmul.f32 %v4147_v13, %v1901_v15 }
 0x9b6   :  { %v1906_v9 = vsel %vm1905_vm2, %v4147_v13, %v1902_v30 }
 0x9b7   :  { %v1919_v19 = vmul.f32 %v1906_v9, %v1778_v53 }
 0x9b9   :  { %v1840_v0 = vpop.xlane.xlu2 %1839  ;;  %1941 = vperm.xlu2 %4086, %v1919_v19   ;;  %v1864_v10 = vpop.xlane.xlu0 %1863  ;;  %v1923_v1 = vmul.f32 %v1919_v19, %v6420_v57 }
 0x9ba   :  { %v1868_v48 = vadd.f32 %v1864_v10, %v1840_v0 }
 0x9bb   :  { %v1927_v37 = vsub.f32 %v3819_v43, %v1923_v1 }
 0x9bc   :  { %v1872_v62 = vmul.f32 %v1868_v48, %v6081_v8 }
 0x9be   :  { %v1876_v26 = vadd.f32 1e-05, %v1872_v62  ;;  %2609 = vadd.xlane.f32.xlu0 %v2608_v7  ;;  %v1779_v62 = vld [vmem:[%s7092_s19 + $0x18] sm:$0xff]  ;;  %v2587_v7 = vsel %vm574_vm0, %v6222_v52, 0.0 }
 0x9c0   :  { %4148 = vrsqrt.f32 %v1876_v26  ;;  %vm1913_vm4 = vweird.f32 %v1876_v26 }
 0x9c1   :  { %v2277_v45 = vpop.xlane.xlu1 %2276  ;;  %1969 = vperm.xlu2 %4086, %v1927_v37   ;;  %v2274_v5 = vpop.xlane.xlu0 %2273 }
 0x9c2   :  { %v2285_v13 = vsub.f32 %v6474_v33, %v2277_v45  ;;  %v2284_v30 = vsub.f32 %v6472_v25, %v2274_v5 }
 0x9c4   :  { %v2290_v46 = vmul.f32 1.442695, %v2285_v13  ;;  %v2288_v48 = vmul.f32 1.442695, %v2284_v30 }
 0x9c6   :  { %v4149_v55 = vpop.eup %4148  ;;  %4150 = vpow2.f32 %v2290_v46 }
 0x9c7   :  { %v1908_v15 = vmul.f32 %v4149_v55, %v1876_v26  ;;  %vm1914_vm3 = vweird.f32 %v4149_v55 }
 0x9c8   :  { %vm1915_vm5 = vmor %vm1913_vm4, %vm1914_vm3 }
 0x9c9   :  { %v1909_v57 = vmul.f32 %v4149_v55, %v1908_v15  ;;  %v2280_v53 = vpop.xlane.xlu2 %2279 }
 0x9ca   :  { %v2286_v39 = vsub.f32 %v6483_v16, %v2280_v53 }
 0x9cb   :  { %v1910_v9 = vmul.f32 0.5, %v1909_v57 }
 0x9cc   :  { %v6527_v19 = vpop.eup %4150  ;;  %v2292_v0 = vmul.f32 1.442695, %v2286_v39 }
 0x9cd   :  { %v1911_v10 = vsub.f32 1.5, %v1910_v9  ;;  %v2299_v33 = vsel %vm574_vm0, %v6527_v19, 0.0 }
 0x9ce   :  { %4152 = vpow2.f32 %v2292_v0  ;;  %2300 = vadd.xlane.f32.xlu0 %v2299_v33  ;;  %v2611_v33 = vsel %vm574_vm0, %v6227_v58, 0.0 }
 0x9cf   :  { %v1912_v1 = vmul.f32 %v4149_v55, %v1911_v10  ;;  %4154 = vpow2.f32 %v2288_v48 }
 0x9d1   :  { %v2283_v25 = vpop.xlane.xlu0 %2282  ;;  %v1916_v16 = vsel %vm1915_vm5, %v4149_v55, %v1912_v1  ;;  %v3820_v55 = vld [vmem:[%s7092_s19 + $0x38] sm:$0xff] }
 0x9d2   :  { %v2287_v43 = vsub.f32 %v6487_v31, %v2283_v25  ;;  %v1920_v37 = vmul.f32 %v1916_v16, %v1779_v62 }
 0x9d3   :  { %2588 = vadd.xlane.f32.xlu1 %v2587_v7  ;;  %v2542_v7 = vsel %vm574_vm0, %v6240_v44, 0.0 }
 0x9d4   :  { %v6535_v45 = vpop.eup %4152  ;;  %v2294_v13 = vmul.f32 1.442695, %v2287_v43  ;;  %1946 = vperm.xlu2 %4086, %v1920_v37   ;;  %v1924_v46 = vmul.f32 %v1920_v37, %v6457_v4 }
 0x9d5   :  { %v2302_v26 = vsel %vm574_vm0, %v6535_v45, 0.0  ;;  %v6540_v5 = vpop.eup %4154 }
 0x9d6   :  { %4156 = vpow2.f32 %v2294_v13  ;;  %2303 = vadd.xlane.f32.xlu0 %v2302_v26  ;;  %v2296_v31 = vsel %vm574_vm0, %v6540_v5, 0.0  ;;  %v1928_v52 = vsub.f32 %v3820_v55, %v1924_v46  ;;  %v2569_v26 = vsel %vm574_vm0, %v6262_v2, 0.0 }
 0x9d7   :  { %v2566_v2 = vsel %vm574_vm0, %v6245_v29, 0.0 }
 0x9d9   :  { %v2490_v0 = vpop.xlane.xlu1 %2489 }
 0x9da   :  { %v2500_v10 = vsub.f32 %v6491_v24, %v2490_v0  ;;  %v2545_v24 = vsel %vm574_vm0, %v6260_v18, 0.0  ;;  %v2590_v18 = vsel %vm574_vm0, %v6242_v59, 0.0  ;;  %v2614_v59 = vsel %vm574_vm0, %v6248_v11, 0.0 }
 0x9db   :  { %2297 = vadd.xlane.f32.xlu1 %v2296_v31 }
 0x9dc   :  { %v6545_v15 = vpop.eup %4156  ;;  %1974 = vperm.xlu2 %4086, %v1928_v52   ;;  %v2504_v48 = vmul.f32 1.442695, %v2500_v10 }
 0x9dd   :  { %v2305_v57 = vsel %vm574_vm0, %v6545_v15, 0.0 }
 0x9de   :  { %2306 = vadd.xlane.f32.xlu0 %v2305_v57 }
 0x9e1   :  { %v2493_v30 = vpop.xlane.xlu0 %2492 }
 0x9e2   :  { %v2501_v53 = vsub.f32 %v6495_v28, %v2493_v30 }
 0x9e4   :  { %v2506_v39 = vmul.f32 1.442695, %v2501_v53 }
 0x9e6   :  { %4158 = vpow2.f32 %v2506_v39 }
 0x9e7   :  { %4160 = vpow2.f32 %v2504_v48 }
 0x9ea   :  { %v1932_v1 = vpop.permute.xlu2 %1931 }
 0x9ec   :  { %v6550_v4 = vpop.eup %4158 }
 0x9ed   :  { %v2515_v9 = vsel %vm574_vm0, %v6550_v4, 0.0  ;;  %v6561_v28 = vpop.eup %4160 }
 0x9ee   :  { %2516 = vadd.xlane.f32.xlu1 %v2515_v9  ;;  %v2512_v62 = vsel %vm574_vm0, %v6561_v28, 0.0 }
 0x9f1   :  { %v2499_v25 = vpop.xlane.xlu0 %2498 }
 0x9f2   :  { %2634 = vrot.lane.b32.xlu0 %v6250_v60, %s4917_s28  ;;  %v2496_v60 = vpop.xlane.xlu1 %2495  ;;  %v2503_v30 = vsub.f32 %v6504_v14, %v2499_v25 }
 0xa05   :  { %2612 = vadd.xlane.f32.xlu2 %v2611_v33 }
 0xa06   :  { %v1960_v43 = vpop.permute.xlu0 %1959 }
 0xa07   :  { %2636 = vrot.lane.b32.xlu1 %v6257_v47, %s4917_s28  ;;  %v1965_v16 = vpop.permute.xlu2 %1964  ;;  %v1949_v47 = vmul.f32 %v1932_v1, %v6276_v50  ;;  %v2502_v50 = vsub.f32 %v6499_v41, %v2496_v60  ;;  %s7100_s28 = sld [smem:[#allocation57_spill]] }
 0xa09   :  { %v1977_v46 = vadd.f32 %v1960_v43, %v1949_v47  ;;  %v2508_v57 = vmul.f32 1.442695, %v2502_v50 }
 0xa0b   :  { %4162 = vpow2.f32 %v2508_v57 }
 0xa0d   :  { %2513 = vadd.xlane.f32.xlu2 %v2512_v62  ;;  %v1953_v62 = vmul.f32 %v1932_v1, %v6307_v56 }
 0xa11   :  { %v6586_v10 = vpop.eup %4162 }
 0xa12   :  { %v2518_v14 = vsel %vm574_vm0, %v6586_v10, 0.0 }
 0xa13   :  { %v1942_v37 = vpop.permute.xlu2 %1941 }
 0xa14   :  { %v1951_v53 = vmul.f32 %v1942_v37, %v6297_v36 }
 0xa15   :  { %2546 = vadd.xlane.f32.xlu2 %v2545_v24  ;;  %v1981_v24 = vadd.f32 %v1960_v43, %v1953_v62 }
 0xa1b   :  { %v1937_v58 = vpop.permute.xlu1 %1936  ;;  %v1970_v44 = vpop.permute.xlu2 %1969 }
 0xa1c   :  { %v1950_v13 = vmul.f32 %v1937_v58, %v6285_v12  ;;  %2543 = vadd.xlane.f32.xlu0 %v2542_v7  ;;  %v2593_v12 = vsel %vm574_vm0, %v6264_v40, 0.0  ;;  %v2510_v40 = vmul.f32 1.442695, %v2503_v30  ;;  %v1979_v9 = vadd.f32 %v1970_v44, %v1951_v53 }
 0xa1d   :  { %2570 = vadd.xlane.f32.xlu2 %v2569_v26 }
 0xa1e   :  { %v1978_v55 = vadd.f32 %v1965_v16, %v1950_v13  ;;  %4164 = vpow2.f32 %v2510_v40  ;;  %v2617_v13 = vsel %vm574_vm0, %v6266_v17, 0.0 }
 0xa20   :  { %v1989_v31 = vpack.c.bf16 %v1978_v55, %v1977_v46  ;;  %v1955_v46 = vmul.f32 %v1942_v37, %v6345_v49 }
 0xa22   :  { %3829 = vmatmul.msk.bf16.vlgmr.msrb.gmra.mxu2 %vm574_vm0, %v1989_v31 }
 0xa24   :  { %v6591_v11 = vpop.eup %4164 }
 0xa25   :  { %2591 = vadd.xlane.f32.xlu2 %v2590_v18  ;;  %v2521_v33 = vsel %vm574_vm0, %v6591_v11, 0.0  ;;  %v1983_v18 = vadd.f32 %v1970_v44, %v1955_v46  ;;  %v7096_v46 = vld [vmem:[#allocation81_spill] sm:$0xff] }
 0xa2d   :  { %2594 = vadd.xlane.f32.xlu2 %v2593_v12 }
 0xa2e   :  { %v1947_v52 = vpop.permute.xlu2 %1946 }
 0xa2f   :  { %v1952_v41 = vmul.f32 %v1947_v52, %v6294_v42  ;;  %v1954_v42 = vmul.f32 %v1937_v58, %v6332_v51  ;;  %v1956_v56 = vmul.f32 %v1947_v52, %v6361_v34 }
 0xa31   :  { %2567 = vadd.xlane.f32.xlu1 %v2566_v2  ;;  %v2610_v48 = vpop.xlane.xlu0 %2609  ;;  %v1982_v60 = vadd.f32 %v1965_v16, %v1954_v42 }
 0xa32   :  { %v2620_v53 = vmul.f32 %v2610_v48, %v6326_v20  ;;  %v3995_v20 = vld [vmem:[#allocation20] sm:$0xff] }
 0xa33   :  { %v1991_v47 = vpack.c.bf16 %v1982_v60, %v1981_v24 }
 0xa35   :  { %2615 = vadd.xlane.f32.xlu2 %v2614_v59 }
 0xa36   :  { %v1975_v39 = vpop.permute.xlu2 %1974 }
 0xa37   :  { %v1980_v0 = vadd.f32 %v1975_v39, %v1952_v41  ;;  %v1984_v55 = vadd.f32 %v1975_v39, %v1956_v56 }
 0xa39   :  { %v1990_v29 = vpack.c.bf16 %v1980_v0, %v1979_v9  ;;  %v1992_v2 = vpack.c.bf16 %v1984_v55, %v1983_v18 }
 0xa3b   :  { %3830 = vmatmul.msk.bf16.gmra.mxu2 %vm574_vm0, %v1990_v29  ;;  %v3996_v29 = vld [vmem:[#allocation20 + $0x8] sm:$0xff] }
 0xa3c   :  { %2088 = vmatpush.bf16.msra.mxu1 %v3996_v29 }
 0xa3d   :  { %2519 = vadd.xlane.f32.xlu2 %v2518_v14 }
 0xa40   :  { %2089 = vmatpush.bf16.msra.mxu1 %v3995_v20 }
 0xa41   :  { %v2301_v36 = vpop.xlane.xlu0 %2300 }
 0xa42   :  { %4166 = vrcp.f32 %v2301_v36 }
 0xa45   :  { %2522 = vadd.xlane.f32.xlu2 %v2521_v33 }
 0xa46   :  { %v2589_v25 = vpop.xlane.xlu1 %2588 }
 0xa48   :  { %v4167_v58 = vpop.eup %4166 }
 0xa49   :  { %v2304_v7 = vpop.xlane.xlu0 %2303  ;;  %v2313_v16 = vmul.f32 %v4167_v58, %v6527_v19 }
 0xa4a   :  { %4168 = vrcp.f32 %v2304_v7 }
 0xa4b   :  { %3831 = vmatmul.msk.bf16.gmra.mxu2 %vm574_vm0, %v1991_v47  ;;  %v2413_v12 = vadd.f32 %v6385_v32, %v2313_v16  ;;  %v2549_v32 = vmul.f32 %v6468_v27, %v6369_v63  ;;  %v2624_v63 = vadd.f32 %v2620_v53, %v6481_v23  ;;  %v4094_v23 = vld [vmem:[#allocation19] ss:$0 sm:$0xff]  ;;  %v7095_v16 = vld [vmem:[#allocation79_spill] sm:$0xff] }
 0xa4d   :  { %2618 = vadd.xlane.f32.xlu2 %v2617_v13 }
 0xa4e   :  { %v2298_v51 = vpop.xlane.xlu1 %2297 }
 0xa4f   :  { %4170 = vrcp.f32 %v2298_v51  ;;  %v7093_v51 = vld [vmem:[#allocation80_spill] sm:$0xff] }
 0xa50   :  { %v4169_v1 = vpop.eup %4168 }
 0xa51   :  { %v2307_v26 = vpop.xlane.xlu0 %2306  ;;  %v2314_v17 = vmul.f32 %v4169_v1, %v6535_v45 }
 0xa52   :  { %4172 = vrcp.f32 %v2307_v26  ;;  %v7094_v26 = vld [vmem:[#allocation103_spill] sm:$0xff] }
 0xa53   :  { %v2414_v19 = vadd.f32 %v6464_v21, %v2314_v17  ;;  %v2573_v21 = vmul.f32 %v6508_v6, %v6366_v35 }
 0xa55   :  { %v4171_v43 = vpop.eup %4170  ;;  %v2577_v30 = vadd.f32 %v2573_v21, %v2549_v32 }
 0xa56   :  { %v2312_v31 = vmul.f32 %v4171_v43, %v6540_v5 }
 0xa58   :  { %v4173_v50 = vpop.eup %4172  ;;  %v2412_v57 = vadd.f32 %v6335_v61, %v2312_v31  ;;  %v7097_v31 = vld [vmem:[#allocation89_spill] sm:$0xff] }
 0xa59   :  { %v2315_v34 = vmul.f32 %v4173_v50, %v6545_v15 }
 0xa5a   :  { %v2416_v52 = vpack.c.bf16 %v2413_v12, %v2412_v57 }
 0xa5b   :  { %3832 = vmatmul.msk.bf16.gmra.mxu2 %vm574_vm0, %v1992_v2  ;;  %v2415_v49 = vadd.f32 %v6446_v22, %v2315_v34  ;;  %v2597_v22 = vmul.f32 %v2589_v25, %v6373_v38  ;;  %v7098_v2 = vld [vmem:[#allocation82_spill] sm:$0xff] }
 0xa5d   :  { %v2417_v37 = vpack.c.bf16 %v2415_v49, %v2414_v19  ;;  %v2601_v41 = vadd.f32 %v2597_v22, %v2577_v30 }
 0xa61   :  { %v2517_v5 = vpop.xlane.xlu1 %2516 }
 0xa62   :  { %4174 = vrcp.f32 %v2517_v5 }
 0xa64   :  { %v2635_v61 = vpop.permute.xlu0 %2634 }
 0xa68   :  { %v4175_v39 = vpop.eup %4174 }
 0xa69   :  { %v2529_v27 = vmul.f32 %v4175_v39, %v6550_v4  ;;  %v4000_v39 = vld [vmem:[#allocation25 + $0x8] sm:$0xff] }
 0xa6a   :  { %2707 = vmatpush.bf16.msrb.mxu1 %v4000_v39 }
 0xa6b   :  { %3867 = vmatmul.msk.bf16.vlgmr.msra.gmra.mxu2 %vm574_vm0, %v2416_v52 }
 0xa78   :  { %v2613_v45 = vpop.xlane.xlu2 %2612 }
 0xa79   :  { %v2637_v44 = vpop.permute.xlu1 %2636  ;;  %v2621_v59 = vmul.f32 %v2613_v45, %v6380_v54 }
 0xa7a   :  { %2652 = vmatpush.bf16.msrb.mxu2 %v2637_v44 }
 0xa7b   :  { %3868 = vmatmul.msk.bf16.gmra.mxu2 %vm574_vm0, %v2417_v37  ;;  %v2625_v40 = vadd.f32 %v2621_v59, %v2601_v41  ;;  %v7099_v37 = vld [vmem:[#allocation100_spill] sm:$0xff] }
 0xa7d   :  { %v2629_v6 = vadd.f32 %v2625_v40, %v2529_v27 }
 0xa7e   :  { %2653 = vmatpush.bf16.msrb.mxu2 %v2635_v61 }
 0xa80   :  { %v2514_v15 = vpop.xlane.xlu2 %2513 }
 0xa81   :  { %4176 = vrcp.f32 %v2514_v15 }
 0xa87   :  { %v4177_v9 = vpop.eup %4176 }
 0xa88   :  { %v2528_v0 = vmul.f32 %v4177_v9, %v6561_v28  ;;  %v2547_v35 = vpop.xlane.xlu2 %2546 }
 0xa89   :  { %v2551_v43 = vmul.f32 %v2547_v35, %v7095_v16 }
 0xa8a   :  { %v2628_v38 = vadd.f32 %v2624_v63, %v2528_v0  ;;  %v3999_v63 = vld [vmem:[#allocation25] sm:$0xff] }
 0xa8b   :  { %2708 = vmatpush.bf16.msrb.mxu1 %v3999_v63 }
 0xa8c   :  { %v2632_v14 = vpack.c.bf16 %v2629_v6, %v2628_v38 }
 0xa8e   :  { %3871 = vmatmul.msk.bf16.vlgmr.msrb.gmra.mxu2 %vm574_vm0, %v2632_v14 }
 0xa8f   :  { %v2544_v7 = vpop.xlane.xlu0 %2543 }
 0xa90   :  { %v2571_v54 = vpop.xlane.xlu2 %2570  ;;  %v2550_v58 = vmul.f32 %v2544_v7, %v7093_v51  ;;  %v528_v51 = vld [vmem:[%s7100_s28 + $0x10] sm:$0xff] }
 0xa91   :  { %v2575_v56 = vmul.f32 %v2571_v54, %v7094_v26 }
 0xa93   :  { %v2579_v12 = vadd.f32 %v2575_v56, %v2551_v43 }
 0xa98   :  { %v2592_v48 = vpop.xlane.xlu2 %2591 }
 0xa99   :  { %v2598_v55 = vmul.f32 %v2592_v48, %v7096_v46 }
 0xaa0   :  { %v2595_v42 = vpop.xlane.xlu2 %2594 }
 0xaa1   :  { %v2599_v18 = vmul.f32 %v2595_v42, %v7097_v31  ;;  %v530_v31 = vld [vmem:[%s7100_s28 + $0x20] sm:$0xff] }
 0xaa3   :  { %v2603_v19 = vadd.f32 %v2599_v18, %v2579_v12  ;;  %v531_v18 = vld [vmem:[%s7100_s28 + $0x28] sm:$0xff] }
 0xaa4   :  { %v2568_v24 = vpop.xlane.xlu1 %2567 }
 0xaa5   :  { %v2030_v36 = vpop.f32.mrf.mxu2  ;;  %v2574_v47 = vmul.f32 %v2568_v24, %v6442_v3 }
 0xaa6   :  { %v2031_v4 = vadd.f32 %v4094_v23, %v2030_v36 }
 0xaa7   :  { %v2578_v1 = vadd.f32 %v2574_v47, %v2550_v58  ;;  %v529_v58 = vld [vmem:[%s7100_s28 + $0x18] sm:$0xff] }
 0xaa8   :  { %v2616_v33 = vpop.xlane.xlu2 %2615 }
 0xaa9   :  { %v2602_v57 = vadd.f32 %v2598_v55, %v2578_v1  ;;  %v2622_v3 = vmul.f32 %v2616_v33, %v7098_v2 }
 0xaab   :  { %v2626_v45 = vadd.f32 %v2622_v3, %v2602_v57  ;;  %v532_v3 = vld [vmem:[%s7100_s28 + $0x30] sm:$0xff] }
 0xaad   :  { %v2032_v62 = vpop.f32.mrf.mxu2 }
 0xaae   :  { %v2033_v60 = vadd.f32 %v4094_v23, %v2032_v62 }
 0xab0   :  { %v2054_v28 = vpack.c.bf16 %v2033_v60, %v2031_v4  ;;  %v2520_v25 = vpop.xlane.xlu2 %2519  ;;  %v526_v4 = vld [vmem:[%s7100_s28] sm:$0xff]  ;;  %v527_v60 = vld [vmem:[%s7100_s28 + $0x8] sm:$0xff] }
 0xab1   :  { %4178 = vrcp.f32 %v2520_v25 }
 0xab2   :  { %3841 = vmatmul.msk.bf16.vlgmr.msra.gmra.mxu1 %vm574_vm0, %v2054_v28 }
 0xab7   :  { %v4179_v17 = vpop.eup %4178 }
 0xab8   :  { %v2523_v13 = vpop.xlane.xlu2 %2522  ;;  %v2530_v49 = vmul.f32 %v4179_v17, %v6586_v10 }
 0xab9   :  { %4180 = vrcp.f32 %v2523_v13 }
 0xaba   :  { %v2630_v32 = vadd.f32 %v2626_v45, %v2530_v49 }
 0xabe   :  { %v2035_v50 = vpop.f32.mrf.mxu2 }
 0xabf   :  { %v4181_v34 = vpop.eup %4180  ;;  %v2036_v15 = vadd.f32 %v4094_v23, %v2035_v50 }
 0xac0   :  { %v2619_v52 = vpop.xlane.xlu2 %2618  ;;  %v2531_v44 = vmul.f32 %v4181_v34, %v6591_v11  ;;  %v533_v34 = vld [vmem:[%s7100_s28 + $0x38] sm:$0xff] }
 0xac1   :  { %v2623_v5 = vmul.f32 %v2619_v52, %v7099_v37 }
 0xac3   :  { %v2627_v61 = vadd.f32 %v2623_v5, %v2603_v19  ;;  %v4095_v5 = vld [vmem:[#allocation26] ss:$0 sm:$0xff] }
 0xac5   :  { %v2631_v21 = vadd.f32 %v2627_v61, %v2531_v44  ;;  %v4210_v61 = vld [vmem:[%s7026_s12 + $0x40] sm:$0xff] }
 0xac6   :  { %v2037_v22 = vpop.f32.mrf.mxu2 }
 0xac7   :  { %v2633_v30 = vpack.c.bf16 %v2631_v21, %v2630_v32  ;;  %v2038_v59 = vadd.f32 %v4094_v23, %v2037_v22 }
 0xac9   :  { %v2055_v53 = vpack.c.bf16 %v2038_v59, %v2036_v15  ;;  %3872 = vmatmul.msk.bf16.gmra.mxu2 %vm574_vm0, %v2633_v30  ;;  %v4211_v30 = vld [vmem:[%s7026_s12 + $0x48] sm:$0xff] }
 0xacb   :  { %3842 = vmatmul.msk.bf16.gmra.mxu1 %vm574_vm0, %v2055_v53 }
 0xace   :  { %v2040_v41 = vpop.f32.mrf.mxu2 }
 0xacf   :  { %v2041_v40 = vadd.f32 %v4094_v23, %v2040_v41 }
 0xad6   :  { %v2042_v10 = vpop.f32.mrf.mxu2 }
 0xad7   :  { %v2043_v9 = vadd.f32 %v4094_v23, %v2042_v10  ;;  %v4212_v10 = vld [vmem:[%s7026_s12 + $0x50] sm:$0xff] }
 0xad9   :  { %v2056_v11 = vpack.c.bf16 %v2043_v9, %v2041_v40 }
 0xadb   :  { %3843 = vmatmul.msk.bf16.gmra.mxu1 %vm574_vm0, %v2056_v11 }
 0xade   :  { %v2045_v27 = vpop.f32.mrf.mxu2 }
 0xadf   :  { %v2046_v35 = vadd.f32 %v4094_v23, %v2045_v27 }
 0xae6   :  { %v2047_v0 = vpop.f32.mrf.mxu2 }
 0xae7   :  { %v2048_v6 = vadd.f32 %v4094_v23, %v2047_v0  ;;  %v4213_v0 = vld [vmem:[%s7026_s12 + $0x60] sm:$0xff] }
 0xae9   :  { %v2057_v38 = vpack.c.bf16 %v2048_v6, %v2046_v35 }
 0xaeb   :  { %3844 = vmatmul.msk.bf16.gmra.mxu1 %vm574_vm0, %v2057_v38 }
 0xaee   :  { %v2439_v29 = vpop.f32.mrf.mxu2 }
 0xaf6   :  { %v2441_v14 = vpop.f32.mrf.mxu2 }
 0xaf7   :  { %v2669_v54 = vpack.c.bf16 %v2441_v14, %v2439_v29  ;;  %v4214_v14 = vld [vmem:[%s7026_s12 + $0x58] sm:$0xff] }
 0xafb   :  { %3881 = vmatmul.msk.bf16.vlgmr.msrb.gmra.mxu1 %vm574_vm0, %v2669_v54 }
 0xafe   :  { %v2444_v20 = vpop.f32.mrf.mxu2 }
 0xb06   :  { %v2446_v48 = vpop.f32.mrf.mxu2 }
 0xb07   :  { %v2670_v42 = vpack.c.bf16 %v2446_v48, %v2444_v20  ;;  %v4215_v48 = vld [vmem:[%s7026_s12 + $0x68] sm:$0xff] }
 0xb0b   :  { %3882 = vmatmul.msk.bf16.gmra.mxu1 %vm574_vm0, %v2670_v42 }
 0xb11   :  { %v2655_v36 = vpop.f32.mrf.mxu2 }
 0xb19   :  { %v2657_v33 = vpop.f32.mrf.mxu2 }
 0xb1a   :  { %v2671_v23 = vpack.c.bf16 %v2657_v33, %v2655_v36 }
 0xb1c   :  { %3883 = vmatmul.msk.bf16.gmra.mxu1 %vm574_vm0, %v2671_v23 }
 0xb2f   :  { %v2091_v62 = vpop.f32.mrf.mxu1 }
 0xb30   :  { %v6644_v25 = vmul.f32 %v2091_v62, %v526_v4  ;;  %v4216_v4 = vld [vmem:[%s7026_s12 + $0x70] sm:$0xff] }
 0xb37   :  { %v2093_v28 = vpop.f32.mrf.mxu1 }
 0xb38   :  { %v6646_v24 = vmul.f32 %v2093_v28, %v527_v60 }
 0xb3a   :  { %v2119_v7 = vpack.c.bf16 %v6646_v24, %v6644_v25 }
 0xb48   :  { %v2096_v47 = vpop.f32.mrf.mxu1 }
 0xb49   :  { %v6652_v56 = vmul.f32 %v2096_v47, %v528_v51  ;;  %v4217_v51 = vld [vmem:[%s7026_s12 + $0x78] sm:$0xff] }
 0xb4c   :  { %v2660_v13 = vpop.f32.mrf.mxu2 }
 0xb50   :  { %v2098_v26 = vpop.f32.mrf.mxu1 }
 0xb51   :  { %v6654_v1 = vmul.f32 %v2098_v26, %v529_v58 }
 0xb53   :  { %v2120_v16 = vpack.c.bf16 %v6654_v1, %v6652_v56 }
 0xb54   :  { %v2662_v43 = vpop.f32.mrf.mxu2 }
 0xb55   :  { %v2672_v46 = vpack.c.bf16 %v2662_v43, %v2660_v13 }
 0xb57   :  { %3884 = vmatmul.msk.bf16.gmra.mxu1 %vm574_vm0, %v2672_v46 }
 0xb58   :  { %v2101_v55 = vpop.f32.mrf.mxu1 }
 0xb59   :  { %v6661_v50 = vmul.f32 %v2101_v55, %v530_v31 }
 0xb60   :  { %v2103_v17 = vpop.f32.mrf.mxu1 }
 0xb61   :  { %v6663_v12 = vmul.f32 %v2103_v17, %v531_v18 }
 0xb63   :  { %v2121_v57 = vpack.c.bf16 %v6663_v12, %v6661_v50 }
 0xb68   :  { %v2106_v2 = vpop.f32.mrf.mxu1 }
 0xb69   :  { %v6669_v19 = vmul.f32 %v2106_v2, %v532_v3 }
 0xb70   :  { %v2108_v52 = vpop.f32.mrf.mxu1 }
 0xb71   :  { %v6671_v49 = vmul.f32 %v2108_v52, %v533_v34 }
 0xb73   :  { %v2122_v37 = vpack.c.bf16 %v6671_v49, %v6669_v19 }
 0xb78   :  { %v2710_v45 = vpop.f32.mrf.mxu1 }
 0xb79   :  { %v2711_v44 = vadd.f32 %v4095_v5, %v2710_v45 }
 0xb7b   :  { %v6676_v32 = vadd.f32 %v4210_v61, %v2711_v44 }
 0xb7d   :  { %v2747_v21 = vsel %vm574_vm0, %v6676_v32, 0.0 }
 0xb7e   :  { %2748 = vadd.xlane.f32.xlu0 %v2747_v21 }
 0xb80   :  { %v2712_v22 = vpop.f32.mrf.mxu1 }
 0xb81   :  { %v2713_v15 = vadd.f32 %v4095_v5, %v2712_v22 }
 0xb83   :  { %v6681_v59 = vadd.f32 %v4211_v30, %v2713_v15 }
 0xb85   :  { %v2750_v53 = vsel %vm574_vm0, %v6681_v59, 0.0 }
 0xb86   :  { %2751 = vadd.xlane.f32.xlu1 %v2750_v53 }
 0xb88   :  { %v2715_v41 = vpop.f32.mrf.mxu1 }
 0xb89   :  { %v2716_v39 = vadd.f32 %v4095_v5, %v2715_v41 }
 0xb8b   :  { %v6686_v40 = vadd.f32 %v4212_v10, %v2716_v39 }
 0xb8d   :  { %v2753_v9 = vsel %vm574_vm0, %v6686_v40, 0.0 }
 0xb8e   :  { %2754 = vadd.xlane.f32.xlu1 %v2753_v9 }
 0xb90   :  { %v2717_v63 = vpop.f32.mrf.mxu1 }
 0xb91   :  { %v2718_v6 = vadd.f32 %v4095_v5, %v2717_v63 }
 0xb93   :  { %v6696_v54 = vadd.f32 %v4214_v14, %v2718_v6 }
 0xb95   :  { %v2756_v33 = vsel %vm574_vm0, %v6696_v54, 0.0 }
 0xb99   :  { %v2720_v11 = vpop.f32.mrf.mxu1 }
 0xb9a   :  { %v2721_v27 = vadd.f32 %v4095_v5, %v2720_v11 }
 0xb9c   :  { %v6691_v35 = vadd.f32 %v4213_v0, %v2721_v27 }
 0xb9e   :  { %v2763_v38 = vsel %vm574_vm0, %v6691_v35, 0.0 }
 0xb9f   :  { %2764 = vadd.xlane.f32.xlu2 %v2763_v38 }
 0xba1   :  { %v2722_v29 = vpop.f32.mrf.mxu1 }
 0xba2   :  { %v2723_v20 = vadd.f32 %v4095_v5, %v2722_v29 }
 0xba4   :  { %v6699_v42 = vadd.f32 %v4215_v48, %v2723_v20 }
 0xba6   :  { %v2766_v36 = vsel %vm574_vm0, %v6699_v42, 0.0 }
 0xba7   :  { %2767 = vadd.xlane.f32.xlu0 %v2766_v36  ;;  %2757 = vadd.xlane.f32.xlu2 %v2756_v33 }
 0xbd4   :  { %v2725_v23 = vpop.f32.mrf.mxu1 }
 0xbd5   :  { %v2726_v62 = vadd.f32 %v4095_v5, %v2725_v23 }
 0xbd7   :  { %v6706_v60 = vadd.f32 %v4216_v4, %v2726_v62 }
 0xbd9   :  { %v2769_v28 = vsel %vm574_vm0, %v6706_v60, 0.0 }
 0xbda   :  { %2770 = vadd.xlane.f32.xlu0 %v2769_v28 }
 0xbdc   :  { %v2727_v47 = vpop.f32.mrf.mxu1 }
 0xbdd   :  { %v2728_v13 = vadd.f32 %v4095_v5, %v2727_v47 }
 0xbdf   :  { %v6711_v58 = vadd.f32 %v4217_v51, %v2728_v13 }
 0xbe1   :  { %v2772_v26 = vsel %vm574_vm0, %v6711_v58, 0.0 }
 0xbe2   :  { %2773 = vadd.xlane.f32.xlu1 %v2772_v26 }
 0xbf1   :  { %v2749_v43 = vpop.xlane.xlu0 %2748 }
 0xbf9   :  { %v2752_v34 = vpop.xlane.xlu1 %2751 }
 0xc01   :  { %v2755_v39 = vpop.xlane.xlu1 %2754 }
 0xc12   :  { %v2765_v46 = vpop.xlane.xlu2 %2764 }
 0xc13   :  { %v2775_v55 = vadd.f32 %v2765_v46, %v2749_v43 }
 0xc15   :  { %v6716_v31 = vmul.f32 %v2775_v55, %v6081_v8 }
 0xc17   :  { %v2807_v18 = vsub.f32 %v6691_v35, %v6716_v31  ;;  %v2783_v17 = vsub.f32 %v6676_v32, %v6716_v31 }
 0xc19   :  { %v2811_v2 = vmul.f32 %v2807_v18, %v2807_v18  ;;  %v2787_v3 = vmul.f32 %v2783_v17, %v2783_v17 }
 0xc1a   :  { %v2768_v52 = vpop.xlane.xlu0 %2767  ;;  %v2758_v38 = vpop.xlane.xlu2 %2757 }
 0xc1b   :  { %v2776_v5 = vadd.f32 %v2768_v52, %v2752_v34  ;;  %v2815_v45 = vsel %vm574_vm0, %v2811_v2, 0.0  ;;  %v2791_v44 = vsel %vm574_vm0, %v2787_v3, 0.0 }
 0xc1c   :  { %2816 = vadd.xlane.f32.xlu1 %v2815_v45  ;;  %2792 = vadd.xlane.f32.xlu2 %v2791_v44 }
 0xc1d   :  { %v6725_v61 = vmul.f32 %v2776_v5, %v6081_v8 }
 0xc1f   :  { %v2808_v21 = vsub.f32 %v6699_v42, %v6725_v61  ;;  %v2784_v22 = vsub.f32 %v6681_v59, %v6725_v61 }
 0xc21   :  { %v2812_v15 = vmul.f32 %v2808_v21, %v2808_v21  ;;  %v2788_v30 = vmul.f32 %v2784_v22, %v2784_v22 }
 0xc23   :  { %v2818_v53 = vsel %vm574_vm0, %v2812_v15, 0.0  ;;  %v2794_v41 = vsel %vm574_vm0, %v2788_v30, 0.0  ;;  %v2738_v30 = vld [vmem:[%s7101_s27] sm:$0xff] }
 0xc24   :  { %2819 = vadd.xlane.f32.xlu2 %v2818_v53  ;;  %2795 = vadd.xlane.f32.xlu0 %v2794_v41 }
 0xc4d   :  { %v2771_v10 = vpop.xlane.xlu0 %2770 }
 0xc4e   :  { %v2777_v9 = vadd.f32 %v2771_v10, %v2755_v39 }
 0xc50   :  { %v6734_v63 = vmul.f32 %v2777_v9, %v6081_v8  ;;  %v3885_v9 = vld [vmem:[%s7101_s27 + $0x20] sm:$0xff] }
 0xc52   :  { %v2809_v11 = vsub.f32 %v6706_v60, %v6734_v63  ;;  %v2785_v27 = vsub.f32 %v6686_v40, %v6734_v63 }
 0xc54   :  { %v2813_v0 = vmul.f32 %v2809_v11, %v2809_v11  ;;  %v2789_v6 = vmul.f32 %v2785_v27, %v2785_v27 }
 0xc55   :  { %v2774_v29 = vpop.xlane.xlu1 %2773 }
 0xc56   :  { %v2778_v14 = vadd.f32 %v2774_v29, %v2758_v38  ;;  %v2821_v20 = vsel %vm574_vm0, %v2813_v0, 0.0  ;;  %v2797_v48 = vsel %vm574_vm0, %v2789_v6, 0.0  ;;  %v2739_v38 = vld [vmem:[%s7101_s27 + $0x8] sm:$0xff] }
 0xc57   :  { %2822 = vadd.xlane.f32.xlu2 %v2821_v20  ;;  %2798 = vadd.xlane.f32.xlu0 %v2797_v48  ;;  %v3886_v20 = vld [vmem:[%s7101_s27 + $0x28] sm:$0xff] }
 0xc58   :  { %v6743_v36 = vmul.f32 %v2778_v14, %v6081_v8 }
 0xc5a   :  { %v2786_v33 = vsub.f32 %v6696_v54, %v6743_v36  ;;  %v2810_v23 = vsub.f32 %v6711_v58, %v6743_v36 }
 0xc5c   :  { %v2790_v62 = vmul.f32 %v2786_v33, %v2786_v33  ;;  %v2814_v4 = vmul.f32 %v2810_v23, %v2810_v23 }
 0xc5e   :  { %v2800_v28 = vsel %vm574_vm0, %v2790_v62, 0.0  ;;  %v2824_v47 = vsel %vm574_vm0, %v2814_v4, 0.0 }
 0xc5f   :  { %2801 = vadd.xlane.f32.xlu1 %v2800_v28  ;;  %2825 = vadd.xlane.f32.xlu0 %v2824_v47 }
 0xc8f   :  { %v2817_v13 = vpop.xlane.xlu1 %2816  ;;  %v2793_v51 = vpop.xlane.xlu2 %2792 }
 0xc90   :  { %v2827_v26 = vadd.f32 %v2817_v13, %v2793_v51 }
 0xc92   :  { %v2831_v43 = vmul.f32 %v2827_v26, %v6081_v8 }
 0xc94   :  { %v2835_v46 = vadd.f32 1e-05, %v2831_v43 }
 0xc96   :  { %4182 = vrsqrt.f32 %v2835_v46  ;;  %vm2845_vm7 = vweird.f32 %v2835_v46 }
 0xc97   :  { %v2820_v55 = vpop.xlane.xlu2 %2819  ;;  %v2796_v18 = vpop.xlane.xlu0 %2795 }
 0xc98   :  { %v2828_v17 = vadd.f32 %v2820_v55, %v2796_v18 }
 0xc9a   :  { %v2832_v2 = vmul.f32 %v2828_v17, %v6081_v8 }
 0xc9c   :  { %v4183_v3 = vpop.eup %4182  ;;  %v2836_v34 = vadd.f32 1e-05, %v2832_v2 }
 0xc9d   :  { %v2840_v52 = vmul.f32 %v4183_v3, %v2835_v46  ;;  %vm2846_vm6 = vweird.f32 %v4183_v3 }
 0xc9e   :  { %4184 = vrsqrt.f32 %v2836_v34  ;;  %vm2847_vm8 = vmor %vm2845_vm7, %vm2846_vm6  ;;  %vm2855_vm10 = vweird.f32 %v2836_v34 }
 0xc9f   :  { %v2841_v5 = vmul.f32 %v4183_v3, %v2840_v52  ;;  %v2740_v52 = vld [vmem:[%s7101_s27 + $0x10] sm:$0xff] }
 0xca1   :  { %v2842_v45 = vmul.f32 0.5, %v2841_v5 }
 0xca3   :  { %v2843_v44 = vsub.f32 1.5, %v2842_v45 }
 0xca4   :  { %v4185_v21 = vpop.eup %4184 }
 0xca5   :  { %v2844_v22 = vmul.f32 %v4183_v3, %v2843_v44  ;;  %v2850_v15 = vmul.f32 %v4185_v21, %v2836_v34  ;;  %vm2856_vm9 = vweird.f32 %v4185_v21 }
 0xca6   :  { %vm2857_vm11 = vmor %vm2855_vm10, %vm2856_vm9 }
 0xca7   :  { %v2851_v53 = vmul.f32 %v4185_v21, %v2850_v15  ;;  %v2848_v41 = vsel %vm2847_vm8, %v4183_v3, %v2844_v22  ;;  %v3887_v22 = vld [vmem:[%s7101_s27 + $0x30] sm:$0xff] }
 0xca8   :  { %v2879_v39 = vmul.f32 %v2848_v41, %v2738_v30 }
 0xca9   :  { %v2852_v10 = vmul.f32 0.5, %v2851_v53 }
 0xcaa   :  { %2893 = vperm.xlu1 %4087, %v2879_v39   ;;  %v2883_v11 = vmul.f32 %v2879_v39, %v6716_v31  ;;  %v2741_v39 = vld [vmem:[%s7101_s27 + $0x18] sm:$0xff] }
 0xcab   :  { %v2853_v27 = vsub.f32 1.5, %v2852_v10 }
 0xcac   :  { %v2887_v0 = vsub.f32 %v3885_v9, %v2883_v11  ;;  %v3888_v11 = vld [vmem:[%s7101_s27 + $0x38] sm:$0xff] }
 0xcad   :  { %v2854_v6 = vmul.f32 %v4185_v21, %v2853_v27 }
 0xcae   :  { %2921 = vperm.xlu0 %4088, %v2887_v0  }
 0xcaf   :  { %v2858_v29 = vsel %vm2857_vm11, %v4185_v21, %v2854_v6  ;;  %v4002_v6 = vld [vmem:[#allocation32 + $0x8] sm:$0xff] }
 0xcb0   :  { %v2880_v14 = vmul.f32 %v2858_v29, %v2739_v38  ;;  %2989 = vmatpush.bf16.msrb.mxu3 %v4002_v6  ;;  %v4001_v38 = vld [vmem:[#allocation32] sm:$0xff] }
 0xcb2   :  { %2898 = vperm.xlu2 %4086, %v2880_v14   ;;  %v2884_v48 = vmul.f32 %v2880_v14, %v6725_v61 }
 0xcb4   :  { %v2888_v33 = vsub.f32 %v3886_v20, %v2884_v48  ;;  %2990 = vmatpush.bf16.msrb.mxu3 %v4001_v38 }
 0xcb6   :  { %2926 = vperm.xlu0 %4088, %v2888_v33  }
 0xcca   :  { %v2823_v23 = vpop.xlane.xlu2 %2822  ;;  %v2799_v62 = vpop.xlane.xlu0 %2798 }
 0xccb   :  { %v2829_v4 = vadd.f32 %v2823_v23, %v2799_v62 }
 0xccd   :  { %v2833_v31 = vmul.f32 %v2829_v4, %v6081_v8 }
 0xccf   :  { %v2837_v28 = vadd.f32 1e-05, %v2833_v31 }
 0xcd1   :  { %4186 = vrsqrt.f32 %v2837_v28  ;;  %vm2865_vm13 = vweird.f32 %v2837_v28 }
 0xcd2   :  { %v2802_v47 = vpop.xlane.xlu1 %2801  ;;  %v2826_v13 = vpop.xlane.xlu0 %2825 }
 0xcd3   :  { %v2830_v51 = vadd.f32 %v2826_v13, %v2802_v47 }
 0xcd5   :  { %v2834_v26 = vmul.f32 %v2830_v51, %v6081_v8 }
 0xcd7   :  { %v4187_v43 = vpop.eup %4186  ;;  %v2838_v46 = vadd.f32 1e-05, %v2834_v26 }
 0xcd8   :  { %v2860_v55 = vmul.f32 %v4187_v43, %v2837_v28  ;;  %vm2866_vm12 = vweird.f32 %v4187_v43 }
 0xcd9   :  { %4188 = vrsqrt.f32 %v2838_v46  ;;  %vm2867_vm14 = vmor %vm2865_vm13, %vm2866_vm12  ;;  %vm2875_vm2 = vweird.f32 %v2838_v46 }
 0xcda   :  { %v2861_v61 = vmul.f32 %v4187_v43, %v2860_v55 }
 0xcdc   :  { %v2862_v18 = vmul.f32 0.5, %v2861_v61 }
 0xcde   :  { %v2863_v17 = vsub.f32 1.5, %v2862_v18 }
 0xcdf   :  { %v4189_v2 = vpop.eup %4188 }
 0xce0   :  { %v2864_v3 = vmul.f32 %v4187_v43, %v2863_v17  ;;  %v2870_v34 = vmul.f32 %v4189_v2, %v2838_v46  ;;  %vm2876_vm15 = vweird.f32 %v4189_v2 }
 0xce1   :  { %vm2877_vm3 = vmor %vm2875_vm2, %vm2876_vm15 }
 0xce2   :  { %v2871_v5 = vmul.f32 %v4189_v2, %v2870_v34  ;;  %v2868_v45 = vsel %vm2867_vm14, %v4187_v43, %v2864_v3  ;;  %v4005_v3 = vld [vmem:[%s7102_s29 + $0x10] sm:$0xff]  ;;  %v4004_v34 = vld [vmem:[%s7102_s29 + $0x8] sm:$0xff] }
 0xce3   :  { %v2881_v44 = vmul.f32 %v2868_v45, %v2740_v52  ;;  %v4003_v52 = vld [vmem:[%s7102_s29] sm:$0xff] }
 0xce4   :  { %v2872_v21 = vmul.f32 0.5, %v2871_v5  ;;  %v4096_v5 = vld [vmem:[#allocation34] ss:$0 sm:$0xff] }
 0xce5   :  { %2903 = vperm.xlu1 %4087, %v2881_v44   ;;  %v2885_v15 = vmul.f32 %v2881_v44, %v6734_v63 }
 0xce6   :  { %v2873_v30 = vsub.f32 1.5, %v2872_v21 }
 0xce7   :  { %v2889_v53 = vsub.f32 %v3887_v22, %v2885_v15 }
 0xce8   :  { %v2874_v41 = vmul.f32 %v4189_v2, %v2873_v30 }
 0xce9   :  { %2931 = vperm.xlu0 %4088, %v2889_v53  }
 0xcea   :  { %v2878_v10 = vsel %vm2877_vm3, %v4189_v2, %v2874_v41  ;;  %v4006_v2 = vld [vmem:[%s7102_s29 + $0x18] sm:$0xff] }
 0xceb   :  { %v2882_v9 = vmul.f32 %v2878_v10, %v2741_v39  ;;  %3092 = vmatpush.bf16.msra.mxu0 %v4006_v2 }
 0xced   :  { %2908 = vperm.xlu2 %4086, %v2882_v9   ;;  %v2886_v27 = vmul.f32 %v2882_v9, %v6743_v36 }
 0xcef   :  { %v2890_v0 = vsub.f32 %v3888_v11, %v2886_v27  ;;  %3093 = vmatpush.bf16.msra.mxu0 %v4005_v3 }
 0xcf1   :  { %2936 = vperm.xlu1 %4087, %v2890_v0  }
 0xcf3   :  { %3094 = vmatpush.bf16.msra.mxu0 %v4004_v34  ;;  %v4097_v34 = vld [vmem:[#allocation35] ss:$0 sm:$0xff] }
 0xcf7   :  { %3095 = vmatpush.bf16.msra.mxu0 %v4003_v52 }
 0xd0c   :  { %v2899_v48 = vpop.permute.xlu2 %2898 }
 0xd0d   :  { %v2912_v33 = vmul.f32 %v2899_v48, %v6681_v59  ;;  %v2916_v23 = vmul.f32 %v2899_v48, %v6699_v42 }
 0xd1c   :  { %v2894_v63 = vpop.permute.xlu1 %2893 }
 0xd1d   :  { %v2915_v29 = vmul.f32 %v2894_v63, %v6691_v35  ;;  %v2911_v62 = vmul.f32 %v2894_v63, %v6676_v32 }
 0xd20   :  { %v2922_v14 = vpop.permute.xlu0 %2921 }
 0xd21   :  { %v6768_v20 = vadd.f32 %v2922_v14, %v2915_v29  ;;  %v6773_v4 = vadd.f32 %v2922_v14, %v2911_v62  ;;  %v3982_v29 = vld [vmem:[%s7103_s3 + $0x18] sm:$0xff]  ;;  %v3981_v14 = vld [vmem:[%s7103_s3 + $0x10] sm:$0xff] }
 0xd22   :  { %3553 = vmatpush.bf16.msrb.mxu0 %v3982_v29  ;;  %3512 = vmatpush.bf16.msra.mxu3 %v3982_v29 }
 0xd26   :  { %3554 = vmatpush.bf16.msrb.mxu0 %v3981_v14  ;;  %3513 = vmatpush.bf16.msra.mxu3 %v3981_v14 }
 0xd28   :  { %v2927_v36 = vpop.permute.xlu0 %2926 }
 0xd29   :  { %v6775_v31 = vadd.f32 %v2927_v36, %v2912_v33  ;;  %v6777_v28 = vadd.f32 %v2927_v36, %v2916_v23  ;;  %v3980_v33 = vld [vmem:[%s7103_s3 + $0x8] sm:$0xff] }
 0xd2a   :  { %3555 = vmatpush.bf16.msrb.mxu0 %v3980_v33  ;;  %3514 = vmatpush.bf16.msra.mxu3 %v3980_v33 }
 0xd2b   :  { %v2951_v35 = vpack.c.bf16 %v6775_v31, %v6773_v4  ;;  %v2953_v55 = vpack.c.bf16 %v6777_v28, %v6768_v20 }
 0xd2d   :  { %3897 = vmatmul.msk.bf16.vlgmr.msrb.gmra.mxu3 %vm574_vm0, %v2951_v35  ;;  %v3979_v35 = vld [vmem:[%s7103_s3] sm:$0xff] }
 0xd2e   :  { %3556 = vmatpush.bf16.msrb.mxu0 %v3979_v35  ;;  %3515 = vmatpush.bf16.msra.mxu3 %v3979_v35 }
 0xd47   :  { %v2909_v13 = vpop.permute.xlu2 %2908 }
 0xd48   :  { %v2914_v59 = vmul.f32 %v2909_v13, %v6696_v54 }
 0xd57   :  { %v2904_v47 = vpop.permute.xlu1 %2903 }
 0xd58   :  { %v2913_v32 = vmul.f32 %v2904_v47, %v6686_v40  ;;  %v2918_v40 = vmul.f32 %v2909_v13, %v6711_v58  ;;  %v2917_v54 = vmul.f32 %v2904_v47, %v6706_v60 }
 0xd5b   :  { %v2932_v51 = vpop.permute.xlu0 %2931 }
 0xd5c   :  { %v6784_v26 = vadd.f32 %v2932_v51, %v2913_v32  ;;  %v6798_v18 = vadd.f32 %v2932_v51, %v2917_v54 }
 0xd63   :  { %v2937_v42 = vpop.permute.xlu1 %2936 }
 0xd64   :  { %v6786_v43 = vadd.f32 %v2937_v42, %v2914_v59  ;;  %v6796_v61 = vadd.f32 %v2937_v42, %v2918_v40 }
 0xd66   :  { %v2952_v46 = vpack.c.bf16 %v6786_v43, %v6784_v26  ;;  %v2954_v17 = vpack.c.bf16 %v6796_v61, %v6798_v18 }
 0xd68   :  { %3898 = vmatmul.msk.bf16.gmra.mxu3 %vm574_vm0, %v2952_v46 }
 0xd78   :  { %3899 = vmatmul.msk.bf16.gmra.mxu3 %vm574_vm0, %v2953_v55 }
 0xd88   :  { %3900 = vmatmul.msk.bf16.gmra.mxu3 %vm574_vm0, %v2954_v17 }
 0xdb0   :  { %v2992_v58 = vpop.f32.mrf.mxu3 }
 0xdb1   :  { %v2993_v60 = vadd.f32 %v4096_v5, %v2992_v58 }
 0xdb3   :  { %v3020_v44 = vmul.f32 0.01, %v2993_v60  ;;  %vm3012_vm4 = vcmp.ge.f32.partialorder %v2993_v60, 0.0 }
 0xdb5   :  { %v3028_v15 = vsel %vm3012_vm4, %v2993_v60, %v3020_v44 }
 0xdb8   :  { %v2994_v45 = vpop.f32.mrf.mxu3 }
 0xdb9   :  { %v2995_v21 = vadd.f32 %v4096_v5, %v2994_v45 }
 0xdbb   :  { %vm3013_vm5 = vcmp.ge.f32.partialorder %v2995_v21, 0.0  ;;  %v3021_v22 = vmul.f32 0.01, %v2995_v21 }
 0xdbd   :  { %v3029_v30 = vsel %vm3013_vm5, %v2995_v21, %v3021_v22 }
 0xdbe   :  { %v3044_v53 = vpack.c.bf16 %v3029_v30, %v3028_v15 }
 0xdc0   :  { %3917 = vmatmul.msk.bf16.vlgmr.msra.gmra.mxu0 %vm1726_vm1, %v3044_v53 }
 0xdeb   :  { %v2997_v41 = vpop.f32.mrf.mxu3 }
 0xdec   :  { %v2998_v39 = vadd.f32 %v4096_v5, %v2997_v41 }
 0xdee   :  { %v3022_v9 = vmul.f32 0.01, %v2998_v39  ;;  %vm3014_vm6 = vcmp.ge.f32.partialorder %v2998_v39, 0.0 }
 0xdf0   :  { %v3030_v0 = vsel %vm3014_vm6, %v2998_v39, %v3022_v9 }
 0xdf3   :  { %v2999_v10 = vpop.f32.mrf.mxu3 }
 0xdf4   :  { %v3000_v11 = vadd.f32 %v4096_v5, %v2999_v10 }
 0xdf6   :  { %vm3015_vm7 = vcmp.ge.f32.partialorder %v3000_v11, 0.0  ;;  %v3023_v27 = vmul.f32 0.01, %v3000_v11 }
 0xdf8   :  { %v3031_v6 = vsel %vm3015_vm7, %v3000_v11, %v3023_v27 }
 0xdf9   :  { %v3045_v38 = vpack.c.bf16 %v3031_v6, %v3030_v0 }
 0xdfb   :  { %v3002_v63 = vpop.f32.mrf.mxu3  ;;  %3918 = vmatmul.msk.bf16.gmra.mxu0 %vm1726_vm1, %v3045_v38 }
 0xdfc   :  { %v3003_v48 = vadd.f32 %v4096_v5, %v3002_v63 }
 0xdfe   :  { %v3024_v62 = vmul.f32 0.01, %v3003_v48  ;;  %vm3016_vm8 = vcmp.ge.f32.partialorder %v3003_v48, 0.0 }
 0xe00   :  { %v3032_v13 = vsel %vm3016_vm8, %v3003_v48, %v3024_v62 }
 0xe03   :  { %v3004_v23 = vpop.f32.mrf.mxu3 }
 0xe04   :  { %v3005_v36 = vadd.f32 %v4096_v5, %v3004_v23 }
 0xe06   :  { %vm3017_vm9 = vcmp.ge.f32.partialorder %v3005_v36, 0.0  ;;  %v3025_v47 = vmul.f32 0.01, %v3005_v36 }
 0xe08   :  { %v3033_v51 = vsel %vm3017_vm9, %v3005_v36, %v3025_v47 }
 0xe09   :  { %v3046_v59 = vpack.c.bf16 %v3033_v51, %v3032_v13 }
 0xe0b   :  { %v3007_v32 = vpop.f32.mrf.mxu3  ;;  %3919 = vmatmul.msk.bf16.gmra.mxu0 %vm1726_vm1, %v3046_v59 }
 0xe0c   :  { %v3008_v42 = vadd.f32 %v4096_v5, %v3007_v32 }
 0xe0e   :  { %v3026_v55 = vmul.f32 0.01, %v3008_v42  ;;  %vm3018_vm10 = vcmp.ge.f32.partialorder %v3008_v42, 0.0 }
 0xe10   :  { %v3034_v17 = vsel %vm3018_vm10, %v3008_v42, %v3026_v55  ;;  %vm3619_vm10 = vcmask 130048  }
 0xe13   :  { %v3009_v46 = vpop.f32.mrf.mxu3 }
 0xe14   :  { %v3010_v40 = vadd.f32 %v4096_v5, %v3009_v46 }
 0xe16   :  { %vm3019_vm11 = vcmp.ge.f32.partialorder %v3010_v40, 0.0  ;;  %v3027_v54 = vmul.f32 0.01, %v3010_v40 }
 0xe18   :  { %v3035_v2 = vsel %vm3019_vm11, %v3010_v40, %v3027_v54 }
 0xe19   :  { %v3047_v3 = vpack.c.bf16 %v3035_v2, %v3034_v17 }
 0xe1b   :  { %3920 = vmatmul.msk.bf16.gmra.mxu0 %vm1726_vm1, %v3047_v3 }
 0xe2b   :  { %3969 = vmatmul.msk.bf16.vlgmr.msrb.gmra.mxu0 %vm1726_vm1, %v2119_v7 }
 0xe3b   :  { %3970 = vmatmul.msk.bf16.gmra.mxu0 %vm1726_vm1, %v2120_v16 }
 0xe3d   :  { %v3097_v52 = vpop.f32.mrf.mxu0 }
 0xe3e   :  { %v3098_v58 = vadd.f32 %v4097_v34, %v3097_v52 }
 0xe40   :  { %v6824_v5 = vadd.f32 %v3098_v58, %v6773_v4 }
 0xe42   :  { %v3134_v60 = vsel %vm574_vm0, %v6824_v5, 0.0 }
 0xe43   :  { %3135 = vadd.xlane.f32.xlu2 %v3134_v60 }
 0xe45   :  { %v3099_v45 = vpop.f32.mrf.mxu0 }
 0xe46   :  { %v3100_v44 = vadd.f32 %v4097_v34, %v3099_v45 }
 0xe48   :  { %v6829_v25 = vadd.f32 %v3100_v44, %v6775_v31 }
 0xe4a   :  { %v3137_v24 = vsel %vm574_vm0, %v6829_v25, 0.0 }
 0xe4b   :  { %3138 = vadd.xlane.f32.xlu0 %v3137_v24  ;;  %3971 = vmatmul.msk.bf16.gmra.mxu0 %vm1726_vm1, %v2121_v57 }
 0xe5b   :  { %3972 = vmatmul.msk.bf16.gmra.mxu0 %vm1726_vm1, %v2122_v37 }
 0xe78   :  { %v3102_v7 = vpop.f32.mrf.mxu0 }
 0xe79   :  { %v3103_v56 = vadd.f32 %v4097_v34, %v3102_v7 }
 0xe7b   :  { %v6842_v1 = vadd.f32 %v3103_v56, %v6784_v26 }
 0xe7d   :  { %v3140_v16 = vsel %vm574_vm0, %v6842_v1, 0.0 }
 0xe7e   :  { %3141 = vadd.xlane.f32.xlu0 %v3140_v16 }
 0xe80   :  { %v3104_v4 = vpop.f32.mrf.mxu0 }
 0xe81   :  { %v3105_v12 = vadd.f32 %v4097_v34, %v3104_v4 }
 0xe83   :  { %v6852_v49 = vadd.f32 %v3105_v12, %v6786_v43 }
 0xe88   :  { %v3107_v31 = vpop.f32.mrf.mxu0 }
 0xe89   :  { %v3108_v21 = vadd.f32 %v4097_v34, %v3107_v31 }
 0xe8b   :  { %v6847_v50 = vadd.f32 %v3108_v21, %v6768_v20  ;;  %v3143_v20 = vsel %vm574_vm0, %v6852_v49, 0.0 }
 0xe8d   :  { %v3150_v57 = vsel %vm574_vm0, %v6847_v50, 0.0 }
 0xe8e   :  { %3151 = vadd.xlane.f32.xlu1 %v3150_v57 }
 0xe90   :  { %v3109_v19 = vpop.f32.mrf.mxu0 }
 0xe91   :  { %v3110_v37 = vadd.f32 %v4097_v34, %v3109_v19 }
 0xe93   :  { %v6855_v26 = vadd.f32 %v3110_v37, %v6777_v28 }
 0xe95   :  { %v3153_v22 = vsel %vm574_vm0, %v6855_v26, 0.0 }
 0xe96   :  { %3154 = vadd.xlane.f32.xlu2 %v3153_v22  ;;  %3144 = vadd.xlane.f32.xlu1 %v3143_v20 }
 0xe98   :  { %v3112_v15 = vpop.f32.mrf.mxu0 }
 0xe99   :  { %v3113_v30 = vadd.f32 %v4097_v34, %v3112_v15 }
 0xe9b   :  { %v6862_v53 = vadd.f32 %v3113_v30, %v6798_v18 }
 0xe9d   :  { %v3156_v43 = vsel %vm574_vm0, %v6862_v53, 0.0 }
 0xe9e   :  { %3157 = vadd.xlane.f32.xlu2 %v3156_v43 }
 0xea0   :  { %v3114_v41 = vpop.f32.mrf.mxu0 }
 0xea1   :  { %v3115_v28 = vadd.f32 %v4097_v34, %v3114_v41 }
 0xea3   :  { %v6867_v39 = vadd.f32 %v3115_v28, %v6796_v61 }
 0xea5   :  { %v3159_v10 = vsel %vm574_vm0, %v6867_v39, 0.0 }
 0xea6   :  { %3160 = vadd.xlane.f32.xlu0 %v3159_v10 }
 0xeb6   :  { %v3136_v9 = vpop.xlane.xlu2 %3135 }
 0xebe   :  { %v3139_v61 = vpop.xlane.xlu0 %3138 }
 0xef1   :  { %v3142_v13 = vpop.xlane.xlu0 %3141 }
 0xf01   :  { %v3152_v11 = vpop.xlane.xlu1 %3151 }
 0xf02   :  { %v3162_v27 = vadd.f32 %v3152_v11, %v3136_v9 }
 0xf04   :  { %v6872_v0 = vmul.f32 %v3162_v27, %v6081_v8 }
 0xf06   :  { %v3170_v18 = vsub.f32 %v6824_v5, %v6872_v0  ;;  %v3194_v6 = vsub.f32 %v6847_v50, %v6872_v0 }
 0xf08   :  { %v3174_v38 = vmul.f32 %v3170_v18, %v3170_v18  ;;  %v3198_v63 = vmul.f32 %v3194_v6, %v3194_v6 }
 0xf09   :  { %v3155_v29 = vpop.xlane.xlu2 %3154  ;;  %v3145_v2 = vpop.xlane.xlu1 %3144 }
 0xf0a   :  { %v3163_v14 = vadd.f32 %v3155_v29, %v3139_v61  ;;  %v3178_v48 = vsel %vm574_vm0, %v3174_v38, 0.0  ;;  %v3202_v33 = vsel %vm574_vm0, %v3198_v63, 0.0  ;;  %v3125_v29 = vld [vmem:[%s7104_s17] sm:$0xff] }
 0xf0b   :  { %3179 = vadd.xlane.f32.xlu1 %v3178_v48  ;;  %3203 = vadd.xlane.f32.xlu0 %v3202_v33 }
 0xf0c   :  { %v6881_v23 = vmul.f32 %v3163_v14, %v6081_v8 }
 0xf0e   :  { %v3195_v62 = vsub.f32 %v6855_v26, %v6881_v23  ;;  %v3171_v36 = vsub.f32 %v6829_v25, %v6881_v23 }
 0xf10   :  { %v3199_v35 = vmul.f32 %v3195_v62, %v3195_v62  ;;  %v3175_v47 = vmul.f32 %v3171_v36, %v3171_v36 }
 0xf11   :  { %v3158_v51 = vpop.xlane.xlu2 %3157 }
 0xf12   :  { %v3164_v59 = vadd.f32 %v3158_v51, %v3142_v13  ;;  %v3205_v32 = vsel %vm574_vm0, %v3199_v35, 0.0  ;;  %v3181_v42 = vsel %vm574_vm0, %v3175_v47, 0.0  ;;  %v3921_v13 = vld [vmem:[%s7104_s17 + $0x20] sm:$0xff] }
 0xf13   :  { %3206 = vadd.xlane.f32.xlu1 %v3205_v32  ;;  %3182 = vadd.xlane.f32.xlu2 %v3181_v42 }
 0xf14   :  { %v6890_v46 = vmul.f32 %v3164_v59, %v6081_v8 }
 0xf16   :  { %v3196_v55 = vsub.f32 %v6862_v53, %v6890_v46  ;;  %v3172_v40 = vsub.f32 %v6842_v1, %v6890_v46 }
 0xf18   :  { %v3200_v54 = vmul.f32 %v3196_v55, %v3196_v55  ;;  %v3176_v17 = vmul.f32 %v3172_v40, %v3172_v40 }
 0xf19   :  { %v3161_v3 = vpop.xlane.xlu0 %3160 }
 0xf1a   :  { %v3165_v34 = vadd.f32 %v3161_v3, %v3145_v2  ;;  %v3208_v52 = vsel %vm574_vm0, %v3200_v54, 0.0  ;;  %v3184_v58 = vsel %vm574_vm0, %v3176_v17, 0.0  ;;  %v3126_v2 = vld [vmem:[%s7104_s17 + $0x8] sm:$0xff] }
 0xf1b   :  { %3209 = vadd.xlane.f32.xlu1 %v3208_v52  ;;  %3185 = vadd.xlane.f32.xlu2 %v3184_v58  ;;  %v3922_v58 = vld [vmem:[%s7104_s17 + $0x28] sm:$0xff] }
 0xf1c   :  { %v6899_v60 = vmul.f32 %v3165_v34, %v6081_v8 }
 0xf1e   :  { %v3197_v45 = vsub.f32 %v6867_v39, %v6899_v60  ;;  %v3173_v44 = vsub.f32 %v6852_v49, %v6899_v60 }
 0xf20   :  { %v3201_v24 = vmul.f32 %v3197_v45, %v3197_v45  ;;  %v3177_v7 = vmul.f32 %v3173_v44, %v3173_v44 }
 0xf22   :  { %v3211_v56 = vsel %vm574_vm0, %v3201_v24, 0.0  ;;  %v3187_v16 = vsel %vm574_vm0, %v3177_v7, 0.0 }
 0xf23   :  { %3212 = vadd.xlane.f32.xlu2 %v3211_v56  ;;  %3188 = vadd.xlane.f32.xlu0 %v3187_v16  ;;  %v3127_v16 = vld [vmem:[%s7104_s17 + $0x10] sm:$0xff] }
 0xf7e   :  { %v3180_v4 = vpop.xlane.xlu1 %3179  ;;  %v3204_v31 = vpop.xlane.xlu0 %3203 }
 0xf7f   :  { %v3214_v21 = vadd.f32 %v3204_v31, %v3180_v4 }
 0xf81   :  { %v3218_v12 = vmul.f32 %v3214_v21, %v6081_v8 }
 0xf83   :  { %v3222_v57 = vadd.f32 1e-05, %v3218_v12 }
 0xf85   :  { %4190 = vrsqrt.f32 %v3222_v57  ;;  %vm3232_vm13 = vweird.f32 %v3222_v57 }
 0xf86   :  { %v3207_v19 = vpop.xlane.xlu1 %3206  ;;  %v3183_v37 = vpop.xlane.xlu2 %3182 }
 0xf87   :  { %v3215_v22 = vadd.f32 %v3207_v19, %v3183_v37 }
 0xf89   :  { %v3219_v20 = vmul.f32 %v3215_v22, %v6081_v8 }
 0xf8b   :  { %v4191_v15 = vpop.eup %4190  ;;  %v3223_v30 = vadd.f32 1e-05, %v3219_v20  ;;  %v3128_v20 = vld [vmem:[%s7104_s17 + $0x18] sm:$0xff] }
 0xf8c   :  { %v3227_v43 = vmul.f32 %v4191_v15, %v3222_v57  ;;  %vm3233_vm12 = vweird.f32 %v4191_v15  ;;  %v3923_v57 = vld [vmem:[%s7104_s17 + $0x30] sm:$0xff] }
 0xf8d   :  { %4192 = vrsqrt.f32 %v3223_v30  ;;  %vm3234_vm14 = vmor %vm3232_vm13, %vm3233_vm12  ;;  %vm3242_vm2 = vweird.f32 %v3223_v30 }
 0xf8e   :  { %v3228_v41 = vmul.f32 %v4191_v15, %v3227_v43  ;;  %v3210_v28 = vpop.xlane.xlu1 %3209  ;;  %v3186_v10 = vpop.xlane.xlu2 %3185  ;;  %v3924_v43 = vld [vmem:[%s7104_s17 + $0x38] sm:$0xff] }
 0xf8f   :  { %v3216_v9 = vadd.f32 %v3210_v28, %v3186_v10  ;;  %v4008_v10 = vld [vmem:[#allocation37 + $0x8] sm:$0xff] }
 0xf90   :  { %v3229_v11 = vmul.f32 0.5, %v3228_v41  ;;  %3376 = vmatpush.bf16.msra.mxu2 %v4008_v10  ;;  %v4221_v10 = vld [vmem:[%s7100_s28 + $0x18] sm:$0xff] }
 0xf91   :  { %v3220_v27 = vmul.f32 %v3216_v9, %v6081_v8  ;;  %v4007_v9 = vld [vmem:[#allocation37] sm:$0xff] }
 0xf92   :  { %v3230_v18 = vsub.f32 1.5, %v3229_v11 }
 0xf93   :  { %v4193_v6 = vpop.eup %4192  ;;  %v3224_v38 = vadd.f32 1e-05, %v3220_v27 }
 0xf94   :  { %v3231_v63 = vmul.f32 %v4191_v15, %v3230_v18  ;;  %v3237_v61 = vmul.f32 %v4193_v6, %v3223_v30  ;;  %vm3243_vm15 = vweird.f32 %v4193_v6  ;;  %3377 = vmatpush.bf16.msra.mxu2 %v4007_v9 }
 0xf95   :  { %4194 = vrsqrt.f32 %v3224_v38  ;;  %vm3244_vm3 = vmor %vm3242_vm2, %vm3243_vm15  ;;  %vm3252_vm5 = vweird.f32 %v3224_v38 }
 0xf96   :  { %v3238_v14 = vmul.f32 %v4193_v6, %v3237_v61  ;;  %v3213_v48 = vpop.xlane.xlu2 %3212  ;;  %v3189_v33 = vpop.xlane.xlu0 %3188  ;;  %v3235_v62 = vsel %vm3234_vm14, %v4191_v15, %v3231_v63 }
 0xf97   :  { %v3217_v36 = vadd.f32 %v3213_v48, %v3189_v33  ;;  %v3266_v35 = vmul.f32 %v3235_v62, %v3125_v29 }
 0xf98   :  { %v3239_v47 = vmul.f32 0.5, %v3238_v14 }
 0xf99   :  { %v3221_v51 = vmul.f32 %v3217_v36, %v6081_v8  ;;  %3280 = vperm.xlu0 %4088, %v3266_v35   ;;  %v3270_v59 = vmul.f32 %v3266_v35, %v6872_v0 }
 0xf9a   :  { %v3240_v32 = vsub.f32 1.5, %v3239_v47 }
 0xf9b   :  { %v4195_v42 = vpop.eup %4194  ;;  %v3225_v55 = vadd.f32 1e-05, %v3221_v51  ;;  %v3274_v40 = vsub.f32 %v3921_v13, %v3270_v59 }
 0xf9c   :  { %v3241_v54 = vmul.f32 %v4193_v6, %v3240_v32  ;;  %v3247_v17 = vmul.f32 %v4195_v42, %v3224_v38  ;;  %vm3253_vm4 = vweird.f32 %v4195_v42 }
 0xf9d   :  { %4196 = vrsqrt.f32 %v3225_v55  ;;  %3308 = vperm.xlu2 %4086, %v3274_v40   ;;  %vm3254_vm6 = vmor %vm3252_vm5, %vm3253_vm4  ;;  %vm3262_vm8 = vweird.f32 %v3225_v55 }
 0xf9e   :  { %v3248_v3 = vmul.f32 %v4195_v42, %v3247_v17  ;;  %v3245_v34 = vsel %vm3244_vm3, %v4193_v6, %v3241_v54  ;;  %v4009_v17 = vld [vmem:[#allocation40] sm:$0xff] }
 0xf9f   :  { %v3267_v8 = vmul.f32 %v3245_v34, %v3126_v2 }
 0xfa0   :  { %v3249_v52 = vmul.f32 0.5, %v3248_v3 }
 0xfa1   :  { %3285 = vperm.xlu1 %4087, %v3267_v8   ;;  %v3271_v0 = vmul.f32 %v3267_v8, %v6881_v23 }
 0xfa2   :  { %v3250_v45 = vsub.f32 1.5, %v3249_v52 }
 0xfa3   :  { %v4197_v44 = vpop.eup %4196  ;;  %v3275_v24 = vsub.f32 %v3922_v58, %v3271_v0 }
 0xfa4   :  { %v3251_v7 = vmul.f32 %v4195_v42, %v3250_v45  ;;  %v3257_v56 = vmul.f32 %v4197_v44, %v3225_v55  ;;  %vm3263_vm7 = vweird.f32 %v4197_v44 }
 0xfa5   :  { %3313 = vperm.xlu0 %4088, %v3275_v24   ;;  %vm3264_vm9 = vmor %vm3262_vm8, %vm3263_vm7 }
 0xfa6   :  { %v3258_v4 = vmul.f32 %v4197_v44, %v3257_v56  ;;  %v3255_v31 = vsel %vm3254_vm6, %v4195_v42, %v3251_v7 }
 0xfa7   :  { %v3268_v21 = vmul.f32 %v3255_v31, %v3127_v16 }
 0xfa8   :  { %v3259_v12 = vmul.f32 0.5, %v3258_v4 }
 0xfa9   :  { %3290 = vperm.xlu1 %4087, %v3268_v21   ;;  %v3272_v23 = vmul.f32 %v3268_v21, %v6890_v46 }
 0xfaa   :  { %v3260_v19 = vsub.f32 1.5, %v3259_v12 }
 0xfab   :  { %v3276_v37 = vsub.f32 %v3923_v57, %v3272_v23 }
 0xfac   :  { %v3261_v22 = vmul.f32 %v4197_v44, %v3260_v19  ;;  %v4218_v19 = vld [vmem:[%s7100_s28] sm:$0xff] }
 0xfad   :  { %3318 = vperm.xlu0 %4088, %v3276_v37  }
 0xfae   :  { %v3265_v15 = vsel %vm3264_vm9, %v4197_v44, %v3261_v22  ;;  %v4219_v22 = vld [vmem:[%s7100_s28 + $0x8] sm:$0xff] }
 0xfaf   :  { %v3269_v30 = vmul.f32 %v3265_v15, %v3128_v20 }
 0xfb1   :  { %3295 = vperm.xlu2 %4086, %v3269_v30   ;;  %v3273_v41 = vmul.f32 %v3269_v30, %v6899_v60 }
 0xfb3   :  { %v3277_v28 = vsub.f32 %v3924_v43, %v3273_v41  ;;  %v4220_v41 = vld [vmem:[%s7100_s28 + $0x10] sm:$0xff] }
 0xfb5   :  { %3323 = vperm.xlu1 %4087, %v3277_v28  }
 0xff7   :  { %v3309_v6 = vpop.permute.xlu2 %3308 }
0x100b   :  { %v3281_v46 = vpop.permute.xlu0 %3280  ;;  %v3296_v14 = vpop.permute.xlu2 %3295 }
0x100c   :  { %v3298_v27 = vmul.f32 %v3281_v46, %v6824_v5  ;;  %v3301_v33 = vmul.f32 %v3296_v14, %v6852_v49  ;;  %v3302_v13 = vmul.f32 %v3281_v46, %v6847_v50  ;;  %v3305_v49 = vmul.f32 %v3296_v14, %v6867_v39  ;;  %v4098_v50 = vld [vmem:[#allocation38] ss:$0 sm:$0xff]  ;;  %v4224_v14 = vld [vmem:[%s7100_s28 + $0x30] sm:$0xff] }
0x100e   :  { %v3326_v63 = vadd.f32 %v3309_v6, %v3298_v27  ;;  %v3330_v32 = vadd.f32 %v3309_v6, %v3302_v13 }
0x1013   :  { %v3286_v11 = vpop.permute.xlu1 %3285 }
0x1014   :  { %v3299_v18 = vmul.f32 %v3286_v11, %v6829_v25  ;;  %v4010_v25 = vld [vmem:[#allocation40 + $0x8] sm:$0xff]  ;;  %v3303_v51 = vmul.f32 %v3286_v11, %v6855_v26 }
0x1015   :  { %3437 = vmatpush.bf16.msra.mxu1 %v4010_v25 }
0x1017   :  { %v3314_v38 = vpop.permute.xlu0 %3313 }
0x1018   :  { %v3327_v61 = vadd.f32 %v3314_v38, %v3299_v18  ;;  %v3331_v59 = vadd.f32 %v3314_v38, %v3303_v51  ;;  %v4222_v18 = vld [vmem:[%s7100_s28 + $0x20] sm:$0xff]  ;;  %v4223_v38 = vld [vmem:[%s7100_s28 + $0x28] sm:$0xff] }
0x1019   :  { %3438 = vmatpush.bf16.msra.mxu1 %v4009_v17 }
0x101a   :  { %v3338_v29 = vpack.c.bf16 %v3327_v61, %v3326_v63  ;;  %v3340_v42 = vpack.c.bf16 %v3331_v59, %v3330_v32 }
0x101b   :  { %v3291_v60 = vpop.permute.xlu1 %3290 }
0x101c   :  { %3933 = vmatmul.msk.bf16.vlgmr.msra.gmra.mxu2 %vm574_vm0, %v3338_v29  ;;  %v3300_v62 = vmul.f32 %v3291_v60, %v6842_v1  ;;  %v3304_v1 = vmul.f32 %v3291_v60, %v6862_v53 }
0x101f   :  { %v3319_v48 = vpop.permute.xlu0 %3318 }
0x1020   :  { %v3328_v35 = vadd.f32 %v3319_v48, %v3300_v62  ;;  %v3332_v40 = vadd.f32 %v3319_v48, %v3304_v1 }
0x1027   :  { %v3324_v36 = vpop.permute.xlu1 %3323 }
0x1028   :  { %v3329_v47 = vadd.f32 %v3324_v36, %v3301_v33  ;;  %v3333_v55 = vadd.f32 %v3324_v36, %v3305_v49  ;;  %v4225_v33 = vld [vmem:[%s7100_s28 + $0x38] sm:$0xff] }
0x102a   :  { %v3339_v5 = vpack.c.bf16 %v3329_v47, %v3328_v35  ;;  %v3341_v54 = vpack.c.bf16 %v3333_v55, %v3332_v40  ;;  %v3558_v35 = vpop.f32.mrf.mxu0 }
0x102c   :  { %3934 = vmatmul.msk.bf16.gmra.mxu2 %vm574_vm0, %v3339_v5 }
0x1032   :  { %v3560_v47 = vpop.f32.mrf.mxu0 }
0x103a   :  { %v3563_v13 = vpop.f32.mrf.mxu0 }
0x103c   :  { %3935 = vmatmul.msk.bf16.gmra.mxu2 %vm574_vm0, %v3340_v42 }
0x1042   :  { %v3565_v59 = vpop.f32.mrf.mxu0 }
0x104a   :  { %v3568_v49 = vpop.f32.mrf.mxu0 }
0x104c   :  { %3936 = vmatmul.msk.bf16.gmra.mxu2 %vm574_vm0, %v3341_v54 }
0x1052   :  { %v3570_v55 = vpop.f32.mrf.mxu0 }
0x105a   :  { %v3573_v54 = vpop.f32.mrf.mxu0 }
0x109f   :  { %v3379_v2 = vpop.f32.mrf.mxu2 }
0x10a0   :  { %v3380_v26 = vadd.f32 %v4098_v50, %v3379_v2  ;;  %v3575_v2 = vpop.f32.mrf.mxu0 }
0x10a7   :  { %v3381_v3 = vpop.f32.mrf.mxu2 }
0x10a8   :  { %v3382_v34 = vadd.f32 %v4098_v50, %v3381_v3 }
0x10aa   :  { %v3403_v8 = vpack.c.bf16 %v3382_v34, %v3380_v26 }
0x10ac   :  { %3945 = vmatmul.msk.bf16.vlgmr.msra.gmra.mxu1 %vm574_vm0, %v3403_v8 }
0x10af   :  { %v3384_v52 = vpop.f32.mrf.mxu2 }
0x10b0   :  { %v3385_v39 = vadd.f32 %v4098_v50, %v3384_v52 }
0x10b7   :  { %v3386_v58 = vpop.f32.mrf.mxu2 }
0x10b8   :  { %v3387_v0 = vadd.f32 %v4098_v50, %v3386_v58 }
0x10ba   :  { %v3404_v53 = vpack.c.bf16 %v3387_v0, %v3385_v39 }
0x10bc   :  { %3946 = vmatmul.msk.bf16.gmra.mxu1 %vm574_vm0, %v3404_v53 }
0x10bf   :  { %v3389_v45 = vpop.f32.mrf.mxu2 }
0x10c0   :  { %v3390_v24 = vadd.f32 %v4098_v50, %v3389_v45 }
0x10c7   :  { %v3391_v44 = vpop.f32.mrf.mxu2 }
0x10c8   :  { %v3392_v7 = vadd.f32 %v4098_v50, %v3391_v44 }
0x10ca   :  { %v3405_v56 = vpack.c.bf16 %v3392_v7, %v3390_v24  ;;  %v4011_v24 = vld [vmem:[%s7105_s0] sm:$0xff] }
0x10cb   :  { %v4099_v7 = vld [vmem:[#allocation2] ss:$0 sm:$0xff] }
0x10cc   :  { %3947 = vmatmul.msk.bf16.gmra.mxu1 %vm574_vm0, %v3405_v56 }
0x10cf   :  { %v3394_v16 = vpop.f32.mrf.mxu2 }
0x10d0   :  { %v3395_v31 = vadd.f32 %v4098_v50, %v3394_v16 }
0x10d7   :  { %v3396_v4 = vpop.f32.mrf.mxu2 }
0x10d8   :  { %v3397_v21 = vadd.f32 %v4098_v50, %v3396_v4 }
0x10da   :  { %v3406_v12 = vpack.c.bf16 %v3397_v21, %v3395_v31 }
0x10dc   :  { %3948 = vmatmul.msk.bf16.gmra.mxu1 %vm574_vm0, %v3406_v12 }
0x1129   :  { %v3440_v57 = vpop.f32.mrf.mxu1 }
0x112a   :  { %v3460_v37 = vmul.f32 %v4218_v19, %v3440_v57 }
0x1131   :  { %v3442_v23 = vpop.f32.mrf.mxu1 }
0x1132   :  { %v3461_v20 = vmul.f32 %v4219_v22, %v3442_v23  ;;  %v4948_v22 = vmov 32.0  }
0x1133   :  { %4198 = vrcp.f32 %v4948_v22 }
0x1134   :  { %v3468_v15 = vpack.c.bf16 %v3461_v20, %v3460_v37 }
0x1136   :  { %3965 = vmatmul.msk.bf16.vlgmr.msra.gmra.mxu3 %vm1726_vm1, %v3468_v15 }
0x1139   :  { %v3445_v30 = vpop.f32.mrf.mxu1  ;;  %v4199_v20 = vpop.eup %4198 }
0x113a   :  { %v3462_v28 = vmul.f32 %v4220_v41, %v3445_v30  ;;  %v3629_v15 = vmul.f32 32.0, %v4199_v20 }
0x113c   :  { %v3630_v30 = vsub.f32 1.0, %v3629_v15 }
0x1141   :  { %v3447_v43 = vpop.f32.mrf.mxu1 }
0x1142   :  { %v3463_v9 = vmul.f32 %v4221_v10, %v3447_v43  ;;  %v3631_v43 = vmul.f32 %v4199_v20, %v3630_v30 }
0x1144   :  { %v3469_v46 = vpack.c.bf16 %v3463_v9, %v3462_v28  ;;  %v3632_v41 = vadd.f32 %v4199_v20, %v3631_v43 }
0x1146   :  { %3966 = vmatmul.msk.bf16.gmra.mxu3 %vm1726_vm1, %v3469_v46 }
0x1149   :  { %v3450_v11 = vpop.f32.mrf.mxu1 }
0x114a   :  { %v3464_v6 = vmul.f32 %v4222_v18, %v3450_v11 }
0x1151   :  { %v3452_v27 = vpop.f32.mrf.mxu1 }
0x1152   :  { %v3465_v63 = vmul.f32 %v4223_v38, %v3452_v27 }
0x1154   :  { %v3470_v61 = vpack.c.bf16 %v3465_v63, %v3464_v6 }
0x1156   :  { %3967 = vmatmul.msk.bf16.gmra.mxu3 %vm1726_vm1, %v3470_v61 }
0x1159   :  { %v3455_v29 = vpop.f32.mrf.mxu1 }
0x115a   :  { %v3466_v48 = vmul.f32 %v4224_v14, %v3455_v29 }
0x1161   :  { %v3457_v60 = vpop.f32.mrf.mxu1 }
0x1162   :  { %v3467_v62 = vmul.f32 %v4225_v33, %v3457_v60 }
0x1164   :  { %v3471_v36 = vpack.c.bf16 %v3467_v62, %v3466_v48 }
0x1166   :  { %3968 = vmatmul.msk.bf16.gmra.mxu3 %vm1726_vm1, %v3471_v36 }
0x11b9   :  { %v3517_v5 = vpop.f32.mrf.mxu3 }
0x11ba   :  { %v3559_v25 = vadd.f32 %v3558_v35, %v3517_v5 }
0x11c1   :  { %v3519_v51 = vpop.f32.mrf.mxu3 }
0x11c2   :  { %v3561_v53 = vadd.f32 %v3560_v47, %v3519_v51 }
0x11c4   :  { %v3580_v44 = vpack.c.bf16 %v3561_v53, %v3559_v25 }
0x11c9   :  { %v3522_v32 = vpop.f32.mrf.mxu3 }
0x11ca   :  { %v3564_v0 = vadd.f32 %v3563_v13, %v3522_v32  ;;  %v3616_v13 = vld [vmem:[%s7106_s15] sm:$0xff]  ;;  %v3978_v32 = vld [vmem:[%s7106_s15 + $0x8] sm:$0xff] }
0x11d1   :  { %v3524_v42 = vpop.f32.mrf.mxu3 }
0x11d2   :  { %v3566_v58 = vadd.f32 %v3565_v59, %v3524_v42 }
0x11d4   :  { %v3581_v45 = vpack.c.bf16 %v3566_v58, %v3564_v0 }
0x11d9   :  { %v3527_v1 = vpop.f32.mrf.mxu3 }
0x11da   :  { %v3569_v52 = vadd.f32 %v3568_v49, %v3527_v1 }
0x11e1   :  { %v3529_v40 = vpop.f32.mrf.mxu3 }
0x11e2   :  { %v3571_v34 = vadd.f32 %v3570_v55, %v3529_v40 }
0x11e4   :  { %v3582_v39 = vpack.c.bf16 %v3571_v34, %v3569_v52 }
0x11e9   :  { %v3532_v17 = vpop.f32.mrf.mxu3 }
0x11ea   :  { %v3574_v3 = vadd.f32 %v3573_v54, %v3532_v17 }
0x11f1   :  { %v3534_v50 = vpop.f32.mrf.mxu3 }
0x11f2   :  { %v3576_v26 = vadd.f32 %v3575_v2, %v3534_v50 }
0x11f4   :  { %v3583_v8 = vpack.c.bf16 %v3576_v26, %v3574_v3 }
0x11f6   :  { %3600 = vmatpush.bf16.msrb.mxu2 %v3583_v8 }
0x11fa   :  { %3601 = vmatpush.bf16.msrb.mxu2 %v3582_v39 }
0x11fe   :  { %3602 = vmatpush.bf16.msrb.mxu2 %v3581_v45 }
0x1202   :  { %3603 = vmatpush.bf16.msrb.mxu2 %v3580_v44 }
0x1205   :  { %3977 = vmatmul.msk.bf16.vlgmr.msrb.gmra.mxu2 %vm1726_vm1, %v4011_v24  ;;  %vm3633_vm1 = vweird.f32 %v4199_v20 }
0x1206   :  { %v3634_v10 = vsel %vm3633_vm1, %v4199_v20, %v3632_v41 }
0x1288   :  { %v3605_v56 = vpop.f32.mrf.mxu2 }
0x1289   :  { %v3606_v16 = vadd.f32 %v4099_v7, %v3605_v56 }
0x128b   :  { %vm3610_vm0 = vcmp.ge.f32.partialorder %v3606_v16, 0.0  ;;  %v3612_v4 = vmul.f32 0.01, %v3606_v16 }
0x128d   :  { %v3614_v31 = vsel %vm3610_vm0, %v3606_v16, %v3612_v4 }
0x128e   :  { %v3620_v21 = vsel %vm3619_vm10, %v3614_v31, 0.0 }
0x128f   :  { %3621 = vadd.xlane.f32.xlu2 %v3620_v21 }
0x1290   :  { %v3607_v12 = vpop.f32.mrf.mxu2 }
0x1291   :  { %v3608_v57 = vadd.f32 %v4099_v7, %v3607_v12 }
0x1293   :  { %vm3611_vm11 = vcmp.ge.f32.partialorder %v3608_v57, 0.0  ;;  %v3613_v23 = vmul.f32 0.01, %v3608_v57 }
0x1295   :  { %v3615_v19 = vsel %vm3611_vm11, %v3608_v57, %v3613_v23 }
0x1296   :  { %v3624_v37 = vsel %vm3619_vm10, %v3615_v19, 0.0 }
0x1297   :  { %3625 = vadd.xlane.f32.xlu0 %v3624_v37 }
0x1302   :  { %v3622_v9 = vpop.xlane.xlu2 %3621 }
0x130a   :  { %v3626_v28 = vpop.xlane.xlu0 %3625 }
0x130b   :  { %v3627_v46 = vadd.f32 %v3626_v28, %v3622_v9 }
0x130d   :  { %v3635_v11 = vmul.f32 %v3634_v10, %v3627_v46 }
0x130f   :  { %v3642_v27 = vsub.f32 %v3615_v19, %v3635_v11  ;;  %v3636_v18 = vsub.f32 %v3614_v31, %v3635_v11 }
0x1311   :  { %v3643_v6 = vmul.f32 %v3642_v27, %v3642_v27  ;;  %v3637_v38 = vmul.f32 %v3636_v18, %v3636_v18 }
0x1313   :  { %v3644_v63 = vsel %vm3619_vm10, %v3643_v6, 0.0  ;;  %v3638_v61 = vsel %vm3619_vm10, %v3637_v38, 0.0 }
0x1314   :  { %3645 = vadd.xlane.f32.xlu2 %v3644_v63  ;;  %3639 = vadd.xlane.f32.xlu1 %v3638_v61 }
0x1387   :  { %v3646_v29 = vpop.xlane.xlu2 %3645  ;;  %v3640_v60 = vpop.xlane.xlu1 %3639 }
0x1388   :  { %v3647_v14 = vadd.f32 %v3646_v29, %v3640_v60 }
0x138a   :  { %v3648_v48 = vmul.f32 %v3647_v14, %v3634_v10 }
0x138c   :  { %v3649_v33 = vadd.f32 1e-05, %v3648_v48 }
0x138e   :  { %4200 = vrsqrt.f32 %v3649_v33  ;;  %vm3656_vm13 = vweird.f32 %v3649_v33 }
0x1394   :  { %v4201_v62 = vpop.eup %4200 }
0x1395   :  { %v3651_v36 = vmul.f32 %v4201_v62, %v3649_v33  ;;  %vm3657_vm12 = vweird.f32 %v4201_v62 }
0x1396   :  { %vm3658_vm14 = vmor %vm3656_vm13, %vm3657_vm12 }
0x1397   :  { %v3652_v35 = vmul.f32 %v4201_v62, %v3651_v36 }
0x1399   :  { %v3653_v47 = vmul.f32 0.5, %v3652_v35 }
0x139b   :  { %v3654_v5 = vsub.f32 1.5, %v3653_v47 }
0x139d   :  { %v3655_v25 = vmul.f32 %v4201_v62, %v3654_v5 }
0x139f   :  { %v3659_v51 = vsel %vm3658_vm14, %v4201_v62, %v3655_v25 }
0x13a0   :  { %v3660_v59 = vmul.f32 %v3659_v51, %v3616_v13 }
0x13a2   :  { %3665 = vperm.xlu0 %4088, %v3660_v59   ;;  %v3661_v42 = vmul.f32 %v3660_v59, %v3635_v11 }
0x13a4   :  { %v3662_v49 = vsub.f32 %v3978_v32, %v3661_v42 }
0x13a6   :  { %3672 = vperm.xlu2 %4086, %v3662_v49  }
0x1400   :  { %v3673_v54 = vpop.permute.xlu2 %3672 }
0x1414   :  { %v3666_v1 = vpop.permute.xlu0 %3665 }
0x1415   :  { %v3668_v55 = vmul.f32 %v3666_v1, %v3614_v31  ;;  %v3669_v40 = vmul.f32 %v3666_v1, %v3615_v19 }
0x1417   :  { %v3675_v17 = vadd.f32 %v3673_v54, %v3668_v55  ;;  %v3676_v2 = vadd.f32 %v3673_v54, %v3669_v40 }
0x1419   :  { %3677 = vst.msk [vmem:[#allocation41] sm:$0xff] %vm3619_vm10, %v3675_v17 }
0x141a   :  { %3679 = vst.msk [vmem:[#allocation41 + $0x8] sm:$0xff] %vm3619_vm10, %v3676_v2 }
0x141b   :  { %4849 = shalt.err (!%p4846_p3)
}
0x141c   :  { %3692 = dma.vmem_to_hbm [thread:$0]  %s3685_s30, 256, %s3687_s11, [#allocation4], %s4921_s2, %s4921_s2, %s4922_s18  }
0x141d   :  { %4876 = dma.done.wait [#allocation4], 256  }
0x141e   :  { %4877 = vsyncadd [#allocation4], 4294967040 }
0x141f   :  { %3697 = vsyncpa [#allocation3], 1 }
0x1420   :  { %3698 = vsyncpa [#allocation6], 1 }
0x1421   :  { %3699 = vsyncpa [#allocation9], 1 }
0x1422   :  { %3700 = vsyncpa [#allocation12], 1 }
0x1423   :  { %3701 = vsyncpa [#allocation15], 1 }
0x1424   :  { %3702 = vsyncpa [#allocation18], 1 }
0x1425   :  { %3703 = vsyncpa [#allocation21], 1 }
0x1426   :  { %3704 = vsyncpa [#allocation24], 1 }
0x1427   :  { %3705 = vsyncpa [#allocation27], 1 }
0x1428   :  { %3706 = vsyncpa [#allocation30], 1 }
0x1429   :  { %3707 = vsyncpa [#allocation33], 1 }
0x142a   :  { %3708 = vsyncpa [#allocation36], 1 }
0x142b   :  { %3709 = vsyncpa [#allocation39], 1 }
0x142c   :  { %3710 = vsyncpa [#allocation4], 1 }

</bundles_post_ra>
